<compile_context>
chip_gen: v6e
topology: v6e:2x2x1
jax: 0.10.0
libtpu: 0.0.40
codegen_flags: <defaults>
</compile_context>

<pallas_src>
import functools

import numpy as np
import jax
import jax.numpy as jnp
from jax import lax
from jax.experimental import pallas as pl
from jax.experimental.pallas import tpu as pltpu

NORM_MEAN = np.array([0.485, 0.456, 0.406], np.float32)
NORM_STD = np.array([0.229, 0.224, 0.225], np.float32)
BN_EPS = 1e-5
CIN_PAD = 8        # pad the 3 input channels to a full sublane group
ROW_SLACK = 3      # zero rows appended per image (>= the 2-row+2-px conv tap reach)
N_GROUPS = 5       # torch view(-1, 5, 6*H3*W3)
GROUP_PAD = 8      # conv3 rows per local-channel block: 5 groups + 3 zero pad rows


# --------------------------- Pallas kernel ----------------------------------

def _single_torus_kernel(x_ref,
                         w1_ref, b1_ref, w2_ref, b2_ref, w3_ref, b3_ref, s3_ref,
                         f1w_ref, f1b_ref, f2w_ref, f2b_ref,
                         out_ref, *, W, RW, Bt, H3W, chpg):
    """conv1..conv3 (+folded Normalize/BN) -> BN3 scale -> fc1 -> ReLU -> fc2 for Bt images."""

    def conv_relu(a, w_ref, b_ref):
        # a: (Cin, L) bf16, channel-on-sublane, Bt images stacked on the lane axis
        # (per-image stride RW, row-major spatial).  Full im2col -> one bf16 MXU
        # matmul with K = 9*Cin and a lane-dense f32 result.  The 3 zero slack rows
        # per image keep every tap slice in-bounds; garbage only lands in rows /
        # columns that are never read back as valid.
        n = a.shape[1] - ROW_SLACK * W
        taps = [a[:, kh * W + kw: kh * W + kw + n]
                for kh in range(3) for kw in range(3)]
        patches = jnp.concatenate(taps, axis=0)                   # (9*Cin, n) bf16
        y = jnp.dot(w_ref[...], patches, preferred_element_type=jnp.float32)
        return jnp.maximum(y + b_ref[...], 0.0)                   # bias + ReLU (f32)

    a = x_ref[0]                                                  # (8, Bt*RW) bf16
    a = conv_relu(a, w1_ref, b1_ref).astype(jnp.bfloat16)         # (16, L-3W)
    a = conv_relu(a, w2_ref, b2_ref).astype(jnp.bfloat16)         # (32, L-6W)
    a = conv_relu(a, w3_ref, b3_ref)                              # (48, L-9W) f32
    # eval BatchNorm3 scale (its shift is folded into the fc1 bias); rows are j*8+g.
    a = (a * s3_ref[...]).astype(jnp.bfloat16)

    # fc1 LHS: (5*Bt, 6*H3*W).  Row b*5+g / lane block j holds image b, group g,
    # local channel j.  Sublane slices start at multiples of 8 (GROUP_PAD).
    blocks = []
    for j in range(chpg):
        rows = a[j * GROUP_PAD: j * GROUP_PAD + N_GROUPS, :]
        blocks.append(jnp.concatenate(
            [rows[:, b * RW: b * RW + H3W] for b in range(Bt)], axis=0))
    lhs = jnp.concatenate(blocks, axis=1)                         # (5*Bt, 6*H3W) bf16

    # fc1: one long-K bf16 matmul against the lane-dense (16, 6*H3W) weight,
    # contracting the last dims; the conv "garbage" columns are zeroed in the weight.
    z = lax.dot_general(lhs, f1w_ref[...], (((1,), (1,)), ((), ())),
                        preferred_element_type=jnp.float32)       # (5*Bt, 16)
    z = jnp.maximum(z + f1b_ref[...], 0.0)                        # bias (+BN3 shift) + ReLU
    out = jnp.dot(z, f2w_ref[...],
                  preferred_element_type=jnp.float32) + f2b_ref[...]   # (5*Bt, 5)
    for b in range(Bt):
        out_ref[b] = out[b * N_GROUPS:(b + 1) * N_GROUPS, :]


# --------------------------- pallas_call wrapper -----------------------------

def _const_spec(a):
    # whole (un-tiled) array, same block every grid step
    return pl.BlockSpec(a.shape, lambda s, _n=a.ndim: (0,) * _n)


def single_torus_forward(x_nchw, p, *, batch_tile=4):
    """Inference forward of SingleTorus; x_nchw is (B, 3, H, W) float."""
    B, Cin, H, W = x_nchw.shape
    H3, W3 = H - 6, W - 6
    assert H3 >= 1 and W3 >= 1 and W >= 2
    C3 = p["c3w"].shape[0]                    # 30
    chpg = C3 // N_GROUPS                     # 6
    fd = p["f1w"].shape[0]                    # 16
    f2o = p["f2w"].shape[0]                   # 5
    assert p["f1w"].shape[1] == chpg * H3 * W3
    R, RW, H3W = H + ROW_SLACK, (H + ROW_SLACK) * W, H3 * W

    Bt = max(1, min(batch_tile, B // 2 if B >= 2 else 1))   # keep >= 2 grid steps
    B_pad = -(-B // Bt) * Bt
    nsteps = B_pad // Bt

    # ---- input: NCHW -> (nsteps, 8, Bt*RW) bf16; channel on sublanes, images
    # stacked on the lane axis with per-image stride RW (3 zero slack rows each).
    x = jnp.pad(x_nchw.astype(jnp.float32),
                ((0, B_pad - B), (0, CIN_PAD - Cin), (0, ROW_SLACK), (0, 0)))
    x = x.reshape(B_pad, CIN_PAD, RW).transpose(1, 0, 2)
    x = x.reshape(CIN_PAD, nsteps, Bt * RW).transpose(1, 0, 2).astype(jnp.bfloat16)

    def im2col_w(w_oihw):             # OIHW -> (O, 9*I), columns ordered (kh, kw, cin)
        return jnp.transpose(w_oihw, (0, 2, 3, 1)).reshape(w_oihw.shape[0], -1)

    def bn_affine(gamma, beta):       # eval BN with default running stats mean=0/var=1
        return gamma / jnp.sqrt(1.0 + BN_EPS), beta

    inv_std = jnp.asarray(1.0 / NORM_STD, jnp.float32)
    mean_over_std = jnp.asarray(NORM_MEAN / NORM_STD, jnp.float32)

    # ---- fold transforms.Normalize into conv1 (exact) ----
    w1 = p["c1w"] * inv_std[None, :, None, None]
    b1 = p["c1b"] - jnp.sum(p["c1w"] * mean_over_std[None, :, None, None],
                            axis=(1, 2, 3))
    w1 = jnp.concatenate(
        [w1, jnp.zeros((w1.shape[0], CIN_PAD - Cin, 3, 3), jnp.float32)], axis=1)

    # ---- fold eval BatchNorm1/2 into the *next* conv (exact, ReLU/sign-safe) ----
    s1, t1 = bn_affine(p["g1"], p["be1"])
    w2 = p["c2w"] * s1[None, :, None, None]
    b2 = p["c2b"] + jnp.sum(p["c2w"] * t1[None, :, None, None], axis=(1, 2, 3))
    s2, t2 = bn_affine(p["g2"], p["be2"])
    w3 = p["c3w"] * s2[None, :, None, None]
    b3 = p["c3b"] + jnp.sum(p["c3w"] * t2[None, :, None, None], axis=(1, 2, 3))
    s3, t3 = bn_affine(p["g3"], p["be3"])

    # ---- conv3 channels: torch channel 6g+j -> kernel row j*8+g (rows j*8+5..7 zero)
    perm = np.array([chpg * g + j for j in range(chpg) for g in range(N_GROUPS)],
                    np.int32)

    def regroup(v2d):                 # (30, ...) torch-channel rows -> (48, ...) kernel rows
        v = v2d[perm].reshape(chpg, N_GROUPS, -1)
        v = jnp.pad(v, ((0, 0), (0, GROUP_PAD - N_GROUPS), (0, 0)))
        return v.reshape(chpg * GROUP_PAD, -1)

    w3m = regroup(im2col_w(w3))
    b3p = regroup(b3.reshape(C3, 1))
    s3p = regroup(s3.reshape(C3, 1))

    # ---- fc1 weight: lane-dense (16, 6*H3*W); zeros at the W3..W-1 garbage columns,
    # so the valid-column crop of the feature map is implicit in the matmul.
    f1wr = p["f1w"].reshape(fd, chpg, H3, W3)
    f1w_flat = jnp.pad(f1wr, ((0, 0), (0, 0), (0, 0), (0, W - W3))
                       ).reshape(fd, chpg * H3W)

    # ---- BatchNorm3 shift folded exactly into a per-group fc1 bias; tiled over Bt.
    S = jnp.sum(f1wr, axis=(2, 3))                                   # (16, 6)
    f1b_g = p["f1b"][None, :] + t3.reshape(N_GROUPS, chpg) @ S.T     # (5, 16)
    f1b_tiled = jnp.tile(f1b_g, (Bt, 1))                             # (5*Bt, 16)

    bf16 = jnp.bfloat16
    const_args = (
        im2col_w(w1).astype(bf16), b1.reshape(-1, 1),
        im2col_w(w2).astype(bf16), b2.reshape(-1, 1),
        w3m.astype(bf16), b3p, s3p,
        f1w_flat.astype(bf16), f1b_tiled,
        jnp.transpose(p["f2w"]), p["f2b"].reshape(1, -1),
    )

    c1o, c2o, c3o = p["c1w"].shape[0], p["c2w"].shape[0], chpg * GROUP_PAD
    L0 = Bt * RW
    conv_flops = 2 * (9 * CIN_PAD * c1o * (L0 - 3 * W)
                      + 9 * c1o * c2o * (L0 - 6 * W)
                      + 9 * c2o * c3o * (L0 - 9 * W))
    fc_flops = 2 * N_GROUPS * Bt * (chpg * H3W * fd + fd * f2o)
    flops = nsteps * (conv_flops + fc_flops)
    bytes_accessed = (int(x.size) * 2
                      + sum(int(a.size) * a.dtype.itemsize for a in const_args)
                      + B_pad * N_GROUPS * f2o * 4)

    # TODO(synk): at the module's real resolution (fc1 in_features = 6*362*234) the
    # whole-image conv activations and the (16, 6*H3*W) fc1 weight exceed VMEM on every
    # generation; that regime needs conv row tiling (2-row halo), a K-tiled fc1
    # accumulation over an extra grid axis, W padded to a multiple of 128, and
    # single-buffered (pl.Buffered(1)) constant operands.  Test-scale shapes fit fully.
    out = pl.pallas_call(
        functools.partial(_single_torus_kernel, W=W, RW=RW, Bt=Bt, H3W=H3W, chpg=chpg),
        out_shape=jax.ShapeDtypeStruct((B_pad, N_GROUPS, f2o), jnp.float32),
        grid=(nsteps,),
        in_specs=[pl.BlockSpec((1, CIN_PAD, Bt * RW), lambda s: (s, 0, 0))]
                 + [_const_spec(a) for a in const_args],
        out_specs=pl.BlockSpec((Bt, N_GROUPS, f2o), lambda s: (s, 0, 0)),
        compiler_params=pltpu.CompilerParams(
            dimension_semantics=("parallel",),
            vmem_limit_bytes=32 * 1024 * 1024),
        cost_estimate=pl.CostEstimate(flops=int(flops), transcendentals=0,
                                      bytes_accessed=int(bytes_accessed)),
    )(x, *const_args)
    return out[:B]


# --------------------------- pure-JAX reference -------------------------------

def reference_forward(x_nchw, p):
    mean = jnp.asarray(NORM_MEAN).reshape(1, 3, 1, 1)
    std = jnp.asarray(NORM_STD).reshape(1, 3, 1, 1)
    x = (x_nchw - mean) / std

    def block(x, w, b, gamma, beta):
        y = jax.lax.conv_general_dilated(
            x, w, (1, 1), "VALID",
            dimension_numbers=("NCHW", "OIHW", "NCHW"),
            precision=jax.lax.Precision.HIGHEST)
        y = y + b.reshape(1, -1, 1, 1)
        y = jnp.maximum(y, 0.0)
        s = (gamma / jnp.sqrt(1.0 + BN_EPS)).reshape(1, -1, 1, 1)
        return y * s + beta.reshape(1, -1, 1, 1)

    x = block(x, p["c1w"], p["c1b"], p["g1"], p["be1"])
    x = block(x, p["c2w"], p["c2b"], p["g2"], p["be2"])
    x = block(x, p["c3w"], p["c3b"], p["g3"], p["be3"])
    B = x.shape[0]
    x = x.reshape(B, 5, -1)
    h = jnp.maximum(
        jnp.einsum("bgf,jf->bgj", x, p["f1w"],
                   precision=jax.lax.Precision.HIGHEST) + p["f1b"], 0.0)
    return jnp.einsum("bgk,jk->bgj", h, p["f2w"],
                      precision=jax.lax.Precision.HIGHEST) + p["f2b"]


# --------------------------- main ---------------------------------------------

if __name__ == "__main__":
    key = jax.random.PRNGKey(0)
    ks = jax.random.split(key, 17)

    def init(k, shape, scale):
        return (scale * jax.random.normal(k, shape)).astype(jnp.float32)

    H_IN = W_IN = 22          # -> 16x16 after three VALID 3x3 convs
    FC_IN = 6 * 16 * 16       # module literal 6*362*234 implies 368x240 inputs;
                              # scaled down consistently for a small synthetic test
    B = 8

    params = dict(
        c1w=init(ks[0], (16, 3, 3, 3), 0.2),   c1b=init(ks[1], (16,), 0.1),
        g1=1.0 + init(ks[2], (16,), 0.1),      be1=init(ks[3], (16,), 0.1),
        c2w=init(ks[4], (32, 16, 3, 3), 0.08), c2b=init(ks[5], (32,), 0.1),
        g2=1.0 + init(ks[6], (32,), 0.1),      be2=init(ks[7], (32,), 0.1),
        c3w=init(ks[8], (30, 32, 3, 3), 0.06), c3b=init(ks[9], (30,), 0.1),
        g3=1.0 + init(ks[10], (30,), 0.1),     be3=init(ks[11], (30,), 0.1),
        f1w=init(ks[12], (16, FC_IN), 0.02),   f1b=init(ks[13], (16,), 0.1),
        f2w=init(ks[14], (5, 16), 0.2),        f2b=init(ks[15], (5,), 0.1),
    )
    x = jax.random.normal(ks[16], (B, 3, H_IN, W_IN), jnp.float32)

    out = jax.block_until_ready(jax.jit(single_torus_forward)(x, params))
    assert out.shape == (B, 5, 5), out.shape

    ref = reference_forward(x, params)
    # bf16 MXU operands -> slightly looser tolerance than the all-f32 path
    np.testing.assert_allclose(np.asarray(out), np.asarray(ref), rtol=3e-2, atol=3e-2)

    print("KERNEL_OK")
</pallas_src>

<mosaic_0001>
module attributes {stable_mosaic.version = 11 : i64} {
  func.func @_single_torus_kernel(%arg0: i32, %arg1: memref<1x8x2200xbf16, #tpu.memory_space<vmem>>, %arg2: memref<16x72xbf16, #tpu.memory_space<vmem>>, %arg3: memref<16x1xf32, #tpu.memory_space<vmem>>, %arg4: memref<32x144xbf16, #tpu.memory_space<vmem>>, %arg5: memref<32x1xf32, #tpu.memory_space<vmem>>, %arg6: memref<48x288xbf16, #tpu.memory_space<vmem>>, %arg7: memref<48x1xf32, #tpu.memory_space<vmem>>, %arg8: memref<48x1xf32, #tpu.memory_space<vmem>>, %arg9: memref<16x2112xbf16, #tpu.memory_space<vmem>>, %arg10: memref<20x16xf32, #tpu.memory_space<vmem>>, %arg11: memref<16x5xf32, #tpu.memory_space<vmem>>, %arg12: memref<1x5xf32, #tpu.memory_space<vmem>>, %arg13: memref<4x5x5xf32, #tpu.memory_space<vmem>>) attributes {dimension_semantics = [#tpu.dimension_semantics<parallel>], iteration_bounds = array<i64: 2>, scalar_prefetch = 0 : i64, scratch_operands = 0 : i64, tpu.core_type = #tpu.core_type<tc>, window_params = [{transform_indices = @transform_0, window_bounds = array<i64: 1, 8, 2200>}, {pipeline_mode = #tpu.pipeline_mode<synchronous>, transform_indices = @transform_1, window_bounds = array<i64: 16, 72>}, {pipeline_mode = #tpu.pipeline_mode<synchronous>, transform_indices = @transform_2, window_bounds = array<i64: 16, 1>}, {pipeline_mode = #tpu.pipeline_mode<synchronous>, transform_indices = @transform_3, window_bounds = array<i64: 32, 144>}, {pipeline_mode = #tpu.pipeline_mode<synchronous>, transform_indices = @transform_4, window_bounds = array<i64: 32, 1>}, {pipeline_mode = #tpu.pipeline_mode<synchronous>, transform_indices = @transform_5, window_bounds = array<i64: 48, 288>}, {pipeline_mode = #tpu.pipeline_mode<synchronous>, transform_indices = @transform_6, window_bounds = array<i64: 48, 1>}, {pipeline_mode = #tpu.pipeline_mode<synchronous>, transform_indices = @transform_7, window_bounds = array<i64: 48, 1>}, {pipeline_mode = #tpu.pipeline_mode<synchronous>, transform_indices = @transform_8, window_bounds = array<i64: 16, 2112>}, {pipeline_mode = #tpu.pipeline_mode<synchronous>, transform_indices = @transform_9, window_bounds = array<i64: 20, 16>}, {pipeline_mode = #tpu.pipeline_mode<synchronous>, transform_indices = @transform_10, window_bounds = array<i64: 16, 5>}, {pipeline_mode = #tpu.pipeline_mode<synchronous>, transform_indices = @transform_11, window_bounds = array<i64: 1, 5>}, {transform_indices = @transform_12, window_bounds = array<i64: 4, 5, 5>}]} {
    %c0 = arith.constant 0 : index
    %c0_0 = arith.constant 0 : index
    %c0_1 = arith.constant 0 : index
    %0 = vector.load %arg1[%c0, %c0_0, %c0_1] : memref<1x8x2200xbf16, #tpu.memory_space<vmem>>, vector<1x8x2200xbf16>
    %1 = vector.shape_cast %0 : vector<1x8x2200xbf16> to vector<8x2200xbf16>
    %2 = vector.extract_strided_slice %1 {offsets = [0, 0], sizes = [8, 2134], strides = [1, 1]} : vector<8x2200xbf16> to vector<8x2134xbf16>
    %3 = vector.extract_strided_slice %1 {offsets = [0, 1], sizes = [8, 2134], strides = [1, 1]} : vector<8x2200xbf16> to vector<8x2134xbf16>
    %4 = vector.extract_strided_slice %1 {offsets = [0, 2], sizes = [8, 2134], strides = [1, 1]} : vector<8x2200xbf16> to vector<8x2134xbf16>
    %5 = vector.extract_strided_slice %1 {offsets = [0, 22], sizes = [8, 2134], strides = [1, 1]} : vector<8x2200xbf16> to vector<8x2134xbf16>
    %6 = vector.extract_strided_slice %1 {offsets = [0, 23], sizes = [8, 2134], strides = [1, 1]} : vector<8x2200xbf16> to vector<8x2134xbf16>
    %7 = vector.extract_strided_slice %1 {offsets = [0, 24], sizes = [8, 2134], strides = [1, 1]} : vector<8x2200xbf16> to vector<8x2134xbf16>
    %8 = vector.extract_strided_slice %1 {offsets = [0, 44], sizes = [8, 2134], strides = [1, 1]} : vector<8x2200xbf16> to vector<8x2134xbf16>
    %9 = vector.extract_strided_slice %1 {offsets = [0, 45], sizes = [8, 2134], strides = [1, 1]} : vector<8x2200xbf16> to vector<8x2134xbf16>
    %10 = vector.extract_strided_slice %1 {offsets = [0, 46], sizes = [8, 2134], strides = [1, 1]} : vector<8x2200xbf16> to vector<8x2134xbf16>
    %11 = tpu.concatenate %2, %3, %4, %5, %6, %7, %8, %9, %10 in 0 : vector<8x2134xbf16>, vector<8x2134xbf16>, vector<8x2134xbf16>, vector<8x2134xbf16>, vector<8x2134xbf16>, vector<8x2134xbf16>, vector<8x2134xbf16>, vector<8x2134xbf16>, vector<8x2134xbf16> -> vector<72x2134xbf16>
    %c0_2 = arith.constant 0 : index
    %c0_3 = arith.constant 0 : index
    %12 = vector.load %arg2[%c0_2, %c0_3] : memref<16x72xbf16, #tpu.memory_space<vmem>>, vector<16x72xbf16>
    %cst = arith.constant dense<0.000000e+00> : vector<16x2134xf32>
    %13 = tpu.matmul %12, %11, %cst {dimension_numbers = #tpu.dot_dimension_numbers<[1], [0], [0], [1], [0, 0, 1, 1], [], []>} : vector<16x72xbf16>, vector<72x2134xbf16>, vector<16x2134xf32> -> vector<16x2134xf32>
    %c0_4 = arith.constant 0 : index
    %c0_5 = arith.constant 0 : index
    %14 = vector.load %arg3[%c0_4, %c0_5] : memref<16x1xf32, #tpu.memory_space<vmem>>, vector<16x1xf32>
    %15 = vector.broadcast %14 : vector<16x1xf32> to vector<16x2134xf32>
    %16 = arith.addf %13, %15 : vector<16x2134xf32>
    %cst_6 = arith.constant 0.000000e+00 : f32
    %17 = vector.broadcast %cst_6 : f32 to vector<16x2134xf32>
    %18 = arith.maximumf %16, %17 : vector<16x2134xf32>
    %19 = arith.truncf %18 : vector<16x2134xf32> to vector<16x2134xbf16>
    %20 = vector.extract_strided_slice %19 {offsets = [0, 0], sizes = [16, 2068], strides = [1, 1]} : vector<16x2134xbf16> to vector<16x2068xbf16>
    %21 = vector.extract_strided_slice %19 {offsets = [0, 1], sizes = [16, 2068], strides = [1, 1]} : vector<16x2134xbf16> to vector<16x2068xbf16>
    %22 = vector.extract_strided_slice %19 {offsets = [0, 2], sizes = [16, 2068], strides = [1, 1]} : vector<16x2134xbf16> to vector<16x2068xbf16>
    %23 = vector.extract_strided_slice %19 {offsets = [0, 22], sizes = [16, 2068], strides = [1, 1]} : vector<16x2134xbf16> to vector<16x2068xbf16>
    %24 = vector.extract_strided_slice %19 {offsets = [0, 23], sizes = [16, 2068], strides = [1, 1]} : vector<16x2134xbf16> to vector<16x2068xbf16>
    %25 = vector.extract_strided_slice %19 {offsets = [0, 24], sizes = [16, 2068], strides = [1, 1]} : vector<16x2134xbf16> to vector<16x2068xbf16>
    %26 = vector.extract_strided_slice %19 {offsets = [0, 44], sizes = [16, 2068], strides = [1, 1]} : vector<16x2134xbf16> to vector<16x2068xbf16>
    %27 = vector.extract_strided_slice %19 {offsets = [0, 45], sizes = [16, 2068], strides = [1, 1]} : vector<16x2134xbf16> to vector<16x2068xbf16>
    %28 = vector.extract_strided_slice %19 {offsets = [0, 46], sizes = [16, 2068], strides = [1, 1]} : vector<16x2134xbf16> to vector<16x2068xbf16>
    %29 = tpu.concatenate %20, %21, %22, %23, %24, %25, %26, %27, %28 in 0 : vector<16x2068xbf16>, vector<16x2068xbf16>, vector<16x2068xbf16>, vector<16x2068xbf16>, vector<16x2068xbf16>, vector<16x2068xbf16>, vector<16x2068xbf16>, vector<16x2068xbf16>, vector<16x2068xbf16> -> vector<144x2068xbf16>
    %c0_7 = arith.constant 0 : index
    %c0_8 = arith.constant 0 : index
    %30 = vector.load %arg4[%c0_7, %c0_8] : memref<32x144xbf16, #tpu.memory_space<vmem>>, vector<32x144xbf16>
    %cst_9 = arith.constant dense<0.000000e+00> : vector<32x2068xf32>
    %31 = tpu.matmul %30, %29, %cst_9 {dimension_numbers = #tpu.dot_dimension_numbers<[1], [0], [0], [1], [0, 0, 1, 1], [], []>} : vector<32x144xbf16>, vector<144x2068xbf16>, vector<32x2068xf32> -> vector<32x2068xf32>
    %c0_10 = arith.constant 0 : index
    %c0_11 = arith.constant 0 : index
    %32 = vector.load %arg5[%c0_10, %c0_11] : memref<32x1xf32, #tpu.memory_space<vmem>>, vector<32x1xf32>
    %33 = vector.broadcast %32 : vector<32x1xf32> to vector<32x2068xf32>
    %34 = arith.addf %31, %33 : vector<32x2068xf32>
    %cst_12 = arith.constant 0.000000e+00 : f32
    %35 = vector.broadcast %cst_12 : f32 to vector<32x2068xf32>
    %36 = arith.maximumf %34, %35 : vector<32x2068xf32>
    %37 = arith.truncf %36 : vector<32x2068xf32> to vector<32x2068xbf16>
    %38 = vector.extract_strided_slice %37 {offsets = [0, 0], sizes = [32, 2002], strides = [1, 1]} : vector<32x2068xbf16> to vector<32x2002xbf16>
    %39 = vector.extract_strided_slice %37 {offsets = [0, 1], sizes = [32, 2002], strides = [1, 1]} : vector<32x2068xbf16> to vector<32x2002xbf16>
    %40 = vector.extract_strided_slice %37 {offsets = [0, 2], sizes = [32, 2002], strides = [1, 1]} : vector<32x2068xbf16> to vector<32x2002xbf16>
    %41 = vector.extract_strided_slice %37 {offsets = [0, 22], sizes = [32, 2002], strides = [1, 1]} : vector<32x2068xbf16> to vector<32x2002xbf16>
    %42 = vector.extract_strided_slice %37 {offsets = [0, 23], sizes = [32, 2002], strides = [1, 1]} : vector<32x2068xbf16> to vector<32x2002xbf16>
    %43 = vector.extract_strided_slice %37 {offsets = [0, 24], sizes = [32, 2002], strides = [1, 1]} : vector<32x2068xbf16> to vector<32x2002xbf16>
    %44 = vector.extract_strided_slice %37 {offsets = [0, 44], sizes = [32, 2002], strides = [1, 1]} : vector<32x2068xbf16> to vector<32x2002xbf16>
    %45 = vector.extract_strided_slice %37 {offsets = [0, 45], sizes = [32, 2002], strides = [1, 1]} : vector<32x2068xbf16> to vector<32x2002xbf16>
    %46 = vector.extract_strided_slice %37 {offsets = [0, 46], sizes = [32, 2002], strides = [1, 1]} : vector<32x2068xbf16> to vector<32x2002xbf16>
    %47 = tpu.concatenate %38, %39, %40, %41, %42, %43, %44, %45, %46 in 0 : vector<32x2002xbf16>, vector<32x2002xbf16>, vector<32x2002xbf16>, vector<32x2002xbf16>, vector<32x2002xbf16>, vector<32x2002xbf16>, vector<32x2002xbf16>, vector<32x2002xbf16>, vector<32x2002xbf16> -> vector<288x2002xbf16>
    %c0_13 = arith.constant 0 : index
    %c0_14 = arith.constant 0 : index
    %48 = vector.load %arg6[%c0_13, %c0_14] : memref<48x288xbf16, #tpu.memory_space<vmem>>, vector<48x288xbf16>
    %cst_15 = arith.constant dense<0.000000e+00> : vector<48x2002xf32>
    %49 = tpu.matmul %48, %47, %cst_15 {dimension_numbers = #tpu.dot_dimension_numbers<[1], [0], [0], [1], [0, 0, 1, 1], [], []>} : vector<48x288xbf16>, vector<288x2002xbf16>, vector<48x2002xf32> -> vector<48x2002xf32>
    %c0_16 = arith.constant 0 : index
    %c0_17 = arith.constant 0 : index
    %50 = vector.load %arg7[%c0_16, %c0_17] : memref<48x1xf32, #tpu.memory_space<vmem>>, vector<48x1xf32>
    %51 = vector.broadcast %50 : vector<48x1xf32> to vector<48x2002xf32>
    %52 = arith.addf %49, %51 : vector<48x2002xf32>
    %cst_18 = arith.constant 0.000000e+00 : f32
    %53 = vector.broadcast %cst_18 : f32 to vector<48x2002xf32>
    %54 = arith.maximumf %52, %53 : vector<48x2002xf32>
    %c0_19 = arith.constant 0 : index
    %c0_20 = arith.constant 0 : index
    %55 = vector.load %arg8[%c0_19, %c0_20] : memref<48x1xf32, #tpu.memory_space<vmem>>, vector<48x1xf32>
    %56 = vector.broadcast %55 : vector<48x1xf32> to vector<48x2002xf32>
    %57 = arith.mulf %54, %56 : vector<48x2002xf32>
    %58 = arith.truncf %57 : vector<48x2002xf32> to vector<48x2002xbf16>
    %59 = vector.extract_strided_slice %58 {offsets = [0, 0], sizes = [5, 2002], strides = [1, 1]} : vector<48x2002xbf16> to vector<5x2002xbf16>
    %60 = vector.extract_strided_slice %59 {offsets = [0, 0], sizes = [5, 352], strides = [1, 1]} : vector<5x2002xbf16> to vector<5x352xbf16>
    %61 = vector.extract_strided_slice %59 {offsets = [0, 550], sizes = [5, 352], strides = [1, 1]} : vector<5x2002xbf16> to vector<5x352xbf16>
    %62 = vector.extract_strided_slice %59 {offsets = [0, 1100], sizes = [5, 352], strides = [1, 1]} : vector<5x2002xbf16> to vector<5x352xbf16>
    %63 = vector.extract_strided_slice %59 {offsets = [0, 1650], sizes = [5, 352], strides = [1, 1]} : vector<5x2002xbf16> to vector<5x352xbf16>
    %64 = tpu.concatenate %60, %61, %62, %63 in 0 : vector<5x352xbf16>, vector<5x352xbf16>, vector<5x352xbf16>, vector<5x352xbf16> -> vector<20x352xbf16>
    %65 = vector.extract_strided_slice %58 {offsets = [8, 0], sizes = [5, 2002], strides = [1, 1]} : vector<48x2002xbf16> to vector<5x2002xbf16>
    %66 = vector.extract_strided_slice %65 {offsets = [0, 0], sizes = [5, 352], strides = [1, 1]} : vector<5x2002xbf16> to vector<5x352xbf16>
    %67 = vector.extract_strided_slice %65 {offsets = [0, 550], sizes = [5, 352], strides = [1, 1]} : vector<5x2002xbf16> to vector<5x352xbf16>
    %68 = vector.extract_strided_slice %65 {offsets = [0, 1100], sizes = [5, 352], strides = [1, 1]} : vector<5x2002xbf16> to vector<5x352xbf16>
    %69 = vector.extract_strided_slice %65 {offsets = [0, 1650], sizes = [5, 352], strides = [1, 1]} : vector<5x2002xbf16> to vector<5x352xbf16>
    %70 = tpu.concatenate %66, %67, %68, %69 in 0 : vector<5x352xbf16>, vector<5x352xbf16>, vector<5x352xbf16>, vector<5x352xbf16> -> vector<20x352xbf16>
    %71 = vector.extract_strided_slice %58 {offsets = [16, 0], sizes = [5, 2002], strides = [1, 1]} : vector<48x2002xbf16> to vector<5x2002xbf16>
    %72 = vector.extract_strided_slice %71 {offsets = [0, 0], sizes = [5, 352], strides = [1, 1]} : vector<5x2002xbf16> to vector<5x352xbf16>
    %73 = vector.extract_strided_slice %71 {offsets = [0, 550], sizes = [5, 352], strides = [1, 1]} : vector<5x2002xbf16> to vector<5x352xbf16>
    %74 = vector.extract_strided_slice %71 {offsets = [0, 1100], sizes = [5, 352], strides = [1, 1]} : vector<5x2002xbf16> to vector<5x352xbf16>
    %75 = vector.extract_strided_slice %71 {offsets = [0, 1650], sizes = [5, 352], strides = [1, 1]} : vector<5x2002xbf16> to vector<5x352xbf16>
    %76 = tpu.concatenate %72, %73, %74, %75 in 0 : vector<5x352xbf16>, vector<5x352xbf16>, vector<5x352xbf16>, vector<5x352xbf16> -> vector<20x352xbf16>
    %77 = vector.extract_strided_slice %58 {offsets = [24, 0], sizes = [5, 2002], strides = [1, 1]} : vector<48x2002xbf16> to vector<5x2002xbf16>
    %78 = vector.extract_strided_slice %77 {offsets = [0, 0], sizes = [5, 352], strides = [1, 1]} : vector<5x2002xbf16> to vector<5x352xbf16>
    %79 = vector.extract_strided_slice %77 {offsets = [0, 550], sizes = [5, 352], strides = [1, 1]} : vector<5x2002xbf16> to vector<5x352xbf16>
    %80 = vector.extract_strided_slice %77 {offsets = [0, 1100], sizes = [5, 352], strides = [1, 1]} : vector<5x2002xbf16> to vector<5x352xbf16>
    %81 = vector.extract_strided_slice %77 {offsets = [0, 1650], sizes = [5, 352], strides = [1, 1]} : vector<5x2002xbf16> to vector<5x352xbf16>
    %82 = tpu.concatenate %78, %79, %80, %81 in 0 : vector<5x352xbf16>, vector<5x352xbf16>, vector<5x352xbf16>, vector<5x352xbf16> -> vector<20x352xbf16>
    %83 = vector.extract_strided_slice %58 {offsets = [32, 0], sizes = [5, 2002], strides = [1, 1]} : vector<48x2002xbf16> to vector<5x2002xbf16>
    %84 = vector.extract_strided_slice %83 {offsets = [0, 0], sizes = [5, 352], strides = [1, 1]} : vector<5x2002xbf16> to vector<5x352xbf16>
    %85 = vector.extract_strided_slice %83 {offsets = [0, 550], sizes = [5, 352], strides = [1, 1]} : vector<5x2002xbf16> to vector<5x352xbf16>
    %86 = vector.extract_strided_slice %83 {offsets = [0, 1100], sizes = [5, 352], strides = [1, 1]} : vector<5x2002xbf16> to vector<5x352xbf16>
    %87 = vector.extract_strided_slice %83 {offsets = [0, 1650], sizes = [5, 352], strides = [1, 1]} : vector<5x2002xbf16> to vector<5x352xbf16>
    %88 = tpu.concatenate %84, %85, %86, %87 in 0 : vector<5x352xbf16>, vector<5x352xbf16>, vector<5x352xbf16>, vector<5x352xbf16> -> vector<20x352xbf16>
    %89 = vector.extract_strided_slice %58 {offsets = [40, 0], sizes = [5, 2002], strides = [1, 1]} : vector<48x2002xbf16> to vector<5x2002xbf16>
    %90 = vector.extract_strided_slice %89 {offsets = [0, 0], sizes = [5, 352], strides = [1, 1]} : vector<5x2002xbf16> to vector<5x352xbf16>
    %91 = vector.extract_strided_slice %89 {offsets = [0, 550], sizes = [5, 352], strides = [1, 1]} : vector<5x2002xbf16> to vector<5x352xbf16>
    %92 = vector.extract_strided_slice %89 {offsets = [0, 1100], sizes = [5, 352], strides = [1, 1]} : vector<5x2002xbf16> to vector<5x352xbf16>
    %93 = vector.extract_strided_slice %89 {offsets = [0, 1650], sizes = [5, 352], strides = [1, 1]} : vector<5x2002xbf16> to vector<5x352xbf16>
    %94 = tpu.concatenate %90, %91, %92, %93 in 0 : vector<5x352xbf16>, vector<5x352xbf16>, vector<5x352xbf16>, vector<5x352xbf16> -> vector<20x352xbf16>
    %95 = tpu.concatenate %64, %70, %76, %82, %88, %94 in 1 : vector<20x352xbf16>, vector<20x352xbf16>, vector<20x352xbf16>, vector<20x352xbf16>, vector<20x352xbf16>, vector<20x352xbf16> -> vector<20x2112xbf16>
    %c0_21 = arith.constant 0 : index
    %c0_22 = arith.constant 0 : index
    %96 = vector.load %arg9[%c0_21, %c0_22] : memref<16x2112xbf16, #tpu.memory_space<vmem>>, vector<16x2112xbf16>
    %cst_23 = arith.constant dense<0.000000e+00> : vector<20x16xf32>
    %97 = tpu.matmul %95, %96, %cst_23 {dimension_numbers = #tpu.dot_dimension_numbers<[1], [1], [0], [0], [0, 0, 1, 0], [], []>} : vector<20x2112xbf16>, vector<16x2112xbf16>, vector<20x16xf32> -> vector<20x16xf32>
    %c0_24 = arith.constant 0 : index
    %c0_25 = arith.constant 0 : index
    %98 = vector.load %arg10[%c0_24, %c0_25] : memref<20x16xf32, #tpu.memory_space<vmem>>, vector<20x16xf32>
    %99 = arith.addf %97, %98 : vector<20x16xf32>
    %cst_26 = arith.constant 0.000000e+00 : f32
    %100 = vector.broadcast %cst_26 : f32 to vector<20x16xf32>
    %101 = arith.maximumf %99, %100 : vector<20x16xf32>
    %c0_27 = arith.constant 0 : index
    %c0_28 = arith.constant 0 : index
    %102 = vector.load %arg11[%c0_27, %c0_28] : memref<16x5xf32, #tpu.memory_space<vmem>>, vector<16x5xf32>
    %cst_29 = arith.constant dense<0.000000e+00> : vector<20x5xf32>
    %103 = tpu.matmul %101, %102, %cst_29 {dimension_numbers = #tpu.dot_dimension_numbers<[1], [0], [0], [1], [0, 0, 1, 1], [], []>} : vector<20x16xf32>, vector<16x5xf32>, vector<20x5xf32> -> vector<20x5xf32>
    %c0_30 = arith.constant 0 : index
    %c0_31 = arith.constant 0 : index
    %104 = vector.load %arg12[%c0_30, %c0_31] : memref<1x5xf32, #tpu.memory_space<vmem>>, vector<1x5xf32>
    %105 = vector.broadcast %104 : vector<1x5xf32> to vector<20x5xf32>
    %106 = arith.addf %103, %105 : vector<20x5xf32>
    %107 = vector.extract_strided_slice %106 {offsets = [0, 0], sizes = [5, 5], strides = [1, 1]} : vector<20x5xf32> to vector<5x5xf32>
    %c0_32 = arith.constant 0 : index
    %c0_33 = arith.constant 0 : index
    %c0_34 = arith.constant 0 : index
    %108 = vector.load %arg13[%c0_32, %c0_33, %c0_34] : memref<4x5x5xf32, #tpu.memory_space<vmem>>, vector<1x5x5xf32>
    %109 = vector.shape_cast %108 : vector<1x5x5xf32> to vector<5x5xf32>
    %110 = vector.shape_cast %107 : vector<5x5xf32> to vector<1x5x5xf32>
    tpu.vector_store %arg13[%c0_32, %c0_33, %c0_34], %110 {strides = array<i32>} : memref<4x5x5xf32, #tpu.memory_space<vmem>>, vector<1x5x5xf32>,
    %111 = vector.extract_strided_slice %106 {offsets = [5, 0], sizes = [5, 5], strides = [1, 1]} : vector<20x5xf32> to vector<5x5xf32>
    %c1 = arith.constant 1 : index
    %c0_35 = arith.constant 0 : index
    %c0_36 = arith.constant 0 : index
    %112 = vector.load %arg13[%c1, %c0_35, %c0_36] : memref<4x5x5xf32, #tpu.memory_space<vmem>>, vector<1x5x5xf32>
    %113 = vector.shape_cast %112 : vector<1x5x5xf32> to vector<5x5xf32>
    %114 = vector.shape_cast %111 : vector<5x5xf32> to vector<1x5x5xf32>
    tpu.vector_store %arg13[%c1, %c0_35, %c0_36], %114 {strides = array<i32>} : memref<4x5x5xf32, #tpu.memory_space<vmem>>, vector<1x5x5xf32>,
    %115 = vector.extract_strided_slice %106 {offsets = [10, 0], sizes = [5, 5], strides = [1, 1]} : vector<20x5xf32> to vector<5x5xf32>
    %c2 = arith.constant 2 : index
    %c0_37 = arith.constant 0 : index
    %c0_38 = arith.constant 0 : index
    %116 = vector.load %arg13[%c2, %c0_37, %c0_38] : memref<4x5x5xf32, #tpu.memory_space<vmem>>, vector<1x5x5xf32>
    %117 = vector.shape_cast %116 : vector<1x5x5xf32> to vector<5x5xf32>
    %118 = vector.shape_cast %115 : vector<5x5xf32> to vector<1x5x5xf32>
    tpu.vector_store %arg13[%c2, %c0_37, %c0_38], %118 {strides = array<i32>} : memref<4x5x5xf32, #tpu.memory_space<vmem>>, vector<1x5x5xf32>,
    %119 = vector.extract_strided_slice %106 {offsets = [15, 0], sizes = [5, 5], strides = [1, 1]} : vector<20x5xf32> to vector<5x5xf32>
    %c3 = arith.constant 3 : index
    %c0_39 = arith.constant 0 : index
    %c0_40 = arith.constant 0 : index
    %120 = vector.load %arg13[%c3, %c0_39, %c0_40] : memref<4x5x5xf32, #tpu.memory_space<vmem>>, vector<1x5x5xf32>
    %121 = vector.shape_cast %120 : vector<1x5x5xf32> to vector<5x5xf32>
    %122 = vector.shape_cast %119 : vector<5x5xf32> to vector<1x5x5xf32>
    tpu.vector_store %arg13[%c3, %c0_39, %c0_40], %122 {strides = array<i32>} : memref<4x5x5xf32, #tpu.memory_space<vmem>>, vector<1x5x5xf32>,
    return
  }
  func.func @transform_0(%arg0: i32) -> (i32, i32, i32) {
    %c0_i32 = arith.constant 0 : i32
    %c0_i32_0 = arith.constant 0 : i32
    %c0_i32_1 = arith.constant 0 : i32
    return %arg0, %c0_i32, %c0_i32_0 : i32, i32, i32
  }
  func.func @transform_1(%arg0: i32) -> (i32, i32) {
    %c0_i32 = arith.constant 0 : i32
    %c0_i32_0 = arith.constant 0 : i32
    %c0_i32_1 = arith.constant 0 : i32
    return %c0_i32, %c0_i32_0 : i32, i32
  }
  func.func @transform_2(%arg0: i32) -> (i32, i32) {
    %c0_i32 = arith.constant 0 : i32
    %c0_i32_0 = arith.constant 0 : i32
    %c0_i32_1 = arith.constant 0 : i32
    return %c0_i32, %c0_i32_0 : i32, i32
  }
  func.func @transform_3(%arg0: i32) -> (i32, i32) {
    %c0_i32 = arith.constant 0 : i32
    %c0_i32_0 = arith.constant 0 : i32
    %c0_i32_1 = arith.constant 0 : i32
    return %c0_i32, %c0_i32_0 : i32, i32
  }
  func.func @transform_4(%arg0: i32) -> (i32, i32) {
    %c0_i32 = arith.constant 0 : i32
    %c0_i32_0 = arith.constant 0 : i32
    %c0_i32_1 = arith.constant 0 : i32
    return %c0_i32, %c0_i32_0 : i32, i32
  }
  func.func @transform_5(%arg0: i32) -> (i32, i32) {
    %c0_i32 = arith.constant 0 : i32
    %c0_i32_0 = arith.constant 0 : i32
    %c0_i32_1 = arith.constant 0 : i32
    return %c0_i32, %c0_i32_0 : i32, i32
  }
  func.func @transform_6(%arg0: i32) -> (i32, i32) {
    %c0_i32 = arith.constant 0 : i32
    %c0_i32_0 = arith.constant 0 : i32
    %c0_i32_1 = arith.constant 0 : i32
    return %c0_i32, %c0_i32_0 : i32, i32
  }
  func.func @transform_7(%arg0: i32) -> (i32, i32) {
    %c0_i32 = arith.constant 0 : i32
    %c0_i32_0 = arith.constant 0 : i32
    %c0_i32_1 = arith.constant 0 : i32
    return %c0_i32, %c0_i32_0 : i32, i32
  }
  func.func @transform_8(%arg0: i32) -> (i32, i32) {
    %c0_i32 = arith.constant 0 : i32
    %c0_i32_0 = arith.constant 0 : i32
    %c0_i32_1 = arith.constant 0 : i32
    return %c0_i32, %c0_i32_0 : i32, i32
  }
  func.func @transform_9(%arg0: i32) -> (i32, i32) {
    %c0_i32 = arith.constant 0 : i32
    %c0_i32_0 = arith.constant 0 : i32
    %c0_i32_1 = arith.constant 0 : i32
    return %c0_i32, %c0_i32_0 : i32, i32
  }
  func.func @transform_10(%arg0: i32) -> (i32, i32) {
    %c0_i32 = arith.constant 0 : i32
    %c0_i32_0 = arith.constant 0 : i32
    %c0_i32_1 = arith.constant 0 : i32
    return %c0_i32, %c0_i32_0 : i32, i32
  }
  func.func @transform_11(%arg0: i32) -> (i32, i32) {
    %c0_i32 = arith.constant 0 : i32
    %c0_i32_0 = arith.constant 0 : i32
    %c0_i32_1 = arith.constant 0 : i32
    return %c0_i32, %c0_i32_0 : i32, i32
  }
  func.func @transform_12(%arg0: i32) -> (i32, i32, i32) {
    %c0_i32 = arith.constant 0 : i32
    %c0_i32_0 = arith.constant 0 : i32
    %c0_i32_1 = arith.constant 0 : i32
    return %arg0, %c0_i32, %c0_i32_0 : i32, i32, i32
  }
}

</mosaic_0001>

<bundles_post_ra>
// kernel: tile.9
= control target key start
LH: loop header
LB: loop body
LE: loop exit
PB: predicated region body
PF: predicated region fallthrough
CT: control target
= control target key end

     0   :  { %vm3_vm0 = vcmask 130048   ;;  %s60_s0 = inlined_call_operand.vmem [shape: f32[4,5,16], index: 0, kind: input, shape index: {}]   ;;  %s61_s1 = inlined_call_operand.vmem [shape: f32[20,16], index: 1, kind: output, shape index: {}]  }
   0x1   :  { %v2_v0 = vld [vmem:[%s60_s0] sm:$0x1f]   ;;  %v20_v1 = vld [vmem:[%s60_s0 + $0x8] sm:$0x1f]   ;;  %v22_v2 = vld [vmem:[%s60_s0 + $0x10] sm:$0x1f]  }
   0x2   :  { %4 = vst.msk [vmem:[%s61_s1] sm:$0x1f] %vm3_vm0, %v2_v0   ;;  %21 = vst.msk [vmem:[%s61_s1 + $0x5] sm:$0x1f] %vm3_vm0, %v20_v1   ;;  %v24_v3 = vld [vmem:[%s60_s0 + $0x18] sm:$0x1f]  }
   0x3   :  { %23 = vst.msk [vmem:[%s61_s1 + $0xa] sm:$0x1f] %vm3_vm0, %v22_v2   ;;  %25 = vst.msk [vmem:[%s61_s1 + $0xf] sm:$0x1f] %vm3_vm0, %v24_v3  }

// kernel: single_torus_forward.1
= control target key start
LH: loop header
LB: loop body
LE: loop exit
PB: predicated region body
PF: predicated region fallthrough
CT: control target
= control target key end

     0   :  { %s7206_s21 = smov 0   ;;  %s12173_s0 = inlined_call_operand.vmem [shape: bf16[2,8,2200], index: 0, kind: input, shape index: {}]   ;;  %s12174_s1 = inlined_call_operand.vmem [shape: bf16[16,72], index: 1, kind: input, shape index: {}]   ;;  %s12175_s2 = inlined_call_operand.vmem [shape: f32[16,1], index: 2, kind: input, shape index: {}]   ;;  %s12176_s3 = inlined_call_operand.vmem [shape: bf16[32,144], index: 3, kind: input, shape index: {}]   ;;  %s12177_s4 = inlined_call_operand.vmem [shape: f32[32,1], index: 4, kind: input, shape index: {}]   ;;  %s12178_s5 = inlined_call_operand.vmem [shape: bf16[48,288], index: 5, kind: input, shape index: {}]   ;;  %s12179_s6 = inlined_call_operand.vmem [shape: f32[48,1], index: 6, kind: input, shape index: {}]   ;;  %s12180_s7 = inlined_call_operand.vmem [shape: f32[48,1], index: 7, kind: input, shape index: {}]   ;;  %s12181_s8 = inlined_call_operand.vmem [shape: bf16[16,2112], index: 8, kind: input, shape index: {}]   ;;  %s12182_s9 = inlined_call_operand.vmem [shape: f32[20,16], index: 9, kind: input, shape index: {}]   ;;  %s12183_s10 = inlined_call_operand.vmem [shape: f32[16,5], index: 10, kind: input, shape index: {}]   ;;  %s12184_s11 = inlined_call_operand.vmem [shape: f32[1,5], index: 11, kind: input, shape index: {}]   ;;  %s12185_s12 = inlined_call_operand.vmem [shape: f32[8,5,5], index: 12, kind: output, shape index: {}]  }
   0x1 LB: > { %s7212_s22 = sadd.s32 4294967295, %s7122_s21   ;;  %p6777_p0 = scmp.ge.s32.totalorder %s7122_s21, 1  ;;  %s7122_s21 = sphi %s7206_s21, %s22_s21  }
   0x2   : > { %p362_p1 = scmp.lt.s32.totalorder %s7122_s21, 3 }
   0x4   : > { %p363_p2 = pnand %p6777_p0, %p362_p1 }
   0x6   : > { %366 = sbr.rel (%p363_p2) target bundleno = 2375 (0x947), region = 68 }
   0xb   : > { %p404_p3 = scmp.lt.s32.totalorder %s7212_s22, 1  ;;  %s7124_s28 = smov 82   ;;  %v12188_v8 = vmov 0   ;;  %vm869_vm0 = vcmask 670720   ;;  %vm887_vm1 = vcmask 1043456   ;;  %vm761_vm2 = vcmask 687104  }
   0xc   : > { %s7125_s29 = smov 84   ;;  %s7126_s30 = smov 83   ;;  %1266 = vmatprep.mubr.bf16.mxu0 %v12188_v8  ;;  %1309 = vmatprep.mubr.bf16.mxu1 %v12188_v8  ;;  %vm815_vm3 = vcmask 678912   ;;  %vm655_vm4 = vcmask 859136   ;;  %vm706_vm5 = vcmask 850944   ;;  %vm553_vm6 = vcmask 1031168  }
   0xd   : > { %s405_s23 = scalar_select %p404_p3, %s7212_s22, 1  ;;  %6979 = vset.pattern.permute.xlu1 %v12188_v8  ;;  %6978 = vset.pattern.permute.xlu0 %v12188_v8  ;;  %vm604_vm7 = vcmask 867328   ;;  %vm502_vm8 = vcmask 1039360   ;;  %vm1179_vm9 = vcmask 588800   ;;  %vm7134_vm10 = vmmov 0  }
   0xe   : > { %s7127_s13 = smov 105   ;;  %s7128_s14 = smov 104   ;;  %vm2261_vm11 = vcmask 130048   ;;  %vm3921_vm12 = vcmask 261120   ;;  %vm5228_vm13 = vcmask 736256   ;;  %vm5251_vm14 = vcmask 424960  }
   0xf   : > { %s6952_s24 = smul.u32 72, %s405_s23  ;;  %s7129_s15 = smov 126   ;;  %vm5311_vm15 = vcmask 1042432  }
  0x10   : > { %s7130_s16 = smov 106   ;;  %s7132_s17 = smov 127  }
  0x11   : > { %s7221_s27 = scalar_lea.vmem %s12173_s0, %s6952_s24  ;;  %s7136_s25 = smov 52  }
  0x12   : > { %v417_v0 = vld [vmem:[%s7221_s27 + $0x8] sm:$0xff]  ;;  %v416_v1 = vld [vmem:[%s7221_s27] sm:$0xff]  ;;  %v418_v6 = vld [vmem:[%s7221_s27 + $0x10] sm:$0xff]  ;;  %s7137_s26 = smov 14   ;;  %s7140_s24 = smov 32  }
  0x13   : > { %v7225_v2 = vcombine.low %v417_v0, %v417_v0  ;;  %v7227_v3 = vcombine.low %v416_v1, %v416_v1  ;;  %v7233_v4 = vcombine.high %v416_v1, %v416_v1  ;;  %v7247_v5 = vcombine.high %v417_v0, %v417_v0  ;;  %v419_v9 = vld [vmem:[%s7221_s27 + $0x18] sm:$0xff]  ;;  %v420_v12 = vld [vmem:[%s7221_s27 + $0x20] sm:$0xff]  ;;  %v7411_v39 = vld [vmem:[%s7221_s27 + $0x28] sm:$0xff]  ;;  %s6779_s18 = sshll.u32 %s7212_s22, 2 }
  0x14   : > { %v7254_v7 = vcombine.low %v418_v6, %v418_v6  ;;  %v7317_v10 = vcombine.low %v419_v9, %v419_v9  ;;  %v7319_v11 = vcombine.high %v418_v6, %v418_v6  ;;  %v7358_v13 = vcombine.low %v420_v12, %v420_v12  ;;  %p410_p4 = scmp.lt.s32.totalorder %s6779_s18, 7 }
  0x15   : > { %837 = vrot.lane.b32.xlu1 %v7225_v2, %s7124_s28  ;;  %833 = vrot.lane.b32.xlu0 %v7227_v3, %s7124_s28  ;;  %v7360_v14 = vcombine.high %v419_v9, %v419_v9  ;;  %v7421_v42 = vcombine.low %v7411_v39, %v7411_v39  ;;  %v7423_v43 = vcombine.high %v420_v12, %v420_v12 }
  0x16   : > { %s12475_s18 = smov (!%p410_p4, %s6779_s18), 7 }
  0x17   : > { %s6780_s19 = sshll.u32 %s12475_s18, 3 }
  0x19   : > { %727 = vrot.lane.b32.xlu1 %v7233_v4, %s7125_s29  ;;  %835 = vrot.lane.b32.xlu0 %v7233_v4, %s7124_s28 }
  0x1d   : > { %781 = vrot.lane.b32.xlu1 %v7233_v4, %s7126_s30  ;;  %729 = vrot.lane.b32.xlu0 %v7225_v2, %s7125_s29 }
  0x21   : > { %725 = vrot.lane.b32.xlu1 %v7227_v3, %s7125_s29  ;;  %783 = vrot.lane.b32.xlu0 %v7225_v2, %s7126_s30 }
  0x25   : > { %839 = vrot.lane.b32.xlu1 %v7247_v5, %s7124_s28  ;;  %779 = vrot.lane.b32.xlu0 %v7227_v3, %s7126_s30 }
  0x29   : > { %623 = vrot.lane.b32.xlu1 %v7233_v4, %s7127_s13  ;;  %841 = vrot.lane.b32.xlu0 %v7254_v7, %s7124_s28 }
  0x2d   : > { %674 = vrot.lane.b32.xlu1 %v7233_v4, %s7128_s14  ;;  %625 = vrot.lane.b32.xlu0 %v7225_v2, %s7127_s13 }
  0x31   : > { %621 = vrot.lane.b32.xlu1 %v7227_v3, %s7127_s13  ;;  %676 = vrot.lane.b32.xlu0 %v7225_v2, %s7128_s14 }
  0x35   : > { %731 = vrot.lane.b32.xlu1 %v7247_v5, %s7125_s29  ;;  %672 = vrot.lane.b32.xlu0 %v7227_v3, %s7128_s14 }
  0x39   : > { %785 = vrot.lane.b32.xlu1 %v7247_v5, %s7126_s30  ;;  %733 = vrot.lane.b32.xlu0 %v7254_v7, %s7125_s29 }
  0x3d   : > { %521 = vrot.lane.b32.xlu1 %v7233_v4, %s7129_s15  ;;  %787 = vrot.lane.b32.xlu0 %v7254_v7, %s7126_s30 }
  0x41   : > { %572 = vrot.lane.b32.xlu1 %v7233_v4, %s7130_s16  ;;  %523 = vrot.lane.b32.xlu0 %v7225_v2, %s7129_s15 }
  0x45   : > { %519 = vrot.lane.b32.xlu1 %v7227_v3, %s7129_s15  ;;  %574 = vrot.lane.b32.xlu0 %v7225_v2, %s7130_s16 }
  0x49   : > { %627 = vrot.lane.b32.xlu1 %v7247_v5, %s7127_s13  ;;  %570 = vrot.lane.b32.xlu0 %v7227_v3, %s7130_s16 }
  0x4d   : > { %678 = vrot.lane.b32.xlu1 %v7247_v5, %s7128_s14  ;;  %629 = vrot.lane.b32.xlu0 %v7254_v7, %s7127_s13 }
  0x51   : > { %470 = vrot.lane.b32.xlu1 %v7233_v4, %s7132_s17  ;;  %680 = vrot.lane.b32.xlu0 %v7254_v7, %s7128_s14 }
  0x55   : > { %468 = vrot.lane.b32.xlu1 %v7227_v3, %s7132_s17  ;;  %472 = vrot.lane.b32.xlu0 %v7225_v2, %s7132_s17 }
  0x59   : > { %527 = vrot.lane.b32.xlu1 %v7254_v7, %s7129_s15  ;;  %525 = vrot.lane.b32.xlu0 %v7247_v5, %s7129_s15 }
  0x5d   : > { %578 = vrot.lane.b32.xlu1 %v7254_v7, %s7130_s16  ;;  %576 = vrot.lane.b32.xlu0 %v7247_v5, %s7130_s16 }
  0x61   : > { %845 = vrot.lane.b32.xlu1 %v7317_v10, %s7124_s28  ;;  %843 = vrot.lane.b32.xlu0 %v7319_v11, %s7124_s28 }
  0x65   : > { %476 = vrot.lane.b32.xlu1 %v7254_v7, %s7132_s17  ;;  %474 = vrot.lane.b32.xlu0 %v7247_v5, %s7132_s17 }
  0x69   : > { %737 = vrot.lane.b32.xlu1 %v7317_v10, %s7125_s29  ;;  %735 = vrot.lane.b32.xlu0 %v7319_v11, %s7125_s29 }
  0x6d   : > { %791 = vrot.lane.b32.xlu1 %v7317_v10, %s7126_s30  ;;  %789 = vrot.lane.b32.xlu0 %v7319_v11, %s7126_s30 }
  0x71   : > { %633 = vrot.lane.b32.xlu1 %v7317_v10, %s7127_s13  ;;  %631 = vrot.lane.b32.xlu0 %v7319_v11, %s7127_s13 }
  0x75   : > { %684 = vrot.lane.b32.xlu1 %v7317_v10, %s7128_s14  ;;  %682 = vrot.lane.b32.xlu0 %v7319_v11, %s7128_s14 }
  0x79   : > { %531 = vrot.lane.b32.xlu1 %v7317_v10, %s7129_s15  ;;  %529 = vrot.lane.b32.xlu0 %v7319_v11, %s7129_s15 }
  0x7d   : > { %582 = vrot.lane.b32.xlu1 %v7317_v10, %s7130_s16  ;;  %580 = vrot.lane.b32.xlu0 %v7319_v11, %s7130_s16 }
  0x81   : > { %480 = vrot.lane.b32.xlu1 %v7317_v10, %s7132_s17  ;;  %478 = vrot.lane.b32.xlu0 %v7319_v11, %s7132_s17 }
  0x85   : > { %849 = vrot.lane.b32.xlu1 %v7358_v13, %s7124_s28  ;;  %847 = vrot.lane.b32.xlu0 %v7360_v14, %s7124_s28 }
  0x87   : > { %v838_v15 = vpop.permute.xlu1 %837  ;;  %v834_v16 = vpop.permute.xlu0 %833 }
  0x89   : > { %741 = vrot.lane.b32.xlu1 %v7358_v13, %s7125_s29  ;;  %739 = vrot.lane.b32.xlu0 %v7360_v14, %s7125_s29 }
  0x8b   : > { %v728_v17 = vpop.permute.xlu1 %727  ;;  %v836_v18 = vpop.permute.xlu0 %835 }
  0x8c   : > { %v871_v19 = vsel %vm869_vm0, %v836_v18, %v838_v15  ;;  %v870_v20 = vsel %vm869_vm0, %v834_v16, %v836_v18 }
  0x8d   : > { %795 = vrot.lane.b32.xlu1 %v7358_v13, %s7126_s30  ;;  %793 = vrot.lane.b32.xlu0 %v7360_v14, %s7126_s30  ;;  %v1184_v21 = vsel %vm887_vm1, %v870_v20, 0 }
  0x8e   : > { %6800 = vmatprep.subr.msk.bf16.mxu0 %vm887_vm1, %v871_v19 }
  0x8f   : > { %1241 = vmatpush1.bf16.msra.mxu0 %v1184_v21  ;;  %v782_v22 = vpop.permute.xlu1 %781  ;;  %v7378_v23 = vpop.permute.xlu0 %729 }
  0x90   : > { %v763_v26 = vsel %vm761_vm2, %v728_v17, %v7378_v23 }
  0x91   : > { %637 = vrot.lane.b32.xlu1 %v7358_v13, %s7127_s13  ;;  %635 = vrot.lane.b32.xlu0 %v7360_v14, %s7127_s13 }
  0x93   : > { %v726_v24 = vpop.permute.xlu1 %725  ;;  %v784_v25 = vpop.permute.xlu0 %783 }
  0x94   : > { %v817_v27 = vsel %vm815_vm3, %v782_v22, %v784_v25  ;;  %v762_v31 = vsel %vm761_vm2, %v726_v24, %v728_v17 }
  0x95   : > { %688 = vrot.lane.b32.xlu1 %v7358_v13, %s7128_s14  ;;  %686 = vrot.lane.b32.xlu0 %v7360_v14, %s7128_s14  ;;  %v1098_v28 = vsel %vm887_vm1, %v763_v26, %v817_v27  ;;  %v7494_v26 = vcombine.high %v7411_v39, %v7411_v39 }
  0x96   : > { %1242 = vmatprep.subr.bf16.mxu0 %v1098_v28 }
  0x97   : > { %v840_v29 = vpop.permute.xlu1 %839  ;;  %v780_v30 = vpop.permute.xlu0 %779 }
  0x98   : > { %v816_v32 = vsel %vm815_vm3, %v780_v30, %v782_v22  ;;  %v872_v36 = vsel %vm869_vm0, %v838_v15, %v840_v29  ;;  %v7480_v22 = vld [vmem:[%s7221_s27 + $0x30] sm:$0xff] }
  0x99   : > { %535 = vrot.lane.b32.xlu1 %v7358_v13, %s7129_s15  ;;  %533 = vrot.lane.b32.xlu0 %v7360_v14, %s7129_s15  ;;  %v1094_v33 = vsel %vm887_vm1, %v762_v31, %v816_v32  ;;  %v1190_v38 = vsel %vm887_vm1, %v872_v36, 0 }
  0x9a   : > { %1243 = vmatpush1.bf16.msra.mxu0 %v1094_v33 }
  0x9b   : > { %v624_v34 = vpop.permute.xlu1 %623  ;;  %v7399_v35 = vpop.permute.xlu0 %841 }
  0x9c   : > { %v873_v37 = vsel %vm869_vm0, %v840_v29, %v7399_v35 }
  0x9d   : > { %586 = vrot.lane.b32.xlu1 %v7358_v13, %s7130_s16  ;;  %584 = vrot.lane.b32.xlu0 %v7360_v14, %s7130_s16 }
  0x9e   : > { %6802 = vmatprep.subr.msk.bf16.mxu1 %vm887_vm1, %v873_v37 }
  0x9f   : > { %1284 = vmatpush1.bf16.msra.mxu1 %v1190_v38  ;;  %v675_v40 = vpop.permute.xlu1 %674  ;;  %v7413_v41 = vpop.permute.xlu0 %625 }
  0xa0   : > { %v657_v46 = vsel %vm655_vm4, %v624_v34, %v7413_v41 }
  0xa1   : > { %484 = vrot.lane.b32.xlu1 %v7358_v13, %s7132_s17  ;;  %482 = vrot.lane.b32.xlu0 %v7360_v14, %s7132_s17 }
  0xa3   : > { %v622_v44 = vpop.permute.xlu1 %621  ;;  %v677_v45 = vpop.permute.xlu0 %676 }
  0xa4   : > { %v708_v47 = vsel %vm706_vm5, %v675_v40, %v677_v45  ;;  %v656_v51 = vsel %vm655_vm4, %v622_v44, %v624_v34  ;;  %v7524_v44 = vld [vmem:[%s12174_s1] sm:$0xff]  }
  0xa5   : > { %853 = vrot.lane.b32.xlu1 %v7421_v42, %s7124_s28  ;;  %851 = vrot.lane.b32.xlu0 %v7423_v43, %s7124_s28  ;;  %v1030_v48 = vsel %vm887_vm1, %v657_v46, %v708_v47 }
  0xa6   : > { %1244 = vmatprep.subr.bf16.mxu0 %v1030_v48 }
  0xa7   : > { %v732_v49 = vpop.permute.xlu1 %731  ;;  %v673_v50 = vpop.permute.xlu0 %672 }
  0xa8   : > { %v707_v52 = vsel %vm706_vm5, %v673_v50, %v675_v40  ;;  %v764_v61 = vsel %vm761_vm2, %v7378_v23, %v732_v49 }
  0xa9   : > { %745 = vrot.lane.b32.xlu1 %v7421_v42, %s7125_s29  ;;  %743 = vrot.lane.b32.xlu0 %v7423_v43, %s7125_s29  ;;  %v1026_v53 = vsel %vm887_vm1, %v656_v51, %v707_v52 }
  0xaa   : > { %1245 = vmatpush1.bf16.msra.mxu0 %v1026_v53 }
  0xab   : > { %v786_v54 = vpop.permute.xlu1 %785  ;;  %v7440_v55 = vpop.permute.xlu0 %733 }
  0xac   : > { %v818_v56 = vsel %vm815_vm3, %v784_v25, %v786_v54  ;;  %v765_v59 = vsel %vm761_vm2, %v732_v49, %v7440_v55  ;;  %v7490_v25 = vcombine.low %v7480_v22, %v7480_v22 }
  0xad   : > { %799 = vrot.lane.b32.xlu1 %v7421_v42, %s7126_s30  ;;  %797 = vrot.lane.b32.xlu0 %v7423_v43, %s7126_s30  ;;  %v1102_v63 = vsel %vm887_vm1, %v764_v61, %v818_v56 }
  0xaf   : > { %v522_v57 = vpop.permute.xlu1 %521  ;;  %v7447_v58 = vpop.permute.xlu0 %787 }
  0xb0   : > { %v819_v60 = vsel %vm815_vm3, %v786_v54, %v7447_v58 }
  0xb1   : > { %641 = vrot.lane.b32.xlu1 %v7421_v42, %s7127_s13  ;;  %639 = vrot.lane.b32.xlu0 %v7423_v43, %s7127_s13  ;;  %v1106_v62 = vsel %vm887_vm1, %v765_v59, %v819_v60 }
  0xb2   : > { %1285 = vmatprep.subr.bf16.mxu1 %v1106_v62 }
  0xb3   : > { %v573_v0 = vpop.permute.xlu1 %572  ;;  %1286 = vmatpush1.bf16.msra.mxu1 %v1102_v63  ;;  %v524_v1 = vpop.permute.xlu0 %523 }
  0xb4   : > { %v555_v12 = vsel %vm553_vm6, %v522_v57, %v524_v1 }
  0xb5   : > { %692 = vrot.lane.b32.xlu1 %v7421_v42, %s7128_s14  ;;  %690 = vrot.lane.b32.xlu0 %v7423_v43, %s7128_s14 }
  0xb7   : > { %v520_v6 = vpop.permute.xlu1 %519  ;;  %v575_v9 = vpop.permute.xlu0 %574 }
  0xb8   : > { %v606_v15 = vsel %vm604_vm7, %v573_v0, %v575_v9  ;;  %v554_v19 = vsel %vm553_vm6, %v520_v6, %v522_v57 }
  0xb9   : > { %539 = vrot.lane.b32.xlu1 %v7421_v42, %s7129_s15  ;;  %537 = vrot.lane.b32.xlu0 %v7423_v43, %s7129_s15  ;;  %v962_v16 = vsel %vm887_vm1, %v555_v12, %v606_v15 }
  0xba   : > { %1246 = vmatprep.subr.bf16.mxu0 %v962_v16 }
  0xbb   : > { %v628_v17 = vpop.permute.xlu1 %627  ;;  %v571_v18 = vpop.permute.xlu0 %570 }
  0xbc   : > { %v605_v20 = vsel %vm604_vm7, %v571_v18, %v573_v0  ;;  %v658_v32 = vsel %vm655_vm4, %v7413_v41, %v628_v17 }
  0xbd   : > { %590 = vrot.lane.b32.xlu1 %v7421_v42, %s7130_s16  ;;  %588 = vrot.lane.b32.xlu0 %v7423_v43, %s7130_s16  ;;  %v958_v21 = vsel %vm887_vm1, %v554_v19, %v605_v20 }
  0xbe   : > { %1247 = vmatpush1.bf16.msra.mxu0 %v958_v21 }
  0xbf   : > { %v679_v23 = vpop.permute.xlu1 %678  ;;  %v7482_v24 = vpop.permute.xlu0 %629 }
  0xc0   : > { %v709_v27 = vsel %vm706_vm5, %v677_v45, %v679_v23  ;;  %v659_v30 = vsel %vm655_vm4, %v628_v17, %v7482_v24 }
  0xc1   : > { %488 = vrot.lane.b32.xlu1 %v7421_v42, %s7132_s17  ;;  %486 = vrot.lane.b32.xlu0 %v7423_v43, %s7132_s17  ;;  %v1034_v34 = vsel %vm887_vm1, %v658_v32, %v709_v27 }
  0xc3   : > { %v471_v28 = vpop.permute.xlu1 %470  ;;  %v7497_v29 = vpop.permute.xlu0 %680 }
  0xc4   : > { %v710_v31 = vsel %vm706_vm5, %v679_v23, %v7497_v29 }
  0xc5   : > { %857 = vrot.lane.b32.xlu1 %v7490_v25, %s7124_s28  ;;  %855 = vrot.lane.b32.xlu0 %v7494_v26, %s7124_s28  ;;  %v1038_v33 = vsel %vm887_vm1, %v659_v30, %v710_v31 }
  0xc6   : > { %1287 = vmatprep.subr.bf16.mxu1 %v1038_v33 }
  0xc7   : > { %v469_v36 = vpop.permute.xlu1 %468  ;;  %1288 = vmatpush1.bf16.msra.mxu1 %v1034_v34  ;;  %v473_v37 = vpop.permute.xlu0 %472 }
  0xc8   : > { %v503_v38 = vsel %vm502_vm8, %v469_v36, %v471_v28  ;;  %v504_v39 = vsel %vm502_vm8, %v471_v28, %v473_v37 }
  0xc9   : > { %749 = vrot.lane.b32.xlu1 %v7490_v25, %s7125_s29  ;;  %747 = vrot.lane.b32.xlu0 %v7494_v26, %s7125_s29  ;;  %v894_v40 = vsel %vm887_vm1, %v7233_v4, %v504_v39  ;;  %v890_v41 = vsel %vm887_vm1, %v7227_v3, %v503_v38 }
  0xca   : > { %1248 = vmatprep.subr.bf16.mxu0 %v894_v40 }
  0xcb   : > { %v7526_v45 = vpop.permute.xlu1 %527  ;;  %1249 = vmatpush1.bf16.msra.mxu0 %v890_v41  ;;  %v526_v46 = vpop.permute.xlu0 %525 }
  0xcc   : > { %v556_v47 = vsel %vm553_vm6, %v524_v1, %v526_v46  ;;  %v557_v48 = vsel %vm553_vm6, %v526_v46, %v7526_v45 }
  0xcd   : > { %803 = vrot.lane.b32.xlu1 %v7490_v25, %s7126_s30  ;;  %801 = vrot.lane.b32.xlu0 %v7494_v26, %s7126_s30 }
  0xce   : > { %6801 = vmatmul.mubr.msk.bf16.vlgmr.msra.gmra.mxu0 %vm1179_vm9, %v7524_v44 }
  0xcf   : > { %v7534_v3 = vpop.permute.xlu1 %578  ;;  %v577_v4 = vpop.permute.xlu0 %576  ;;  %1352 = vmatprep.mubr.bf16.mxu0 %v12188_v8 }
  0xd0   : > { %v607_v49 = vsel %vm604_vm7, %v575_v9, %v577_v4  ;;  %v608_v50 = vsel %vm604_vm7, %v577_v4, %v7534_v3  ;;  %v7581_v9 = vld [vmem:[%s7221_s27 + $0x38] sm:$0xff] }
  0xd1   : > { %645 = vrot.lane.b32.xlu1 %v7490_v25, %s7127_s13  ;;  %643 = vrot.lane.b32.xlu0 %v7494_v26, %s7127_s13  ;;  %v970_v51 = vsel %vm887_vm1, %v557_v48, %v608_v50  ;;  %v966_v52 = vsel %vm887_vm1, %v556_v47, %v607_v49  ;;  %v7598_v18 = vcombine.low %v7581_v9, %v7581_v9 }
  0xd2   : > { %1289 = vmatprep.subr.bf16.mxu1 %v970_v51 }
  0xd3   : > { %v7549_v53 = vpop.permute.xlu1 %845  ;;  %1290 = vmatpush1.bf16.msra.mxu1 %v966_v52  ;;  %v844_v54 = vpop.permute.xlu0 %843 }
  0xd4   : > { %v874_v56 = vsel %vm869_vm0, %v7399_v35, %v844_v54  ;;  %v875_v57 = vsel %vm869_vm0, %v844_v54, %v7549_v53 }
  0xd5   : > { %696 = vrot.lane.b32.xlu1 %v7490_v25, %s7128_s14  ;;  %694 = vrot.lane.b32.xlu0 %v7494_v26, %s7128_s14  ;;  %v1196_v59 = vsel %vm887_vm1, %v874_v56, 0  ;;  %v7690_v56 = vld [vmem:[%s7221_s27 + $0x40] sm:$0xff] }
  0xd6   : > { %6804 = vmatprep.subr.msk.bf16.mxu0 %vm887_vm1, %v875_v57 }
  0xd7   : > { %1327 = vmatpush1.bf16.msra.mxu0 %v1196_v59  ;;  %v7561_v60 = vpop.permute.xlu1 %476  ;;  %v475_v61 = vpop.permute.xlu0 %474 }
  0xd8   : > { %v505_v35 = vsel %vm502_vm8, %v473_v37, %v475_v61  ;;  %v506_v62 = vsel %vm502_vm8, %v475_v61, %v7561_v60 }
  0xd9   : > { %543 = vrot.lane.b32.xlu1 %v7490_v25, %s7129_s15  ;;  %541 = vrot.lane.b32.xlu0 %v7494_v26, %s7129_s15  ;;  %v902_v63 = vsel %vm887_vm1, %v7247_v5, %v506_v62  ;;  %v898_v0 = vsel %vm887_vm1, %v7225_v2, %v505_v35 }
  0xda   : > { %1291 = vmatprep.subr.bf16.mxu1 %v902_v63  ;;  %v7704_v63 = vcombine.low %v7690_v56, %v7690_v56 }
  0xdb   : > { %v7574_v1 = vpop.permute.xlu1 %737  ;;  %1292 = vmatpush1.bf16.msra.mxu1 %v898_v0  ;;  %v736_v6 = vpop.permute.xlu0 %735 }
  0xdc   : > { %v767_v12 = vsel %vm761_vm2, %v736_v6, %v7574_v1  ;;  %v766_v15 = vsel %vm761_vm2, %v7440_v55, %v736_v6  ;;  %v7714_v6 = vcombine.high %v7581_v9, %v7581_v9 }
  0xdd   : > { %594 = vrot.lane.b32.xlu1 %v7490_v25, %s7130_s16  ;;  %592 = vrot.lane.b32.xlu0 %v7494_v26, %s7130_s16 }
  0xde   : > { %6803 = vmatmul.mubr.msk.bf16.vlgmr.msra.gmra.mxu1 %vm1179_vm9, %v7524_v44 }
  0xdf   : > { %v7587_v2 = vpop.permute.xlu1 %791  ;;  %v790_v5 = vpop.permute.xlu0 %789  ;;  %1395 = vmatprep.mubr.bf16.mxu1 %v12188_v8 }
  0xe0   : > { %v820_v16 = vsel %vm815_vm3, %v7447_v58, %v790_v5  ;;  %v821_v17 = vsel %vm815_vm3, %v790_v5, %v7587_v2  ;;  %v7608_v58 = vcombine.high %v7480_v22, %v7480_v22 }
  0xe1   : > { %492 = vrot.lane.b32.xlu1 %v7490_v25, %s7132_s17  ;;  %490 = vrot.lane.b32.xlu0 %v7494_v26, %s7132_s17  ;;  %v1114_v19 = vsel %vm887_vm1, %v767_v12, %v821_v17  ;;  %v1110_v55 = vsel %vm887_vm1, %v766_v15, %v820_v16 }
  0xe2   : > { %1328 = vmatprep.subr.bf16.mxu0 %v1114_v19 }
  0xe3   : > { %v7610_v20 = vpop.permute.xlu1 %633  ;;  %1329 = vmatpush1.bf16.msra.mxu0 %v1110_v55  ;;  %v632_v21 = vpop.permute.xlu0 %631 }
  0xe4   : > { %v661_v23 = vsel %vm655_vm4, %v632_v21, %v7610_v20  ;;  %v660_v22 = vsel %vm655_vm4, %v7482_v24, %v632_v21 }
  0xe5   : > { %861 = vrot.lane.b32.xlu1 %v7598_v18, %s7124_s28  ;;  %859 = vrot.lane.b32.xlu0 %v7608_v58, %s7124_s28 }
  0xe7   : > { %v7618_v27 = vpop.permute.xlu1 %684  ;;  %v683_v28 = vpop.permute.xlu0 %682 }
  0xe8   : > { %v711_v30 = vsel %vm706_vm5, %v7497_v29, %v683_v28  ;;  %v712_v31 = vsel %vm706_vm5, %v683_v28, %v7618_v27  ;;  %v1163_v28 = vld [vmem:[%s12175_s2 + $0x8] sm:$0xff] }
  0xe9   : > { %753 = vrot.lane.b32.xlu1 %v7598_v18, %s7125_s29  ;;  %751 = vrot.lane.b32.xlu0 %v7608_v58, %s7125_s29  ;;  %v1046_v32 = vsel %vm887_vm1, %v661_v23, %v712_v31  ;;  %v1042_v33 = vsel %vm887_vm1, %v660_v22, %v711_v30  ;;  %v1162_v22 = vld [vmem:[%s12175_s2] sm:$0xff] }
  0xea   : > { %1330 = vmatprep.subr.bf16.mxu0 %v1046_v32 }
  0xeb   : > { %v7632_v34 = vpop.permute.xlu1 %531  ;;  %1331 = vmatpush1.bf16.msra.mxu0 %v1042_v33  ;;  %v530_v24 = vpop.permute.xlu0 %529 }
  0xec   : > { %v559_v29 = vsel %vm553_vm6, %v530_v24, %v7632_v34  ;;  %v558_v38 = vsel %vm553_vm6, %v7526_v45, %v530_v24 }
  0xed   : > { %807 = vrot.lane.b32.xlu1 %v7598_v18, %s7126_s30  ;;  %805 = vrot.lane.b32.xlu0 %v7608_v58, %s7126_s30 }
  0xef   : > { %v7640_v36 = vpop.permute.xlu1 %582  ;;  %v581_v37 = vpop.permute.xlu0 %580 }
  0xf0   : > { %v609_v39 = vsel %vm604_vm7, %v7534_v3, %v581_v37  ;;  %v610_v40 = vsel %vm604_vm7, %v581_v37, %v7640_v36 }
  0xf1   : > { %649 = vrot.lane.b32.xlu1 %v7598_v18, %s7127_s13  ;;  %647 = vrot.lane.b32.xlu0 %v7608_v58, %s7127_s13  ;;  %v978_v41 = vsel %vm887_vm1, %v559_v29, %v610_v40  ;;  %v974_v46 = vsel %vm887_vm1, %v558_v38, %v609_v39 }
  0xf2   : > { %1332 = vmatprep.subr.bf16.mxu0 %v978_v41 }
  0xf3   : > { %v7654_v4 = vpop.permute.xlu1 %480  ;;  %1333 = vmatpush1.bf16.msra.mxu0 %v974_v46  ;;  %v479_v45 = vpop.permute.xlu0 %478 }
  0xf4   : > { %v507_v3 = vsel %vm502_vm8, %v7561_v60, %v479_v45  ;;  %v508_v47 = vsel %vm502_vm8, %v479_v45, %v7654_v4 }
  0xf5   : > { %700 = vrot.lane.b32.xlu1 %v7598_v18, %s7128_s14  ;;  %698 = vrot.lane.b32.xlu0 %v7608_v58, %s7128_s14  ;;  %v910_v48 = vsel %vm887_vm1, %v7319_v11, %v508_v47  ;;  %v906_v49 = vsel %vm887_vm1, %v7254_v7, %v507_v3 }
  0xf6   : > { %1334 = vmatprep.subr.bf16.mxu0 %v910_v48 }
  0xf7   : > { %v7668_v50 = vpop.permute.xlu1 %849  ;;  %1335 = vmatpush1.bf16.msra.mxu0 %v906_v49  ;;  %v848_v51 = vpop.permute.xlu0 %847 }
  0xf8   : > { %v876_v52 = vsel %vm869_vm0, %v7549_v53, %v848_v51  ;;  %v877_v54 = vsel %vm869_vm0, %v848_v51, %v7668_v50 }
  0xf9   : > { %547 = vrot.lane.b32.xlu1 %v7598_v18, %s7129_s15  ;;  %545 = vrot.lane.b32.xlu0 %v7608_v58, %s7129_s15  ;;  %v1202_v7 = vsel %vm887_vm1, %v876_v52, 0 }
  0xfa   : > { %6806 = vmatprep.subr.msk.bf16.mxu1 %vm887_vm1, %v877_v54  ;;  %6805 = vmatmul.mubr.msk.bf16.vlgmr.msra.gmra.mxu0 %vm1179_vm9, %v7524_v44 }
  0xfb   : > { %1370 = vmatpush1.bf16.msra.mxu1 %v1202_v7  ;;  %v7682_v11 = vpop.permute.xlu1 %741  ;;  %v740_v53 = vpop.permute.xlu0 %739  ;;  %1438 = vmatprep.mubr.bf16.mxu0 %v12188_v8 }
  0xfc   : > { %v769_v57 = vsel %vm761_vm2, %v740_v53, %v7682_v11  ;;  %v768_v61 = vsel %vm761_vm2, %v7574_v1, %v740_v53 }
  0xfd   : > { %598 = vrot.lane.b32.xlu1 %v7598_v18, %s7130_s16  ;;  %596 = vrot.lane.b32.xlu0 %v7608_v58, %s7130_s16 }
  0xff   : > { %v7694_v59 = vpop.permute.xlu1 %795  ;;  %v794_v60 = vpop.permute.xlu0 %793 }
 0x100   : > { %v822_v35 = vsel %vm815_vm3, %v7587_v2, %v794_v60  ;;  %v823_v62 = vsel %vm815_vm3, %v794_v60, %v7694_v59 }
 0x101   : > { %496 = vrot.lane.b32.xlu1 %v7598_v18, %s7132_s17  ;;  %494 = vrot.lane.b32.xlu0 %v7608_v58, %s7132_s17  ;;  %v1122_v0 = vsel %vm887_vm1, %v769_v57, %v823_v62  ;;  %v1118_v1 = vsel %vm887_vm1, %v768_v61, %v822_v35 }
 0x102   : > { %1371 = vmatprep.subr.bf16.mxu1 %v1122_v0 }
 0x103   : > { %v7716_v12 = vpop.permute.xlu1 %637  ;;  %1372 = vmatpush1.bf16.msra.mxu1 %v1118_v1  ;;  %v636_v2 = vpop.permute.xlu0 %635 }
 0x104   : > { %v663_v5 = vsel %vm655_vm4, %v636_v2, %v7716_v12  ;;  %v662_v9 = vsel %vm655_vm4, %v7610_v20, %v636_v2 }
 0x105   : > { %865 = vrot.lane.b32.xlu1 %v7704_v63, %s7124_s28  ;;  %863 = vrot.lane.b32.xlu0 %v7714_v6, %s7124_s28 }
 0x107   : > { %v7724_v15 = vpop.permute.xlu1 %688  ;;  %v687_v16 = vpop.permute.xlu0 %686 }
 0x108   : > { %v713_v17 = vsel %vm706_vm5, %v7618_v27, %v687_v16  ;;  %v714_v19 = vsel %vm706_vm5, %v687_v16, %v7724_v15 }
 0x109   : > { %757 = vrot.lane.b32.xlu1 %v7704_v63, %s7125_s29  ;;  %755 = vrot.lane.b32.xlu0 %v7714_v6, %s7125_s29  ;;  %v1054_v55 = vsel %vm887_vm1, %v663_v5, %v714_v19  ;;  %v1050_v21 = vsel %vm887_vm1, %v662_v9, %v713_v17 }
 0x10a   : > { %1373 = vmatprep.subr.bf16.mxu1 %v1054_v55 }
 0x10b   : > { %v7738_v23 = vpop.permute.xlu1 %535  ;;  %1374 = vmatpush1.bf16.msra.mxu1 %v1050_v21  ;;  %v534_v20 = vpop.permute.xlu0 %533 }
 0x10c   : > { %v561_v27 = vsel %vm553_vm6, %v534_v20, %v7738_v23  ;;  %v560_v32 = vsel %vm553_vm6, %v7632_v34, %v534_v20 }
 0x10d   : > { %811 = vrot.lane.b32.xlu1 %v7704_v63, %s7126_s30  ;;  %809 = vrot.lane.b32.xlu0 %v7714_v6, %s7126_s30 }
 0x10f   : > { %v7752_v30 = vpop.permute.xlu1 %586  ;;  %v585_v31 = vpop.permute.xlu0 %584 }
 0x110   : > { %v611_v33 = vsel %vm604_vm7, %v7640_v36, %v585_v31  ;;  %v612_v24 = vsel %vm604_vm7, %v585_v31, %v7752_v30 }
 0x111   : > { %1171 = vperm.xlu1 %6979, %v1163_v28   ;;  %1166 = vperm.xlu0 %6978, %v1162_v22   ;;  %v986_v29 = vsel %vm887_vm1, %v561_v27, %v612_v24  ;;  %v982_v37 = vsel %vm887_vm1, %v560_v32, %v611_v33 }
 0x112   : > { %1375 = vmatprep.subr.bf16.mxu1 %v986_v29 }
 0x113   : > { %v7762_v38 = vpop.permute.xlu1 %484  ;;  %1376 = vmatpush1.bf16.msra.mxu1 %v982_v37  ;;  %v483_v39 = vpop.permute.xlu0 %482 }
 0x114   : > { %v509_v34 = vsel %vm502_vm8, %v7654_v4, %v483_v39  ;;  %v510_v36 = vsel %vm502_vm8, %v483_v39, %v7762_v38 }
 0x115   : > { %v918_v40 = vsel %vm887_vm1, %v7360_v14, %v510_v36  ;;  %v914_v41 = vsel %vm887_vm1, %v7317_v10, %v509_v34  ;;  %651 = vrot.lane.b32.xlu1 %v7714_v6, %s7127_s13  ;;  %653 = vrot.lane.b32.xlu0 %v7704_v63, %s7127_s13 }
 0x116   : > { %1377 = vmatprep.subr.bf16.mxu1 %v918_v40 }
 0x117   : > { %v7776_v46 = vpop.permute.xlu1 %853  ;;  %1378 = vmatpush1.bf16.msra.mxu1 %v914_v41  ;;  %v852_v4 = vpop.permute.xlu0 %851 }
 0x118   : > { %v878_v45 = vsel %vm869_vm0, %v7668_v50, %v852_v4  ;;  %v879_v14 = vsel %vm869_vm0, %v852_v4, %v7776_v46 }
 0x119   : > { %6808 = vmatprep.subr.msk.bf16.mxu0 %vm887_vm1, %v879_v14  ;;  %v1208_v10 = vsel %vm887_vm1, %v878_v45, 0  ;;  %702 = vrot.lane.b32.xlu1 %v7714_v6, %s7128_s14 }
 0x11a   : > { %6807 = vmatmul.mubr.msk.bf16.vlgmr.msra.gmra.mxu1 %vm1179_vm9, %v7524_v44  ;;  %1413 = vmatpush1.bf16.msra.mxu0 %v1208_v10 }
 0x11b   : > { %v7788_v3 = vpop.permute.xlu1 %745  ;;  %v744_v47 = vpop.permute.xlu0 %743  ;;  %704 = vrot.lane.b32.xlu0 %v7704_v63, %s7128_s14  ;;  %1481 = vmatprep.mubr.bf16.mxu1 %v12188_v8 }
 0x11c   : > { %v771_v48 = vsel %vm761_vm2, %v744_v47, %v7788_v3  ;;  %v770_v51 = vsel %vm761_vm2, %v7682_v11, %v744_v47  ;;  %v6798_v11 = vcombine.high %v7690_v56, %v7690_v56 }
 0x11d   : > { %549 = vrot.lane.b32.xlu1 %v7714_v6, %s7129_s15 }
 0x11f   : > { %v7797_v49 = vpop.permute.xlu1 %799  ;;  %v798_v50 = vpop.permute.xlu0 %797  ;;  %551 = vrot.lane.b32.xlu0 %v7704_v63, %s7129_s15 }
 0x120   : > { %v824_v52 = vsel %vm815_vm3, %v7694_v59, %v798_v50  ;;  %v825_v54 = vsel %vm815_vm3, %v798_v50, %v7797_v49 }
 0x121   : > { %v1130_v7 = vsel %vm887_vm1, %v771_v48, %v825_v54  ;;  %v1126_v53 = vsel %vm887_vm1, %v770_v51, %v824_v52  ;;  %600 = vrot.lane.b32.xlu1 %v7714_v6, %s7130_s16 }
 0x122   : > { %1414 = vmatprep.subr.bf16.mxu0 %v1130_v7 }
 0x123   : > { %v7811_v57 = vpop.permute.xlu1 %641  ;;  %1415 = vmatpush1.bf16.msra.mxu0 %v1126_v53  ;;  %v640_v60 = vpop.permute.xlu0 %639  ;;  %602 = vrot.lane.b32.xlu0 %v7704_v63, %s7130_s16 }
 0x124   : > { %v665_v59 = vsel %vm655_vm4, %v640_v60, %v7811_v57  ;;  %v664_v62 = vsel %vm655_vm4, %v7716_v12, %v640_v60 }
 0x125   : > { %498 = vrot.lane.b32.xlu1 %v7714_v6, %s7132_s17 }
 0x127   : > { %v693_v61 = vpop.permute.xlu1 %692  ;;  %v691_v35 = vpop.permute.xlu0 %690  ;;  %500 = vrot.lane.b32.xlu0 %v7704_v63, %s7132_s17 }
 0x128   : > { %v715_v0 = vsel %vm706_vm5, %v7724_v15, %v691_v35  ;;  %v716_v1 = vsel %vm706_vm5, %v691_v35, %v693_v61 }
 0x129   : > { %v1062_v2 = vsel %vm887_vm1, %v665_v59, %v716_v1  ;;  %v1058_v56 = vsel %vm887_vm1, %v664_v62, %v715_v0  ;;  %867 = vrot.lane.b32.xlu1 %v6798_v11, %s7124_s28 }
 0x12a   : > { %1416 = vmatprep.subr.bf16.mxu0 %v1062_v2 }
 0x12b   : > { %v540_v5 = vpop.permute.xlu1 %539  ;;  %1417 = vmatpush1.bf16.msra.mxu0 %v1058_v56  ;;  %v538_v16 = vpop.permute.xlu0 %537  ;;  %759 = vrot.lane.b32.xlu0 %v6798_v11, %s7125_s29 }
 0x12c   : > { %v563_v12 = vsel %vm553_vm6, %v538_v16, %v540_v5  ;;  %v562_v17 = vsel %vm553_vm6, %v7738_v23, %v538_v16 }
 0x12d   : > { %813 = vrot.lane.b32.xlu1 %v6798_v11, %s7126_s30 }
 0x12f   : > { %v591_v9 = vpop.permute.xlu1 %590  ;;  %v589_v15 = vpop.permute.xlu0 %588 }
 0x130   : > { %v613_v19 = vsel %vm604_vm7, %v7752_v30, %v589_v15  ;;  %v614_v55 = vsel %vm604_vm7, %v589_v15, %v591_v9 }
 0x131   : > { %v994_v21 = vsel %vm887_vm1, %v563_v12, %v614_v55  ;;  %v990_v20 = vsel %vm887_vm1, %v562_v17, %v613_v19 }
 0x132   : > { %1418 = vmatprep.subr.bf16.mxu0 %v994_v21 }
 0x133   : > { %v489_v27 = vpop.permute.xlu1 %488  ;;  %1419 = vmatpush1.bf16.msra.mxu0 %v990_v20  ;;  %v487_v28 = vpop.permute.xlu0 %486 }
 0x134   : > { %v511_v22 = vsel %vm502_vm8, %v7762_v38, %v487_v28  ;;  %v512_v31 = vsel %vm502_vm8, %v487_v28, %v489_v27 }
 0x135   : > { %v926_v23 = vsel %vm887_vm1, %v7423_v43, %v512_v31  ;;  %v922_v30 = vsel %vm887_vm1, %v7358_v13, %v511_v22 }
 0x136   : > { %1420 = vmatprep.subr.bf16.mxu0 %v926_v23 }
 0x137   : > { %v858_v32 = vpop.permute.xlu1 %857  ;;  %1421 = vmatpush1.bf16.msra.mxu0 %v922_v30  ;;  %v856_v33 = vpop.permute.xlu0 %855 }
 0x138   : > { %v880_v24 = vsel %vm869_vm0, %v7776_v46, %v856_v33  ;;  %v881_v29 = vsel %vm869_vm0, %v856_v33, %v858_v32 }
 0x139   : > { %6810 = vmatprep.subr.msk.bf16.mxu1 %vm887_vm1, %v881_v29  ;;  %v1214_v37 = vsel %vm887_vm1, %v880_v24, 0 }
 0x13a   : > { %6809 = vmatmul.mubr.msk.bf16.vlgmr.msra.gmra.mxu0 %vm1179_vm9, %v7524_v44  ;;  %1456 = vmatpush1.bf16.msra.mxu1 %v1214_v37 }
 0x13b   : > { %v750_v43 = vpop.permute.xlu1 %749  ;;  %v748_v38 = vpop.permute.xlu0 %747  ;;  %1524 = vmatprep.mubr.bf16.mxu0 %v12188_v8 }
 0x13c   : > { %v773_v13 = vsel %vm761_vm2, %v748_v38, %v750_v43  ;;  %v772_v36 = vsel %vm761_vm2, %v7788_v3, %v748_v38 }
 0x13f   : > { %v804_v39 = vpop.permute.xlu1 %803  ;;  %v802_v34 = vpop.permute.xlu0 %801 }
 0x140   : > { %v826_v40 = vsel %vm815_vm3, %v7797_v49, %v802_v34  ;;  %v827_v41 = vsel %vm815_vm3, %v802_v34, %v804_v39 }
 0x141   : > { %v1138_v46 = vsel %vm887_vm1, %v773_v13, %v827_v41  ;;  %v1134_v4 = vsel %vm887_vm1, %v772_v36, %v826_v40 }
 0x142   : > { %1457 = vmatprep.subr.bf16.mxu1 %v1138_v46 }
 0x143   : > { %v646_v45 = vpop.permute.xlu1 %645  ;;  %1458 = vmatpush1.bf16.msra.mxu1 %v1134_v4  ;;  %v644_v14 = vpop.permute.xlu0 %643 }
 0x144   : > { %v667_v10 = vsel %vm655_vm4, %v644_v14, %v646_v45  ;;  %v666_v3 = vsel %vm655_vm4, %v7811_v57, %v644_v14 }
 0x147   : > { %v697_v47 = vpop.permute.xlu1 %696  ;;  %v695_v48 = vpop.permute.xlu0 %694 }
 0x148   : > { %v717_v50 = vsel %vm706_vm5, %v693_v61, %v695_v48  ;;  %v718_v49 = vsel %vm706_vm5, %v695_v48, %v697_v47 }
 0x149   : > { %v1070_v51 = vsel %vm887_vm1, %v667_v10, %v718_v49  ;;  %v1066_v52 = vsel %vm887_vm1, %v666_v3, %v717_v50 }
 0x14a   : > { %1459 = vmatprep.subr.bf16.mxu1 %v1070_v51 }
 0x14b   : > { %v544_v54 = vpop.permute.xlu1 %543  ;;  %1460 = vmatpush1.bf16.msra.mxu1 %v1066_v52  ;;  %v542_v7 = vpop.permute.xlu0 %541 }
 0x14c   : > { %v565_v53 = vsel %vm553_vm6, %v542_v7, %v544_v54  ;;  %v564_v59 = vsel %vm553_vm6, %v540_v5, %v542_v7 }
 0x14f   : > { %v595_v60 = vpop.permute.xlu1 %594  ;;  %v593_v11 = vpop.permute.xlu0 %592 }
 0x150   : > { %v615_v57 = vsel %vm604_vm7, %v591_v9, %v593_v11  ;;  %v616_v61 = vsel %vm604_vm7, %v593_v11, %v595_v60  ;;  %v12186_v11 = vmov 0.0  }
 0x151   : > { %v1002_v35 = vsel %vm887_vm1, %v565_v53, %v616_v61  ;;  %v998_v62 = vsel %vm887_vm1, %v564_v59, %v615_v57 }
 0x152   : > { %1461 = vmatprep.subr.bf16.mxu1 %v1002_v35 }
 0x153   : > { %v493_v0 = vpop.permute.xlu1 %492  ;;  %1462 = vmatpush1.bf16.msra.mxu1 %v998_v62  ;;  %v491_v1 = vpop.permute.xlu0 %490 }
 0x154   : > { %v513_v2 = vsel %vm502_vm8, %v489_v27, %v491_v1  ;;  %v514_v56 = vsel %vm502_vm8, %v491_v1, %v493_v0 }
 0x155   : > { %v934_v16 = vsel %vm887_vm1, %v7494_v26, %v514_v56  ;;  %v930_v5 = vsel %vm887_vm1, %v7421_v42, %v513_v2 }
 0x156   : > { %1463 = vmatprep.subr.bf16.mxu1 %v934_v16 }
 0x157   : > { %v862_v12 = vpop.permute.xlu1 %861  ;;  %1464 = vmatpush1.bf16.msra.mxu1 %v930_v5  ;;  %v860_v9 = vpop.permute.xlu0 %859 }
 0x158   : > { %v882_v15 = vsel %vm869_vm0, %v858_v32, %v860_v9  ;;  %v883_v17 = vsel %vm869_vm0, %v860_v9, %v862_v12 }
 0x159   : > { %6812 = vmatprep.subr.msk.bf16.mxu0 %vm887_vm1, %v883_v17  ;;  %v1220_v19 = vsel %vm887_vm1, %v882_v15, 0 }
 0x15a   : > { %6811 = vmatmul.mubr.msk.bf16.vlgmr.msra.gmra.mxu1 %vm1179_vm9, %v7524_v44  ;;  %1499 = vmatpush1.bf16.msra.mxu0 %v1220_v19 }
 0x15b   : > { %v7889_v26 = vpop.permute.xlu1 %753  ;;  %v752_v55 = vpop.permute.xlu0 %751  ;;  %1567 = vmatprep.mubr.bf16.mxu1 %v12188_v8 }
 0x15c   : > { %v775_v42 = vsel %vm761_vm2, %v752_v55, %v7889_v26  ;;  %v774_v27 = vsel %vm761_vm2, %v750_v43, %v752_v55 }
 0x15f   : > { %v808_v21 = vpop.permute.xlu1 %807  ;;  %v806_v20 = vpop.permute.xlu0 %805 }
 0x160   : > { %v828_v28 = vsel %vm815_vm3, %v804_v39, %v806_v20  ;;  %v829_v22 = vsel %vm815_vm3, %v806_v20, %v808_v21 }
 0x161   : > { %v1146_v31 = vsel %vm887_vm1, %v775_v42, %v829_v22  ;;  %v1142_v23 = vsel %vm887_vm1, %v774_v27, %v828_v28 }
 0x162   : > { %1500 = vmatprep.subr.bf16.mxu0 %v1146_v31 }
 0x163   : > { %v7899_v30 = vpop.permute.xlu1 %649  ;;  %1501 = vmatpush1.bf16.msra.mxu0 %v1142_v23  ;;  %v648_v32 = vpop.permute.xlu0 %647 }
 0x164   : > { %v669_v33 = vsel %vm655_vm4, %v648_v32, %v7899_v30  ;;  %v668_v37 = vsel %vm655_vm4, %v646_v45, %v648_v32 }
 0x167   : > { %v7903_v24 = vpop.permute.xlu1 %700  ;;  %v699_v29 = vpop.permute.xlu0 %698 }
 0x168   : > { %v719_v43 = vsel %vm706_vm5, %v697_v47, %v699_v29  ;;  %v720_v38 = vsel %vm706_vm5, %v699_v29, %v7903_v24 }
 0x169   : > { %v1078_v13 = vsel %vm887_vm1, %v669_v33, %v720_v38  ;;  %v1074_v39 = vsel %vm887_vm1, %v668_v37, %v719_v43 }
 0x16a   : > { %1502 = vmatprep.subr.bf16.mxu0 %v1078_v13 }
 0x16b   : > { %v7911_v34 = vpop.permute.xlu1 %547  ;;  %1503 = vmatpush1.bf16.msra.mxu0 %v1074_v39  ;;  %v546_v36 = vpop.permute.xlu0 %545 }
 0x16c   : > { %v567_v40 = vsel %vm553_vm6, %v546_v36, %v7911_v34  ;;  %v566_v4 = vsel %vm553_vm6, %v544_v54, %v546_v36 }
 0x16f   : > { %v7915_v41 = vpop.permute.xlu1 %598  ;;  %v597_v46 = vpop.permute.xlu0 %596 }
 0x170   : > { %v617_v45 = vsel %vm604_vm7, %v595_v60, %v597_v46  ;;  %v618_v14 = vsel %vm604_vm7, %v597_v46, %v7915_v41 }
 0x171   : > { %v1010_v10 = vsel %vm887_vm1, %v567_v40, %v618_v14  ;;  %v1006_v47 = vsel %vm887_vm1, %v566_v4, %v617_v45 }
 0x172   : > { %1504 = vmatprep.subr.bf16.mxu0 %v1010_v10 }
 0x173   : > { %v7923_v48 = vpop.permute.xlu1 %496  ;;  %1505 = vmatpush1.bf16.msra.mxu0 %v1006_v47  ;;  %v495_v3 = vpop.permute.xlu0 %494 }
 0x174   : > { %v515_v50 = vsel %vm502_vm8, %v493_v0, %v495_v3  ;;  %v516_v49 = vsel %vm502_vm8, %v495_v3, %v7923_v48 }
 0x175   : > { %v942_v51 = vsel %vm887_vm1, %v7608_v58, %v516_v49  ;;  %v938_v52 = vsel %vm887_vm1, %v7490_v25, %v515_v50 }
 0x176   : > { %1506 = vmatprep.subr.bf16.mxu0 %v942_v51 }
 0x177   : > { %v7932_v54 = vpop.permute.xlu1 %865  ;;  %1507 = vmatpush1.bf16.msra.mxu0 %v938_v52  ;;  %v864_v7 = vpop.permute.xlu0 %863 }
 0x178   : > { %v884_v53 = vsel %vm869_vm0, %v862_v12, %v864_v7  ;;  %v885_v60 = vsel %vm869_vm0, %v864_v7, %v7932_v54  ;;  %6914 = vmatprep.subr.bf16.mxu0 %v12186_v11 }
 0x179   : > { %6814 = vmatprep.subr.msk.bf16.mxu1 %vm887_vm1, %v885_v60  ;;  %v1226_v58 = vsel %vm887_vm1, %v884_v53, 0 }
 0x17a   : > { %6813 = vmatmul.mubr.msk.bf16.vlgmr.msra.gmra.mxu0 %vm1179_vm9, %v7524_v44  ;;  %1542 = vmatpush1.bf16.msra.mxu1 %v1226_v58 }
 0x17b   : > { %v7942_v25 = vpop.permute.xlu1 %757  ;;  %v756_v59 = vpop.permute.xlu0 %755  ;;  %6924 = vmatprep.mubr.msk.bf16.mxu0 %vm7134_vm10, %v12186_v11 }
 0x17c   : > { %v777_v57 = vsel %vm761_vm2, %v756_v59, %v7942_v25  ;;  %v776_v62 = vsel %vm761_vm2, %v7889_v26, %v756_v59 }
 0x17f   : > { %v7948_v61 = vpop.permute.xlu1 %811  ;;  %v810_v35 = vpop.permute.xlu0 %809 }
 0x180   : > { %v830_v0 = vsel %vm815_vm3, %v808_v21, %v810_v35  ;;  %v831_v1 = vsel %vm815_vm3, %v810_v35, %v7948_v61 }
 0x181   : > { %v1154_v2 = vsel %vm887_vm1, %v777_v57, %v831_v1  ;;  %v1150_v56 = vsel %vm887_vm1, %v776_v62, %v830_v0 }
 0x182   : > { %1543 = vmatprep.subr.bf16.mxu1 %v1154_v2 }
 0x183   : > { %1544 = vmatpush1.bf16.msra.mxu1 %v1150_v56 }
 0x18c   : > { %v7957_v16 = vpop.permute.xlu1 %1171  ;;  %v7959_v5 = vpop.permute.xlu0 %1166 }
 0x18e   : > { %v1268_v12 = vpop.f32.mrf.mxu0 }
 0x18f   : > { %v1269_v9 = vadd.f32 %v1268_v12, %v7959_v5 }
 0x190   : > { %v652_v15 = vpop.permute.xlu1 %651  ;;  %v7962_v17 = vpop.f32.mrf.mxu0 }
 0x191   : > { %v7964_v19 = vpop.permute.xlu0 %653  ;;  %v1619_v55 = vmax.f32 %v1269_v9, 0.0  ;;  %v670_v27 = vsel %vm655_vm4, %v7899_v30, %v652_v15  ;;  %v1271_v0 = vadd.f32 %v7962_v17, %v7959_v5 }
 0x192   : > { %v1272_v26 = vpop.f32.mrf.mxu0  ;;  %v671_v21 = vsel %vm655_vm4, %v652_v15, %v7964_v19 }
 0x193   : > { %v1273_v42 = vadd.f32 %v1272_v26, %v7957_v16 }
 0x194   : > { %v703_v20 = vpop.permute.xlu1 %702  ;;  %v1274_v62 = vpop.f32.mrf.mxu0 }
 0x195   : > { %v1636_v28 = vmax.f32 %v1273_v42, 0.0  ;;  %v721_v22 = vsel %vm706_vm5, %v7903_v24, %v703_v20  ;;  %v705_v31 = vpop.permute.xlu0 %704  ;;  %v1275_v1 = vadd.f32 %v1274_v62, %v7957_v16 }
 0x196   : > { %v722_v23 = vsel %vm706_vm5, %v703_v20, %v705_v31  ;;  %v1082_v32 = vsel %vm887_vm1, %v670_v27, %v721_v22  ;;  %v8085_v20 = vld [vmem:[%s12176_s3 + $0x4] ss:$8 sps:$4 sm:$0xff]  }
 0x197   : > { %v7975_v33 = vpack.c.bf16 %v1636_v28, %v1619_v55  ;;  %v1086_v29 = vsel %vm887_vm1, %v671_v21, %v722_v23  ;;  %v1637_v2 = vmax.f32 %v1275_v1, 0.0 }
 0x198   : > { %1545 = vmatprep.subr.bf16.mxu1 %v1086_v29  ;;  %v550_v37 = vpop.permute.xlu1 %549 }
 0x199   : > { %1546 = vmatpush1.bf16.msra.mxu1 %v1082_v32  ;;  %v552_v43 = vpop.permute.xlu0 %551  ;;  %2083 = vrot.lane.b32.xlu0 %v7975_v33, %s7126_s30  ;;  %v568_v24 = vsel %vm553_vm6, %v7911_v34, %v550_v37 }
 0x19a   : > { %v569_v30 = vsel %vm553_vm6, %v550_v37, %v552_v43 }
 0x19c   : > { %v601_v38 = vpop.permute.xlu1 %600 }
 0x19d   : > { %v619_v13 = vsel %vm604_vm7, %v7915_v41, %v601_v38  ;;  %v603_v39 = vpop.permute.xlu0 %602 }
 0x19e   : > { %v620_v36 = vsel %vm604_vm7, %v601_v38, %v603_v39  ;;  %v1311_v40 = vpop.f32.mrf.mxu1  ;;  %v1014_v46 = vsel %vm887_vm1, %v568_v24, %v619_v13 }
 0x19f   : > { %v1018_v4 = vsel %vm887_vm1, %v569_v30, %v620_v36  ;;  %v1312_v10 = vadd.f32 %v1311_v40, %v7959_v5 }
 0x1a0   : > { %1547 = vmatprep.subr.bf16.mxu1 %v1018_v4  ;;  %v499_v45 = vpop.permute.xlu1 %498  ;;  %v1313_v14 = vpop.f32.mrf.mxu1 }
 0x1a1   : > { %v517_v47 = vsel %vm502_vm8, %v7923_v48, %v499_v45  ;;  %1548 = vmatpush1.bf16.msra.mxu1 %v1014_v46  ;;  %v501_v34 = vpop.permute.xlu0 %500  ;;  %v1621_v7 = vmax.f32 %v1312_v10, 0.0  ;;  %v1314_v9 = vadd.f32 %v1313_v14, %v7959_v5 }
 0x1a2   : > { %v518_v41 = vsel %vm502_vm8, %v499_v45, %v501_v34  ;;  %v1315_v3 = vpop.f32.mrf.mxu1  ;;  %v946_v50 = vsel %vm887_vm1, %v7598_v18, %v517_v47  ;;  %v954_v35 = vsel %vm887_vm1, %v7704_v63, %v501_v34  ;;  %v1620_v63 = vmax.f32 %v1271_v0, 0.0 }
 0x1a3   : > { %v1316_v49 = vadd.f32 %v1315_v3, %v7957_v16  ;;  %v950_v51 = vsel %vm887_vm1, %v7714_v6, %v518_v41  ;;  %v1622_v17 = vmax.f32 %v1314_v9, 0.0 }
 0x1a4   : > { %1549 = vmatprep.subr.bf16.mxu1 %v950_v51  ;;  %v868_v52 = vpop.permute.xlu1 %867  ;;  %v1317_v56 = vpop.f32.mrf.mxu1 }
 0x1a5   : > { %v1638_v53 = vmax.f32 %v1316_v49, 0.0  ;;  %v886_v48 = vsel %vm869_vm0, %v7932_v54, %v868_v52  ;;  %1550 = vmatpush1.bf16.msra.mxu1 %v946_v50  ;;  %v760_v58 = vpop.permute.xlu0 %759  ;;  %v1318_v12 = vadd.f32 %v1317_v56, %v7957_v16 }
 0x1a6   : > { %v1232_v60 = vsel %vm887_vm1, %v886_v48, 0  ;;  %v778_v6 = vsel %vm761_vm2, %v7942_v25, %v760_v58  ;;  %v1090_v25 = vsel %vm887_vm1, %v7964_v19, %v705_v31 }
 0x1a7   : > { %v8000_v59 = vpack.c.bf16 %v1638_v53, %v1621_v7  ;;  %6915 = vmatpush3.bf16.msra.mxu0 %v1232_v60  ;;  %v1639_v15 = vmax.f32 %v1318_v12, 0.0 }
 0x1a8   : > { %6815 = vmatmul.mubr.msk.bf16.vlgmr.msra.gmra.mxu1 %vm1179_vm9, %v7524_v44  ;;  %v814_v18 = vpop.permute.xlu1 %813  ;;  %6916 = vmatprep.subr.bf16.mxu0 %v12186_v11 }
 0x1a9   : > { %v832_v57 = vsel %vm815_vm3, %v7948_v61, %v814_v18  ;;  %2087 = vrot.lane.b32.xlu1 %v8000_v59, %s7126_s30  ;;  %2021 = vrot.lane.b32.xlu0 %v8000_v59, %s7125_s29  ;;  %v1022_v61 = vsel %vm887_vm1, %v552_v43, %v603_v39  ;;  %v8063_v19 = vpack.c.bf16 %v1639_v15, %v1622_v17 }
 0x1aa   : > { %v1158_v54 = vsel %vm887_vm1, %v778_v6, %v832_v57  ;;  %6821 = vmatprep.mubr.msk.bf16.mxu1 %vm2261_vm11, %v8085_v20  ;;  %vm5317_vm1 = vcmask 1044480  }
 0x1ab   : > { %6917 = vmatpush3.bf16.msra.mxu0 %v1158_v54 }
 0x1ac   : > { %6918 = vmatprep.subr.bf16.mxu0 %v12186_v11 }
 0x1ad   : > { %2017 = vrot.lane.b32.xlu1 %v7975_v33, %s7125_s29  ;;  %1951 = vrot.lane.b32.xlu0 %v7975_v33, %s7128_s14 }
 0x1af   : > { %6919 = vmatpush3.bf16.msra.mxu0 %v1090_v25 }
 0x1b0   : > { %6920 = vmatprep.subr.bf16.mxu0 %v12186_v11 }
 0x1b1   : > { %1955 = vrot.lane.b32.xlu1 %v8000_v59, %s7128_s14  ;;  %1889 = vrot.lane.b32.xlu0 %v8000_v59, %s7127_s13 }
 0x1b3   : > { %6921 = vmatpush3.bf16.msra.mxu0 %v1022_v61 }
 0x1b4   : > { %6922 = vmatprep.subr.bf16.mxu0 %v12186_v11 }
 0x1b5   : > { %1885 = vrot.lane.b32.xlu1 %v7975_v33, %s7127_s13  ;;  %1819 = vrot.lane.b32.xlu0 %v7975_v33, %s7130_s16 }
 0x1b7   : > { %6923 = vmatpush3.bf16.msra.mxu0 %v954_v35 }
 0x1b9   : > { %1823 = vrot.lane.b32.xlu1 %v8000_v59, %s7130_s16  ;;  %1757 = vrot.lane.b32.xlu0 %v8000_v59, %s7129_s15 }
 0x1ba   : > { %6925 = vmatmul.mubr.msk.bf16.vlgmr.msra.gmra.mxu0 %vm1179_vm9, %v7524_v44  ;;  %v8051_v44 = vpack.c.bf16 %v1637_v2, %v1620_v63  ;;  %v1354_v26 = vpop.f32.mrf.mxu0  ;;  %vm6702_vm9 = vcmask 36864  }
 0x1bb   : > { %v1355_v28 = vadd.f32 %v1354_v26, %v7959_v5  ;;  %6823 = vmatprep.mubr.msk.bf16.mxu0 %vm2261_vm11, %v8085_v20 }
 0x1bc   : > { %v1356_v55 = vpop.f32.mrf.mxu0 }
 0x1bd   : > { %1753 = vrot.lane.b32.xlu1 %v7975_v33, %s7129_s15  ;;  %1687 = vrot.lane.b32.xlu0 %v7975_v33, %s7132_s17  ;;  %v1623_v23 = vmax.f32 %v1355_v28, 0.0  ;;  %v1357_v38 = vadd.f32 %v1356_v55, %v7959_v5 }
 0x1be   : > { %v1358_v42 = vpop.f32.mrf.mxu0 }
 0x1bf   : > { %v1359_v21 = vadd.f32 %v1358_v42, %v7957_v16  ;;  %v1624_v36 = vmax.f32 %v1357_v38, 0.0 }
 0x1c0   : > { %v1360_v29 = vpop.f32.mrf.mxu0 }
 0x1c1   : > { %1691 = vrot.lane.b32.xlu1 %v8000_v59, %s7132_s17  ;;  %2153 = vrot.lane.b32.xlu0 %v8000_v59, %s7124_s28  ;;  %v1640_v22 = vmax.f32 %v1359_v21, 0.0  ;;  %v1361_v43 = vadd.f32 %v1360_v29, %v7957_v16 }
 0x1c3   : > { %v8100_v32 = vpack.c.bf16 %v1640_v22, %v1623_v23  ;;  %v1641_v13 = vmax.f32 %v1361_v43, 0.0 }
 0x1c5   : > { %2149 = vrot.lane.b32.xlu1 %v7975_v33, %s7124_s28  ;;  %2085 = vrot.lane.b32.xlu0 %v8051_v44, %s7126_s30  ;;  %v8118_v46 = vpack.c.bf16 %v1641_v13, %v1624_v36 }
 0x1c9   : > { %2019 = vrot.lane.b32.xlu1 %v8051_v44, %s7125_s29  ;;  %1953 = vrot.lane.b32.xlu0 %v8051_v44, %s7128_s14 }
 0x1cd   : > { %1887 = vrot.lane.b32.xlu1 %v8051_v44, %s7127_s13  ;;  %2089 = vrot.lane.b32.xlu0 %v8063_v19, %s7126_s30 }
 0x1d1   : > { %2023 = vrot.lane.b32.xlu1 %v8063_v19, %s7125_s29  ;;  %1821 = vrot.lane.b32.xlu0 %v8051_v44, %s7130_s16 }
 0x1d5   : > { %1755 = vrot.lane.b32.xlu1 %v8051_v44, %s7129_s15  ;;  %1957 = vrot.lane.b32.xlu0 %v8063_v19, %s7128_s14 }
 0x1d9   : > { %1891 = vrot.lane.b32.xlu1 %v8063_v19, %s7127_s13  ;;  %1689 = vrot.lane.b32.xlu0 %v8051_v44, %s7132_s17 }
 0x1da   : > { %v1397_v27 = vpop.f32.mrf.mxu1 }
 0x1db   : > { %v1398_v24 = vadd.f32 %v1397_v27, %v7959_v5 }
 0x1dc   : > { %v1399_v31 = vpop.f32.mrf.mxu1 }
 0x1dd   : > { %1825 = vrot.lane.b32.xlu1 %v8063_v19, %s7130_s16  ;;  %1759 = vrot.lane.b32.xlu0 %v8063_v19, %s7129_s15  ;;  %v1625_v40 = vmax.f32 %v1398_v24, 0.0  ;;  %v1400_v41 = vadd.f32 %v1399_v31, %v7959_v5 }
 0x1de   : > { %v1401_v37 = vpop.f32.mrf.mxu1 }
 0x1df   : > { %v1402_v30 = vadd.f32 %v1401_v37, %v7957_v16  ;;  %v1626_v49 = vmax.f32 %v1400_v41, 0.0 }
 0x1e0   : > { %v1403_v14 = vpop.f32.mrf.mxu1 }
 0x1e1   : > { %2151 = vrot.lane.b32.xlu1 %v8051_v44, %s7124_s28  ;;  %1693 = vrot.lane.b32.xlu0 %v8063_v19, %s7132_s17  ;;  %v1642_v39 = vmax.f32 %v1402_v30, 0.0  ;;  %v1404_v47 = vadd.f32 %v1403_v14, %v7957_v16 }
 0x1e3   : > { %v8120_v4 = vpack.c.bf16 %v1642_v39, %v1625_v40  ;;  %v1643_v3 = vmax.f32 %v1404_v47, 0.0 }
 0x1e5   : > { %2091 = vrot.lane.b32.xlu1 %v8100_v32, %s7126_s30  ;;  %2025 = vrot.lane.b32.xlu0 %v8100_v32, %s7125_s29  ;;  %v8162_v52 = vpack.c.bf16 %v1643_v3, %v1626_v49 }
 0x1e9   : > { %1959 = vrot.lane.b32.xlu1 %v8100_v32, %s7128_s14  ;;  %1893 = vrot.lane.b32.xlu0 %v8100_v32, %s7127_s13 }
 0x1ed   : > { %1761 = vrot.lane.b32.xlu1 %v8100_v32, %s7129_s15  ;;  %1827 = vrot.lane.b32.xlu0 %v8100_v32, %s7130_s16 }
 0x1f1   : > { %2095 = vrot.lane.b32.xlu1 %v8120_v4, %s7126_s30  ;;  %2093 = vrot.lane.b32.xlu0 %v8118_v46, %s7126_s30 }
 0x1f5   : > { %1695 = vrot.lane.b32.xlu1 %v8100_v32, %s7132_s17  ;;  %2027 = vrot.lane.b32.xlu0 %v8118_v46, %s7125_s29 }
 0x1f9   : > { %2029 = vrot.lane.b32.xlu1 %v8120_v4, %s7125_s29  ;;  %1961 = vrot.lane.b32.xlu0 %v8118_v46, %s7128_s14 }
 0x1fa   : > { %v1440_v45 = vpop.f32.mrf.mxu0 }
 0x1fb   : > { %v1441_v51 = vadd.f32 %v1440_v45, %v7959_v5 }
 0x1fc   : > { %v1442_v10 = vpop.f32.mrf.mxu0 }
 0x1fd   : > { %1963 = vrot.lane.b32.xlu1 %v8120_v4, %s7128_s14  ;;  %2155 = vrot.lane.b32.xlu0 %v8063_v19, %s7124_s28  ;;  %v1627_v53 = vmax.f32 %v1441_v51, 0.0  ;;  %v1443_v63 = vadd.f32 %v1442_v10, %v7959_v5 }
 0x1fe   : > { %v1444_v34 = vpop.f32.mrf.mxu0 }
 0x1ff   : > { %v1445_v50 = vadd.f32 %v1444_v34, %v7957_v16  ;;  %v1628_v15 = vmax.f32 %v1443_v63, 0.0 }
 0x200   : > { %v1446_v25 = vpop.f32.mrf.mxu0 }
 0x201   : > { %2157 = vrot.lane.b32.xlu1 %v8100_v32, %s7124_s28  ;;  %1895 = vrot.lane.b32.xlu0 %v8118_v46, %s7127_s13  ;;  %v1644_v7 = vmax.f32 %v1445_v50, 0.0  ;;  %v1447_v35 = vadd.f32 %v1446_v25, %v7957_v16 }
 0x203   : > { %v8168_v48 = vpack.c.bf16 %v1644_v7, %v1627_v53  ;;  %v1645_v2 = vmax.f32 %v1447_v35, 0.0 }
 0x205   : > { %1897 = vrot.lane.b32.xlu1 %v8120_v4, %s7127_s13  ;;  %1829 = vrot.lane.b32.xlu0 %v8118_v46, %s7130_s16  ;;  %v8206_v26 = vpack.c.bf16 %v1645_v2, %v1628_v15 }
 0x209   : > { %1831 = vrot.lane.b32.xlu1 %v8120_v4, %s7130_s16  ;;  %1763 = vrot.lane.b32.xlu0 %v8118_v46, %s7129_s15 }
 0x20b   : > { %v2084_v60 = vpop.permute.xlu0 %2083 }
 0x20d   : > { %1765 = vrot.lane.b32.xlu1 %v8120_v4, %s7129_s15  ;;  %1697 = vrot.lane.b32.xlu0 %v8118_v46, %s7132_s17 }
 0x211   : > { %1699 = vrot.lane.b32.xlu1 %v8120_v4, %s7132_s17  ;;  %2159 = vrot.lane.b32.xlu0 %v8118_v46, %s7124_s28 }
 0x215   : > { %2161 = vrot.lane.b32.xlu1 %v8120_v4, %s7124_s28  ;;  %2097 = vrot.lane.b32.xlu0 %v8162_v52, %s7126_s30 }
 0x219   : > { %2099 = vrot.lane.b32.xlu1 %v8168_v48, %s7126_s30  ;;  %2031 = vrot.lane.b32.xlu0 %v8162_v52, %s7125_s29 }
 0x21a   : > { %v1483_v6 = vpop.f32.mrf.mxu1 }
 0x21b   : > { %v8174_v58 = vpop.permute.xlu1 %2087  ;;  %v8176_v18 = vpop.permute.xlu0 %2021  ;;  %v1484_v17 = vadd.f32 %v1483_v6, %v7959_v5 }
 0x21c   : > { %v8182_v61 = vpop.f32.mrf.mxu1 }
 0x21d   : > { %2033 = vrot.lane.b32.xlu1 %v8168_v48, %s7125_s29  ;;  %1965 = vrot.lane.b32.xlu0 %v8162_v52, %s7128_s14  ;;  %v1629_v27 = vmax.f32 %v1484_v17, 0.0  ;;  %v1486_v63 = vadd.f32 %v8182_v61, %v7959_v5 }
 0x21e   : > { %v1487_v1 = vpop.f32.mrf.mxu1 }
 0x21f   : > { %v2018_v57 = vpop.permute.xlu1 %2017  ;;  %v1952_v54 = vpop.permute.xlu0 %1951  ;;  %v1488_v56 = vadd.f32 %v1487_v1, %v7957_v16  ;;  %v1630_v61 = vmax.f32 %v1486_v63, 0.0 }
 0x220   : > { %v1489_v53 = vpop.f32.mrf.mxu1 }
 0x221   : > { %1967 = vrot.lane.b32.xlu1 %v8168_v48, %s7128_s14  ;;  %1899 = vrot.lane.b32.xlu0 %v8162_v52, %s7127_s13  ;;  %v1646_v55 = vmax.f32 %v1488_v56, 0.0 }
 0x223   : > { %v8189_v62 = vpop.permute.xlu1 %1955  ;;  %v8191_v0 = vpop.permute.xlu0 %1889  ;;  %v8216_v28 = vpack.c.bf16 %v1646_v55, %v1629_v27 }
 0x225   : > { %1901 = vrot.lane.b32.xlu1 %v8168_v48, %s7127_s13  ;;  %1833 = vrot.lane.b32.xlu0 %v8162_v52, %s7130_s16 }
 0x227   : > { %v1886_v12 = vpop.permute.xlu1 %1885  ;;  %v8199_v9 = vpop.permute.xlu0 %1819 }
 0x229   : > { %1835 = vrot.lane.b32.xlu1 %v8168_v48, %s7130_s16  ;;  %1767 = vrot.lane.b32.xlu0 %v8162_v52, %s7129_s15 }
 0x22b   : > { %v8208_v42 = vpop.permute.xlu1 %1823  ;;  %v8210_v21 = vpop.permute.xlu0 %1757 }
 0x22d   : > { %1769 = vrot.lane.b32.xlu1 %v8168_v48, %s7129_s15  ;;  %2101 = vrot.lane.b32.xlu0 %v8206_v26, %s7126_s30 }
 0x22f   : > { %v1754_v22 = vpop.permute.xlu1 %1753  ;;  %v8218_v31 = vpop.permute.xlu0 %1687 }
 0x231   : > { %2103 = vrot.lane.b32.xlu1 %v8216_v28, %s7126_s30  ;;  %1701 = vrot.lane.b32.xlu0 %v8162_v52, %s7132_s17 }
 0x233   : > { %v8224_v23 = vpop.permute.xlu1 %1691  ;;  %v8226_v29 = vpop.permute.xlu0 %2153 }
 0x235   : > { %1703 = vrot.lane.b32.xlu1 %v8168_v48, %s7132_s17  ;;  %2035 = vrot.lane.b32.xlu0 %v8206_v26, %s7125_s29 }
 0x237   : > { %v8232_v37 = vpop.permute.xlu1 %2149  ;;  %v2086_v43 = vpop.permute.xlu0 %2085 }
 0x238   : > { %v2118_v30 = vsel %vm815_vm3, %v2086_v43, %v8174_v58  ;;  %v2117_v38 = vsel %vm815_vm3, %v2084_v60, %v2086_v43 }
 0x239   : > { %2037 = vrot.lane.b32.xlu1 %v8216_v28, %s7125_s29  ;;  %1969 = vrot.lane.b32.xlu0 %v8206_v26, %s7128_s14 }
 0x23a   : > { %2268 = vmatprep.subr.bf16.mxu1 %v2118_v30  ;;  %v1526_v3 = vpop.f32.mrf.mxu0 }
 0x23b   : > { %2269 = vmatpush1.bf16.msra.mxu1 %v2117_v38  ;;  %v2020_v24 = vpop.permute.xlu1 %2019  ;;  %v1954_v13 = vpop.permute.xlu0 %1953  ;;  %v1527_v55 = vadd.f32 %v1526_v3, %v7959_v5 }
 0x23c   : > { %v2052_v39 = vsel %vm761_vm2, %v2020_v24, %v8176_v18  ;;  %v2051_v36 = vsel %vm761_vm2, %v2018_v57, %v2020_v24  ;;  %v1986_v45 = vsel %vm706_vm5, %v1954_v13, %v8189_v62  ;;  %v1985_v10 = vsel %vm706_vm5, %v1952_v54, %v1954_v13  ;;  %v8270_v60 = vpop.f32.mrf.mxu0 }
 0x23d   : > { %1971 = vrot.lane.b32.xlu1 %v8216_v28, %s7128_s14  ;;  %2163 = vrot.lane.b32.xlu0 %v8162_v52, %s7124_s28  ;;  %v1490_v57 = vadd.f32 %v1489_v53, %v7957_v16  ;;  %v1631_v24 = vmax.f32 %v1527_v55, 0.0 }
 0x23e   : > { %2270 = vmatprep.subr.bf16.mxu1 %v2052_v39  ;;  %v1530_v1 = vpop.f32.mrf.mxu0 }
 0x23f   : > { %2271 = vmatpush1.bf16.msra.mxu1 %v2051_v36  ;;  %v1888_v40 = vpop.permute.xlu1 %1887  ;;  %v8250_v14 = vpop.permute.xlu0 %2089  ;;  %v1647_v56 = vmax.f32 %v1490_v57, 0.0 }
 0x240   : > { %2272 = vmatprep.subr.bf16.mxu1 %v1986_v45  ;;  %v1920_v34 = vsel %vm655_vm4, %v1888_v40, %v8191_v0  ;;  %v1919_v50 = vsel %vm655_vm4, %v1886_v12, %v1888_v40  ;;  %v1531_v12 = vadd.f32 %v1530_v1, %v7957_v16  ;;  %v2119_v40 = vsel %vm815_vm3, %v8174_v58, %v8250_v14  ;;  %v8334_v45 = vld [vmem:[%s12176_s3] ss:$8 sps:$4 sm:$0xff]  }
 0x241   : > { %2165 = vrot.lane.b32.xlu1 %v8168_v48, %s7124_s28  ;;  %1903 = vrot.lane.b32.xlu0 %v8206_v26, %s7127_s13 }
 0x242   : > { %v1648_v43 = vmax.f32 %v1531_v12, 0.0 }
 0x243   : > { %2273 = vmatpush1.bf16.msra.mxu1 %v1985_v10  ;;  %v8257_v47 = vpop.permute.xlu1 %2023  ;;  %v1822_v41 = vpop.permute.xlu0 %1821 }
 0x244   : > { %2274 = vmatprep.subr.bf16.mxu1 %v1920_v34  ;;  %v1854_v51 = vsel %vm604_vm7, %v1822_v41, %v8208_v42  ;;  %v1853_v6 = vsel %vm604_vm7, %v8199_v9, %v1822_v41  ;;  %v8313_v13 = vpack.c.bf16 %v1648_v43, %v1631_v24  ;;  %v2053_v58 = vsel %vm761_vm2, %v8176_v18, %v8257_v47 }
 0x245   : > { %1905 = vrot.lane.b32.xlu1 %v8216_v28, %s7127_s13  ;;  %1837 = vrot.lane.b32.xlu0 %v8206_v26, %s7130_s16 }
 0x247   : > { %2275 = vmatpush1.bf16.msra.mxu1 %v1919_v50  ;;  %v1756_v49 = vpop.permute.xlu1 %1755  ;;  %v8268_v7 = vpop.permute.xlu0 %1957 }
 0x248   : > { %2276 = vmatprep.subr.bf16.mxu1 %v1854_v51  ;;  %v1788_v25 = vsel %vm553_vm6, %v1756_v49, %v8210_v21  ;;  %v1787_v2 = vsel %vm553_vm6, %v1754_v22, %v1756_v49  ;;  %v8304_v22 = vpack.c.bf16 %v1647_v56, %v1630_v61  ;;  %v1532_v49 = vpop.f32.mrf.mxu0  ;;  %v1987_v18 = vsel %vm706_vm5, %v8189_v62, %v8268_v7 }
 0x249   : > { %1839 = vrot.lane.b32.xlu1 %v8216_v28, %s7130_s16  ;;  %1771 = vrot.lane.b32.xlu0 %v8206_v26, %s7129_s15  ;;  %v1533_v51 = vadd.f32 %v1532_v49, %v7957_v16 }
 0x24b   : > { %2277 = vmatpush1.bf16.msra.mxu1 %v1853_v6  ;;  %v8279_v54 = vpop.permute.xlu1 %1891  ;;  %v1690_v35 = vpop.permute.xlu0 %1689  ;;  %v1649_v1 = vmax.f32 %v1533_v51, 0.0 }
 0x24c   : > { %2278 = vmatprep.subr.bf16.mxu1 %v1788_v25  ;;  %v1722_v15 = vsel %vm502_vm8, %v1690_v35, %v8224_v23  ;;  %v1721_v27 = vsel %vm502_vm8, %v8218_v31, %v1690_v35  ;;  %v1921_v35 = vsel %vm655_vm4, %v8191_v0, %v8279_v54 }
 0x24d   : > { %1773 = vrot.lane.b32.xlu1 %v8216_v28, %s7129_s15  ;;  %1705 = vrot.lane.b32.xlu0 %v8206_v26, %s7132_s17 }
 0x24f   : > { %2279 = vmatpush1.bf16.msra.mxu1 %v1787_v2  ;;  %v8291_v9 = vpop.permute.xlu1 %1825  ;;  %v8295_v17 = vpop.permute.xlu0 %1759 }
 0x250   : > { %2280 = vmatprep.subr.bf16.mxu1 %v1722_v15 }
 0x251   : > { %1707 = vrot.lane.b32.xlu1 %v8216_v28, %s7132_s17  ;;  %2167 = vrot.lane.b32.xlu0 %v8206_v26, %s7124_s28 }
 0x253   : > { %2281 = vmatpush1.bf16.msra.mxu1 %v1721_v27  ;;  %v2152_v30 = vpop.permute.xlu1 %2151  ;;  %v8306_v38 = vpop.permute.xlu0 %1693 }
 0x254   : > { %2282 = vmatprep.subr.bf16.mxu1 %v8051_v44  ;;  %v2184_v39 = vsel %vm869_vm0, %v2152_v30, %v8226_v29 }
 0x255   : > { %2169 = vrot.lane.b32.xlu1 %v8216_v28, %s7124_s28  ;;  %2105 = vrot.lane.b32.xlu0 %v8304_v22, %s7126_s30 }
 0x257   : > { %2283 = vmatpush1.bf16.msra.mxu1 %v7975_v33  ;;  %v2092_v31 = vpop.permute.xlu1 %2091  ;;  %v8318_v36 = vpop.permute.xlu0 %2025  ;;  %v2183_v33 = vsel %vm869_vm0, %v8232_v37, %v2152_v30  ;;  %v8346_v37 = vld [vmem:[%s12176_s3 + $0x14] ss:$8 sps:$4 sm:$0xff]  }
 0x258   : > { %2298 = vmatprep.subr.bf16.mxu1 %v2184_v39  ;;  %v2120_v44 = vsel %vm815_vm3, %v8250_v14, %v2092_v31  ;;  %v2054_v34 = vsel %vm761_vm2, %v8257_v47, %v8318_v36  ;;  %v8375_v47 = vld [vmem:[%s12176_s3 + $0x10] ss:$8 sps:$4 sm:$0xff]  }
 0x259   : > { %2107 = vrot.lane.b32.xlu1 %v8313_v13, %s7126_s30  ;;  %2039 = vrot.lane.b32.xlu0 %v8304_v22, %s7125_s29 }
 0x25a   : > { %2321 = vmatprep.subr.bf16.mxu0 %v2120_v44 }
 0x25b   : > { %2299 = vmatpush2.bf16.msra.mxu1 %v2183_v33  ;;  %2322 = vmatpush1.bf16.msra.mxu0 %v2119_v40  ;;  %v8336_v10 = vpop.permute.xlu1 %1959  ;;  %v8341_v41 = vpop.permute.xlu0 %1893 }
 0x25c   : > { %2323 = vmatprep.subr.bf16.mxu0 %v2054_v34  ;;  %v1988_v3 = vsel %vm706_vm5, %v8268_v7, %v8336_v10  ;;  %v1922_v6 = vsel %vm655_vm4, %v8279_v54, %v8341_v41  ;;  %v1529_v7 = vadd.f32 %v8270_v60, %v7959_v5  ;;  %v1855_v54 = vsel %vm604_vm7, %v8208_v42, %v8291_v9 }
 0x25d   : > { %2041 = vrot.lane.b32.xlu1 %v8313_v13, %s7125_s29  ;;  %1973 = vrot.lane.b32.xlu0 %v8304_v22, %s7128_s14  ;;  %v1789_v42 = vsel %vm553_vm6, %v8210_v21, %v8295_v17  ;;  %v1723_v21 = vsel %vm502_vm8, %v8224_v23, %v8306_v38 }
 0x25e   : > { %2301 = vmatmul.mubr.bf16.vlgmr.msra.gmra.mxu1 %v8334_v45  ;;  %v1632_v12 = vmax.f32 %v1529_v7, 0.0 }
 0x25f   : > { %2324 = vmatpush1.bf16.msra.mxu0 %v2053_v58  ;;  %v8356_v14 = vpop.permute.xlu1 %1761  ;;  %v8361_v50 = vpop.permute.xlu0 %1827  ;;  %6822 = vmatprep.mubr.msk.bf16.mxu1 %vm2261_vm11, %v8346_v37 }
 0x260   : > { %2325 = vmatprep.subr.bf16.mxu0 %v1988_v3  ;;  %v1856_v60 = vsel %vm604_vm7, %v8291_v9, %v8361_v50  ;;  %v8412_v15 = vpack.c.bf16 %v1649_v1, %v1632_v12  ;;  %v1790_v27 = vsel %vm553_vm6, %v8295_v17, %v8356_v14 }
 0x261   : > { %1975 = vrot.lane.b32.xlu1 %v8313_v13, %s7128_s14  ;;  %1907 = vrot.lane.b32.xlu0 %v8304_v22, %s7127_s13 }
 0x263   : > { %2326 = vmatpush1.bf16.msra.mxu0 %v1987_v18  ;;  %v8378_v53 = vpop.permute.xlu1 %2095  ;;  %v2094_v57 = vpop.permute.xlu0 %2093 }
 0x264   : > { %2327 = vmatprep.subr.bf16.mxu0 %v1922_v6  ;;  %v2122_v25 = vsel %vm815_vm3, %v2094_v57, %v8378_v53  ;;  %v2121_v62 = vsel %vm815_vm3, %v2092_v31, %v2094_v57 }
 0x265   : > { %1909 = vrot.lane.b32.xlu1 %v8313_v13, %s7127_s13  ;;  %1841 = vrot.lane.b32.xlu0 %v8304_v22, %s7130_s16 }
 0x266   : > { %2311 = vmatmul.mubr.bf16.gmra.mxu1 %v8375_v47  ;;  %2374 = vmatprep.subr.bf16.mxu1 %v2122_v25 }
 0x267   : > { %2328 = vmatpush1.bf16.msra.mxu0 %v1921_v35  ;;  %2375 = vmatpush1.bf16.msra.mxu1 %v2121_v62  ;;  %v8396_v63 = vpop.permute.xlu1 %1695  ;;  %v2028_v2 = vpop.permute.xlu0 %2027 }
 0x268   : > { %v1569_v56 = vpop.f32.mrf.mxu1  ;;  %2329 = vmatprep.subr.bf16.mxu0 %v1856_v60  ;;  %6825 = vmatprep.mubr.msk.bf16.mxu1 %vm2261_vm11, %v8085_v20  ;;  %v2055_v9 = vsel %vm761_vm2, %v8318_v36, %v2028_v2  ;;  %v1724_v40 = vsel %vm502_vm8, %v8306_v38, %v8396_v63 }
 0x269   : > { %1843 = vrot.lane.b32.xlu1 %v8313_v13, %s7130_s16  ;;  %1775 = vrot.lane.b32.xlu0 %v8304_v22, %s7129_s15  ;;  %v1570_v61 = vadd.f32 %v1569_v56, %v7959_v5 }
 0x26a   : > { %v8407_v0 = vpop.f32.mrf.mxu1 }
 0x26b   : > { %2330 = vmatpush1.bf16.msra.mxu0 %v1855_v54  ;;  %v8415_v55 = vpop.permute.xlu1 %2029  ;;  %v1962_v43 = vpop.permute.xlu0 %1961  ;;  %v1633_v39 = vmax.f32 %v1570_v61, 0.0 }
 0x26c   : > { %v1573_v30 = vpop.f32.mrf.mxu1  ;;  %2331 = vmatprep.subr.bf16.mxu0 %v1790_v27  ;;  %v2056_v24 = vsel %vm761_vm2, %v2028_v2, %v8415_v55  ;;  %v1989_v17 = vsel %vm706_vm5, %v8336_v10, %v1962_v43 }
 0x26d   : > { %v1574_v31 = vadd.f32 %v1573_v30, %v7957_v16  ;;  %1777 = vrot.lane.b32.xlu1 %v8313_v13, %s7129_s15  ;;  %2109 = vrot.lane.b32.xlu0 %v8412_v15, %s7126_s30 }
 0x26e   : > { %2376 = vmatprep.subr.bf16.mxu1 %v2056_v24 }
 0x26f   : > { %v1650_v44 = vmax.f32 %v1574_v31, 0.0  ;;  %2332 = vmatpush1.bf16.msra.mxu0 %v1789_v42  ;;  %2377 = vmatpush1.bf16.msra.mxu1 %v2055_v9  ;;  %v8432_v33 = vpop.permute.xlu1 %1963  ;;  %v2156_v34 = vpop.permute.xlu0 %2155 }
 0x270   : > { %2333 = vmatprep.subr.bf16.mxu0 %v1724_v40  ;;  %v1990_v58 = vsel %vm706_vm5, %v1962_v43, %v8432_v33  ;;  %v1575_v42 = vpop.f32.mrf.mxu1 }
 0x271   : > { %v8439_v3 = vpack.c.bf16 %v1650_v44, %v1633_v39  ;;  %1709 = vrot.lane.b32.xlu0 %v8304_v22, %s7132_s17  ;;  %2378 = vmatprep.subr.bf16.mxu1 %v1990_v58  ;;  %v2221_v39 = vld [vmem:[%s12177_s4 + $0x10] sm:$0xff]  ;;  %v1576_v44 = vadd.f32 %v1575_v42, %v7957_v16 }
 0x273   : > { %2111 = vrot.lane.b32.xlu1 %v8439_v3, %s7126_s30  ;;  %2334 = vmatpush1.bf16.msra.mxu0 %v1723_v21  ;;  %v8450_v36 = vpop.permute.xlu1 %2157  ;;  %v1896_v49 = vpop.permute.xlu0 %1895 }
 0x274   : > { %2379 = vmatpush1.bf16.msra.mxu1 %v1989_v17  ;;  %2335 = vmatprep.subr.bf16.mxu0 %v8063_v19  ;;  %v2186_v38 = vsel %vm869_vm0, %v2156_v34, %v8450_v36  ;;  %v1923_v19 = vsel %vm655_vm4, %v8341_v41, %v1896_v49  ;;  %v2219_v17 = vld [vmem:[%s12177_s4] sm:$0xff] }
 0x275   : > { %2043 = vrot.lane.b32.xlu0 %v8412_v15, %s7125_s29 }
 0x277   : > { %1711 = vrot.lane.b32.xlu1 %v8313_v13, %s7132_s17  ;;  %2336 = vmatpush1.bf16.msra.mxu0 %v8000_v59  ;;  %v8458_v23 = vpop.permute.xlu1 %1897  ;;  %v1830_v10 = vpop.permute.xlu0 %1829  ;;  %v2185_v59 = vsel %vm869_vm0, %v8226_v29, %v2156_v34 }
 0x278   : > { %2351 = vmatprep.subr.bf16.mxu0 %v2186_v38  ;;  %v1924_v18 = vsel %vm655_vm4, %v1896_v49, %v8458_v23  ;;  %v1857_v41 = vsel %vm604_vm7, %v8361_v50, %v1830_v10 }
 0x279   : > { %1977 = vrot.lane.b32.xlu0 %v8412_v15, %s7128_s14  ;;  %2380 = vmatprep.subr.bf16.mxu1 %v1924_v18 }
 0x27a   : > { %v8468_v51 = vpop.f32.mrf.mxu0  ;;  %2381 = vmatpush1.bf16.msra.mxu1 %v1923_v19 }
 0x27b   : > { %2045 = vrot.lane.b32.xlu1 %v8439_v3, %s7125_s29  ;;  %2352 = vmatpush2.bf16.msra.mxu0 %v2185_v59  ;;  %v8474_v6 = vpop.permute.xlu1 %1831  ;;  %v1764_v57 = vpop.permute.xlu0 %1763 }
 0x27c   : > { %v6926_v25 = vpop.f32.mrf.mxu0  ;;  %v1858_v62 = vsel %vm604_vm7, %v1830_v10, %v8474_v6  ;;  %v1791_v50 = vsel %vm553_vm6, %v8356_v14, %v1764_v57  ;;  %v2222_v10 = vld [vmem:[%s12177_s4 + $0x18] sm:$0xff] }
 0x27d   : > { %2171 = vrot.lane.b32.xlu0 %v8304_v22, %s7124_s28  ;;  %2382 = vmatprep.subr.bf16.mxu1 %v1858_v62 }
 0x27e   : > { %2354 = vmatmul.mubr.bf16.vlgmr.msra.gmra.mxu0 %v8334_v45  ;;  %v8483_v29 = vpop.f32.mrf.mxu0  ;;  %2383 = vmatpush1.bf16.msra.mxu1 %v1857_v41 }
 0x27f   : > { %1979 = vrot.lane.b32.xlu1 %v8439_v3, %s7128_s14  ;;  %v8487_v7 = vpop.permute.xlu1 %1765  ;;  %v1698_v35 = vpop.permute.xlu0 %1697  ;;  %6824 = vmatprep.mubr.msk.bf16.mxu0 %vm2261_vm11, %v8346_v37  ;;  %v1616_v18 = vadd.f32 %v8483_v29, %v7957_v16 }
 0x280   : > { %v1792_v1 = vsel %vm553_vm6, %v1764_v57, %v8487_v7  ;;  %v6927_v60 = vpop.f32.mrf.mxu0  ;;  %v1725_v54 = vsel %vm502_vm8, %v8396_v63, %v1698_v35  ;;  %v1613_v57 = vadd.f32 %v8468_v51, %v7959_v5 }
 0x281   : > { %1911 = vrot.lane.b32.xlu0 %v8412_v15, %s7127_s13  ;;  %2384 = vmatprep.subr.bf16.mxu1 %v1792_v1  ;;  %v1652_v41 = vmax.f32 %v1616_v18, 0.0 }
 0x282   : > { %2385 = vmatpush1.bf16.msra.mxu1 %v1791_v50  ;;  %v1635_v51 = vmax.f32 %v1613_v57, 0.0 }
 0x283   : > { %2173 = vrot.lane.b32.xlu1 %v8313_v13, %s7124_s28  ;;  %v8499_v2 = vpop.permute.xlu1 %1699  ;;  %v2160_v56 = vpop.permute.xlu0 %2159 }
 0x284   : > { %v1726_v12 = vsel %vm502_vm8, %v1698_v35, %v8499_v2  ;;  %v8597_v60 = vpack.c.bf16 %v1652_v41, %v1635_v51 }
 0x285   : > { %1845 = vrot.lane.b32.xlu0 %v8412_v15, %s7130_s16  ;;  %2386 = vmatprep.subr.bf16.mxu1 %v1726_v12 }
 0x286   : > { %2364 = vmatmul.mubr.bf16.gmra.mxu0 %v8375_v47  ;;  %2387 = vmatpush1.bf16.msra.mxu1 %v1725_v54 }
 0x287   : > { %1913 = vrot.lane.b32.xlu1 %v8439_v3, %s7127_s13  ;;  %v8510_v14 = vpop.permute.xlu1 %2161  ;;  %2388 = vmatprep.subr.bf16.mxu1 %v8118_v46  ;;  %v2098_v61 = vpop.permute.xlu0 %2097 }
 0x288   : > { %6827 = vmatprep.mubr.msk.bf16.mxu0 %vm2261_vm11, %v8085_v20  ;;  %v2188_v63 = vsel %vm869_vm0, %v2160_v56, %v8510_v14  ;;  %v2123_v30 = vsel %vm815_vm3, %v8378_v53, %v2098_v61 }
 0x289   : > { %1779 = vrot.lane.b32.xlu0 %v8412_v15, %s7129_s15 }
 0x28a   : > { %2389 = vmatpush1.bf16.msra.mxu1 %v8100_v32  ;;  %v2187_v32 = vsel %vm869_vm0, %v8450_v36, %v2160_v56  ;;  %v1651_v36 = vmax.f32 %v1576_v44, 0.0 }
 0x28b   : > { %1847 = vrot.lane.b32.xlu1 %v8439_v3, %s7130_s16  ;;  %v8522_v27 = vpop.permute.xlu1 %2099  ;;  %2404 = vmatprep.subr.bf16.mxu1 %v2188_v63  ;;  %v2032_v43 = vpop.permute.xlu0 %2031 }
 0x28c   : > { %v2124_v46 = vsel %vm815_vm3, %v2098_v61, %v8522_v27  ;;  %v2057_v53 = vsel %vm761_vm2, %v8415_v55, %v2032_v43  ;;  %v1572_v55 = vadd.f32 %v8407_v0, %v7959_v5 }
 0x28d   : > { %1713 = vrot.lane.b32.xlu0 %v8412_v15, %s7132_s17  ;;  %2427 = vmatprep.subr.bf16.mxu0 %v2124_v46 }
 0x28e   : > { %2405 = vmatpush2.bf16.msra.mxu1 %v2187_v32  ;;  %2428 = vmatpush1.bf16.msra.mxu0 %v2123_v30 }
 0x28f   : > { %1781 = vrot.lane.b32.xlu1 %v8439_v3, %s7129_s15  ;;  %v8534_v24 = vpop.permute.xlu1 %2033  ;;  %v1966_v31 = vpop.permute.xlu0 %1965 }
 0x290   : > { %v2058_v9 = vsel %vm761_vm2, %v2032_v43, %v8534_v24  ;;  %v1991_v21 = vsel %vm706_vm5, %v8432_v33, %v1966_v31  ;;  %v1634_v33 = vmax.f32 %v1572_v55, 0.0 }
 0x291   : > { %2175 = vrot.lane.b32.xlu0 %v8412_v15, %s7124_s28  ;;  %2407 = vmatmul.mubr.bf16.vlgmr.msra.gmra.mxu1 %v8334_v45 }
 0x292   : > { %2429 = vmatprep.subr.bf16.mxu0 %v2058_v9  ;;  %6826 = vmatprep.mubr.msk.bf16.mxu1 %vm2261_vm11, %v8346_v37  ;;  %v8578_v59 = vpack.c.bf16 %v1651_v36, %v1634_v33 }
 0x293   : > { %1715 = vrot.lane.b32.xlu1 %v8439_v3, %s7132_s17  ;;  %2430 = vmatpush1.bf16.msra.mxu0 %v2057_v53  ;;  %v8551_v40 = vpop.permute.xlu1 %1967  ;;  %v1900_v34 = vpop.permute.xlu0 %1899 }
 0x294   : > { %v1992_v58 = vsel %vm706_vm5, %v1966_v31, %v8551_v40  ;;  %v1925_v19 = vsel %vm655_vm4, %v8458_v23, %v1900_v34  ;;  %v2220_v23 = vld [vmem:[%s12177_s4 + $0x8] sm:$0xff] }
 0x295   : > { %2235 = vperm.xlu0 %6978, %v2221_v39   ;;  %2431 = vmatprep.subr.bf16.mxu0 %v1992_v58 }
 0x297   : > { %2177 = vrot.lane.b32.xlu1 %v8439_v3, %s7124_s28  ;;  %2432 = vmatpush1.bf16.msra.mxu0 %v1991_v21  ;;  %v8564_v49 = vpop.permute.xlu1 %1901  ;;  %v1834_v38 = vpop.permute.xlu0 %1833 }
 0x298   : > { %v1926_v0 = vsel %vm655_vm4, %v1900_v34, %v8564_v49  ;;  %v1859_v5 = vsel %vm604_vm7, %v8474_v6, %v1834_v38 }
 0x299   : > { %2225 = vperm.xlu0 %6978, %v2219_v17   ;;  %2417 = vmatmul.mubr.bf16.gmra.mxu1 %v8375_v47 }
 0x29a   : > { %2433 = vmatprep.subr.bf16.mxu0 %v1926_v0  ;;  %6829 = vmatprep.mubr.msk.bf16.mxu1 %vm2261_vm11, %v8085_v20 }
 0x29b   : > { %2240 = vperm.xlu1 %6979, %v2222_v10   ;;  %2434 = vmatpush1.bf16.msra.mxu0 %v1925_v19  ;;  %v8582_v25 = vpop.permute.xlu1 %1835  ;;  %v1768_v16 = vpop.permute.xlu0 %1767 }
 0x29c   : > { %v1860_v62 = vsel %vm604_vm7, %v1834_v38, %v8582_v25  ;;  %v1793_v50 = vsel %vm553_vm6, %v8487_v7, %v1768_v16 }
 0x29d   : > { %2113 = vrot.lane.b32.xlu0 %v8578_v59, %s7126_s30  ;;  %2435 = vmatprep.subr.bf16.mxu0 %v1860_v62 }
 0x29f   : > { %2230 = vperm.xlu1 %6979, %v2220_v23   ;;  %2436 = vmatpush1.bf16.msra.mxu0 %v1859_v5  ;;  %v8593_v29 = vpop.permute.xlu1 %1769  ;;  %v2102_v35 = vpop.permute.xlu0 %2101 }
 0x2a0   : > { %v1794_v1 = vsel %vm553_vm6, %v1768_v16, %v8593_v29  ;;  %v2125_v54 = vsel %vm815_vm3, %v8522_v27, %v2102_v35 }
 0x2a1   : > { %2047 = vrot.lane.b32.xlu0 %v8578_v59, %s7125_s29  ;;  %2437 = vmatprep.subr.bf16.mxu0 %v1794_v1 }
 0x2a3   : > { %2115 = vrot.lane.b32.xlu1 %v8597_v60, %s7126_s30  ;;  %2438 = vmatpush1.bf16.msra.mxu0 %v1793_v50  ;;  %v8605_v6 = vpop.permute.xlu1 %2103  ;;  %v1702_v56 = vpop.permute.xlu0 %1701 }
 0x2a4   : > { %v2126_v12 = vsel %vm815_vm3, %v2102_v35, %v8605_v6  ;;  %v1727_v43 = vsel %vm502_vm8, %v8499_v2, %v1702_v56 }
 0x2a5   : > { %1981 = vrot.lane.b32.xlu0 %v8578_v59, %s7128_s14  ;;  %2480 = vmatprep.subr.bf16.mxu1 %v2126_v12 }
 0x2a6   : > { %2481 = vmatpush1.bf16.msra.mxu1 %v2125_v54 }
 0x2a7   : > { %2049 = vrot.lane.b32.xlu1 %v8597_v60, %s7125_s29  ;;  %v8615_v7 = vpop.permute.xlu1 %1703  ;;  %v2036_v61 = vpop.permute.xlu0 %2035 }
 0x2a8   : > { %v1728_v63 = vsel %vm502_vm8, %v1702_v56, %v8615_v7  ;;  %v2059_v30 = vsel %vm761_vm2, %v8534_v24, %v2036_v61 }
 0x2a9   : > { %1915 = vrot.lane.b32.xlu0 %v8578_v59, %s7127_s13  ;;  %2439 = vmatprep.subr.bf16.mxu0 %v1728_v63 }
 0x2aa   : > { %2440 = vmatpush1.bf16.msra.mxu0 %v1727_v43 }
 0x2ab   : > { %1983 = vrot.lane.b32.xlu1 %v8597_v60, %s7128_s14  ;;  %v8625_v27 = vpop.permute.xlu1 %2037  ;;  %2441 = vmatprep.subr.bf16.mxu0 %v8162_v52  ;;  %v1970_v46 = vpop.permute.xlu0 %1969 }
 0x2ac   : > { %v2060_v32 = vsel %vm761_vm2, %v2036_v61, %v8625_v27  ;;  %v1993_v42 = vsel %vm706_vm5, %v8551_v40, %v1970_v46  ;;  %v8713_v61 = vld [vmem:[%s12176_s3 + $0x4] ss:$8 sps:$4 sm:$0xff]  }
 0x2ad   : > { %1849 = vrot.lane.b32.xlu0 %v8578_v59, %s7130_s16  ;;  %2482 = vmatprep.subr.bf16.mxu1 %v2060_v32 }
 0x2ae   : > { %2442 = vmatpush1.bf16.msra.mxu0 %v8120_v4  ;;  %2483 = vmatpush1.bf16.msra.mxu1 %v2059_v30 }
 0x2af   : > { %1917 = vrot.lane.b32.xlu1 %v8597_v60, %s7127_s13  ;;  %v8637_v2 = vpop.permute.xlu1 %1971  ;;  %v2164_v52 = vpop.permute.xlu0 %2163 }
 0x2b0   : > { %v1994_v31 = vsel %vm706_vm5, %v1970_v46, %v8637_v2  ;;  %v2189_v53 = vsel %vm869_vm0, %v8510_v14, %v2164_v52 }
 0x2b1   : > { %1783 = vrot.lane.b32.xlu0 %v8578_v59, %s7129_s15  ;;  %2484 = vmatprep.subr.bf16.mxu1 %v1994_v31 }
 0x2b2   : > { %2485 = vmatpush1.bf16.msra.mxu1 %v1993_v42 }
 0x2b3   : > { %1851 = vrot.lane.b32.xlu1 %v8597_v60, %s7130_s16  ;;  %v2166_v4 = vpop.permute.xlu1 %2165  ;;  %v1904_v24 = vpop.permute.xlu0 %1903 }
 0x2b4   : > { %v2190_v9 = vsel %vm869_vm0, %v2164_v52, %v2166_v4  ;;  %v1927_v34 = vsel %vm655_vm4, %v8564_v49, %v1904_v24 }
 0x2b5   : > { %1717 = vrot.lane.b32.xlu0 %v8578_v59, %s7132_s17  ;;  %2457 = vmatprep.subr.bf16.mxu0 %v2190_v9 }
 0x2b6   : > { %2458 = vmatpush2.bf16.msra.mxu0 %v2189_v53 }
 0x2b7   : > { %1785 = vrot.lane.b32.xlu1 %v8597_v60, %s7129_s15  ;;  %v8654_v39 = vpop.permute.xlu1 %1905  ;;  %v1838_v44 = vpop.permute.xlu0 %1837 }
 0x2b8   : > { %v1928_v40 = vsel %vm655_vm4, %v1904_v24, %v8654_v39  ;;  %v1861_v21 = vsel %vm604_vm7, %v8582_v25, %v1838_v44 }
 0x2b9   : > { %2179 = vrot.lane.b32.xlu0 %v8578_v59, %s7124_s28  ;;  %2460 = vmatmul.mubr.bf16.vlgmr.msra.gmra.mxu0 %v8334_v45 }
 0x2ba   : > { %2486 = vmatprep.subr.bf16.mxu1 %v1928_v40  ;;  %6828 = vmatprep.mubr.msk.bf16.mxu0 %vm2261_vm11, %v8346_v37 }
 0x2bb   : > { %1719 = vrot.lane.b32.xlu1 %v8597_v60, %s7132_s17  ;;  %2487 = vmatpush1.bf16.msra.mxu1 %v1927_v34  ;;  %v8667_v14 = vpop.permute.xlu1 %1839  ;;  %v1772_v58 = vpop.permute.xlu0 %1771 }
 0x2bc   : > { %v1862_v55 = vsel %vm604_vm7, %v1838_v44, %v8667_v14  ;;  %v1795_v38 = vsel %vm553_vm6, %v8593_v29, %v1772_v58 }
 0x2bd   : > { %2488 = vmatprep.subr.bf16.mxu1 %v1862_v55 }
 0x2bf   : > { %2181 = vrot.lane.b32.xlu1 %v8597_v60, %s7124_s28  ;;  %2489 = vmatpush1.bf16.msra.mxu1 %v1861_v21  ;;  %v1774_v17 = vpop.permute.xlu1 %1773  ;;  %v1706_v36 = vpop.permute.xlu0 %1705 }
 0x2c0   : > { %v1796_v49 = vsel %vm553_vm6, %v1772_v58, %v1774_v17  ;;  %v1729_v18 = vsel %vm502_vm8, %v8615_v7, %v1706_v36 }
 0x2c1   : > { %2470 = vmatmul.mubr.bf16.gmra.mxu0 %v8375_v47  ;;  %2490 = vmatprep.subr.bf16.mxu1 %v1796_v49 }
 0x2c2   : > { %6831 = vmatprep.mubr.msk.bf16.mxu0 %vm2261_vm11, %v8085_v20 }
 0x2c3   : > { %2491 = vmatpush1.bf16.msra.mxu1 %v1795_v38  ;;  %v8681_v0 = vpop.permute.xlu1 %1707  ;;  %v2168_v10 = vpop.permute.xlu0 %2167 }
 0x2c4   : > { %v1730_v33 = vsel %vm502_vm8, %v1706_v36, %v8681_v0  ;;  %v2191_v41 = vsel %vm869_vm0, %v2166_v4, %v2168_v10 }
 0x2c5   : > { %2492 = vmatprep.subr.bf16.mxu1 %v1730_v33 }
 0x2c7   : > { %2493 = vmatpush1.bf16.msra.mxu1 %v1729_v18  ;;  %v8687_v19 = vpop.permute.xlu1 %2169  ;;  %v2106_v57 = vpop.permute.xlu0 %2105 }
 0x2c8   : > { %2494 = vmatprep.subr.bf16.mxu1 %v8206_v26  ;;  %v2192_v25 = vsel %vm869_vm0, %v2168_v10, %v8687_v19  ;;  %v2127_v23 = vsel %vm815_vm3, %v8605_v6, %v2106_v57 }
 0x2cb   : > { %2495 = vmatpush1.bf16.msra.mxu1 %v8168_v48  ;;  %v2108_v20 = vpop.permute.xlu1 %2107  ;;  %v2040_v16 = vpop.permute.xlu0 %2039 }
 0x2cc   : > { %2510 = vmatprep.subr.bf16.mxu1 %v2192_v25  ;;  %v2128_v62 = vsel %vm815_vm3, %v2106_v57, %v2108_v20  ;;  %v2061_v51 = vsel %vm761_vm2, %v8625_v27, %v2040_v16 }
 0x2cd   : > { %2533 = vmatprep.subr.bf16.mxu0 %v2128_v62 }
 0x2ce   : > { %2534 = vmatpush1.bf16.msra.mxu0 %v2127_v23 }
 0x2cf   : > { %2511 = vmatpush2.bf16.msra.mxu1 %v2191_v41  ;;  %v2042_v5 = vpop.permute.xlu1 %2041  ;;  %v1974_v26 = vpop.permute.xlu0 %1973 }
 0x2d0   : > { %v2062_v48 = vsel %vm761_vm2, %v2040_v16, %v2042_v5  ;;  %v1995_v60 = vsel %vm706_vm5, %v8637_v2, %v1974_v26 }
 0x2d1   : > { %2535 = vmatprep.subr.bf16.mxu0 %v2062_v48 }
 0x2d2   : > { %2513 = vmatmul.mubr.bf16.vlgmr.msra.gmra.mxu1 %v8334_v45  ;;  %2536 = vmatpush1.bf16.msra.mxu0 %v2061_v51 }
 0x2d3   : > { %v1976_v29 = vpop.permute.xlu1 %1975  ;;  %v1908_v35 = vpop.permute.xlu0 %1907  ;;  %6830 = vmatprep.mubr.msk.bf16.mxu1 %vm2261_vm11, %v8346_v37 }
 0x2d4   : > { %v1996_v1 = vsel %vm706_vm5, %v1974_v26, %v1976_v29  ;;  %v1929_v12 = vsel %vm655_vm4, %v8654_v39, %v1908_v35 }
 0x2d5   : > { %2537 = vmatprep.subr.bf16.mxu0 %v1996_v1 }
 0x2d6   : > { %2538 = vmatpush1.bf16.msra.mxu0 %v1995_v60 }
 0x2d7   : > { %v1910_v50 = vpop.permute.xlu1 %1909  ;;  %v1842_v6 = vpop.permute.xlu0 %1841 }
 0x2d8   : > { %v1930_v56 = vsel %vm655_vm4, %v1908_v35, %v1910_v50  ;;  %v1863_v43 = vsel %vm604_vm7, %v8667_v14, %v1842_v6 }
 0x2d9   : > { %2539 = vmatprep.subr.bf16.mxu0 %v1930_v56 }
 0x2da   : > { %2523 = vmatmul.mubr.bf16.gmra.mxu1 %v8375_v47  ;;  %2540 = vmatpush1.bf16.msra.mxu0 %v1929_v12 }
 0x2db   : > { %v1844_v54 = vpop.permute.xlu1 %1843  ;;  %v1776_v7 = vpop.permute.xlu0 %1775  ;;  %6833 = vmatprep.mubr.msk.bf16.mxu1 %vm2261_vm11, %v8713_v61 }
 0x2dc   : > { %v1864_v63 = vsel %vm604_vm7, %v1842_v6, %v1844_v54  ;;  %v1797_v30 = vsel %vm553_vm6, %v1774_v17, %v1776_v7 }
 0x2dd   : > { %2541 = vmatprep.subr.bf16.mxu0 %v1864_v63 }
 0x2de   : > { %2542 = vmatpush1.bf16.msra.mxu0 %v1863_v43 }
 0x2df   : > { %v1778_v27 = vpop.permute.xlu1 %1777  ;;  %v2110_v46 = vpop.permute.xlu0 %2109 }
 0x2e0   : > { %v1798_v32 = vsel %vm553_vm6, %v1776_v7, %v1778_v27  ;;  %v2129_v42 = vsel %vm815_vm3, %v2108_v20, %v2110_v46 }
 0x2e1   : > { %2543 = vmatprep.subr.bf16.mxu0 %v1798_v32 }
 0x2e2   : > { %2544 = vmatpush1.bf16.msra.mxu0 %v1797_v30 }
 0x2e3   : > { %v1710_v2 = vpop.permute.xlu0 %1709 }
 0x2e4   : > { %v1731_v53 = vsel %vm502_vm8, %v8681_v0, %v1710_v2 }
 0x2e5   : > { %v8722_v52 = vpop.permute.xlu1 %2111 }
 0x2e6   : > { %v2130_v31 = vsel %vm815_vm3, %v2110_v46, %v8722_v52 }
 0x2e7   : > { %2586 = vmatprep.subr.bf16.mxu1 %v2130_v31  ;;  %v2044_v4 = vpop.permute.xlu0 %2043 }
 0x2e8   : > { %2587 = vmatpush1.bf16.msra.mxu1 %v2129_v42  ;;  %v2063_v34 = vsel %vm761_vm2, %v2042_v5, %v2044_v4 }
 0x2e9   : > { %v1712_v24 = vpop.permute.xlu1 %1711 }
 0x2ea   : > { %v1732_v9 = vsel %vm502_vm8, %v1710_v2, %v1712_v24 }
 0x2eb   : > { %2545 = vmatprep.subr.bf16.mxu0 %v1732_v9  ;;  %v1978_v39 = vpop.permute.xlu0 %1977 }
 0x2ec   : > { %2546 = vmatpush1.bf16.msra.mxu0 %v1731_v53  ;;  %v1997_v21 = vsel %vm706_vm5, %v1976_v29, %v1978_v39 }
 0x2ed   : > { %v8730_v44 = vpop.permute.xlu1 %2045  ;;  %2547 = vmatprep.subr.bf16.mxu0 %v8304_v22 }
 0x2ee   : > { %v2064_v40 = vsel %vm761_vm2, %v2044_v4, %v8730_v44 }
 0x2ef   : > { %2588 = vmatprep.subr.bf16.mxu1 %v2064_v40  ;;  %v2172_v14 = vpop.permute.xlu0 %2171 }
 0x2f0   : > { %2548 = vmatpush1.bf16.msra.mxu0 %v8216_v28  ;;  %2589 = vmatpush1.bf16.msra.mxu1 %v2063_v34  ;;  %v2193_v49 = vsel %vm869_vm0, %v8687_v19, %v2172_v14 }
 0x2f1   : > { %v8737_v58 = vpop.permute.xlu1 %1979 }
 0x2f2   : > { %v1998_v55 = vsel %vm706_vm5, %v1978_v39, %v8737_v58 }
 0x2f3   : > { %2590 = vmatprep.subr.bf16.mxu1 %v1998_v55  ;;  %v1912_v17 = vpop.permute.xlu0 %1911 }
 0x2f4   : > { %2591 = vmatpush1.bf16.msra.mxu1 %v1997_v21  ;;  %v1931_v10 = vsel %vm655_vm4, %v1910_v50, %v1912_v17 }
 0x2f5   : > { %v2174_v22 = vpop.permute.xlu1 %2173 }
 0x2f6   : > { %v2194_v36 = vsel %vm869_vm0, %v2172_v14, %v2174_v22 }
 0x2f7   : > { %2563 = vmatprep.subr.bf16.mxu0 %v2194_v36  ;;  %v1846_v28 = vpop.permute.xlu0 %1845 }
 0x2f8   : > { %2564 = vmatpush2.bf16.msra.mxu0 %v2193_v49  ;;  %v1865_v57 = vsel %vm604_vm7, %v1844_v54, %v1846_v28 }
 0x2f9   : > { %v8745_v38 = vpop.permute.xlu1 %1913 }
 0x2fa   : > { %v1932_v0 = vsel %vm655_vm4, %v1912_v17, %v8745_v38 }
 0x2fb   : > { %2566 = vmatmul.mubr.bf16.vlgmr.msra.gmra.mxu0 %v8334_v45  ;;  %2592 = vmatprep.subr.bf16.mxu1 %v1932_v0  ;;  %v1780_v18 = vpop.permute.xlu0 %1779 }
 0x2fc   : > { %2593 = vmatpush1.bf16.msra.mxu1 %v1931_v10  ;;  %6832 = vmatprep.mubr.msk.bf16.mxu0 %vm2261_vm11, %v8346_v37  ;;  %v1799_v16 = vsel %vm553_vm6, %v1778_v27, %v1780_v18 }
 0x2fd   : > { %v8753_v33 = vpop.permute.xlu1 %1847 }
 0x2fe   : > { %v1866_v19 = vsel %vm604_vm7, %v1846_v28, %v8753_v33 }
 0x2ff   : > { %2594 = vmatprep.subr.bf16.mxu1 %v1866_v19  ;;  %v1714_v62 = vpop.permute.xlu0 %1713 }
 0x300   : > { %2595 = vmatpush1.bf16.msra.mxu1 %v1865_v57  ;;  %v1733_v5 = vsel %vm502_vm8, %v1712_v24, %v1714_v62 }
 0x301   : > { %v8758_v20 = vpop.permute.xlu1 %1781 }
 0x302   : > { %v1800_v25 = vsel %vm553_vm6, %v1780_v18, %v8758_v20 }
 0x303   : > { %2576 = vmatmul.mubr.bf16.gmra.mxu0 %v8375_v47  ;;  %2596 = vmatprep.subr.bf16.mxu1 %v1800_v25  ;;  %v2176_v48 = vpop.permute.xlu0 %2175 }
 0x304   : > { %2597 = vmatpush1.bf16.msra.mxu1 %v1799_v16  ;;  %6835 = vmatprep.mubr.msk.bf16.mxu0 %vm2261_vm11, %v8713_v61  ;;  %v2195_v29 = vsel %vm869_vm0, %v2174_v22, %v2176_v48 }
 0x305   : > { %v8766_v23 = vpop.permute.xlu1 %1715 }
 0x306   : > { %v1734_v41 = vsel %vm502_vm8, %v1714_v62, %v8766_v23 }
 0x307   : > { %2598 = vmatprep.subr.bf16.mxu1 %v1734_v41 }
 0x308   : > { %2599 = vmatpush1.bf16.msra.mxu1 %v1733_v5 }
 0x309   : > { %v8771_v26 = vpop.permute.xlu1 %2177  ;;  %2600 = vmatprep.subr.bf16.mxu1 %v8412_v15 }
 0x30a   : > { %v2196_v51 = vsel %vm869_vm0, %v2176_v48, %v8771_v26 }
 0x30c   : > { %2601 = vmatpush1.bf16.msra.mxu1 %v8313_v13 }
 0x30d   : > { %2616 = vmatprep.subr.bf16.mxu1 %v2196_v51 }
 0x310   : > { %2617 = vmatpush2.bf16.msra.mxu1 %v2195_v29  ;;  %v8778_v35 = vpop.permute.xlu0 %2235 }
 0x313   : > { %2619 = vmatmul.mubr.bf16.vlgmr.msra.gmra.mxu1 %v8334_v45 }
 0x314   : > { %v8781_v1 = vpop.permute.xlu0 %2225  ;;  %6834 = vmatprep.mubr.msk.bf16.mxu1 %vm2261_vm11, %v8346_v37 }
 0x316   : > { %v8785_v15 = vpop.permute.xlu1 %2240 }
 0x318   : > { %v2114_v60 = vpop.permute.xlu0 %2113 }
 0x319   : > { %v2131_v7 = vsel %vm815_vm3, %v8722_v52, %v2114_v60 }
 0x31a   : > { %v8787_v13 = vpop.permute.xlu1 %2230 }
 0x31b   : > { %12249 = vst [vmem:[#allocation2_spill] sm:$0xff] %v8787_v13  ;;  %2629 = vmatmul.mubr.bf16.gmra.mxu1 %v8375_v47 }
 0x31c   : > { %v2048_v50 = vpop.permute.xlu0 %2047 }
 0x31d   : > { %v2065_v2 = vsel %vm761_vm2, %v8730_v44, %v2048_v50 }
 0x31e   : > { %v2116_v6 = vpop.permute.xlu1 %2115  ;;  %v2302_v56 = vpop.f32.mrf.mxu1 }
 0x31f   : > { %v2132_v12 = vsel %vm815_vm3, %v2114_v60, %v2116_v6  ;;  %v2303_v63 = vadd.f32 %v2302_v56, %v8781_v1 }
 0x320   : > { %v2304_v54 = vpop.f32.mrf.mxu1  ;;  %2639 = vmatprep.subr.bf16.mxu0 %v2132_v12  ;;  %v1982_v61 = vpop.permute.xlu0 %1981 }
 0x321   : > { %2640 = vmatpush1.bf16.msra.mxu0 %v2131_v7  ;;  %v2692_v42 = vmax.f32 %v2303_v63, 0.0  ;;  %v2305_v4 = vadd.f32 %v2304_v54, %v8781_v1  ;;  %v1999_v21 = vsel %vm706_vm5, %v8737_v58, %v1982_v61 }
 0x322   : > { %v2050_v43 = vpop.permute.xlu1 %2049  ;;  %v2306_v27 = vpop.f32.mrf.mxu1 }
 0x323   : > { %v2307_v46 = vadd.f32 %v2306_v27, %v8787_v13  ;;  %v2066_v32 = vsel %vm761_vm2, %v2048_v50, %v2050_v43  ;;  %v2693_v55 = vmax.f32 %v2305_v4, 0.0 }
 0x324   : > { %v2308_v30 = vpop.f32.mrf.mxu1  ;;  %2641 = vmatprep.subr.bf16.mxu0 %v2066_v32  ;;  %v1916_v31 = vpop.permute.xlu0 %1915 }
 0x325   : > { %v2708_v52 = vmax.f32 %v2307_v46, 0.0  ;;  %v2309_v24 = vadd.f32 %v2308_v30, %v8787_v13  ;;  %2642 = vmatpush1.bf16.msra.mxu0 %v2065_v2  ;;  %v1933_v58 = vsel %vm655_vm4, %v8745_v38, %v1916_v31 }
 0x326   : > { %v1984_v9 = vpop.permute.xlu1 %1983  ;;  %v2312_v53 = vpop.f32.mrf.mxu1 }
 0x327   : > { %v8800_v39 = vpack.c.bf16 %v2708_v52, %v2692_v42  ;;  %v2709_v40 = vmax.f32 %v2309_v24, 0.0  ;;  %v2000_v34 = vsel %vm706_vm5, %v1982_v61, %v1984_v9  ;;  %v2313_v44 = vadd.f32 %v2312_v53, %v8778_v35 }
 0x328   : > { %v2314_v14 = vpop.f32.mrf.mxu1  ;;  %2643 = vmatprep.subr.bf16.mxu0 %v2000_v34  ;;  %v1850_v17 = vpop.permute.xlu0 %1849 }
 0x329   : > { %3702 = vrot.lane.b32.xlu0 %v8800_v39, %s7124_s28  ;;  %3072 = vrot.lane.b32.xlu1 %v8800_v39, %s7130_s16  ;;  %v8810_v49 = vpack.c.bf16 %v2709_v40, %v2693_v55  ;;  %v2724_v10 = vmax.f32 %v2313_v44, 0.0  ;;  %v1867_v62 = vsel %vm604_vm7, %v8753_v33, %v1850_v17  ;;  %v2315_v56 = vadd.f32 %v2314_v14, %v8778_v35 }
 0x32a   : > { %2644 = vmatpush1.bf16.msra.mxu0 %v1999_v21  ;;  %v1918_v22 = vpop.permute.xlu1 %1917  ;;  %v2316_v36 = vpop.f32.mrf.mxu1 }
 0x32b   : > { %v2317_v28 = vadd.f32 %v2316_v36, %v8785_v15  ;;  %v1934_v0 = vsel %vm655_vm4, %v1916_v31, %v1918_v22  ;;  %v2725_v12 = vmax.f32 %v2315_v56, 0.0 }
 0x32c   : > { %2645 = vmatprep.subr.bf16.mxu0 %v1934_v0  ;;  %v1784_v16 = vpop.permute.xlu0 %1783  ;;  %v2318_v6 = vpop.f32.mrf.mxu1 }
 0x32d   : > { %v2740_v18 = vmax.f32 %v2317_v28, 0.0  ;;  %3704 = vrot.lane.b32.xlu0 %v8810_v49, %s7124_s28  ;;  %2946 = vrot.lane.b32.xlu1 %v8800_v39, %s7129_s15  ;;  %v1801_v5 = vsel %vm553_vm6, %v8758_v20, %v1784_v16 }
 0x32e   : > { %2646 = vmatpush1.bf16.msra.mxu0 %v1933_v58  ;;  %v1852_v19 = vpop.permute.xlu1 %1851 }
 0x32f   : > { %v8820_v57 = vpack.c.bf16 %v2740_v18, %v2724_v10  ;;  %v1868_v25 = vsel %vm604_vm7, %v1850_v17, %v1852_v19 }
 0x330   : > { %2647 = vmatprep.subr.bf16.mxu0 %v1868_v25  ;;  %v1718_v48 = vpop.permute.xlu0 %1717 }
 0x331   : > { %3104 = vrot.lane.b32.xlu0 %v8820_v57, %s7130_s16  ;;  %2820 = vrot.lane.b32.xlu1 %v8800_v39, %s7132_s17  ;;  %v1735_v33 = vsel %vm502_vm8, %v8766_v23, %v1718_v48  ;;  %v2319_v23 = vadd.f32 %v2318_v6, %v8785_v15 }
 0x332   : > { %2648 = vmatpush1.bf16.msra.mxu0 %v1867_v62  ;;  %v1786_v41 = vpop.permute.xlu1 %1785 }
 0x333   : > { %v1802_v38 = vsel %vm553_vm6, %v1784_v16, %v1786_v41 }
 0x334   : > { %2649 = vmatprep.subr.bf16.mxu0 %v1802_v38  ;;  %v2180_v20 = vpop.permute.xlu0 %2179 }
 0x335   : > { %2978 = vrot.lane.b32.xlu0 %v8820_v57, %s7129_s15  ;;  %3576 = vrot.lane.b32.xlu1 %v8800_v39, %s7126_s30 }
 0x336   : > { %2650 = vmatpush1.bf16.msra.mxu0 %v1801_v5  ;;  %v1720_v51 = vpop.permute.xlu1 %1719 }
 0x337   : > { %v1736_v29 = vsel %vm502_vm8, %v1718_v48, %v1720_v51 }
 0x338   : > { %2651 = vmatprep.subr.bf16.mxu0 %v1736_v29 }
 0x339   : > { %3734 = vrot.lane.b32.xlu0 %v8820_v57, %s7124_s28  ;;  %3450 = vrot.lane.b32.xlu1 %v8800_v39, %s7125_s29 }
 0x33a   : > { %2652 = vmatpush1.bf16.msra.mxu0 %v1735_v33  ;;  %v2182_v60 = vpop.permute.xlu1 %2181 }
 0x33b   : > { %2653 = vmatprep.subr.bf16.mxu0 %v8578_v59  ;;  %v2198_v50 = vsel %vm869_vm0, %v2180_v20, %v2182_v60  ;;  %v2197_v59 = vsel %vm869_vm0, %v8771_v26, %v2180_v20 }
 0x33d   : > { %3608 = vrot.lane.b32.xlu0 %v8820_v57, %s7126_s30  ;;  %3324 = vrot.lane.b32.xlu1 %v8800_v39, %s7128_s14 }
 0x33e   : > { %2654 = vmatpush1.bf16.msra.mxu0 %v8439_v3  ;;  %v2741_v3 = vmax.f32 %v2319_v23, 0.0 }
 0x33f   : > { %2669 = vmatprep.subr.bf16.mxu0 %v2198_v50 }
 0x340   : > { %v8869_v26 = vpack.c.bf16 %v2741_v3, %v2725_v12 }
 0x341   : > { %3482 = vrot.lane.b32.xlu0 %v8820_v57, %s7125_s29  ;;  %3198 = vrot.lane.b32.xlu1 %v8800_v39, %s7127_s13 }
 0x342   : > { %2670 = vmatpush2.bf16.msra.mxu0 %v2197_v59 }
 0x345   : > { %2672 = vmatmul.mubr.bf16.vlgmr.msra.gmra.mxu0 %v8334_v45  ;;  %3356 = vrot.lane.b32.xlu0 %v8820_v57, %s7128_s14  ;;  %v2355_v45 = vpop.f32.mrf.mxu0 }
 0x346   : > { %3074 = vrot.lane.b32.xlu1 %v8810_v49, %s7130_s16  ;;  %6836 = vmatprep.mubr.msk.bf16.mxu0 %vm2261_vm11, %v8346_v37  ;;  %v2356_v7 = vadd.f32 %v2355_v45, %v8781_v1 }
 0x347   : > { %v2357_v37 = vpop.f32.mrf.mxu0 }
 0x348   : > { %v2694_v27 = vmax.f32 %v2356_v7, 0.0  ;;  %v2358_v32 = vadd.f32 %v2357_v37, %v8781_v1 }
 0x349   : > { %3230 = vrot.lane.b32.xlu0 %v8820_v57, %s7127_s13 }
 0x34a   : > { %2948 = vrot.lane.b32.xlu1 %v8810_v49, %s7129_s15  ;;  %v2695_v42 = vmax.f32 %v2358_v32, 0.0  ;;  %v9054_v32 = vld [vmem:[%s12178_s5 + $0x4] ss:$12 sps:$4 sm:$0xff]  }
 0x34b   : > { %12257 = vst [vmem:[#allocation10_spill] sm:$0xff] %v9054_v32  ;;  %3963 = vmatprep.mubr.bf16.mxu1 %v9054_v32 }
 0x34d   : > { %2682 = vmatmul.mubr.bf16.gmra.mxu0 %v8375_v47  ;;  %3106 = vrot.lane.b32.xlu0 %v8869_v26, %s7130_s16  ;;  %v2359_v47 = vpop.f32.mrf.mxu0 }
 0x34e   : > { %2822 = vrot.lane.b32.xlu1 %v8810_v49, %s7132_s17  ;;  %4026 = vmatprep.mubr.bf16.mxu0 %v12188_v8  ;;  %v2360_v54 = vadd.f32 %v2359_v47, %v8787_v13 }
 0x34f   : > { %v2361_v61 = vpop.f32.mrf.mxu0 }
 0x350   : > { %v2710_v63 = vmax.f32 %v2360_v54, 0.0  ;;  %v2362_v43 = vadd.f32 %v2361_v61, %v8787_v13 }
 0x351   : > { %2980 = vrot.lane.b32.xlu0 %v8869_v26, %s7129_s15  ;;  %v2365_v46 = vpop.f32.mrf.mxu0  ;;  %v2408_v14 = vpop.f32.mrf.mxu1 }
 0x352   : > { %3578 = vrot.lane.b32.xlu1 %v8810_v49, %s7126_s30  ;;  %v8905_v30 = vpack.c.bf16 %v2710_v63, %v2694_v27  ;;  %v2711_v2 = vmax.f32 %v2362_v43, 0.0  ;;  %v2366_v9 = vadd.f32 %v2365_v46, %v8778_v35  ;;  %v2409_v17 = vadd.f32 %v2408_v14, %v8781_v1 }
 0x353   : > { %v2367_v31 = vpop.f32.mrf.mxu0  ;;  %v8941_v55 = vpop.f32.mrf.mxu1 }
 0x354   : > { %12250 = vst [vmem:[#allocation3_spill] sm:$0xff] %v8905_v30  ;;  %v8911_v4 = vpack.c.bf16 %v2711_v2, %v2695_v42  ;;  %v2726_v40 = vmax.f32 %v2366_v9, 0.0  ;;  %v2696_v0 = vmax.f32 %v2409_v17, 0.0  ;;  %v2368_v58 = vadd.f32 %v2367_v31, %v8778_v35 }
 0x355   : > { %3736 = vrot.lane.b32.xlu0 %v8869_v26, %s7124_s28  ;;  %v2369_v52 = vpop.f32.mrf.mxu0  ;;  %v2412_v44 = vpop.f32.mrf.mxu1 }
 0x356   : > { %3452 = vrot.lane.b32.xlu1 %v8810_v49, %s7125_s29  ;;  %12251 = vst [vmem:[#allocation4_spill] sm:$0xff] %v8911_v4  ;;  %v2370_v24 = vadd.f32 %v2369_v52, %v8785_v15  ;;  %v2413_v21 = vadd.f32 %v2412_v44, %v8787_v13  ;;  %v2727_v16 = vmax.f32 %v2368_v58, 0.0 }
 0x357   : > { %v2371_v22 = vpop.f32.mrf.mxu0  ;;  %v8957_v28 = vpop.f32.mrf.mxu1 }
 0x358   : > { %v2742_v53 = vmax.f32 %v2370_v24, 0.0  ;;  %v2712_v36 = vmax.f32 %v2413_v21, 0.0  ;;  %v2372_v10 = vadd.f32 %v2371_v22, %v8785_v15  ;;  %v2415_v42 = vadd.f32 %v8957_v28, %v8787_v13 }
 0x359   : > { %3610 = vrot.lane.b32.xlu0 %v8869_v26, %s7126_s30  ;;  %v2418_v19 = vpop.f32.mrf.mxu1 }
 0x35a   : > { %3326 = vrot.lane.b32.xlu1 %v8810_v49, %s7128_s14  ;;  %v8927_v34 = vpack.c.bf16 %v2742_v53, %v2726_v40  ;;  %v8964_v18 = vpack.c.bf16 %v2712_v36, %v2696_v0  ;;  %v2743_v25 = vmax.f32 %v2372_v10, 0.0  ;;  %v2419_v60 = vadd.f32 %v2418_v19, %v8778_v35 }
 0x35b   : > { %v8971_v62 = vpop.f32.mrf.mxu1  ;;  %v2411_v53 = vadd.f32 %v8941_v55, %v8781_v1  ;;  %v2713_v44 = vmax.f32 %v2415_v42, 0.0 }
 0x35c   : > { %12252 = vst [vmem:[#allocation5_spill] sm:$0xff] %v8927_v34  ;;  %12253 = vst [vmem:[#allocation6_spill] sm:$0xff] %v8964_v18  ;;  %v8977_v41 = vpack.c.bf16 %v2743_v25, %v2727_v16  ;;  %v2728_v59 = vmax.f32 %v2419_v60, 0.0  ;;  %v2421_v42 = vadd.f32 %v8971_v62, %v8778_v35 }
 0x35d   : > { %3484 = vrot.lane.b32.xlu0 %v8869_v26, %s7125_s29  ;;  %v2422_v48 = vpop.f32.mrf.mxu1  ;;  %v2697_v36 = vmax.f32 %v2411_v53, 0.0 }
 0x35e   : > { %3200 = vrot.lane.b32.xlu1 %v8810_v49, %s7127_s13  ;;  %12254 = vst [vmem:[#allocation7_spill] sm:$0xff] %v8977_v41  ;;  %v2423_v33 = vadd.f32 %v2422_v48, %v8785_v15 }
 0x35f   : > { %v9085_v0 = vpack.c.bf16 %v2713_v44, %v2697_v36  ;;  %v2424_v48 = vpop.f32.mrf.mxu1  ;;  %v2729_v36 = vmax.f32 %v2421_v42, 0.0 }
 0x360   : > { %v2744_v6 = vmax.f32 %v2423_v33, 0.0 }
 0x361   : > { %3358 = vrot.lane.b32.xlu0 %v8869_v26, %s7128_s14  ;;  %12258 = vst [vmem:[#allocation11_spill] sm:$0xff] %v9085_v0 }
 0x362   : > { %2852 = vrot.lane.b32.xlu1 %v8820_v57, %s7132_s17  ;;  %v9009_v3 = vpack.c.bf16 %v2744_v6, %v2728_v59  ;;  %v2425_v6 = vadd.f32 %v2424_v48, %v8785_v15 }
 0x364   : > { %12255 = vst [vmem:[#allocation8_spill] sm:$0xff] %v9009_v3  ;;  %v2745_v53 = vmax.f32 %v2425_v6, 0.0 }
 0x365   : > { %3232 = vrot.lane.b32.xlu0 %v8869_v26, %s7127_s13 }
 0x366   : > { %2854 = vrot.lane.b32.xlu1 %v8869_v26, %s7132_s17  ;;  %v9126_v62 = vpack.c.bf16 %v2745_v53, %v2729_v36 }
 0x368   : > { %12261 = vst [vmem:[#allocation14_spill] sm:$0xff] %v9126_v62 }
 0x369   : > { %3076 = vrot.lane.b32.xlu0 %v8905_v30, %s7130_s16 }
 0x36a   : > { %3706 = vrot.lane.b32.xlu1 %v8905_v30, %s7124_s28 }
 0x36d   : > { %2950 = vrot.lane.b32.xlu0 %v8905_v30, %s7129_s15 }
 0x36e   : > { %2952 = vrot.lane.b32.xlu1 %v8911_v4, %s7129_s15 }
 0x371   : > { %2824 = vrot.lane.b32.xlu0 %v8905_v30, %s7132_s17 }
 0x372   : > { %2826 = vrot.lane.b32.xlu1 %v8911_v4, %s7132_s17 }
 0x375   : > { %3580 = vrot.lane.b32.xlu0 %v8905_v30, %s7126_s30 }
 0x376   : > { %3582 = vrot.lane.b32.xlu1 %v8911_v4, %s7126_s30 }
 0x379   : > { %3454 = vrot.lane.b32.xlu0 %v8905_v30, %s7125_s29  ;;  %v2461_v61 = vpop.f32.mrf.mxu0 }
 0x37a   : > { %3108 = vrot.lane.b32.xlu1 %v8927_v34, %s7130_s16  ;;  %v2462_v14 = vadd.f32 %v2461_v61, %v8781_v1 }
 0x37b   : > { %v9043_v27 = vpop.f32.mrf.mxu0 }
 0x37c   : > { %v2698_v55 = vmax.f32 %v2462_v14, 0.0 }
 0x37d   : > { %3328 = vrot.lane.b32.xlu0 %v8905_v30, %s7128_s14  ;;  %v2465_v31 = vpop.f32.mrf.mxu0 }
 0x37e   : > { %2982 = vrot.lane.b32.xlu1 %v8927_v34, %s7129_s15  ;;  %v2466_v24 = vadd.f32 %v2465_v31, %v8787_v13 }
 0x37f   : > { %v2467_v40 = vpop.f32.mrf.mxu0 }
 0x380   : > { %v2714_v17 = vmax.f32 %v2466_v24, 0.0 }
 0x381   : > { %3202 = vrot.lane.b32.xlu0 %v8905_v30, %s7127_s13  ;;  %v2471_v28 = vpop.f32.mrf.mxu0 }
 0x382   : > { %3738 = vrot.lane.b32.xlu1 %v8927_v34, %s7124_s28  ;;  %v9089_v58 = vpack.c.bf16 %v2714_v17, %v2698_v55  ;;  %v2472_v24 = vadd.f32 %v2471_v28, %v8778_v35 }
 0x383   : > { %v2473_v25 = vpop.f32.mrf.mxu0 }
 0x384   : > { %12259 = vst [vmem:[#allocation12_spill] sm:$0xff] %v9089_v58  ;;  %v2730_v55 = vmax.f32 %v2472_v24, 0.0 }
 0x385   : > { %3078 = vrot.lane.b32.xlu0 %v8911_v4, %s7130_s16  ;;  %v2475_v60 = vpop.f32.mrf.mxu0 }
 0x386   : > { %3612 = vrot.lane.b32.xlu1 %v8927_v34, %s7126_s30  ;;  %v2476_v61 = vadd.f32 %v2475_v60, %v8785_v15 }
 0x387   : > { %v2477_v8 = vpop.f32.mrf.mxu0 }
 0x388   : > { %v2746_v44 = vmax.f32 %v2476_v61, 0.0 }
 0x389   : > { %3456 = vrot.lane.b32.xlu0 %v8911_v4, %s7125_s29 }
 0x38a   : > { %3486 = vrot.lane.b32.xlu1 %v8927_v34, %s7125_s29  ;;  %v9130_v48 = vpack.c.bf16 %v2746_v44, %v2730_v55  ;;  %v2468_v55 = vadd.f32 %v2467_v40, %v8787_v13 }
 0x38c   : > { %12262 = vst [vmem:[#allocation15_spill] sm:$0xff] %v9130_v48  ;;  %v2715_v30 = vmax.f32 %v2468_v55, 0.0 }
 0x38d   : > { %3330 = vrot.lane.b32.xlu0 %v8911_v4, %s7128_s14 }
 0x38e   : > { %3360 = vrot.lane.b32.xlu1 %v8927_v34, %s7128_s14 }
 0x391   : > { %3204 = vrot.lane.b32.xlu0 %v8911_v4, %s7127_s13 }
 0x392   : > { %3234 = vrot.lane.b32.xlu1 %v8927_v34, %s7127_s13  ;;  %v2514_v6 = vpop.f32.mrf.mxu1 }
 0x394   : > { %v9142_v24 = vpop.f32.mrf.mxu1 }
 0x395   : > { %3708 = vrot.lane.b32.xlu0 %v8911_v4, %s7124_s28  ;;  %12263 = vst [vmem:[#allocation16_spill] sm:$0xff] %v9142_v24  ;;  %v2478_v4 = vadd.f32 %v2477_v8, %v8785_v15 }
 0x396   : > { %3080 = vrot.lane.b32.xlu1 %v8964_v18, %s7130_s16  ;;  %v2518_v36 = vpop.f32.mrf.mxu1 }
 0x397   : > { %v2519_v8 = vadd.f32 %v2518_v36, %v8787_v13 }
 0x398   : > { %v9163_v24 = vpop.f32.mrf.mxu1 }
 0x399   : > { %2856 = vrot.lane.b32.xlu0 %v8927_v34, %s7132_s17  ;;  %12265 = vst [vmem:[#allocation18_spill] sm:$0xff] %v9163_v24  ;;  %v2747_v24 = vmax.f32 %v2478_v4, 0.0  ;;  %v2716_v13 = vmax.f32 %v2519_v8, 0.0 }
 0x39a   : > { %3458 = vrot.lane.b32.xlu1 %v8964_v18, %s7125_s29 }
 0x39b   : > { %v8979_v38 = vpop.permute.xlu1 %3072  ;;  %v8981_v5 = vpop.permute.xlu0 %3702 }
 0x39d   : > { %3110 = vrot.lane.b32.xlu0 %v8977_v41, %s7130_s16 }
 0x39e   : > { %3332 = vrot.lane.b32.xlu1 %v8964_v18, %s7128_s14 }
 0x39f   : > { %v8987_v51 = vpop.permute.xlu1 %2946  ;;  %v8989_v29 = vpop.permute.xlu0 %3704 }
 0x3a1   : > { %2984 = vrot.lane.b32.xlu0 %v8977_v41, %s7129_s15 }
 0x3a2   : > { %3206 = vrot.lane.b32.xlu1 %v8964_v18, %s7127_s13 }
 0x3a3   : > { %v8997_v20 = vpop.permute.xlu1 %2820  ;;  %v8999_v50 = vpop.permute.xlu0 %3104 }
 0x3a5   : > { %2858 = vrot.lane.b32.xlu0 %v8977_v41, %s7132_s17 }
 0x3a6   : > { %3710 = vrot.lane.b32.xlu1 %v8964_v18, %s7124_s28 }
 0x3a7   : > { %v9005_v23 = vpop.permute.xlu1 %3576  ;;  %v9007_v56 = vpop.permute.xlu0 %2978 }
 0x3a9   : > { %3614 = vrot.lane.b32.xlu0 %v8977_v41, %s7126_s30 }
 0x3aa   : > { %3112 = vrot.lane.b32.xlu1 %v9009_v3, %s7130_s16 }
 0x3ab   : > { %v9015_v12 = vpop.permute.xlu1 %3450  ;;  %v9017_v45 = vpop.permute.xlu0 %3734 }
 0x3ad   : > { %3488 = vrot.lane.b32.xlu0 %v8977_v41, %s7125_s29 }
 0x3ae   : > { %2986 = vrot.lane.b32.xlu1 %v9009_v3, %s7129_s15 }
 0x3af   : > { %v9023_v37 = vpop.permute.xlu1 %3324  ;;  %v9025_v47 = vpop.permute.xlu0 %3608 }
 0x3b1   : > { %3362 = vrot.lane.b32.xlu0 %v8977_v41, %s7128_s14 }
 0x3b2   : > { %2860 = vrot.lane.b32.xlu1 %v9009_v3, %s7132_s17 }
 0x3b3   : > { %v9031_v54 = vpop.permute.xlu1 %3198  ;;  %v9033_v7 = vpop.permute.xlu0 %3482 }
 0x3b4   : > { %12256 = vst [vmem:[#allocation9_spill] sm:$0xff] %v9031_v54  ;;  %v2474_v54 = vadd.f32 %v2473_v25, %v8778_v35 }
 0x3b5   : > { %3236 = vrot.lane.b32.xlu0 %v8977_v41, %s7127_s13 }
 0x3b6   : > { %3616 = vrot.lane.b32.xlu1 %v9009_v3, %s7126_s30 }
 0x3b7   : > { %v9039_v63 = vpop.permute.xlu0 %3356 }
 0x3b8   : > { %v9041_v43 = vpop.permute.xlu1 %3074 }
 0x3b9   : > { %3740 = vrot.lane.b32.xlu0 %v8977_v41, %s7124_s28 }
 0x3ba   : > { %3490 = vrot.lane.b32.xlu1 %v9009_v3, %s7125_s29 }
 0x3bb   : > { %v9049_v46 = vpop.permute.xlu0 %3230 }
 0x3bc   : > { %v9056_v2 = vpop.permute.xlu1 %2948 }
 0x3bd   : > { %2954 = vrot.lane.b32.xlu0 %v8964_v18, %s7129_s15 }
 0x3be   : > { %3364 = vrot.lane.b32.xlu1 %v9009_v3, %s7128_s14 }
 0x3bf   : > { %v9065_v52 = vpop.permute.xlu0 %3106 }
 0x3c0   : > { %v9068_v9 = vpop.permute.xlu1 %2822  ;;  %v3151_v4 = vsel %vm604_vm7, %v8999_v50, %v9065_v52 }
 0x3c1   : > { %2828 = vrot.lane.b32.xlu0 %v8964_v18, %s7132_s17 }
 0x3c2   : > { %3238 = vrot.lane.b32.xlu1 %v9009_v3, %s7127_s13 }
 0x3c3   : > { %v9077_v21 = vpop.permute.xlu0 %2980 }
 0x3c4   : > { %v9079_v22 = vpop.permute.xlu1 %3578 }
 0x3c5   : > { %3584 = vrot.lane.b32.xlu0 %v8964_v18, %s7126_s30 }
 0x3c6   : > { %3742 = vrot.lane.b32.xlu1 %v9009_v3, %s7124_s28  ;;  %v2464_v3 = vadd.f32 %v9043_v27, %v8781_v1 }
 0x3c7   : > { %v9087_v10 = vpop.permute.xlu0 %3736 }
 0x3c8   : > { %v9091_v19 = vpop.permute.xlu1 %3452  ;;  %v2699_v41 = vmax.f32 %v2464_v3, 0.0 }
 0x3c9   : > { %3082 = vrot.lane.b32.xlu0 %v9085_v0, %s7130_s16 }
 0x3ca   : > { %3084 = vrot.lane.b32.xlu1 %v9089_v58, %s7130_s16  ;;  %v9179_v27 = vpack.c.bf16 %v2715_v30, %v2699_v41  ;;  %v2515_v30 = vadd.f32 %v2514_v6, %v8781_v1 }
 0x3cb   : > { %v9097_v16 = vpop.permute.xlu0 %3610 }
 0x3cc   : > { %v9099_v33 = vpop.permute.xlu1 %3326  ;;  %12267 = vst [vmem:[#allocation20_spill] sm:$0xff] %v9179_v27 }
 0x3cd   : > { %2956 = vrot.lane.b32.xlu0 %v9085_v0, %s7129_s15 }
 0x3ce   : > { %2958 = vrot.lane.b32.xlu1 %v9089_v58, %s7129_s15 }
 0x3cf   : > { %v9106_v59 = vpop.permute.xlu0 %3484 }
 0x3d0   : > { %v9109_v31 = vpop.permute.xlu1 %3200 }
 0x3d1   : > { %12260 = vst [vmem:[#allocation13_spill] sm:$0xff] %v9109_v31  ;;  %3712 = vrot.lane.b32.xlu0 %v9085_v0, %s7124_s28  ;;  %v2524_v31 = vpop.f32.mrf.mxu1 }
 0x3d2   : > { %3714 = vrot.lane.b32.xlu1 %v9089_v58, %s7124_s28 }
 0x3d3   : > { %v9118_v14 = vpop.permute.xlu0 %3358  ;;  %v9186_v3 = vpop.f32.mrf.mxu1 }
 0x3d4   : > { %v9120_v17 = vpop.permute.xlu1 %2852  ;;  %12268 = vst [vmem:[#allocation21_spill] sm:$0xff] %v9186_v3 }
 0x3d5   : > { %2830 = vrot.lane.b32.xlu0 %v9085_v0, %s7132_s17  ;;  %v2528_v6 = vpop.f32.mrf.mxu1 }
 0x3d6   : > { %2832 = vrot.lane.b32.xlu1 %v9089_v58, %s7132_s17  ;;  %v2529_v8 = vadd.f32 %v2528_v6, %v8785_v15 }
 0x3d7   : > { %v9128_v28 = vpop.permute.xlu0 %3232 }
 0x3d8   : > { %v9132_v60 = vpop.permute.xlu1 %2854 }
 0x3d9   : > { %3114 = vrot.lane.b32.xlu0 %v9126_v62, %s7130_s16 }
 0x3da   : > { %3116 = vrot.lane.b32.xlu1 %v9130_v48, %s7130_s16 }
 0x3db   : > { %v9138_v61 = vpop.permute.xlu0 %3076 }
 0x3dc   : > { %v9140_v42 = vpop.permute.xlu1 %3706 }
 0x3dd   : > { %2988 = vrot.lane.b32.xlu0 %v9126_v62, %s7129_s15 }
 0x3de   : > { %2990 = vrot.lane.b32.xlu1 %v9130_v48, %s7129_s15 }
 0x3df   : > { %v9148_v53 = vpop.permute.xlu0 %2950 }
 0x3e0   : > { %v9150_v44 = vpop.permute.xlu1 %2952 }
 0x3e1   : > { %3744 = vrot.lane.b32.xlu0 %v9126_v62, %s7124_s28 }
 0x3e2   : > { %3746 = vrot.lane.b32.xlu1 %v9130_v48, %s7124_s28 }
 0x3e3   : > { %v9157_v11 = vpop.permute.xlu0 %2824 }
 0x3e4   : > { %v9159_v18 = vpop.permute.xlu1 %2826 }
 0x3e5   : > { %12264 = vst [vmem:[#allocation17_spill] sm:$0xff] %v9159_v18  ;;  %2862 = vrot.lane.b32.xlu0 %v9126_v62, %s7132_s17 }
 0x3e6   : > { %2864 = vrot.lane.b32.xlu1 %v9130_v48, %s7132_s17 }
 0x3e7   : > { %v9170_v40 = vpop.permute.xlu0 %3580 }
 0x3e8   : > { %v9172_v34 = vpop.permute.xlu1 %3582 }
 0x3e9   : > { %12266 = vst [vmem:[#allocation19_spill] sm:$0xff] %v9172_v34  ;;  %3618 = vrot.lane.b32.xlu0 %v9126_v62, %s7126_s30  ;;  %v2731_v34 = vmax.f32 %v2474_v54, 0.0  ;;  %v3137_v54 = vsel %vm604_vm7, %v9041_v43, %v9138_v61 }
 0x3ea   : > { %3620 = vrot.lane.b32.xlu1 %v9130_v48, %s7126_s30 }
 0x3eb   : > { %v9181_v55 = vpop.permute.xlu0 %3454  ;;  %v9199_v41 = vpack.c.bf16 %v2747_v24, %v2731_v34  ;;  %v3136_v34 = vsel %vm604_vm7, %v8979_v38, %v9041_v43  ;;  %v2525_v43 = vadd.f32 %v2524_v31, %v8778_v35  ;;  %v3767_v31 = vsel %vm869_vm0, %v8989_v29, %v9140_v42 }
 0x3ec   : > { %v9184_v18 = vpop.permute.xlu1 %3108 }
 0x3ed   : > { %3086 = vrot.lane.b32.xlu0 %v9179_v27, %s7130_s16  ;;  %v3152_v25 = vsel %vm604_vm7, %v9065_v52, %v9184_v18  ;;  %12269 = vst [vmem:[#allocation22_spill] sm:$0xff] %v9199_v41 }
 0x3ee   : > { %3588 = vrot.lane.b32.xlu1 %v9089_v58, %s7126_s30  ;;  %3931 = vmatprep.subr.bf16.mxu1 %v3152_v25  ;;  %v2700_v25 = vmax.f32 %v2515_v30, 0.0  ;;  %v3781_v30 = vsel %vm869_vm0, %v9017_v45, %v9087_v10  ;;  %v3010_v45 = vsel %vm553_vm6, %v8987_v51, %v9056_v2  ;;  %v12273_v51 = vmov 0  }
 0x3ef   : > { %3932 = vmatpush1.bf16.msra.mxu1 %v3151_v4  ;;  %v9204_v36 = vpop.permute.xlu0 %3328 }
 0x3f0   : > { %v9206_v3 = vpop.permute.xlu1 %2982  ;;  %3933 = vmatprep.subr.bf16.mxu1 %v3137_v54  ;;  %v9220_v24 = vpack.c.bf16 %v2716_v13, %v2700_v25  ;;  %v3025_v13 = vsel %vm553_vm6, %v9007_v56, %v9077_v21  ;;  %v3011_v54 = vsel %vm553_vm6, %v9056_v2, %v9148_v53  ;;  %v2748_v25 = vmax.f32 %v2529_v8, 0.0  ;;  %v9288_v2 = vld [vmem:[%s12178_s5 + $0x20] ss:$12 sps:$4 sm:$0xff]  }
 0x3f1   : > { %3118 = vrot.lane.b32.xlu0 %v9199_v41, %s7130_s16  ;;  %v3026_v50 = vsel %vm553_vm6, %v9077_v21, %v9206_v3  ;;  %v2732_v56 = vmax.f32 %v2525_v43, 0.0  ;;  %v3766_v21 = vsel %vm869_vm0, %v8981_v5, %v8989_v29  ;;  %12274 = vst [vmem:[#allocation26_spill] sm:$0xff] %v9288_v2 }
 0x3f2   : > { %3494 = vrot.lane.b32.xlu1 %v9130_v48, %s7125_s29  ;;  %12270 = vst [vmem:[#allocation23_spill] sm:$0xff] %v9220_v24 }
 0x3f3   : > { %3934 = vmatpush1.bf16.msra.mxu1 %v3136_v34  ;;  %v9218_v52 = vpop.permute.xlu0 %3202  ;;  %v9266_v8 = vpack.c.bf16 %v2748_v25, %v2732_v56  ;;  %v9314_v25 = vld [vmem:[%s12178_s5 + $0x38] ss:$12 sps:$4 sm:$0xff]  }
 0x3f4   : > { %v9223_v4 = vpop.permute.xlu1 %3738  ;;  %3935 = vmatprep.subr.bf16.mxu1 %v3026_v50  ;;  %12276 = vst [vmem:[#allocation28_spill] sm:$0xff] %v9314_v25 }
 0x3f5   : > { %2992 = vrot.lane.b32.xlu0 %v9199_v41, %s7129_s15  ;;  %v3782_v38 = vsel %vm869_vm0, %v9087_v10, %v9223_v4  ;;  %v9262_v10 = vld [vmem:[%s12178_s5 + $0x8] ss:$12 sps:$4 sm:$0xff]   ;;  %12271 = vst [vmem:[#allocation24_spill] sm:$0xff] %v9266_v8 }
 0x3f6   : > { %3088 = vrot.lane.b32.xlu1 %v9220_v24, %s7130_s16  ;;  %4006 = vmatprep.subr.bf16.mxu0 %v3782_v38 }
 0x3f7   : > { %3936 = vmatpush1.bf16.msra.mxu1 %v3025_v13  ;;  %4007 = vmatpush1.bf16.msra.mxu0 %v3781_v30  ;;  %v9245_v6 = vpop.permute.xlu0 %3078 }
 0x3f8   : > { %v9247_v34 = vpop.permute.xlu1 %3612  ;;  %3937 = vmatprep.subr.bf16.mxu1 %v3011_v54  ;;  %4008 = vmatprep.subr.bf16.mxu0 %v3767_v31 }
 0x3f9   : > { %2960 = vrot.lane.b32.xlu0 %v9179_v27, %s7129_s15 }
 0x3fa   : > { %2962 = vrot.lane.b32.xlu1 %v9220_v24, %s7129_s15 }
 0x3fb   : > { %3938 = vmatpush1.bf16.msra.mxu1 %v3010_v45  ;;  %4009 = vmatpush1.bf16.msra.mxu0 %v3766_v21  ;;  %v9264_v50 = vpop.permute.xlu0 %3456  ;;  %v2899_v21 = vsel %vm502_vm8, %v9120_v17, %v9132_v60  ;;  %v2884_v17 = vsel %vm502_vm8, %v8997_v20, %v9068_v9 }
 0x3fc   : > { %v9268_v38 = vpop.permute.xlu1 %3486 }
 0x3fd   : > { %3586 = vrot.lane.b32.xlu0 %v9085_v0, %s7126_s30 }
 0x3fe   : > { %3120 = vrot.lane.b32.xlu1 %v9266_v8, %s7130_s16  ;;  %6846 = vmatmul.mubr.msk.bf16.vlgmr.msra.gmra.mxu0 %vm3921_vm12, %v9262_v10 }
 0x3ff   : > { %v9276_v5 = vpop.permute.xlu0 %3330  ;;  %4036 = vmatprep.mubr.bf16.mxu0 %v12273_v51 }
 0x400   : > { %12272 = vst [vmem:[#allocation25_spill] sm:$0xff] %v9276_v5  ;;  %v9279_v29 = vpop.permute.xlu1 %3360 }
 0x401   : > { %2866 = vrot.lane.b32.xlu0 %v9199_v41, %s7132_s17 }
 0x402   : > { %2994 = vrot.lane.b32.xlu1 %v9266_v8, %s7129_s15 }
 0x403   : > { %v9290_v43 = vpop.permute.xlu0 %3204 }
 0x404   : > { %12275 = vst [vmem:[#allocation27_spill] sm:$0xff] %v9290_v43  ;;  %v9292_v13 = vpop.permute.xlu1 %3234  ;;  %v2885_v43 = vsel %vm502_vm8, %v9068_v9, %v9157_v11 }
 0x405   : > { %3492 = vrot.lane.b32.xlu0 %v9126_v62, %s7125_s29 }
 0x406   : > { %2868 = vrot.lane.b32.xlu1 %v9266_v8, %s7132_s17  ;;  %6847 = vmatmul.mubr.msk.bf16.gmra.mxu0 %vm3921_vm12, %v9288_v2 }
 0x407   : > { %v9300_v30 = vpop.permute.xlu0 %3708  ;;  %4046 = vmatprep.mubr.bf16.mxu0 %v12273_v51 }
 0x408   : > { %v9303_v54 = vpop.permute.xlu1 %3080 }
 0x409   : > { %2834 = vrot.lane.b32.xlu0 %v9179_v27, %s7132_s17 }
 0x40a   : > { %2836 = vrot.lane.b32.xlu1 %v9220_v24, %s7132_s17 }
 0x40b   : > { %v9309_v31 = vpop.permute.xlu0 %2856 }
 0x40c   : > { %v9316_v56 = vpop.permute.xlu1 %3458  ;;  %v2900_v45 = vsel %vm502_vm8, %v9132_v60, %v9309_v31 }
 0x40d   : > { %3460 = vrot.lane.b32.xlu0 %v9085_v0, %s7125_s29  ;;  %3939 = vmatprep.subr.bf16.mxu1 %v2900_v45 }
 0x40e   : > { %3462 = vrot.lane.b32.xlu1 %v9089_v58, %s7125_s29  ;;  %3940 = vmatpush1.bf16.msra.mxu1 %v2899_v21 }
 0x40f   : > { %3941 = vmatprep.subr.bf16.mxu1 %v2885_v43  ;;  %v3111_v2 = vpop.permute.xlu0 %3110  ;;  %6848 = vmatmul.mubr.msk.bf16.gmra.mxu0 %vm3921_vm12, %v9314_v25 }
 0x410   : > { %v9333_v5 = vpop.permute.xlu1 %3332  ;;  %4089 = vmatprep.mubr.bf16.mxu0 %v9054_v32  ;;  %v3153_v21 = vsel %vm604_vm7, %v9184_v18, %v3111_v2  ;;  %v3640_v18 = vsel %vm815_vm3, %v9005_v23, %v9079_v22  ;;  %v9408_v23 = vpop.f32.mrf.mxu0 }
 0x411   : > { %3366 = vrot.lane.b32.xlu0 %v9126_v62, %s7128_s14 }
 0x412   : > { %3368 = vrot.lane.b32.xlu1 %v9130_v48, %s7128_s14  ;;  %3942 = vmatpush1.bf16.msra.mxu1 %v2884_v17  ;;  %v3641_v17 = vsel %vm815_vm3, %v9079_v22, %v9170_v40  ;;  %v3529_v22 = vsel %vm761_vm2, %v9033_v7, %v9106_v59  ;;  %v3514_v7 = vsel %vm761_vm2, %v9015_v12, %v9091_v19 }
 0x413   : > { %3943 = vmatprep.subr.bf16.mxu1 %v8869_v26  ;;  %v2985_v60 = vpop.permute.xlu0 %2984  ;;  %v3656_v26 = vsel %vm815_vm3, %v9097_v16, %v9247_v34  ;;  %v3403_v12 = vsel %vm706_vm5, %v9039_v63, %v9118_v14  ;;  %v3012_v63 = vsel %vm553_vm6, %v9148_v53, %v9150_v44 }
 0x414   : > { %v9344_v43 = vpop.permute.xlu1 %3206 }
 0x415   : > { %3334 = vrot.lane.b32.xlu0 %v9085_v0, %s7128_s14 }
 0x416   : > { %3336 = vrot.lane.b32.xlu1 %v9089_v58, %s7128_s14  ;;  %3944 = vmatpush1.bf16.msra.mxu1 %v8820_v57 }
 0x417   : > { %3945 = vmatprep.subr.bf16.mxu1 %v8810_v49  ;;  %v9352_v20 = vpop.permute.xlu0 %2858 }
 0x418   : > { %v9354_v9 = vpop.permute.xlu1 %3710 }
 0x419   : > { %12277 = vst [vmem:[#allocation29_spill] sm:$0xff] %v9354_v9  ;;  %3622 = vrot.lane.b32.xlu0 %v9199_v41, %s7126_s30 }
 0x41a   : > { %3624 = vrot.lane.b32.xlu1 %v9266_v8, %s7126_s30  ;;  %3946 = vmatpush1.bf16.msra.mxu1 %v8800_v39  ;;  %v3655_v39 = vsel %vm815_vm3, %v9025_v47, %v9097_v16  ;;  %v3138_v47 = vsel %vm604_vm7, %v9138_v61, %v9245_v6  ;;  %v3530_v16 = vsel %vm761_vm2, %v9106_v59, %v9268_v38 }
 0x41b   : > { %3947 = vmatprep.subr.bf16.mxu1 %v3656_v26  ;;  %v9364_v57 = vpop.permute.xlu0 %3614  ;;  %v3139_v26 = vsel %vm604_vm7, %v9245_v6, %v9303_v54  ;;  %v3027_v61 = vsel %vm553_vm6, %v9206_v3, %v2985_v60  ;;  %v3515_v6 = vsel %vm761_vm2, %v9091_v19, %v9181_v55  ;;  %v3404_v59 = vsel %vm706_vm5, %v9118_v14, %v9279_v29 }
 0x41c   : > { %v9366_v49 = vpop.permute.xlu1 %3112  ;;  %v3389_v19 = vsel %vm706_vm5, %v9099_v33, %v9204_v36  ;;  %v3388_v14 = vsel %vm706_vm5, %v9023_v37, %v9099_v33  ;;  %v2901_v37 = vsel %vm502_vm8, %v9309_v31, %v9352_v20  ;;  %v3277_v33 = vsel %vm655_vm4, %v9049_v46, %v9128_v28 }
 0x41d   : > { %3240 = vrot.lane.b32.xlu0 %v9126_v62, %s7127_s13  ;;  %v3154_v45 = vsel %vm604_vm7, %v3111_v2, %v9366_v49 }
 0x41e   : > { %3242 = vrot.lane.b32.xlu1 %v9130_v48, %s7127_s13  ;;  %4057 = vmatprep.subr.bf16.mxu0 %v3154_v45 }
 0x41f   : > { %3948 = vmatpush2.bf16.msra.mxu1 %v3655_v39  ;;  %4058 = vmatpush1.bf16.msra.mxu0 %v3153_v21  ;;  %v9385_v32 = vpop.permute.xlu0 %3488 }
 0x420   : > { %v9387_v45 = vpop.permute.xlu1 %2986  ;;  %3949 = vmatprep.subr.bf16.mxu1 %v3641_v17  ;;  %4059 = vmatprep.subr.bf16.mxu0 %v3139_v26 }
 0x421   : > { %3590 = vrot.lane.b32.xlu0 %v9179_v27, %s7126_s30  ;;  %v3028_v2 = vsel %vm553_vm6, %v2985_v60, %v9387_v45 }
 0x422   : > { %3592 = vrot.lane.b32.xlu1 %v9220_v24, %s7126_s30 }
 0x423   : > { %3950 = vmatpush2.bf16.msra.mxu1 %v3640_v18  ;;  %4060 = vmatpush1.bf16.msra.mxu0 %v3138_v47  ;;  %v9404_v39 = vpop.permute.xlu0 %3362  ;;  %v9426_v18 = vpop.f32.mrf.mxu0 }
 0x424   : > { %v9406_v21 = vpop.permute.xlu1 %2860  ;;  %3951 = vmatprep.subr.bf16.mxu1 %v3530_v16  ;;  %4061 = vmatprep.subr.bf16.mxu0 %v3028_v2 }
 0x425   : > { %3208 = vrot.lane.b32.xlu0 %v9085_v0, %s7127_s13  ;;  %v9440_v47 = vpop.f32.mrf.mxu0 }
 0x426   : > { %3210 = vrot.lane.b32.xlu1 %v9089_v58, %s7127_s13 }
 0x427   : > { %3952 = vmatpush2.bf16.msra.mxu1 %v3529_v22  ;;  %4062 = vmatpush1.bf16.msra.mxu0 %v3027_v61  ;;  %v9422_v17 = vpop.permute.xlu0 %3236  ;;  %v9459_v61 = vpop.f32.mrf.mxu0 }
 0x428   : > { %v9424_v26 = vpop.permute.xlu1 %3616  ;;  %3953 = vmatprep.subr.bf16.mxu1 %v3515_v6  ;;  %v2902_v6 = vsel %vm502_vm8, %v9352_v20, %v9406_v21 }
 0x429   : > { %12278 = vst [vmem:[#allocation30_spill] sm:$0xff] %v9424_v26  ;;  %3496 = vrot.lane.b32.xlu0 %v9199_v41, %s7125_s29 }
 0x42a   : > { %3498 = vrot.lane.b32.xlu1 %v9266_v8, %s7125_s29 }
 0x42b   : > { %3954 = vmatpush2.bf16.msra.mxu1 %v3514_v7  ;;  %v3741_v3 = vpop.permute.xlu0 %3740  ;;  %v3278_v7 = vsel %vm655_vm4, %v9128_v28, %v9292_v13  ;;  %v12281_v28 = vld [vmem:[#allocation9_spill] sm:$0xff] }
 0x42c   : > { %v9438_v60 = vpop.permute.xlu1 %3490  ;;  %3955 = vmatprep.subr.bf16.mxu1 %v3404_v59 }
 0x42d   : > { %3464 = vrot.lane.b32.xlu0 %v9179_v27, %s7125_s29 }
 0x42e   : > { %3466 = vrot.lane.b32.xlu1 %v9220_v24, %s7125_s29 }
 0x42f   : > { %3956 = vmatpush2.bf16.msra.mxu1 %v3403_v12  ;;  %v9452_v16 = vpop.permute.xlu0 %2954  ;;  %v12279_v12 = vld [vmem:[#allocation17_spill] sm:$0xff] }
 0x430   : > { %v9454_v2 = vpop.permute.xlu1 %3364  ;;  %3957 = vmatprep.subr.bf16.mxu1 %v3389_v19  ;;  %v3013_v22 = vsel %vm553_vm6, %v9150_v44, %v9452_v16  ;;  %v2577_v44 = vpop.f32.mrf.mxu0  ;;  %v2886_v46 = vsel %vm502_vm8, %v9157_v11, %v12279_v12 }
 0x431   : > { %3370 = vrot.lane.b32.xlu0 %v9199_v41, %s7128_s14  ;;  %4063 = vmatprep.subr.bf16.mxu0 %v3013_v22  ;;  %v12280_v22 = vld [vmem:[#allocation13_spill] sm:$0xff] }
 0x432   : > { %3372 = vrot.lane.b32.xlu1 %v9266_v8, %s7128_s14  ;;  %4064 = vmatpush1.bf16.msra.mxu0 %v3012_v63  ;;  %v3263_v63 = vsel %vm655_vm4, %v12280_v22, %v9218_v52  ;;  %v9501_v20 = vpop.f32.mrf.mxu0 }
 0x433   : > { %3958 = vmatpush2.bf16.msra.mxu1 %v3388_v14  ;;  %4065 = vmatprep.subr.bf16.mxu0 %v2902_v6  ;;  %v9477_v59 = vpop.permute.xlu0 %2828  ;;  %v3262_v6 = vsel %vm655_vm4, %v12281_v28, %v12280_v22  ;;  %v9530_v22 = vld [vmem:[%s12178_s5 + $0x1c] ss:$12 sps:$4 sm:$0xff]  }
 0x434   : > { %v9479_v53 = vpop.permute.xlu1 %3238  ;;  %3959 = vmatprep.subr.bf16.mxu1 %v3278_v7  ;;  %v2887_v19 = vsel %vm502_vm8, %v12279_v12, %v9477_v59  ;;  %v9516_v7 = vld [vmem:[%s12178_s5] ss:$12 sps:$4 sm:$0xff]   ;;  %v2530_v12 = vpop.f32.mrf.mxu1 }
 0x435   : > { %3338 = vrot.lane.b32.xlu0 %v9179_v27, %s7128_s14  ;;  %v2531_v28 = vadd.f32 %v2530_v12, %v8785_v15  ;;  %v2578_v12 = vadd.f32 %v2577_v44, %v8778_v35  ;;  %v3658_v44 = vsel %vm815_vm3, %v9364_v57, %v9424_v26  ;;  %v2568_v26 = vadd.f32 %v9408_v23, %v8781_v1 }
 0x436   : > { %3340 = vrot.lane.b32.xlu1 %v9220_v24, %s7128_s14  ;;  %4066 = vmatpush1.bf16.msra.mxu0 %v2901_v37  ;;  %v12282_v37 = vld [vmem:[#allocation7_spill] sm:$0xff]  ;;  %v9583_v25 = vpop.f32.mrf.mxu1 }
 0x437   : > { %3960 = vmatpush2.bf16.msra.mxu1 %v3277_v33  ;;  %4067 = vmatprep.subr.bf16.mxu0 %v2887_v19  ;;  %v9497_v14 = vpop.permute.xlu0 %3584 }
 0x438   : > { %v9499_v31 = vpop.permute.xlu1 %3742  ;;  %3961 = vmatprep.subr.bf16.mxu1 %v3263_v63  ;;  %v2581_v63 = vpop.f32.mrf.mxu0 }
 0x439   : > { %3244 = vrot.lane.b32.xlu0 %v9199_v41, %s7127_s13  ;;  %v3784_v33 = vsel %vm869_vm0, %v3741_v3, %v9499_v31  ;;  %v2582_v58 = vadd.f32 %v2581_v63, %v8785_v15  ;;  %v3768_v63 = vsel %vm869_vm0, %v9140_v42, %v9300_v30  ;;  %v9575_v42 = vld [vmem:[%s12178_s5 + $0x34] ss:$12 sps:$4 sm:$0xff]  }
 0x43a   : > { %3246 = vrot.lane.b32.xlu1 %v9266_v8, %s7127_s13  ;;  %4068 = vmatpush1.bf16.msra.mxu0 %v2886_v46  ;;  %v3783_v46 = vsel %vm869_vm0, %v9223_v4, %v3741_v3  ;;  %v12285_v4 = vld [vmem:[#allocation21_spill] sm:$0xff] }
 0x43b   : > { %3962 = vmatpush2.bf16.msra.mxu1 %v3262_v6  ;;  %4069 = vmatprep.subr.bf16.mxu0 %v12282_v37  ;;  %v9521_v11 = vpop.permute.xlu0 %3082  ;;  %v12283_v6 = vld [vmem:[#allocation5_spill] sm:$0xff]  ;;  %v3769_v37 = vsel %vm869_vm0, %v9300_v30, %v9354_v9  ;;  %v2527_v3 = vadd.f32 %v12285_v4, %v8778_v35  ;;  %v2749_v4 = vmax.f32 %v2531_v28, 0.0  ;;  %v2750_v62 = vmax.f32 %v2582_v58, 0.0 }
 0x43c   : > { %v9523_v19 = vpop.permute.xlu1 %3084  ;;  %4126 = vmatprep.subr.bf16.mxu1 %v3784_v33  ;;  %v2734_v9 = vmax.f32 %v2578_v12, 0.0  ;;  %v3657_v58 = vsel %vm815_vm3, %v9247_v34, %v9364_v57  ;;  %v9607_v34 = vpop.f32.mrf.mxu1  ;;  %v2702_v57 = vmax.f32 %v2568_v26, 0.0 }
 0x43d   : > { %3748 = vrot.lane.b32.xlu0 %v9199_v41, %s7124_s28  ;;  %v12289_v41 = vld [vmem:[#allocation3_spill] sm:$0xff] }
 0x43e   : > { %3750 = vrot.lane.b32.xlu1 %v9266_v8, %s7124_s28  ;;  %3964 = vmatmul.mubr.bf16.vlgmr.msra.gmra.mxu1 %v9516_v7  ;;  %v12284_v8 = vld [vmem:[#allocation4_spill] sm:$0xff]  ;;  %v9603_v12 = vpack.c.bf16 %v2750_v62, %v2734_v9 }
 0x43f   : > { %4070 = vmatpush1.bf16.msra.mxu0 %v12283_v6  ;;  %4127 = vmatpush1.bf16.msra.mxu1 %v3783_v46  ;;  %v9542_v33 = vpop.permute.xlu0 %2956  ;;  %v12287_v46 = vld [vmem:[#allocation2_spill] sm:$0xff]  ;;  %v9619_v62 = vld [vmem:[%s12178_s5 + $0x30] ss:$12 sps:$4 sm:$0xff]  }
 0x440   : > { %v9545_v48 = vpop.permute.xlu1 %2958  ;;  %4071 = vmatprep.subr.bf16.mxu0 %v12284_v8  ;;  %4128 = vmatprep.subr.bf16.mxu1 %v3769_v37  ;;  %v9562_v8 = vld [vmem:[%s12178_s5 + $0x18] ss:$12 sps:$4 sm:$0xff]   ;;  %v2572_v30 = vadd.f32 %v9440_v47, %v12287_v46 }
 0x441   : > { %3212 = vrot.lane.b32.xlu0 %v9179_v27, %s7127_s13  ;;  %3973 = vmatprep.mubr.bf16.mxu1 %v9530_v22  ;;  %12286 = vst [vmem:[#allocation17_spill] sm:$0xff] %v9562_v8  ;;  %v12288_v6 = vld [vmem:[#allocation18_spill] sm:$0xff] }
 0x442   : > { %3214 = vrot.lane.b32.xlu1 %v9220_v24, %s7127_s13  ;;  %v2521_v37 = vadd.f32 %v12288_v6, %v12287_v46  ;;  %v2718_v23 = vmax.f32 %v2572_v30, 0.0 }
 0x443   : > { %4072 = vmatpush1.bf16.msra.mxu0 %v12289_v41  ;;  %4129 = vmatpush1.bf16.msra.mxu1 %v3768_v63  ;;  %v9570_v0 = vpop.permute.xlu0 %3712  ;;  %v12290_v41 = vld [vmem:[#allocation16_spill] sm:$0xff]  ;;  %v2733_v63 = vmax.f32 %v2527_v3, 0.0 }
 0x444   : > { %v9579_v6 = vpop.permute.xlu1 %3714  ;;  %4073 = vmatprep.subr.bf16.mxu0 %v3658_v44  ;;  %v2517_v28 = vadd.f32 %v12290_v41, %v8781_v1  ;;  %v2717_v47 = vmax.f32 %v2521_v37, 0.0  ;;  %v12291_v44 = vld [vmem:[#allocation19_spill] sm:$0xff]  ;;  %v9626_v30 = vpack.c.bf16 %v2718_v23, %v2702_v57 }
 0x445   : > { %3716 = vrot.lane.b32.xlu0 %v9179_v27, %s7124_s28  ;;  %v9595_v3 = vpack.c.bf16 %v2749_v4, %v2733_v63  ;;  %v3643_v41 = vsel %vm815_vm3, %v12291_v44, %v9497_v14  ;;  %v3642_v37 = vsel %vm815_vm3, %v9170_v40, %v12291_v44  ;;  %v3532_v4 = vsel %vm761_vm2, %v9385_v32, %v9438_v60  ;;  %v9630_v63 = vpop.f32.mrf.mxu1 }
 0x446   : > { %3718 = vrot.lane.b32.xlu1 %v9220_v24, %s7124_s28  ;;  %3974 = vmatmul.mubr.bf16.gmra.mxu1 %v9562_v8  ;;  %v2701_v8 = vmax.f32 %v2517_v28, 0.0 }
 0x447   : > { %4074 = vmatpush2.bf16.msra.mxu0 %v3657_v58  ;;  %v9600_v27 = vpop.permute.xlu0 %2830  ;;  %3983 = vmatprep.mubr.bf16.mxu1 %v9575_v42  ;;  %v3517_v58 = vsel %vm761_vm2, %v9264_v50, %v9316_v56 }
 0x448   : > { %v9605_v24 = vpop.permute.xlu1 %2832  ;;  %4075 = vmatprep.subr.bf16.mxu0 %v3643_v41  ;;  %v9621_v9 = vpack.c.bf16 %v2717_v47, %v2701_v8  ;;  %v3531_v8 = vsel %vm761_vm2, %v9268_v38, %v9385_v32  ;;  %v9648_v41 = vpop.f32.mrf.mxu1  ;;  %v3516_v32 = vsel %vm761_vm2, %v9181_v55, %v9264_v50  ;;  %v3406_v38 = vsel %vm706_vm5, %v9404_v39, %v9454_v2 }
 0x449   : > { %3122 = vrot.lane.b32.xlu0 %v9595_v3, %s7130_s16  ;;  %v3405_v50 = vsel %vm706_vm5, %v9279_v29, %v9404_v39  ;;  %v3140_v29 = vsel %vm604_vm7, %v9303_v54, %v9521_v11 }
 0x44a   : > { %3124 = vrot.lane.b32.xlu1 %v9603_v12, %s7130_s16 }
 0x44b   : > { %4076 = vmatpush2.bf16.msra.mxu0 %v3642_v37  ;;  %v3115_v26 = vpop.permute.xlu0 %3114  ;;  %v2630_v37 = vpop.f32.mrf.mxu1 }
 0x44c   : > { %v9628_v28 = vpop.permute.xlu1 %3116  ;;  %4077 = vmatprep.subr.bf16.mxu0 %v3532_v4  ;;  %v3155_v55 = vsel %vm604_vm7, %v9366_v49, %v3115_v26  ;;  %v3141_v4 = vsel %vm604_vm7, %v9521_v11, %v9523_v19  ;;  %v3279_v11 = vsel %vm655_vm4, %v9292_v13, %v9422_v17 }
 0x44d   : > { %3090 = vrot.lane.b32.xlu0 %v9621_v9, %s7130_s16  ;;  %v3156_v40 = vsel %vm604_vm7, %v3115_v26, %v9628_v28  ;;  %v9683_v49 = vpop.f32.mrf.mxu1 }
 0x44e   : > { %3092 = vrot.lane.b32.xlu1 %v9626_v30, %s7130_s16  ;;  %3984 = vmatmul.mubr.bf16.gmra.mxu1 %v9619_v62 }
 0x44f   : > { %4171 = vmatprep.subr.bf16.mxu1 %v3156_v40  ;;  %4078 = vmatpush2.bf16.msra.mxu0 %v3531_v8  ;;  %v2989_v47 = vpop.permute.xlu0 %2988  ;;  %v12292_v40 = vld [vmem:[#allocation25_spill] sm:$0xff]  ;;  %v2634_v54 = vpop.f32.mrf.mxu1 }
 0x450   : > { %v9645_v44 = vpop.permute.xlu1 %2990  ;;  %4079 = vmatprep.subr.bf16.mxu0 %v3517_v58  ;;  %4146 = vmatprep.mubr.bf16.mxu1 %v12273_v51  ;;  %v3391_v8 = vsel %vm706_vm5, %v12292_v40, %v9333_v5  ;;  %v3390_v39 = vsel %vm706_vm5, %v9204_v36, %v12292_v40  ;;  %v3029_v36 = vsel %vm553_vm6, %v9387_v45, %v2989_v47  ;;  %v12293_v40 = vld [vmem:[#allocation26_spill] sm:$0xff] }
 0x451   : > { %2996 = vrot.lane.b32.xlu0 %v9595_v3, %s7129_s15  ;;  %v3030_v26 = vsel %vm553_vm6, %v2989_v47, %v9645_v44  ;;  %v2635_v47 = vadd.f32 %v2634_v54, %v8785_v15 }
 0x452   : > { %2998 = vrot.lane.b32.xlu1 %v9603_v12, %s7129_s15 }
 0x453   : > { %4080 = vmatpush2.bf16.msra.mxu0 %v3516_v32  ;;  %v9660_v23 = vpop.permute.xlu0 %3744 }
 0x454   : > { %v9662_v57 = vpop.permute.xlu1 %3746  ;;  %4081 = vmatprep.subr.bf16.mxu0 %v3406_v38  ;;  %v3280_v38 = vsel %vm655_vm4, %v9422_v17, %v9479_v53  ;;  %v2580_v17 = vadd.f32 %v9501_v20, %v8778_v35  ;;  %v2574_v20 = vadd.f32 %v9459_v61, %v12287_v46  ;;  %v2570_v61 = vadd.f32 %v9426_v18, %v8781_v1 }
 0x455   : > { %2964 = vrot.lane.b32.xlu0 %v9621_v9, %s7129_s15  ;;  %v3785_v18 = vsel %vm869_vm0, %v9499_v31, %v9660_v23 }
 0x456   : > { %2966 = vrot.lane.b32.xlu1 %v9626_v30, %s7129_s15  ;;  %6849 = vmatmul.mubr.msk.bf16.vlgmr.msra.gmra.mxu1 %vm3921_vm12, %v9262_v10 }
 0x457   : > { %4172 = vmatpush1.bf16.msra.mxu1 %v3155_v55  ;;  %4082 = vmatpush2.bf16.msra.mxu0 %v3405_v50  ;;  %v2863_v58 = vpop.permute.xlu0 %2862  ;;  %v2583_v50 = vpop.f32.mrf.mxu0 }
 0x458   : > { %4173 = vmatprep.subr.bf16.mxu1 %v3141_v4  ;;  %v9681_v32 = vpop.permute.xlu1 %2864  ;;  %4083 = vmatprep.subr.bf16.mxu0 %v3391_v8  ;;  %v2584_v8 = vadd.f32 %v2583_v50, %v8785_v15  ;;  %v3014_v50 = vsel %vm553_vm6, %v9452_v16, %v9542_v33  ;;  %v2625_v16 = vadd.f32 %v9630_v63, %v12287_v46 }
 0x459   : > { %3752 = vrot.lane.b32.xlu0 %v9595_v3, %s7124_s28  ;;  %4154 = vmatprep.mubr.bf16.mxu1 %v12273_v51  ;;  %v2903_v63 = vsel %vm502_vm8, %v9406_v21, %v2863_v58 }
 0x45a   : > { %3754 = vrot.lane.b32.xlu1 %v9603_v12, %s7124_s28  ;;  %v2720_v21 = vmax.f32 %v2625_v16, 0.0 }
 0x45b   : > { %4174 = vmatpush1.bf16.msra.mxu1 %v3140_v29  ;;  %4084 = vmatpush2.bf16.msra.mxu0 %v3390_v39  ;;  %v9701_v55 = vpop.permute.xlu0 %3618  ;;  %v3015_v29 = vsel %vm553_vm6, %v9542_v33, %v9545_v48  ;;  %v12294_v39 = vld [vmem:[#allocation27_spill] sm:$0xff]  ;;  %v2752_v33 = vmax.f32 %v2635_v47, 0.0  ;;  %v2719_v47 = vmax.f32 %v2574_v20, 0.0  ;;  %v2888_v20 = vsel %vm502_vm8, %v9477_v59, %v9600_v27  ;;  %v12300_v59 = vld [vmem:[#allocation8_spill] sm:$0xff] }
 0x45c   : > { %4175 = vmatprep.subr.bf16.mxu1 %v3030_v26  ;;  %v9703_v4 = vpop.permute.xlu1 %3620  ;;  %4085 = vmatprep.subr.bf16.mxu0 %v3280_v38  ;;  %v3265_v26 = vsel %vm655_vm4, %v12294_v39, %v9344_v43  ;;  %v2631_v38 = vadd.f32 %v2630_v37, %v8778_v35  ;;  %v3264_v54 = vsel %vm655_vm4, %v9218_v52, %v12294_v39 }
 0x45d   : > { %2870 = vrot.lane.b32.xlu0 %v9595_v3, %s7132_s17  ;;  %v2904_v37 = vsel %vm502_vm8, %v2863_v58, %v9681_v32  ;;  %v2621_v39 = vadd.f32 %v9583_v25, %v8781_v1  ;;  %v2889_v25 = vsel %vm502_vm8, %v9600_v27, %v9605_v24  ;;  %v12298_v27 = vld [vmem:[#allocation10_spill] sm:$0xff] }
 0x45e   : > { %2872 = vrot.lane.b32.xlu1 %v9603_v12, %s7132_s17  ;;  %6850 = vmatmul.mubr.msk.bf16.gmra.mxu1 %vm3921_vm12, %v12293_v40 }
 0x45f   : > { %4176 = vmatpush1.bf16.msra.mxu1 %v3029_v36  ;;  %4086 = vmatpush2.bf16.msra.mxu0 %v3279_v11  ;;  %v9723_v45 = vpop.permute.xlu0 %3086  ;;  %v2751_v36 = vmax.f32 %v2584_v8, 0.0  ;;  %v3786_v11 = vsel %vm869_vm0, %v9660_v23, %v9662_v57  ;;  %v2735_v8 = vmax.f32 %v2580_v17, 0.0  ;;  %v2703_v23 = vmax.f32 %v2570_v61, 0.0 }
 0x460   : > { %4177 = vmatprep.subr.bf16.mxu1 %v3015_v29  ;;  %v9726_v13 = vpop.permute.xlu1 %3588  ;;  %4087 = vmatprep.subr.bf16.mxu0 %v3265_v26  ;;  %v2736_v26 = vmax.f32 %v2631_v38, 0.0  ;;  %v3771_v38 = vsel %vm869_vm0, %v9570_v0, %v9579_v6 }
 0x461   : > { %3720 = vrot.lane.b32.xlu0 %v9621_v9, %s7124_s28  ;;  %4162 = vmatprep.mubr.bf16.mxu1 %v12273_v51  ;;  %v9769_v17 = vpack.c.bf16 %v2751_v36, %v2735_v8  ;;  %v12295_v36 = vld [vmem:[#allocation29_spill] sm:$0xff]  ;;  %v9796_v16 = vpack.c.bf16 %v2719_v47, %v2703_v23  ;;  %v12297_v8 = vld [vmem:[#allocation14_spill] sm:$0xff] }
 0x462   : > { %3722 = vrot.lane.b32.xlu1 %v9626_v30, %s7124_s28  ;;  %v9779_v58 = vpack.c.bf16 %v2752_v33, %v2736_v26 }
 0x463   : > { %4178 = vmatpush1.bf16.msra.mxu1 %v3014_v50  ;;  %4088 = vmatpush2.bf16.msra.mxu0 %v3264_v54  ;;  %v9749_v29 = vpop.permute.xlu0 %3118  ;;  %v2704_v54 = vmax.f32 %v2621_v39, 0.0 }
 0x464   : > { %4179 = vmatprep.subr.bf16.mxu1 %v2904_v37  ;;  %v9753_v52 = vpop.permute.xlu1 %3494  ;;  %4246 = vmatprep.subr.bf16.mxu0 %v3786_v11  ;;  %v3770_v37 = vsel %vm869_vm0, %v12295_v36, %v9570_v0  ;;  %v12296_v11 = vld [vmem:[#allocation28_spill] sm:$0xff]  ;;  %v12299_v0 = vld [vmem:[#allocation17_spill] sm:$0xff] }
 0x465   : > { %2838 = vrot.lane.b32.xlu0 %v9621_v9, %s7132_s17  ;;  %v9800_v61 = vpack.c.bf16 %v2720_v21, %v2704_v54  ;;  %v12303_v54 = vld [vmem:[#allocation30_spill] sm:$0xff] }
 0x466   : > { %2840 = vrot.lane.b32.xlu1 %v9626_v30, %s7132_s17  ;;  %4090 = vmatmul.mubr.bf16.vlgmr.msra.gmra.mxu0 %v9516_v7 }
 0x467   : > { %4180 = vmatpush1.bf16.msra.mxu1 %v2903_v63  ;;  %4247 = vmatpush1.bf16.msra.mxu0 %v3785_v18  ;;  %v9777_v50 = vpop.permute.xlu0 %2992  ;;  %v12301_v63 = vld [vmem:[#allocation11_spill] sm:$0xff] }
 0x468   : > { %4181 = vmatprep.subr.bf16.mxu1 %v2889_v25  ;;  %v9781_v31 = vpop.permute.xlu1 %3088  ;;  %4248 = vmatprep.subr.bf16.mxu0 %v3771_v38  ;;  %v12302_v25 = vld [vmem:[#allocation6_spill] sm:$0xff]  ;;  %v3660_v38 = vsel %vm815_vm3, %v9701_v55, %v9703_v4 }
 0x469   : > { %3126 = vrot.lane.b32.xlu0 %v9769_v17, %s7130_s16  ;;  %4097 = vmatprep.mubr.bf16.mxu0 %v9530_v22 }
 0x46a   : > { %3128 = vrot.lane.b32.xlu1 %v9779_v58, %s7130_s16  ;;  %6851 = vmatmul.mubr.msk.bf16.gmra.mxu1 %vm3921_vm12, %v12296_v11 }
 0x46b   : > { %4182 = vmatpush1.bf16.msra.mxu1 %v2888_v20  ;;  %4249 = vmatpush1.bf16.msra.mxu0 %v3770_v37  ;;  %v9798_v33 = vpop.permute.xlu0 %2960  ;;  %v3659_v20 = vsel %vm815_vm3, %v12303_v54, %v9701_v55 }
 0x46c   : > { %4183 = vmatprep.subr.bf16.mxu1 %v12297_v8  ;;  %v9803_v39 = vpop.permute.xlu1 %2962  ;;  %4203 = vmatprep.mubr.bf16.mxu1 %v12298_v27 }
 0x46d   : > { %3094 = vrot.lane.b32.xlu0 %v9796_v16, %s7130_s16 }
 0x46e   : > { %3096 = vrot.lane.b32.xlu1 %v9800_v61, %s7130_s16  ;;  %4098 = vmatmul.mubr.bf16.gmra.mxu0 %v12299_v0 }
 0x46f   : > { %4184 = vmatpush1.bf16.msra.mxu1 %v12300_v59  ;;  %v3587_v26 = vpop.permute.xlu0 %3586  ;;  %4105 = vmatprep.mubr.bf16.mxu0 %v9575_v42 }
 0x470   : > { %4185 = vmatprep.subr.bf16.mxu1 %v12301_v63  ;;  %v9814_v18 = vpop.permute.xlu1 %3120  ;;  %v3645_v36 = vsel %vm815_vm3, %v3587_v26, %v9726_v13  ;;  %v3644_v55 = vsel %vm815_vm3, %v9497_v14, %v3587_v26  ;;  %v3157_v14 = vsel %vm604_vm7, %v9628_v28, %v9749_v29  ;;  %v3143_v26 = vsel %vm604_vm7, %v9723_v45, %v9781_v31 }
 0x471   : > { %3000 = vrot.lane.b32.xlu0 %v9769_v17, %s7129_s15  ;;  %v3158_v47 = vsel %vm604_vm7, %v9749_v29, %v9814_v18  ;;  %v3142_v28 = vsel %vm604_vm7, %v9523_v19, %v9723_v45  ;;  %v3031_v19 = vsel %vm553_vm6, %v9645_v44, %v9777_v50 }
 0x472   : > { %3002 = vrot.lane.b32.xlu1 %v9779_v58, %s7129_s15  ;;  %4297 = vmatprep.subr.bf16.mxu0 %v3158_v47 }
 0x473   : > { %4186 = vmatpush1.bf16.msra.mxu1 %v12302_v25  ;;  %v9827_v21 = vpop.permute.xlu0 %2866 }
 0x474   : > { %4187 = vmatprep.subr.bf16.mxu1 %v3660_v38  ;;  %v9829_v23 = vpop.permute.xlu1 %2994 }
 0x475   : > { %3626 = vrot.lane.b32.xlu0 %v9595_v3, %s7126_s30 }
 0x476   : > { %3628 = vrot.lane.b32.xlu1 %v9603_v12, %s7126_s30  ;;  %4106 = vmatmul.mubr.bf16.gmra.mxu0 %v9619_v62 }
 0x477   : > { %4188 = vmatpush2.bf16.msra.mxu1 %v3659_v20  ;;  %v3493_v37 = vpop.permute.xlu0 %3492  ;;  %4266 = vmatprep.mubr.bf16.mxu0 %v12273_v51 }
 0x478   : > { %4189 = vmatprep.subr.bf16.mxu1 %v3645_v36  ;;  %v9842_v8 = vpop.permute.xlu1 %2868  ;;  %v3534_v27 = vsel %vm761_vm2, %v3493_v37, %v9753_v52  ;;  %v3533_v47 = vsel %vm761_vm2, %v9438_v60, %v3493_v37 }
 0x479   : > { %2968 = vrot.lane.b32.xlu0 %v9796_v16, %s7129_s15 }
 0x47a   : > { %2970 = vrot.lane.b32.xlu1 %v9800_v61, %s7129_s15 }
 0x47b   : > { %4190 = vmatpush2.bf16.msra.mxu1 %v3644_v55  ;;  %v9852_v59 = vpop.permute.xlu0 %2834 }
 0x47c   : > { %4191 = vmatprep.subr.bf16.mxu1 %v3534_v27  ;;  %v9854_v63 = vpop.permute.xlu1 %2836 }
 0x47d   : > { %3594 = vrot.lane.b32.xlu0 %v9621_v9, %s7126_s30 }
 0x47e   : > { %3596 = vrot.lane.b32.xlu1 %v9626_v30, %s7126_s30  ;;  %6852 = vmatmul.mubr.msk.bf16.vlgmr.msra.gmra.mxu0 %vm3921_vm12, %v9262_v10 }
 0x47f   : > { %4192 = vmatpush2.bf16.msra.mxu1 %v3533_v47  ;;  %4298 = vmatpush1.bf16.msra.mxu0 %v3157_v14  ;;  %v3461_v25 = vpop.permute.xlu0 %3460 }
 0x480   : > { %4299 = vmatprep.subr.bf16.mxu0 %v3143_v26  ;;  %v9870_v38 = vpop.permute.xlu1 %3462  ;;  %v3518_v60 = vsel %vm761_vm2, %v9316_v56, %v3461_v25  ;;  %4276 = vmatprep.mubr.bf16.mxu0 %v12273_v51  ;;  %v3032_v56 = vsel %vm553_vm6, %v9777_v50, %v9829_v23  ;;  %v3016_v50 = vsel %vm553_vm6, %v9545_v48, %v9798_v33 }
 0x481   : > { %2874 = vrot.lane.b32.xlu0 %v9769_v17, %s7132_s17  ;;  %v3519_v10 = vsel %vm761_vm2, %v3461_v25, %v9870_v38  ;;  %v2905_v48 = vsel %vm502_vm8, %v9681_v32, %v9827_v21  ;;  %v12304_v25 = vld [vmem:[#allocation22_spill] sm:$0xff] }
 0x482   : > { %2876 = vrot.lane.b32.xlu1 %v9779_v58, %s7132_s17  ;;  %4193 = vmatprep.subr.bf16.mxu1 %v3519_v10  ;;  %v12305_v10 = vld [vmem:[#allocation15_spill] sm:$0xff] }
 0x483   : > { %4300 = vmatpush1.bf16.msra.mxu0 %v3142_v28  ;;  %4194 = vmatpush2.bf16.msra.mxu1 %v3518_v60  ;;  %v3367_v29 = vpop.permute.xlu0 %3366 }
 0x484   : > { %4301 = vmatprep.subr.bf16.mxu0 %v3032_v56  ;;  %v9887_v54 = vpop.permute.xlu1 %3368  ;;  %v3407_v20 = vsel %vm706_vm5, %v9454_v2, %v3367_v29  ;;  %v3017_v2 = vsel %vm553_vm6, %v9798_v33, %v9803_v39  ;;  %v2891_v33 = vsel %vm502_vm8, %v9852_v59, %v9854_v63  ;;  %v12306_v56 = vld [vmem:[#allocation20_spill] sm:$0xff] }
 0x485   : > { %3500 = vrot.lane.b32.xlu0 %v9595_v3, %s7125_s29  ;;  %v3408_v36 = vsel %vm706_vm5, %v3367_v29, %v9887_v54 }
 0x486   : > { %3502 = vrot.lane.b32.xlu1 %v9603_v12, %s7125_s29  ;;  %4195 = vmatprep.subr.bf16.mxu1 %v3408_v36 }
 0x487   : > { %4302 = vmatpush1.bf16.msra.mxu0 %v3031_v19  ;;  %4196 = vmatpush2.bf16.msra.mxu1 %v3407_v20  ;;  %v3335_v45 = vpop.permute.xlu0 %3334  ;;  %v12307_v20 = vld [vmem:[#allocation12_spill] sm:$0xff] }
 0x488   : > { %4303 = vmatprep.subr.bf16.mxu0 %v3017_v2  ;;  %v9903_v37 = vpop.permute.xlu1 %3336  ;;  %v3392_v27 = vsel %vm706_vm5, %v9333_v5, %v3335_v45  ;;  %6853 = vmatmul.mubr.msk.bf16.gmra.mxu0 %vm3921_vm12, %v12293_v40  ;;  %v2906_v5 = vsel %vm502_vm8, %v9827_v21, %v9842_v8  ;;  %v9947_v21 = vld [vmem:[%s12178_s5 + $0x4] ss:$12 sps:$4 sm:$0xff]  }
 0x489   : > { %2842 = vrot.lane.b32.xlu0 %v9796_v16, %s7132_s17  ;;  %v3393_v44 = vsel %vm706_vm5, %v3335_v45, %v9903_v37  ;;  %4286 = vmatprep.mubr.bf16.mxu0 %v12273_v51 }
 0x48a   : > { %2844 = vrot.lane.b32.xlu1 %v9800_v61, %s7132_s17  ;;  %4197 = vmatprep.subr.bf16.mxu1 %v3393_v44 }
 0x48b   : > { %4304 = vmatpush1.bf16.msra.mxu0 %v3016_v50  ;;  %4198 = vmatpush2.bf16.msra.mxu1 %v3392_v27  ;;  %v3623_v40 = vpop.permute.xlu0 %3622 }
 0x48c   : > { %4305 = vmatprep.subr.bf16.mxu0 %v2906_v5  ;;  %v9922_v55 = vpop.permute.xlu1 %3624 }
 0x48d   : > { %3468 = vrot.lane.b32.xlu0 %v9621_v9, %s7125_s29  ;;  %v3662_v36 = vsel %vm815_vm3, %v3623_v40, %v9922_v55 }
 0x48e   : > { %3470 = vrot.lane.b32.xlu1 %v9626_v30, %s7125_s29 }
 0x48f   : > { %4306 = vmatpush1.bf16.msra.mxu0 %v2905_v48  ;;  %v3241_v47 = vpop.permute.xlu0 %3240  ;;  %v10001_v48 = vpop.f32.mrf.mxu0 }
 0x490   : > { %4307 = vmatprep.subr.bf16.mxu0 %v2891_v33  ;;  %v9934_v14 = vpop.permute.xlu1 %3242  ;;  %v3281_v26 = vsel %vm655_vm4, %v9479_v53, %v3241_v47  ;;  %6854 = vmatmul.mubr.msk.bf16.gmra.mxu0 %vm3921_vm12, %v12296_v11  ;;  %v2890_v53 = vsel %vm502_vm8, %v9605_v24, %v9852_v59 }
 0x491   : > { %3374 = vrot.lane.b32.xlu0 %v9595_v3, %s7128_s14  ;;  %v3282_v32 = vsel %vm655_vm4, %v3241_v47, %v9934_v14  ;;  %4329 = vmatprep.mubr.bf16.mxu0 %v9947_v21 }
 0x492   : > { %3376 = vrot.lane.b32.xlu1 %v9603_v12, %s7128_s14  ;;  %4199 = vmatprep.subr.bf16.mxu1 %v3282_v32  ;;  %v10015_v32 = vpop.f32.mrf.mxu0 }
 0x493   : > { %4308 = vmatpush1.bf16.msra.mxu0 %v2890_v53  ;;  %4200 = vmatpush2.bf16.msra.mxu1 %v3281_v26  ;;  %v3591_v11 = vpop.permute.xlu0 %3590 }
 0x494   : > { %4309 = vmatprep.subr.bf16.mxu0 %v12304_v25  ;;  %v9956_v60 = vpop.permute.xlu1 %3592 }
 0x495   : > { %3342 = vrot.lane.b32.xlu0 %v9621_v9, %s7128_s14  ;;  %v3647_v45 = vsel %vm815_vm3, %v3591_v11, %v9956_v60 }
 0x496   : > { %3344 = vrot.lane.b32.xlu1 %v9626_v30, %s7128_s14 }
 0x497   : > { %4310 = vmatpush1.bf16.msra.mxu0 %v12305_v10  ;;  %v3209_v28 = vpop.permute.xlu0 %3208  ;;  %v10027_v10 = vpop.f32.mrf.mxu0 }
 0x498   : > { %4311 = vmatprep.subr.bf16.mxu0 %v12306_v56  ;;  %v9964_v29 = vpop.permute.xlu1 %3210  ;;  %v3266_v24 = vsel %vm655_vm4, %v9344_v43, %v3209_v28  ;;  %v3661_v43 = vsel %vm815_vm3, %v9703_v4, %v3623_v40  ;;  %v3646_v4 = vsel %vm815_vm3, %v9726_v13, %v3591_v11 }
 0x499   : > { %3630 = vrot.lane.b32.xlu0 %v9769_v17, %s7126_s30  ;;  %v3267_v59 = vsel %vm655_vm4, %v3209_v28, %v9964_v29 }
 0x49a   : > { %3632 = vrot.lane.b32.xlu1 %v9779_v58, %s7126_s30  ;;  %4201 = vmatprep.subr.bf16.mxu1 %v3267_v59 }
 0x49b   : > { %4312 = vmatpush1.bf16.msra.mxu0 %v12307_v20  ;;  %4202 = vmatpush2.bf16.msra.mxu1 %v3266_v24  ;;  %v3497_v19 = vpop.permute.xlu0 %3496  ;;  %v10043_v20 = vpop.f32.mrf.mxu0 }
 0x49c   : > { %4313 = vmatprep.subr.bf16.mxu0 %v3662_v36  ;;  %v9977_v2 = vpop.permute.xlu1 %3498  ;;  %v3535_v33 = vsel %vm761_vm2, %v9753_v52, %v3497_v19 }
 0x49d   : > { %3248 = vrot.lane.b32.xlu0 %v9595_v3, %s7127_s13  ;;  %v3536_v50 = vsel %vm761_vm2, %v3497_v19, %v9977_v2 }
 0x49e   : > { %3250 = vrot.lane.b32.xlu1 %v9603_v12, %s7127_s13  ;;  %4204 = vmatmul.mubr.bf16.vlgmr.msra.gmra.mxu1 %v9516_v7 }
 0x49f   : > { %4314 = vmatpush2.bf16.msra.mxu0 %v3661_v43  ;;  %v3465_v27 = vpop.permute.xlu0 %3464  ;;  %4213 = vmatprep.mubr.bf16.mxu1 %v9530_v22 }
 0x4a0   : > { %4315 = vmatprep.subr.bf16.mxu0 %v3647_v45  ;;  %v9989_v44 = vpop.permute.xlu1 %3466  ;;  %v3520_v52 = vsel %vm761_vm2, %v9870_v38, %v3465_v27  ;;  %v2683_v45 = vpop.f32.mrf.mxu0 }
 0x4a1   : > { %3598 = vrot.lane.b32.xlu0 %v9796_v16, %s7126_s30  ;;  %v3521_v13 = vsel %vm761_vm2, %v3465_v27, %v9989_v44 }
 0x4a2   : > { %3600 = vrot.lane.b32.xlu1 %v9800_v61, %s7126_s30 }
 0x4a3   : > { %4316 = vmatpush2.bf16.msra.mxu0 %v3646_v4  ;;  %v3371_v5 = vpop.permute.xlu0 %3370 }
 0x4a4   : > { %4317 = vmatprep.subr.bf16.mxu0 %v3536_v50  ;;  %v9999_v40 = vpop.permute.xlu1 %3372  ;;  %v3409_v28 = vsel %vm706_vm5, %v9887_v54, %v3371_v5 }
 0x4a5   : > { %3216 = vrot.lane.b32.xlu0 %v9621_v9, %s7127_s13  ;;  %v3410_v53 = vsel %vm706_vm5, %v3371_v5, %v9999_v40 }
 0x4a6   : > { %3218 = vrot.lane.b32.xlu1 %v9626_v30, %s7127_s13  ;;  %4214 = vmatmul.mubr.bf16.gmra.mxu1 %v12299_v0 }
 0x4a7   : > { %4318 = vmatpush2.bf16.msra.mxu0 %v3535_v33  ;;  %v3339_v47 = vpop.permute.xlu0 %3338  ;;  %4223 = vmatprep.mubr.bf16.mxu1 %v9575_v42  ;;  %v10069_v33 = vpop.f32.mrf.mxu0 }
 0x4a8   : > { %4319 = vmatprep.subr.bf16.mxu0 %v3521_v13  ;;  %v10013_v26 = vpop.permute.xlu1 %3340  ;;  %v3394_v36 = vsel %vm706_vm5, %v9903_v37, %v3339_v47 }
 0x4a9   : > { %3504 = vrot.lane.b32.xlu0 %v9769_v17, %s7125_s29  ;;  %v3395_v38 = vsel %vm706_vm5, %v3339_v47, %v10013_v26 }
 0x4aa   : > { %3506 = vrot.lane.b32.xlu1 %v9779_v58, %s7125_s29 }
 0x4ab   : > { %4320 = vmatpush2.bf16.msra.mxu0 %v3520_v52  ;;  %v3245_v11 = vpop.permute.xlu0 %3244  ;;  %v2636_v52 = vpop.f32.mrf.mxu1 }
 0x4ac   : > { %4321 = vmatprep.subr.bf16.mxu0 %v3410_v53  ;;  %v10025_v25 = vpop.permute.xlu1 %3246  ;;  %v3283_v37 = vsel %vm655_vm4, %v9934_v14, %v3245_v11  ;;  %v2687_v53 = vpop.f32.mrf.mxu0 }
 0x4ad   : > { %3472 = vrot.lane.b32.xlu0 %v9796_v16, %s7125_s29  ;;  %v3284_v19 = vsel %vm655_vm4, %v3245_v11, %v10025_v25 }
 0x4ae   : > { %3474 = vrot.lane.b32.xlu1 %v9800_v61, %s7125_s29  ;;  %4224 = vmatmul.mubr.bf16.gmra.mxu1 %v9619_v62 }
 0x4af   : > { %4322 = vmatpush2.bf16.msra.mxu0 %v3409_v28  ;;  %v3749_v56 = vpop.permute.xlu0 %3748  ;;  %4392 = vmatprep.mubr.bf16.mxu1 %v12273_v51 }
 0x4b0   : > { %4323 = vmatprep.subr.bf16.mxu0 %v3395_v38  ;;  %v10039_v24 = vpop.permute.xlu1 %3750  ;;  %v3787_v59 = vsel %vm869_vm0, %v9662_v57, %v3749_v56  ;;  %v10093_v38 = vld [vmem:[%s12178_s5 + $0x8] ss:$12 sps:$4 sm:$0xff]  }
 0x4b1   : > { %3378 = vrot.lane.b32.xlu0 %v9769_v17, %s7128_s14  ;;  %v3788_v54 = vsel %vm869_vm0, %v3749_v56, %v10039_v24 }
 0x4b2   : > { %3380 = vrot.lane.b32.xlu1 %v9779_v58, %s7128_s14  ;;  %4372 = vmatprep.subr.bf16.mxu1 %v3788_v54  ;;  %v2633_v54 = vadd.f32 %v9683_v49, %v8778_v35 }
 0x4b3   : > { %4324 = vmatpush2.bf16.msra.mxu0 %v3394_v36  ;;  %4373 = vmatpush1.bf16.msra.mxu1 %v3787_v59  ;;  %v3213_v57 = vpop.permute.xlu0 %3212  ;;  %v2688_v59 = vadd.f32 %v2687_v53, %v8785_v15 }
 0x4b4   : > { %4325 = vmatprep.subr.bf16.mxu0 %v3284_v19  ;;  %v10055_v43 = vpop.permute.xlu1 %3214  ;;  %v3268_v14 = vsel %vm655_vm4, %v9964_v29, %v3213_v57  ;;  %v2637_v29 = vadd.f32 %v2636_v52, %v8785_v15  ;;  %v10138_v52 = vld [vmem:[%s12178_s5 + $0x20] ss:$12 sps:$4 sm:$0xff]  }
 0x4b5   : > { %3346 = vrot.lane.b32.xlu0 %v9796_v16, %s7128_s14  ;;  %v3269_v27 = vsel %vm655_vm4, %v3213_v57, %v10055_v43 }
 0x4b6   : > { %3348 = vrot.lane.b32.xlu1 %v9800_v61, %s7128_s14  ;;  %v2753_v49 = vmax.f32 %v2637_v29, 0.0 }
 0x4b7   : > { %4326 = vmatpush2.bf16.msra.mxu0 %v3283_v37  ;;  %v3717_v4 = vpop.permute.xlu0 %3716  ;;  %v2754_v37 = vmax.f32 %v2688_v59, 0.0 }
 0x4b8   : > { %4327 = vmatprep.subr.bf16.mxu0 %v3269_v27  ;;  %v10065_v50 = vpop.permute.xlu1 %3718  ;;  %v3772_v5 = vsel %vm869_vm0, %v9579_v6, %v3717_v4  ;;  %v2678_v27 = vadd.f32 %v10027_v10, %v12287_v46  ;;  %v2674_v10 = vadd.f32 %v10001_v48, %v8781_v1 }
 0x4b9   : > { %3252 = vrot.lane.b32.xlu0 %v9769_v17, %s7127_s13  ;;  %v3773_v13 = vsel %vm869_vm0, %v3717_v4, %v10065_v50 }
 0x4ba   : > { %3254 = vrot.lane.b32.xlu1 %v9779_v58, %s7127_s13  ;;  %4374 = vmatprep.subr.bf16.mxu1 %v3773_v13  ;;  %v2706_v29 = vmax.f32 %v2674_v10, 0.0 }
 0x4bb   : > { %4328 = vmatpush2.bf16.msra.mxu0 %v3268_v14  ;;  %4375 = vmatpush1.bf16.msra.mxu1 %v3772_v5  ;;  %v3123_v47 = vpop.permute.xlu0 %3122 }
 0x4bc   : > { %v10079_v6 = vpop.permute.xlu1 %3124  ;;  %v3159_v28 = vsel %vm604_vm7, %v9814_v18, %v3123_v47 }
 0x4bd   : > { %3756 = vrot.lane.b32.xlu0 %v9769_v17, %s7124_s28  ;;  %v3160_v11 = vsel %vm604_vm7, %v3123_v47, %v10079_v6 }
 0x4be   : > { %3758 = vrot.lane.b32.xlu1 %v9779_v58, %s7124_s28  ;;  %4423 = vmatprep.subr.bf16.mxu1 %v3160_v11 }
 0x4bf   : > { %6855 = vmatmul.mubr.msk.bf16.vlgmr.msra.gmra.mxu1 %vm3921_vm12, %v10093_v38  ;;  %v3091_v56 = vpop.permute.xlu0 %3090  ;;  %4330 = vmatmul.mubr.bf16.vlgmr.msra.gmra.mxu0 %v9516_v7  ;;  %v2684_v7 = vadd.f32 %v2683_v45, %v8778_v35  ;;  %v2737_v45 = vmax.f32 %v2633_v54, 0.0 }
 0x4c0   : > { %4424 = vmatpush1.bf16.msra.mxu1 %v3159_v28  ;;  %v10099_v18 = vpop.permute.xlu1 %3092  ;;  %4339 = vmatprep.mubr.bf16.mxu0 %v9530_v22  ;;  %v3144_v19 = vsel %vm604_vm7, %v9781_v31, %v3091_v56  ;;  %v2627_v22 = vadd.f32 %v9648_v41, %v12287_v46  ;;  %v2623_v31 = vadd.f32 %v9607_v34, %v8781_v1 }
 0x4c1   : > { %3220 = vrot.lane.b32.xlu0 %v9796_v16, %s7127_s13  ;;  %v3145_v36 = vsel %vm604_vm7, %v3091_v56, %v10099_v18  ;;  %4402 = vmatprep.mubr.bf16.mxu1 %v12273_v51  ;;  %v2738_v13 = vmax.f32 %v2684_v7, 0.0  ;;  %v10132_v34 = vpack.c.bf16 %v2753_v49, %v2737_v45  ;;  %v10173_v7 = vld [vmem:[%s12178_s5 + $0x38] ss:$12 sps:$4 sm:$0xff]  }
 0x4c2   : > { %3222 = vrot.lane.b32.xlu1 %v9800_v61, %s7127_s13  ;;  %4425 = vmatprep.subr.bf16.mxu1 %v3145_v36  ;;  %v2721_v14 = vmax.f32 %v2627_v22, 0.0  ;;  %v2705_v11 = vmax.f32 %v2623_v31, 0.0 }
 0x4c3   : > { %v2997_v57 = vpop.permute.xlu0 %2996  ;;  %v10142_v48 = vpack.c.bf16 %v2754_v37, %v2738_v13 }
 0x4c4   : > { %4426 = vmatpush1.bf16.msra.mxu1 %v3144_v19  ;;  %v10118_v4 = vpop.permute.xlu1 %2998  ;;  %v3033_v41 = vsel %vm553_vm6, %v9829_v23, %v2997_v57  ;;  %v2722_v23 = vmax.f32 %v2678_v27, 0.0  ;;  %v10156_v56 = vpack.c.bf16 %v2721_v14, %v2705_v11 }
 0x4c5   : > { %3724 = vrot.lane.b32.xlu0 %v9796_v16, %s7124_s28  ;;  %v3034_v5 = vsel %vm553_vm6, %v2997_v57, %v10118_v4 }
 0x4c6   : > { %3726 = vrot.lane.b32.xlu1 %v9800_v61, %s7124_s28  ;;  %4427 = vmatprep.subr.bf16.mxu1 %v3034_v5  ;;  %v10158_v59 = vpack.c.bf16 %v2722_v23, %v2706_v29 }
 0x4c7   : > { %v2965_v47 = vpop.permute.xlu0 %2964  ;;  %4340 = vmatmul.mubr.bf16.gmra.mxu0 %v12299_v0  ;;  %6856 = vmatmul.mubr.msk.bf16.gmra.mxu1 %vm3921_vm12, %v10138_v52 }
 0x4c8   : > { %4428 = vmatpush1.bf16.msra.mxu1 %v3033_v41  ;;  %v10144_v53 = vpop.permute.xlu1 %2966  ;;  %4349 = vmatprep.mubr.bf16.mxu0 %v9575_v42  ;;  %v3018_v28 = vsel %vm553_vm6, %v9803_v39, %v2965_v47  ;;  %v2689_v41 = vpop.f32.mrf.mxu0 }
 0x4c9   : > { %3130 = vrot.lane.b32.xlu0 %v10132_v34, %s7130_s16  ;;  %v3019_v0 = vsel %vm553_vm6, %v2965_v47, %v10144_v53  ;;  %4412 = vmatprep.mubr.bf16.mxu1 %v12273_v51  ;;  %v2690_v14 = vadd.f32 %v2689_v41, %v8785_v15  ;;  %v12308_v47 = vld [vmem:[#allocation24_spill] sm:$0xff] }
 0x4ca   : > { %3132 = vrot.lane.b32.xlu1 %v10142_v48, %s7130_s16  ;;  %4429 = vmatprep.subr.bf16.mxu1 %v3019_v0  ;;  %v2686_v0 = vadd.f32 %v10069_v33, %v8778_v35 }
 0x4cb   : > { %v3753_v42 = vpop.permute.xlu0 %3752 }
 0x4cc   : > { %4430 = vmatpush1.bf16.msra.mxu1 %v3018_v28  ;;  %v10160_v54 = vpop.permute.xlu1 %3754  ;;  %v3789_v36 = vsel %vm869_vm0, %v10039_v24, %v3753_v42  ;;  %v2676_v28 = vadd.f32 %v10015_v32, %v8781_v1  ;;  %v2739_v29 = vmax.f32 %v2686_v0, 0.0 }
 0x4cd   : > { %3098 = vrot.lane.b32.xlu0 %v10156_v56, %s7130_s16  ;;  %v3790_v39 = vsel %vm869_vm0, %v3753_v42, %v10160_v54 }
 0x4ce   : > { %3100 = vrot.lane.b32.xlu1 %v10158_v59, %s7130_s16  ;;  %4498 = vmatprep.subr.bf16.mxu0 %v3790_v39  ;;  %v2707_v32 = vmax.f32 %v2676_v28, 0.0 }
 0x4cf   : > { %4499 = vmatpush1.bf16.msra.mxu0 %v3789_v36  ;;  %v2871_v19 = vpop.permute.xlu0 %2870  ;;  %6857 = vmatmul.mubr.msk.bf16.gmra.mxu1 %vm3921_vm12, %v10173_v7 }
 0x4d0   : > { %v10177_v24 = vpop.permute.xlu1 %2872  ;;  %v2907_v22 = vsel %vm502_vm8, %v9842_v8, %v2871_v19  ;;  %4350 = vmatmul.mubr.bf16.gmra.mxu0 %v9619_v62  ;;  %4455 = vmatprep.mubr.bf16.mxu1 %v9947_v21 }
 0x4d1   : > { %3004 = vrot.lane.b32.xlu0 %v10132_v34, %s7129_s15  ;;  %v2908_v49 = vsel %vm502_vm8, %v2871_v19, %v10177_v24  ;;  %4518 = vmatprep.mubr.bf16.mxu0 %v12273_v51 }
 0x4d2   : > { %3006 = vrot.lane.b32.xlu1 %v10142_v48, %s7129_s15  ;;  %4431 = vmatprep.subr.bf16.mxu1 %v2908_v49 }
 0x4d3   : > { %4432 = vmatpush1.bf16.msra.mxu1 %v2907_v22  ;;  %v3721_v57 = vpop.permute.xlu0 %3720 }
 0x4d4   : > { %v10190_v27 = vpop.permute.xlu1 %3722  ;;  %v3774_v62 = vsel %vm869_vm0, %v10065_v50, %v3721_v57 }
 0x4d5   : > { %2972 = vrot.lane.b32.xlu0 %v10156_v56, %s7129_s15  ;;  %v3775_v8 = vsel %vm869_vm0, %v3721_v57, %v10190_v27 }
 0x4d6   : > { %2974 = vrot.lane.b32.xlu1 %v10158_v59, %s7129_s15  ;;  %4500 = vmatprep.subr.bf16.mxu0 %v3775_v8 }
 0x4d7   : > { %4501 = vmatpush1.bf16.msra.mxu0 %v3774_v62  ;;  %v2839_v37 = vpop.permute.xlu0 %2838 }
 0x4d8   : > { %v10200_v31 = vpop.permute.xlu1 %2840  ;;  %v2892_v45 = vsel %vm502_vm8, %v9854_v63, %v2839_v37 }
 0x4d9   : > { %3760 = vrot.lane.b32.xlu0 %v10132_v34, %s7124_s28  ;;  %v2893_v50 = vsel %vm502_vm8, %v2839_v37, %v10200_v31 }
 0x4da   : > { %3762 = vrot.lane.b32.xlu1 %v10142_v48, %s7124_s28  ;;  %4433 = vmatprep.subr.bf16.mxu1 %v2893_v50 }
 0x4db   : > { %4434 = vmatpush1.bf16.msra.mxu1 %v2892_v45  ;;  %v3127_v5 = vpop.permute.xlu0 %3126  ;;  %6858 = vmatmul.mubr.msk.bf16.vlgmr.msra.gmra.mxu0 %vm3921_vm12, %v10093_v38 }
 0x4dc   : > { %v10212_v10 = vpop.permute.xlu1 %3128  ;;  %4435 = vmatprep.subr.bf16.mxu1 %v9595_v3  ;;  %v3161_v63 = vsel %vm604_vm7, %v10079_v6, %v3127_v5  ;;  %4528 = vmatprep.mubr.bf16.mxu0 %v12273_v51  ;;  %v2680_v6 = vadd.f32 %v10043_v20, %v12287_v46  ;;  %v2755_v46 = vmax.f32 %v2690_v14, 0.0 }
 0x4dd   : > { %2878 = vrot.lane.b32.xlu0 %v10132_v34, %s7132_s17  ;;  %v3162_v13 = vsel %vm604_vm7, %v3127_v5, %v10212_v10 }
 0x4de   : > { %2880 = vrot.lane.b32.xlu1 %v10142_v48, %s7132_s17  ;;  %4549 = vmatprep.subr.bf16.mxu0 %v3162_v13  ;;  %v10257_v42 = vpack.c.bf16 %v2755_v46, %v2739_v29 }
 0x4df   : > { %4436 = vmatpush1.bf16.msra.mxu1 %v12308_v47  ;;  %4550 = vmatpush1.bf16.msra.mxu0 %v3161_v63  ;;  %v3095_v3 = vpop.permute.xlu0 %3094  ;;  %v10304_v63 = vpop.f32.mrf.mxu0 }
 0x4e0   : > { %v10228_v23 = vpop.permute.xlu1 %3096  ;;  %4437 = vmatprep.subr.bf16.mxu1 %v9621_v9  ;;  %v3146_v11 = vsel %vm604_vm7, %v10099_v18, %v3095_v3  ;;  %v12309_v9 = vld [vmem:[#allocation23_spill] sm:$0xff]  ;;  %v2723_v18 = vmax.f32 %v2680_v6, 0.0  ;;  %12310 = vst [vmem:[#allocation13_spill] sm:$0xff] %v10304_v63 }
 0x4e1   : > { %3728 = vrot.lane.b32.xlu0 %v10156_v56, %s7124_s28  ;;  %v3147_v15 = vsel %vm604_vm7, %v3095_v3, %v10228_v23  ;;  %v10316_v3 = vpop.f32.mrf.mxu0 }
 0x4e2   : > { %3730 = vrot.lane.b32.xlu1 %v10158_v59, %s7124_s28  ;;  %4551 = vmatprep.subr.bf16.mxu0 %v3147_v15  ;;  %v10259_v36 = vpack.c.bf16 %v2723_v18, %v2707_v32  ;;  %12311 = vst [vmem:[#allocation9_spill] sm:$0xff] %v10316_v3 }
 0x4e3   : > { %4438 = vmatpush1.bf16.msra.mxu1 %v12309_v9  ;;  %4552 = vmatpush1.bf16.msra.mxu0 %v3146_v11  ;;  %v3001_v20 = vpop.permute.xlu0 %3000  ;;  %v10330_v28 = vpop.f32.mrf.mxu0 }
 0x4e4   : > { %v10244_v35 = vpop.permute.xlu1 %3002  ;;  %v3035_v33 = vsel %vm553_vm6, %v10118_v4, %v3001_v20  ;;  %6859 = vmatmul.mubr.msk.bf16.gmra.mxu0 %vm3921_vm12, %v10138_v52  ;;  %12313 = vst [vmem:[#allocation5_spill] sm:$0xff] %v10330_v28 }
 0x4e5   : > { %2846 = vrot.lane.b32.xlu0 %v10156_v56, %s7132_s17  ;;  %v3036_v1 = vsel %vm553_vm6, %v3001_v20, %v10244_v35  ;;  %4538 = vmatprep.mubr.bf16.mxu0 %v12273_v51 }
 0x4e6   : > { %2848 = vrot.lane.b32.xlu1 %v10158_v59, %s7132_s17  ;;  %4553 = vmatprep.subr.bf16.mxu0 %v3036_v1 }
 0x4e7   : > { %4554 = vmatpush1.bf16.msra.mxu0 %v3035_v33  ;;  %v3627_v4 = vpop.permute.xlu0 %3626  ;;  %v10348_v33 = vpop.f32.mrf.mxu0 }
 0x4e8   : > { %v10261_v39 = vpop.permute.xlu1 %3628  ;;  %v3663_v19 = vsel %vm815_vm3, %v9922_v55, %v3627_v4  ;;  %12316 = vst [vmem:[#allocation2_spill] sm:$0xff] %v10348_v33 }
 0x4e9   : > { %3134 = vrot.lane.b32.xlu0 %v10257_v42, %s7130_s16  ;;  %v3664_v22 = vsel %vm815_vm3, %v3627_v4, %v10261_v39 }
 0x4ea   : > { %3102 = vrot.lane.b32.xlu1 %v10259_v36, %s7130_s16  ;;  %4439 = vmatprep.subr.bf16.mxu1 %v3664_v22  ;;  %s413_s16 = scalar_lea.vmem %s12185_s12, %s6780_s19 }
 0x4eb   : > { %4440 = vmatpush2.bf16.msra.mxu1 %v3663_v19  ;;  %v2969_v49 = vpop.permute.xlu0 %2968 }
 0x4ec   : > { %v10271_v57 = vpop.permute.xlu1 %2970  ;;  %v3020_v62 = vsel %vm553_vm6, %v10144_v53, %v2969_v49  ;;  %6860 = vmatmul.mubr.msk.bf16.gmra.mxu0 %vm3921_vm12, %v10173_v7 }
 0x4ed   : > { %3008 = vrot.lane.b32.xlu0 %v10257_v42, %s7129_s15  ;;  %v3021_v55 = vsel %vm553_vm6, %v2969_v49, %v10271_v57  ;;  %4581 = vmatprep.mubr.bf16.mxu0 %v9947_v21 }
 0x4ee   : > { %3634 = vrot.lane.b32.xlu1 %v10132_v34, %s7126_s30  ;;  %4555 = vmatprep.subr.bf16.mxu0 %v3021_v55 }
 0x4ef   : > { %4556 = vmatpush1.bf16.msra.mxu0 %v3020_v62  ;;  %v3595_v8 = vpop.permute.xlu0 %3594 }
 0x4f0   : > { %v10284_v37 = vpop.permute.xlu1 %3596  ;;  %v3648_v53 = vsel %vm815_vm3, %v9956_v60, %v3595_v8 }
 0x4f1   : > { %3636 = vrot.lane.b32.xlu0 %v10142_v48, %s7126_s30  ;;  %v3649_v45 = vsel %vm815_vm3, %v3595_v8, %v10284_v37 }
 0x4f2   : > { %2976 = vrot.lane.b32.xlu1 %v10259_v36, %s7129_s15  ;;  %4441 = vmatprep.subr.bf16.mxu1 %v3649_v45 }
 0x4f3   : > { %4442 = vmatpush2.bf16.msra.mxu1 %v3648_v53  ;;  %v2875_v21 = vpop.permute.xlu0 %2874 }
 0x4f4   : > { %v10294_v50 = vpop.permute.xlu1 %2876  ;;  %v2909_v5 = vsel %vm502_vm8, %v10177_v24, %v2875_v21 }
 0x4f5   : > { %3602 = vrot.lane.b32.xlu0 %v10156_v56, %s7126_s30  ;;  %v2910_v60 = vsel %vm502_vm8, %v2875_v21, %v10294_v50 }
 0x4f6   : > { %3604 = vrot.lane.b32.xlu1 %v10158_v59, %s7126_s30  ;;  %4557 = vmatprep.subr.bf16.mxu0 %v2910_v60 }
 0x4f7   : > { %4558 = vmatpush1.bf16.msra.mxu0 %v2909_v5  ;;  %v3501_v41 = vpop.permute.xlu0 %3500 }
 0x4f8   : > { %v10306_v13 = vpop.permute.xlu1 %3502  ;;  %v3537_v14 = vsel %vm761_vm2, %v9977_v2, %v3501_v41 }
 0x4f9   : > { %2882 = vrot.lane.b32.xlu0 %v10257_v42, %s7132_s17  ;;  %v3538_v24 = vsel %vm761_vm2, %v3501_v41, %v10306_v13 }
 0x4fa   : > { %3508 = vrot.lane.b32.xlu1 %v10132_v34, %s7125_s29  ;;  %4443 = vmatprep.subr.bf16.mxu1 %v3538_v24 }
 0x4fb   : > { %4444 = vmatpush2.bf16.msra.mxu1 %v3537_v14  ;;  %v2843_v47 = vpop.permute.xlu0 %2842 }
 0x4fc   : > { %v10318_v6 = vpop.permute.xlu1 %2844  ;;  %v2894_v11 = vsel %vm502_vm8, %v10200_v31, %v2843_v47 }
 0x4fd   : > { %3510 = vrot.lane.b32.xlu0 %v10142_v48, %s7125_s29  ;;  %v2895_v2 = vsel %vm502_vm8, %v2843_v47, %v10318_v6 }
 0x4fe   : > { %2850 = vrot.lane.b32.xlu1 %v10259_v36, %s7132_s17  ;;  %4559 = vmatprep.subr.bf16.mxu0 %v2895_v2  ;;  %v10328_v0 = vpop.f32.mrf.mxu1 }
 0x4ff   : > { %12312 = vst [vmem:[#allocation7_spill] sm:$0xff] %v10328_v0  ;;  %4560 = vmatpush1.bf16.msra.mxu0 %v2894_v11  ;;  %v3469_v15 = vpop.permute.xlu0 %3468 }
 0x500   : > { %v10332_v46 = vpop.permute.xlu1 %3470  ;;  %4561 = vmatprep.subr.bf16.mxu0 %v9769_v17  ;;  %v3522_v31 = vsel %vm761_vm2, %v9989_v44, %v3469_v15  ;;  %v10337_v9 = vpop.f32.mrf.mxu1 }
 0x501   : > { %12314 = vst [vmem:[#allocation4_spill] sm:$0xff] %v10337_v9  ;;  %3476 = vrot.lane.b32.xlu0 %v10156_v56, %s7125_s29  ;;  %v3523_v20 = vsel %vm761_vm2, %v3469_v15, %v10332_v46 }
 0x502   : > { %3478 = vrot.lane.b32.xlu1 %v10158_v59, %s7125_s29  ;;  %4445 = vmatprep.subr.bf16.mxu1 %v3523_v20  ;;  %v10345_v18 = vpop.f32.mrf.mxu1 }
 0x503   : > { %12315 = vst [vmem:[#allocation21_spill] sm:$0xff] %v10345_v18  ;;  %4446 = vmatpush2.bf16.msra.mxu1 %v3522_v31  ;;  %4562 = vmatpush1.bf16.msra.mxu0 %v9603_v12  ;;  %v3375_v17 = vpop.permute.xlu0 %3374  ;;  %v10363_v12 = vpop.f32.mrf.mxu0 }
 0x504   : > { %v10350_v44 = vpop.permute.xlu1 %3376  ;;  %4563 = vmatprep.subr.bf16.mxu0 %v9796_v16  ;;  %v3411_v29 = vsel %vm706_vm5, %v9999_v40, %v3375_v17  ;;  %v10355_v1 = vpop.f32.mrf.mxu1  ;;  %12318 = vst [vmem:[#allocation3_spill] sm:$0xff] %v10363_v12 }
 0x505   : > { %12317 = vst [vmem:[#allocation18_spill] sm:$0xff] %v10355_v1  ;;  %3382 = vrot.lane.b32.xlu0 %v10132_v34, %s7128_s14  ;;  %v3412_v32 = vsel %vm706_vm5, %v3375_v17, %v10350_v44  ;;  %v10380_v62 = vpop.f32.mrf.mxu0  ;;  %v3842_v1 = vld [vmem:[%s12179_s6 + $0x10] sm:$0xff] }
 0x506   : > { %3384 = vrot.lane.b32.xlu1 %v10142_v48, %s7128_s14  ;;  %4447 = vmatprep.subr.bf16.mxu1 %v3412_v32  ;;  %v10365_v4 = vpop.f32.mrf.mxu1  ;;  %12320 = vst [vmem:[#allocation19_spill] sm:$0xff] %v10380_v62 }
 0x507   : > { %12319 = vst [vmem:[#allocation16_spill] sm:$0xff] %v10365_v4  ;;  %4448 = vmatpush2.bf16.msra.mxu1 %v3411_v29  ;;  %4564 = vmatpush1.bf16.msra.mxu0 %v9626_v30  ;;  %v3343_v16 = vpop.permute.xlu0 %3342  ;;  %v10396_v21 = vpop.f32.mrf.mxu0 }
 0x508   : > { %v10368_v40 = vpop.permute.xlu1 %3344  ;;  %v3396_v19 = vsel %vm706_vm5, %v10013_v26, %v3343_v16  ;;  %v10372_v22 = vpop.f32.mrf.mxu1  ;;  %12322 = vst [vmem:[#allocation26_spill] sm:$0xff] %v10396_v21 }
 0x509   : > { %3350 = vrot.lane.b32.xlu0 %v10156_v56, %s7128_s14  ;;  %v3397_v49 = vsel %vm706_vm5, %v3343_v16, %v10368_v40  ;;  %v10412_v47 = vpop.f32.mrf.mxu0 }
 0x50a   : > { %3352 = vrot.lane.b32.xlu1 %v10158_v59, %s7128_s14  ;;  %4449 = vmatprep.subr.bf16.mxu1 %v3397_v49  ;;  %v10382_v30 = vpop.f32.mrf.mxu1  ;;  %12324 = vst [vmem:[#allocation29_spill] sm:$0xff] %v10412_v47 }
 0x50b   : > { %12321 = vst [vmem:[#allocation25_spill] sm:$0xff] %v10382_v30  ;;  %4450 = vmatpush2.bf16.msra.mxu1 %v3396_v19  ;;  %v3631_v55 = vpop.permute.xlu0 %3630  ;;  %v10428_v17 = vpop.f32.mrf.mxu0  ;;  %v5019_v30 = vld [vmem:[%s12180_s7 + $0x10] sm:$0xff] }
 0x50c   : > { %v10384_v8 = vpop.permute.xlu1 %3632  ;;  %v3665_v26 = vsel %vm815_vm3, %v10261_v39, %v3631_v55  ;;  %v10388_v53 = vpop.f32.mrf.mxu1 }
 0x50d   : > { %3638 = vrot.lane.b32.xlu0 %v10257_v42, %s7126_s30  ;;  %v3666_v45 = vsel %vm815_vm3, %v3631_v55, %v10384_v8  ;;  %v10442_v55 = vpop.f32.mrf.mxu0 }
 0x50e   : > { %3256 = vrot.lane.b32.xlu1 %v10132_v34, %s7127_s13  ;;  %4565 = vmatprep.subr.bf16.mxu0 %v3666_v45  ;;  %v10398_v5 = vpop.f32.mrf.mxu1  ;;  %12327 = vst [vmem:[#allocation10_spill] sm:$0xff] %v10442_v55 }
 0x50f   : > { %4566 = vmatpush2.bf16.msra.mxu0 %v3665_v26  ;;  %v3249_v60 = vpop.permute.xlu0 %3248 }
 0x510   : > { %v10400_v41 = vpop.permute.xlu1 %3250  ;;  %v3285_v39 = vsel %vm655_vm4, %v10025_v25, %v3249_v60  ;;  %v10404_v14 = vpop.f32.mrf.mxu1 }
 0x511   : > { %12323 = vst [vmem:[#allocation27_spill] sm:$0xff] %v10404_v14  ;;  %3258 = vrot.lane.b32.xlu0 %v10142_v48, %s7127_s13  ;;  %v3286_v24 = vsel %vm655_vm4, %v3249_v60, %v10400_v41 }
 0x512   : > { %3606 = vrot.lane.b32.xlu1 %v10259_v36, %s7126_s30  ;;  %4451 = vmatprep.subr.bf16.mxu1 %v3286_v24  ;;  %v10414_v11 = vpop.f32.mrf.mxu1  ;;  %s7138_s30 = smov 96  }
 0x513   : > { %4452 = vmatpush2.bf16.msra.mxu1 %v3285_v39  ;;  %v3599_v2 = vpop.permute.xlu0 %3598 }
 0x514   : > { %v10416_v15 = vpop.permute.xlu1 %3600  ;;  %v3650_v25 = vsel %vm815_vm3, %v10284_v37, %v3599_v2  ;;  %v10420_v31 = vpop.f32.mrf.mxu1 }
 0x515   : > { %12325 = vst [vmem:[#allocation28_spill] sm:$0xff] %v10420_v31  ;;  %3224 = vrot.lane.b32.xlu0 %v10156_v56, %s7127_s13  ;;  %v3651_v20 = vsel %vm815_vm3, %v3599_v2, %v10416_v15  ;;  %v10459_v2 = vld [vmem:[%s12178_s5] ss:$12 sps:$4 sm:$0xff]  }
 0x516   : > { %3226 = vrot.lane.b32.xlu1 %v10158_v59, %s7127_s13  ;;  %4567 = vmatprep.subr.bf16.mxu0 %v3651_v20  ;;  %v10430_v29 = vpop.f32.mrf.mxu1 }
 0x517   : > { %12326 = vst [vmem:[#allocation14_spill] sm:$0xff] %v10430_v29  ;;  %4568 = vmatpush2.bf16.msra.mxu0 %v3650_v25  ;;  %v3217_v32 = vpop.permute.xlu0 %3216  ;;  %v10462_v25 = vpop.f32.mrf.mxu0 }
 0x518   : > { %v10432_v16 = vpop.permute.xlu1 %3218  ;;  %v3270_v37 = vsel %vm655_vm4, %v10055_v43, %v3217_v32  ;;  %v4150_v19 = vpop.f32.mrf.mxu1 }
 0x519   : > { %3512 = vrot.lane.b32.xlu0 %v10257_v42, %s7125_s29  ;;  %v3271_v49 = vsel %vm655_vm4, %v3217_v32, %v10432_v16 }
 0x51a   : > { %3480 = vrot.lane.b32.xlu1 %v10259_v36, %s7125_s29  ;;  %4453 = vmatprep.subr.bf16.mxu1 %v3271_v49  ;;  %v10444_v26 = vpop.f32.mrf.mxu1 }
 0x51b   : > { %12328 = vst [vmem:[#allocation17_spill] sm:$0xff] %v10444_v26  ;;  %4454 = vmatpush2.bf16.msra.mxu1 %v3270_v37  ;;  %v3505_v45 = vpop.permute.xlu0 %3504 }
 0x51c   : > { %v10446_v60 = vpop.permute.xlu1 %3506  ;;  %v4153_v43 = vpop.f32.mrf.mxu1  ;;  %v3539_v24 = vsel %vm761_vm2, %v10306_v13, %v3505_v45  ;;  %v10469_v13 = vld [vmem:[%s12178_s5 + $0x1c] ss:$12 sps:$4 sm:$0xff]  }
 0x51d   : > { %3386 = vrot.lane.b32.xlu0 %v10257_v42, %s7128_s14  ;;  %v3540_v39 = vsel %vm761_vm2, %v3505_v45, %v10446_v60  ;;  %v10482_v43 = vpop.f32.mrf.mxu0 }
 0x51e   : > { %3354 = vrot.lane.b32.xlu1 %v10259_v36, %s7128_s14  ;;  %4456 = vmatmul.mubr.bf16.vlgmr.msra.gmra.mxu1 %v10459_v2  ;;  %v10464_v20 = vpop.f32.mrf.mxu1  ;;  %12330 = vst [vmem:[#allocation11_spill] sm:$0xff] %v10482_v43 }
 0x51f   : > { %12329 = vst [vmem:[#allocation8_spill] sm:$0xff] %v10464_v20  ;;  %4569 = vmatprep.subr.bf16.mxu0 %v3540_v39  ;;  %v3473_v32 = vpop.permute.xlu0 %3472  ;;  %4465 = vmatprep.mubr.bf16.mxu1 %v10469_v13 }
 0x520   : > { %4570 = vmatpush2.bf16.msra.mxu0 %v3539_v24  ;;  %v10472_v37 = vpop.permute.xlu1 %3474  ;;  %v4158_v19 = vpop.f32.mrf.mxu1  ;;  %v3524_v45 = vsel %vm761_vm2, %v10332_v46, %v3473_v32 }
 0x521   : > { %3260 = vrot.lane.b32.xlu0 %v10257_v42, %s7127_s13  ;;  %v3525_v49 = vsel %vm761_vm2, %v3473_v32, %v10472_v37  ;;  %v10499_v32 = vld [vmem:[%s12178_s5 + $0x18] ss:$12 sps:$4 sm:$0xff]  }
 0x522   : > { %3764 = vrot.lane.b32.xlu1 %v10257_v42, %s7124_s28  ;;  %4571 = vmatprep.subr.bf16.mxu0 %v3525_v49  ;;  %v10484_v39 = vpop.f32.mrf.mxu1 }
 0x523   : > { %12331 = vst [vmem:[#allocation6_spill] sm:$0xff] %v10484_v39  ;;  %v3379_v24 = vpop.permute.xlu0 %3378 }
 0x524   : > { %4572 = vmatpush2.bf16.msra.mxu0 %v3524_v45  ;;  %v10486_v19 = vpop.permute.xlu1 %3380  ;;  %v4161_v26 = vpop.f32.mrf.mxu1  ;;  %v3413_v46 = vsel %vm706_vm5, %v10350_v44, %v3379_v24  ;;  %v3841_v44 = vld [vmem:[%s12179_s6 + $0x8] sm:$0xff] }
 0x525   : > { %3228 = vrot.lane.b32.xlu0 %v10259_v36, %s7127_s13  ;;  %v3414_v29 = vsel %vm706_vm5, %v3379_v24, %v10486_v19  ;;  %v3840_v26 = vld [vmem:[%s12179_s6] sm:$0xff]  ;;  %s7139_s13 = smov 64  }
 0x526   : > { %3732 = vrot.lane.b32.xlu1 %v10259_v36, %s7124_s28  ;;  %4466 = vmatmul.mubr.bf16.gmra.mxu1 %v10499_v32  ;;  %v10505_v49 = vpop.f32.mrf.mxu0  ;;  %v10513_v24 = vld [vmem:[%s12178_s5 + $0x34] ss:$12 sps:$4 sm:$0xff]   ;;  %s7135_s28 = smov 90  }
 0x527   : > { %12332 = vst [vmem:[#allocation30_spill] sm:$0xff] %v10505_v49  ;;  %4573 = vmatprep.subr.bf16.mxu0 %v3414_v29  ;;  %v3347_v45 = vpop.permute.xlu0 %3346  ;;  %4475 = vmatprep.mubr.bf16.mxu1 %v10513_v24 }
 0x528   : > { %4574 = vmatpush2.bf16.msra.mxu0 %v3413_v46  ;;  %v10516_v33 = vpop.permute.xlu1 %3348  ;;  %v4093_v3 = vpop.f32.mrf.mxu0  ;;  %v3398_v49 = vsel %vm706_vm5, %v10368_v40, %v3347_v45 }
 0x529   : > { %3848 = vperm.xlu0 %6978, %v3840_v26   ;;  %v3399_v29 = vsel %vm706_vm5, %v3347_v45, %v10516_v33  ;;  %v3843_v3 = vld [vmem:[%s12179_s6 + $0x18] sm:$0xff] }
 0x52a   : > { %3853 = vperm.xlu1 %6979, %v3841_v44   ;;  %4575 = vmatprep.subr.bf16.mxu0 %v3399_v29  ;;  %v10525_v9 = vpop.f32.mrf.mxu0  ;;  %v10527_v21 = vpop.f32.mrf.mxu1  ;;  %v10541_v29 = vld [vmem:[%s12178_s5 + $0x30] ss:$12 sps:$4 sm:$0xff]  }
 0x52b   : > { %12333 = vst [vmem:[#allocation22_spill] sm:$0xff] %v10525_v9  ;;  %12334 = vst [vmem:[#allocation15_spill] sm:$0xff] %v10527_v21  ;;  %v3253_v46 = vpop.permute.xlu0 %3252 }
 0x52c   : > { %4576 = vmatpush2.bf16.msra.mxu0 %v3398_v49  ;;  %v10532_v26 = vpop.permute.xlu1 %3254  ;;  %v4096_v12 = vpop.f32.mrf.mxu0  ;;  %v3287_v45 = vsel %vm655_vm4, %v10400_v41, %v3253_v46  ;;  %v5018_v41 = vld [vmem:[%s12180_s7 + $0x8] sm:$0xff] }
 0x52d   : > { %3858 = vperm.xlu0 %6978, %v3842_v1   ;;  %v3288_v40 = vsel %vm655_vm4, %v3253_v46, %v10532_v26  ;;  %v4166_v44 = vpop.f32.mrf.mxu1  ;;  %v5017_v12 = vld [vmem:[%s12180_s7] sm:$0xff] }
 0x52e   : > { %3863 = vperm.xlu1 %6979, %v3843_v3   ;;  %4476 = vmatmul.mubr.bf16.gmra.mxu1 %v10541_v29  ;;  %v10547_v1 = vpop.f32.mrf.mxu0 }
 0x52f   : > { %12335 = vst [vmem:[#allocation20_spill] sm:$0xff] %v10547_v1  ;;  %4577 = vmatprep.subr.bf16.mxu0 %v3288_v40  ;;  %v3757_v49 = vpop.permute.xlu0 %3756  ;;  %4644 = vmatprep.mubr.bf16.mxu1 %v12273_v51  ;;  %v10553_v46 = vpop.f32.mrf.mxu1 }
 0x530   : > { %12336 = vst [vmem:[#allocation12_spill] sm:$0xff] %v10553_v46  ;;  %4578 = vmatpush2.bf16.msra.mxu0 %v3287_v45  ;;  %v10555_v3 = vpop.permute.xlu1 %3758  ;;  %v3791_v44 = vsel %vm869_vm0, %v10160_v54, %v3757_v49  ;;  %v4101_v21 = vpop.f32.mrf.mxu0  ;;  %v5020_v54 = vld [vmem:[%s12180_s7 + $0x18] sm:$0xff]  ;;  %v3845_v46 = vld [vmem:[%s12179_s6 + $0x28] sm:$0xff] }
 0x531   : > { %5025 = vperm.xlu0 %6978, %v5017_v12   ;;  %v3792_v40 = vsel %vm869_vm0, %v3757_v49, %v10555_v3  ;;  %v4169_v9 = vpop.f32.mrf.mxu1 }
 0x532   : > { %5030 = vperm.xlu1 %6979, %v5018_v41   ;;  %4624 = vmatprep.subr.bf16.mxu1 %v3792_v40  ;;  %v10564_v4 = vpop.f32.mrf.mxu0  ;;  %v3844_v41 = vld [vmem:[%s12179_s6 + $0x20] sm:$0xff] }
 0x533   : > { %12337 = vst [vmem:[#allocation24_spill] sm:$0xff] %v10564_v4  ;;  %4625 = vmatpush1.bf16.msra.mxu1 %v3791_v44  ;;  %v3221_v45 = vpop.permute.xlu0 %3220 }
 0x534   : > { %v10569_v21 = vpop.permute.xlu1 %3222  ;;  %v3272_v12 = vsel %vm655_vm4, %v10432_v16, %v3221_v45  ;;  %v4104_v9 = vpop.f32.mrf.mxu0 }
 0x535   : > { %5035 = vperm.xlu0 %6978, %v5019_v30   ;;  %v3273_v49 = vsel %vm655_vm4, %v3221_v45, %v10569_v21 }
 0x536   : > { %5040 = vperm.xlu1 %6979, %v5020_v54   ;;  %4579 = vmatprep.subr.bf16.mxu0 %v3273_v49  ;;  %v10578_v44 = vpop.f32.mrf.mxu0 }
 0x537   : > { %12338 = vst [vmem:[#allocation23_spill] sm:$0xff] %v10578_v44  ;;  %4580 = vmatpush2.bf16.msra.mxu0 %v3272_v12  ;;  %v3725_v40 = vpop.permute.xlu0 %3724  ;;  %v5021_v12 = vld [vmem:[%s12180_s7 + $0x20] sm:$0xff] }
 0x538   : > { %v10583_v16 = vpop.permute.xlu1 %3726  ;;  %v4109_v30 = vpop.f32.mrf.mxu0  ;;  %v3776_v54 = vsel %vm869_vm0, %v10190_v27, %v3725_v40 }
 0x539   : > { %3868 = vperm.xlu0 %6978, %v3844_v41   ;;  %v3777_v45 = vsel %vm869_vm0, %v3725_v40, %v10583_v16  ;;  %v5022_v41 = vld [vmem:[%s12180_s7 + $0x28] sm:$0xff] }
 0x53a   : > { %3873 = vperm.xlu1 %6979, %v3845_v46   ;;  %4582 = vmatmul.mubr.bf16.vlgmr.msra.gmra.mxu0 %v10459_v2  ;;  %v10593_v9 = vpop.f32.mrf.mxu0 }
 0x53b   : > { %12339 = vst [vmem:[#allocation31_spill] sm:$0xff] %v10593_v9  ;;  %4626 = vmatprep.subr.bf16.mxu1 %v3777_v45  ;;  %v3131_v49 = vpop.permute.xlu0 %3130  ;;  %4591 = vmatprep.mubr.bf16.mxu0 %v10469_v13 }
 0x53c   : > { %4627 = vmatpush1.bf16.msra.mxu1 %v3776_v54  ;;  %v10599_v30 = vpop.permute.xlu1 %3132  ;;  %v4112_v27 = vpop.f32.mrf.mxu0  ;;  %v3163_v40 = vsel %vm604_vm7, %v10212_v10, %v3131_v49 }
 0x53d   : > { %5045 = vperm.xlu0 %6978, %v5021_v12   ;;  %v3164_v46 = vsel %vm604_vm7, %v3131_v49, %v10599_v30 }
 0x53e   : > { %5050 = vperm.xlu1 %6979, %v5022_v41   ;;  %4675 = vmatprep.subr.bf16.mxu1 %v3164_v46 }
 0x53f   : > { %6861 = vmatmul.mubr.msk.bf16.vlgmr.msra.gmra.mxu1 %vm3921_vm12, %v10093_v38  ;;  %v3099_v45 = vpop.permute.xlu0 %3098 }
 0x540   : > { %4676 = vmatpush1.bf16.msra.mxu1 %v3163_v40  ;;  %v10607_v9 = vpop.permute.xlu1 %3100  ;;  %4654 = vmatprep.mubr.bf16.mxu1 %v12273_v51  ;;  %v3148_v12 = vsel %vm604_vm7, %v10228_v23, %v3099_v45 }
 0x541   : > { %v3149_v54 = vsel %vm604_vm7, %v3099_v45, %v10607_v9 }
 0x542   : > { %4592 = vmatmul.mubr.bf16.gmra.mxu0 %v10499_v32  ;;  %4677 = vmatprep.subr.bf16.mxu1 %v3149_v54 }
 0x543   : > { %v3005_v10 = vpop.permute.xlu0 %3004  ;;  %4601 = vmatprep.mubr.bf16.mxu0 %v10513_v24 }
 0x544   : > { %4678 = vmatpush1.bf16.msra.mxu1 %v3148_v12  ;;  %v10616_v49 = vpop.permute.xlu1 %3006  ;;  %v3037_v27 = vsel %vm553_vm6, %v10244_v35, %v3005_v10 }
 0x545   : > { %v3038_v41 = vsel %vm553_vm6, %v3005_v10, %v10616_v49 }
 0x546   : > { %4679 = vmatprep.subr.bf16.mxu1 %v3038_v41 }
 0x547   : > { %6862 = vmatmul.mubr.msk.bf16.gmra.mxu1 %vm3921_vm12, %v10138_v52  ;;  %v2973_v23 = vpop.permute.xlu0 %2972 }
 0x548   : > { %4680 = vmatpush1.bf16.msra.mxu1 %v3037_v27  ;;  %v10624_v46 = vpop.permute.xlu1 %2974  ;;  %4664 = vmatprep.mubr.bf16.mxu1 %v12273_v51  ;;  %v3022_v45 = vsel %vm553_vm6, %v10271_v57, %v2973_v23 }
 0x549   : > { %v3023_v40 = vsel %vm553_vm6, %v2973_v23, %v10624_v46  ;;  %v10648_v23 = vld [vmem:[%s12178_s5 + $0x4] ss:$12 sps:$4 sm:$0xff]  }
 0x54a   : > { %4602 = vmatmul.mubr.bf16.gmra.mxu0 %v10541_v29  ;;  %4681 = vmatprep.subr.bf16.mxu1 %v3023_v40 }
 0x54b   : > { %v3761_v35 = vpop.permute.xlu0 %3760  ;;  %4770 = vmatprep.mubr.bf16.mxu0 %v12273_v51 }
 0x54c   : > { %4682 = vmatpush1.bf16.msra.mxu1 %v3022_v45  ;;  %v10633_v54 = vpop.permute.xlu1 %3762  ;;  %v3793_v12 = vsel %vm869_vm0, %v10555_v3, %v3761_v35 }
 0x54d   : > { %v3794_v10 = vsel %vm869_vm0, %v3761_v35, %v10633_v54 }
 0x54e   : > { %4750 = vmatprep.subr.bf16.mxu0 %v3794_v10 }
 0x54f   : > { %6863 = vmatmul.mubr.msk.bf16.gmra.mxu1 %vm3921_vm12, %v10173_v7  ;;  %4751 = vmatpush1.bf16.msra.mxu0 %v3793_v12  ;;  %v2879_v57 = vpop.permute.xlu0 %2878 }
 0x550   : > { %v10641_v41 = vpop.permute.xlu1 %2880  ;;  %v2911_v27 = vsel %vm502_vm8, %v10294_v50, %v2879_v57  ;;  %4707 = vmatprep.mubr.bf16.mxu1 %v10648_v23 }
 0x551   : > { %v2912_v3 = vsel %vm502_vm8, %v2879_v57, %v10641_v41 }
 0x552   : > { %4683 = vmatprep.subr.bf16.mxu1 %v2912_v3 }
 0x553   : > { %4684 = vmatpush1.bf16.msra.mxu1 %v2911_v27  ;;  %v3729_v40 = vpop.permute.xlu0 %3728  ;;  %v10667_v27 = vpop.f32.mrf.mxu0 }
 0x554   : > { %v10653_v45 = vpop.permute.xlu1 %3730  ;;  %v3778_v35 = vsel %vm869_vm0, %v10583_v16, %v3729_v40 }
 0x555   : > { %v3779_v50 = vsel %vm869_vm0, %v3729_v40, %v10653_v45 }
 0x556   : > { %4752 = vmatprep.subr.bf16.mxu0 %v3779_v50 }
 0x557   : > { %4753 = vmatpush1.bf16.msra.mxu0 %v3778_v35  ;;  %v2847_v12 = vpop.permute.xlu0 %2846 }
 0x558   : > { %v10659_v10 = vpop.permute.xlu1 %2848  ;;  %v2896_v44 = vsel %vm502_vm8, %v10318_v6, %v2847_v12 }
 0x559   : > { %v2897_v57 = vsel %vm502_vm8, %v2847_v12, %v10659_v10 }
 0x55a   : > { %4685 = vmatprep.subr.bf16.mxu1 %v2897_v57  ;;  %6864 = vmatmul.mubr.msk.bf16.vlgmr.msra.gmra.mxu0 %vm3921_vm12, %v10093_v38 }
 0x55b   : > { %4686 = vmatpush1.bf16.msra.mxu1 %v2896_v44  ;;  %v3135_v16 = vpop.permute.xlu0 %3134  ;;  %4780 = vmatprep.mubr.bf16.mxu0 %v12273_v51  ;;  %v10676_v44 = vpop.f32.mrf.mxu0 }
 0x55c   : > { %v3103_v3 = vpop.permute.xlu1 %3102  ;;  %4687 = vmatprep.subr.bf16.mxu1 %v10132_v34  ;;  %4801 = vmatprep.subr.bf16.mxu0 %v3135_v16  ;;  %v3165_v6 = vsel %vm604_vm7, %v10599_v30, %v3135_v16 }
 0x55d   : > { %4802 = vmatpush1.bf16.msra.mxu0 %v3165_v6  ;;  %v3150_v50 = vsel %vm604_vm7, %v10607_v9, %v3103_v3  ;;  %vm5940_vm7 = vcmask 785408  }
 0x55e   : > { %4803 = vmatprep.subr.bf16.mxu0 %v3103_v3  ;;  %v10673_v40 = vpop.f32.mrf.mxu1 }
 0x55f   : > { %4688 = vmatpush1.bf16.msra.mxu1 %v9779_v58  ;;  %v3009_v38 = vpop.permute.xlu0 %3008  ;;  %v10688_v58 = vpop.f32.mrf.mxu0 }
 0x560   : > { %v3635_v35 = vpop.permute.xlu1 %3634  ;;  %4689 = vmatprep.subr.bf16.mxu1 %v10156_v56  ;;  %v10681_v34 = vpop.f32.mrf.mxu1  ;;  %v3039_v9 = vsel %vm553_vm6, %v10616_v49, %v3009_v38 }
 0x561   : > { %4804 = vmatpush1.bf16.msra.mxu0 %v3150_v50  ;;  %v10699_v16 = vpop.f32.mrf.mxu0 }
 0x562   : > { %4805 = vmatprep.subr.bf16.mxu0 %v3009_v38  ;;  %6865 = vmatmul.mubr.msk.bf16.gmra.mxu0 %vm3921_vm12, %v10138_v52  ;;  %v10695_v57 = vpop.f32.mrf.mxu1 }
 0x563   : > { %4690 = vmatpush1.bf16.msra.mxu1 %v9800_v61  ;;  %v10686_v30 = vpop.permute.xlu0 %3636  ;;  %4790 = vmatprep.mubr.bf16.mxu0 %v12273_v51  ;;  %v3667_v61 = vsel %vm815_vm3, %v10384_v8, %v3635_v35  ;;  %v10711_v8 = vpop.f32.mrf.mxu0 }
 0x564   : > { %v2977_v12 = vpop.permute.xlu1 %2976  ;;  %v3668_v56 = vsel %vm815_vm3, %v3635_v35, %v10686_v30  ;;  %v10707_v38 = vpop.f32.mrf.mxu1 }
 0x565   : > { %4691 = vmatprep.subr.bf16.mxu1 %v3668_v56  ;;  %4806 = vmatpush1.bf16.msra.mxu0 %v3039_v9  ;;  %v3024_v6 = vsel %vm553_vm6, %v10624_v46, %v2977_v12  ;;  %v10720_v56 = vpop.f32.mrf.mxu0 }
 0x566   : > { %4807 = vmatprep.subr.bf16.mxu0 %v2977_v12  ;;  %v10718_v12 = vpop.f32.mrf.mxu1 }
 0x567   : > { %4692 = vmatpush2.bf16.msra.mxu1 %v3667_v61  ;;  %v3603_v52 = vpop.permute.xlu0 %3602 }
 0x568   : > { %v10701_v3 = vpop.permute.xlu1 %3604  ;;  %v3652_v49 = vsel %vm815_vm3, %v10416_v15, %v3603_v52 }
 0x569   : > { %v3653_v50 = vsel %vm815_vm3, %v3603_v52, %v10701_v3  ;;  %4808 = vmatpush1.bf16.msra.mxu0 %v3024_v6  ;;  %v10726_v52 = vpop.f32.mrf.mxu1  ;;  %v10732_v6 = vpop.f32.mrf.mxu0 }
 0x56a   : > { %4693 = vmatprep.subr.bf16.mxu1 %v3653_v50  ;;  %6866 = vmatmul.mubr.msk.bf16.gmra.mxu0 %vm3921_vm12, %v10173_v7 }
 0x56b   : > { %4694 = vmatpush2.bf16.msra.mxu1 %v3652_v49  ;;  %v2883_v35 = vpop.permute.xlu0 %2882  ;;  %4833 = vmatprep.mubr.bf16.mxu0 %v10648_v23 }
 0x56c   : > { %v3509_v46 = vpop.permute.xlu1 %3508  ;;  %4809 = vmatprep.subr.bf16.mxu0 %v2883_v35  ;;  %v2913_v15 = vsel %vm502_vm8, %v10641_v41, %v2883_v35 }
 0x56d   : > { %4810 = vmatpush1.bf16.msra.mxu0 %v2913_v15  ;;  %v3541_v41 = vsel %vm761_vm2, %v10446_v60, %v3509_v46  ;;  %v10739_v15 = vpop.f32.mrf.mxu1 }
 0x56f   : > { %v10722_v9 = vpop.permute.xlu0 %3510 }
 0x570   : > { %v2851_v61 = vpop.permute.xlu1 %2850  ;;  %v3542_v7 = vsel %vm761_vm2, %v3509_v46, %v10722_v9 }
 0x571   : > { %4811 = vmatprep.subr.bf16.mxu0 %v2851_v61  ;;  %4695 = vmatprep.subr.bf16.mxu1 %v3542_v7  ;;  %v2898_v23 = vsel %vm502_vm8, %v10659_v10, %v2851_v61  ;;  %v10743_v61 = vpop.f32.mrf.mxu0  ;;  %v10749_v7 = vpop.f32.mrf.mxu1  ;;  %vm5964_vm8 = vcmask 523264  }
 0x572   : > { %4812 = vmatpush1.bf16.msra.mxu0 %v2898_v23  ;;  %4696 = vmatpush2.bf16.msra.mxu1 %v3541_v41 }
 0x573   : > { %4813 = vmatprep.subr.bf16.mxu0 %v10257_v42  ;;  %v3477_v49 = vpop.permute.xlu0 %3476  ;;  %v10752_v23 = vpop.f32.mrf.mxu0 }
 0x574   : > { %v10735_v50 = vpop.permute.xlu1 %3478  ;;  %v3526_v35 = vsel %vm761_vm2, %v10472_v37, %v3477_v49 }
 0x575   : > { %v3527_v10 = vsel %vm761_vm2, %v3477_v49, %v10735_v50  ;;  %v10759_v49 = vpop.f32.mrf.mxu1 }
 0x576   : > { %4697 = vmatprep.subr.bf16.mxu1 %v3527_v10  ;;  %4814 = vmatpush1.bf16.msra.mxu0 %v10142_v48 }
 0x577   : > { %4698 = vmatpush2.bf16.msra.mxu1 %v3526_v35  ;;  %4815 = vmatprep.subr.bf16.mxu0 %v10259_v36  ;;  %v3383_v42 = vpop.permute.xlu0 %3382  ;;  %v10763_v35 = vpop.f32.mrf.mxu0 }
 0x578   : > { %v3385_v60 = vpop.permute.xlu1 %3384  ;;  %v3415_v46 = vsel %vm706_vm5, %v10486_v19, %v3383_v42 }
 0x579   : > { %v3416_v37 = vsel %vm706_vm5, %v3383_v42, %v3385_v60 }
 0x57a   : > { %4699 = vmatprep.subr.bf16.mxu1 %v3416_v37  ;;  %4816 = vmatpush1.bf16.msra.mxu0 %v10158_v59  ;;  %v10769_v37 = vpop.f32.mrf.mxu0 }
 0x57b   : > { %4700 = vmatpush2.bf16.msra.mxu1 %v3415_v46  ;;  %v3351_v41 = vpop.permute.xlu0 %3350  ;;  %v10767_v46 = vpop.f32.mrf.mxu1 }
 0x57c   : > { %v10755_v48 = vpop.permute.xlu1 %3352  ;;  %v3400_v36 = vsel %vm706_vm5, %v10516_v33, %v3351_v41 }
 0x57d   : > { %v3401_v19 = vsel %vm706_vm5, %v3351_v41, %v10755_v48  ;;  %v10772_v41 = vpop.f32.mrf.mxu1 }
 0x57e   : > { %4701 = vmatprep.subr.bf16.mxu1 %v3401_v19 }
 0x57f   : > { %4702 = vmatpush2.bf16.msra.mxu1 %v3400_v36  ;;  %v3639_v10 = vpop.permute.xlu0 %3638  ;;  %v10782_v0 = vpop.f32.mrf.mxu1 }
 0x580   : > { %v3257_v42 = vpop.permute.xlu1 %3256  ;;  %4817 = vmatprep.subr.bf16.mxu0 %v3639_v10  ;;  %v3669_v59 = vsel %vm815_vm3, %v10686_v30, %v3639_v10  ;;  %v10778_v30 = vpop.f32.mrf.mxu0 }
 0x581   : > { %4818 = vmatpush2.bf16.msra.mxu0 %v3669_v59  ;;  %v3289_v19 = vsel %vm655_vm4, %v10532_v26, %v3257_v42 }
 0x583   : > { %v3259_v33 = vpop.permute.xlu0 %3258 }
 0x584   : > { %v3607_v28 = vpop.permute.xlu1 %3606  ;;  %v3290_v63 = vsel %vm655_vm4, %v3257_v42, %v3259_v33  ;;  %v10787_v42 = vpop.f32.mrf.mxu1 }
 0x585   : > { %4819 = vmatprep.subr.bf16.mxu0 %v3607_v28  ;;  %4703 = vmatprep.subr.bf16.mxu1 %v3290_v63  ;;  %v3654_v36 = vsel %vm815_vm3, %v10701_v3, %v3607_v28  ;;  %v4331_v63 = vpop.f32.mrf.mxu0  ;;  %vm5330_vm3 = vcmask 1047552  }
 0x586   : > { %4820 = vmatpush2.bf16.msra.mxu0 %v3654_v36  ;;  %4704 = vmatpush2.bf16.msra.mxu1 %v3289_v19 }
 0x587   : > { %v3225_v10 = vpop.permute.xlu0 %3224  ;;  %v10789_v36 = vpop.f32.mrf.mxu0 }
 0x588   : > { %v3227_v59 = vpop.permute.xlu1 %3226  ;;  %v3274_v18 = vsel %vm655_vm4, %v10569_v21, %v3225_v10 }
 0x589   : > { %v3275_v55 = vsel %vm655_vm4, %v3225_v10, %v3227_v59  ;;  %v4335_v10 = vpop.f32.mrf.mxu0 }
 0x58a   : > { %4705 = vmatprep.subr.bf16.mxu1 %v3275_v55  ;;  %v10795_v55 = vpop.f32.mrf.mxu1 }
 0x58b   : > { %4706 = vmatpush2.bf16.msra.mxu1 %v3274_v18  ;;  %v3513_v28 = vpop.permute.xlu0 %3512  ;;  %v4337_v14 = vpop.f32.mrf.mxu0 }
 0x58c   : > { %v3481_v3 = vpop.permute.xlu1 %3480  ;;  %4821 = vmatprep.subr.bf16.mxu0 %v3513_v28  ;;  %v3543_v26 = vsel %vm761_vm2, %v10722_v9, %v3513_v28 }
 0x58d   : > { %4822 = vmatpush2.bf16.msra.mxu0 %v3543_v26  ;;  %v3528_v18 = vsel %vm761_vm2, %v10735_v50, %v3481_v3  ;;  %v4398_v26 = vpop.f32.mrf.mxu1 }
 0x58e   : > { %4708 = vmatmul.mubr.bf16.vlgmr.msra.gmra.mxu1 %v10459_v2  ;;  %4823 = vmatprep.subr.bf16.mxu0 %v3481_v3 }
 0x58f   : > { %4717 = vmatprep.mubr.bf16.mxu1 %v10469_v13  ;;  %v3387_v19 = vpop.permute.xlu0 %3386  ;;  %v10804_v31 = vpop.f32.mrf.mxu1 }
 0x590   : > { %v3355_v21 = vpop.permute.xlu1 %3354  ;;  %v3417_v28 = vsel %vm706_vm5, %v3385_v60, %v3387_v19 }
 0x591   : > { %4824 = vmatpush2.bf16.msra.mxu0 %v3528_v18  ;;  %v3402_v18 = vsel %vm706_vm5, %v10755_v48, %v3355_v21  ;;  %vm5299_vm5 = vcmask 113664  }
 0x592   : > { %4825 = vmatprep.subr.bf16.mxu0 %v3387_v19 }
 0x593   : > { %v3261_v50 = vpop.permute.xlu0 %3260 }
 0x594   : > { %v3765_v9 = vpop.permute.xlu1 %3764  ;;  %v3291_v19 = vsel %vm655_vm4, %v3259_v33, %v3261_v50 }
 0x595   : > { %4876 = vmatprep.subr.bf16.mxu1 %v3765_v9  ;;  %4826 = vmatpush2.bf16.msra.mxu0 %v3417_v28  ;;  %v3795_v43 = vsel %vm869_vm0, %v10633_v54, %v3765_v9  ;;  %v10808_v54 = vpop.f32.mrf.mxu0 }
 0x596   : > { %4718 = vmatmul.mubr.bf16.gmra.mxu1 %v10499_v32  ;;  %4827 = vmatprep.subr.bf16.mxu0 %v3355_v21 }
 0x597   : > { %4877 = vmatpush1.bf16.msra.mxu1 %v3795_v43  ;;  %4727 = vmatprep.mubr.bf16.mxu1 %v10513_v24  ;;  %v10811_v43 = vpop.f32.mrf.mxu1  ;;  %v3229_v9 = vpop.permute.xlu0 %3228 }
 0x598   : > { %v3733_v3 = vpop.permute.xlu1 %3732  ;;  %v10813_v28 = vpop.f32.mrf.mxu0  ;;  %v3276_v48 = vsel %vm655_vm4, %v3227_v59, %v3229_v9  ;;  %vm5331_vm4 = vsmask.f32 7424 }
 0x599   : > { %4878 = vmatprep.subr.bf16.mxu1 %v3733_v3  ;;  %4828 = vmatpush2.bf16.msra.mxu0 %v3402_v18  ;;  %v3780_v60 = vsel %vm869_vm0, %v10653_v45, %v3733_v3  ;;  %v10818_v45 = vpop.f32.mrf.mxu1  ;;  %vm5312_vm0 = vsmask.f32 2304  ;;  %vm11703_vm6 = vmand %vm5330_vm3, %vm5331_vm4 }
 0x59a   : > { %4829 = vmatprep.subr.bf16.mxu0 %v3261_v50  ;;  %v4345_v21 = vpop.f32.mrf.mxu0  ;;  %vm11408_vm2 = vmand %vm5311_vm15, %vm5312_vm0 }
 0x59b   : > { %4879 = vmatpush1.bf16.msra.mxu1 %v3780_v60  ;;  %v4408_v50 = vpop.f32.mrf.mxu1 }
 0x59c   : > { %v4347_v18 = vpop.f32.mrf.mxu0 }
 0x59d   : > { %4830 = vmatpush2.bf16.msra.mxu0 %v3291_v19 }
 0x59e   : > { %4728 = vmatmul.mubr.bf16.gmra.mxu1 %v10541_v29  ;;  %4831 = vmatprep.subr.bf16.mxu0 %v3229_v9 }
 0x59f   : > { %4896 = vmatprep.mubr.bf16.mxu1 %v12273_v51 }
 0x5a1   : > { %4832 = vmatpush2.bf16.msra.mxu0 %v3276_v48 }
 0x5a4   : > { %4834 = vmatmul.mubr.bf16.vlgmr.msra.gmra.mxu0 %v10459_v2  ;;  %v10821_v33 = vpop.permute.xlu0 %3848  ;;  %v7113_v2 = vld [vmem:[%s12178_s5 + $0x8] ss:$12 sps:$4 sm:$0xff]  }
 0x5a5   : > { %12340 = vst [vmem:[#allocation32_spill] sm:$0xff] %v10821_v33  ;;  %v10823_v3 = vpop.permute.xlu1 %3853  ;;  %4843 = vmatprep.mubr.bf16.mxu0 %v10469_v13  ;;  %v4208_v60 = vadd.f32 %v10681_v34, %v10821_v33  ;;  %v4206_v59 = vadd.f32 %v10673_v40, %v10821_v33  ;;  %v4332_v19 = vadd.f32 %v4331_v63, %v10821_v33  ;;  %v10841_v34 = vpop.f32.mrf.mxu0 }
 0x5a6   : > { %12341 = vst [vmem:[#allocation33_spill] sm:$0xff] %v10823_v3  ;;  %6867 = vmatmul.mubr.msk.bf16.vlgmr.msra.gmra.mxu1 %vm3921_vm12, %v7113_v2  ;;  %v4212_v9 = vadd.f32 %v10707_v38, %v10823_v3  ;;  %v4210_v13 = vadd.f32 %v10695_v57, %v10823_v3  ;;  %v4336_v48 = vadd.f32 %v4335_v10, %v10823_v3  ;;  %v4410_v10 = vpop.f32.mrf.mxu1 }
 0x5a7   : > { %4906 = vmatprep.mubr.bf16.mxu1 %v12273_v51  ;;  %v4271_v40 = vadd.f32 %v10676_v44, %v4208_v60  ;;  %v4269_v63 = vadd.f32 %v10667_v27, %v4206_v59  ;;  %v4334_v38 = vadd.f32 %v10789_v36, %v10821_v33  ;;  %v4395_v27 = vadd.f32 %v10787_v42, %v4332_v19  ;;  %v10861_v36 = vpop.f32.mrf.mxu0 }
 0x5a8   : > { %v10845_v39 = vpop.permute.xlu0 %3858  ;;  %v4275_v2 = vadd.f32 %v10699_v16, %v4212_v9  ;;  %v4273_v20 = vadd.f32 %v10688_v58, %v4210_v13  ;;  %v4338_v60 = vadd.f32 %v4337_v14, %v10823_v3  ;;  %v4399_v9 = vadd.f32 %v4398_v26, %v4336_v48  ;;  %v10863_v13 = vpop.f32.mrf.mxu1 }
 0x5a9   : > { %v10851_v57 = vpop.permute.xlu1 %3863  ;;  %v4216_v4 = vadd.f32 %v10718_v12, %v10845_v39  ;;  %v4218_v44 = vadd.f32 %v10726_v52, %v10845_v39  ;;  %v4931_v59 = vmax.f32 %v4271_v40, 0.0  ;;  %v4930_v1 = vmax.f32 %v4269_v63, 0.0 }
 0x5aa   : > { %v4348_v16 = vadd.f32 %v4347_v18, %v10851_v57  ;;  %v4346_v58 = vadd.f32 %v4345_v21, %v10851_v57  ;;  %v4220_v12 = vadd.f32 %v10739_v15, %v10851_v57  ;;  %v4222_v42 = vadd.f32 %v10749_v7, %v10851_v57  ;;  %v10896_v40 = vpop.f32.mrf.mxu1 }
 0x5ab   : > { %v4279_v52 = vadd.f32 %v10711_v8, %v4216_v4  ;;  %v4946_v26 = vmax.f32 %v4275_v2, 0.0  ;;  %v4945_v18 = vmax.f32 %v4273_v20, 0.0  ;;  %v10876_v19 = vadd.f32 %v10795_v55, %v4334_v38  ;;  %v7114_v20 = vld [vmem:[%s12178_s5 + $0x20] ss:$12 sps:$4 sm:$0xff]  }
 0x5ac   : > { %v10870_v14 = vadd.f32 %v4408_v50, %v4346_v58  ;;  %4844 = vmatmul.mubr.bf16.gmra.mxu0 %v10499_v32  ;;  %v10873_v21 = vpop.permute.xlu0 %5025  ;;  %v4283_v15 = vadd.f32 %v10732_v6, %v4220_v12  ;;  %v4281_v7 = vadd.f32 %v10720_v56, %v4218_v44  ;;  %v10885_v32 = vadd.f32 %v4410_v10, %v4348_v16 }
 0x5ad   : > { %12342 = vst [vmem:[#allocation34_spill] sm:$0xff] %v10873_v21  ;;  %v10878_v48 = vpop.permute.xlu1 %5030  ;;  %4853 = vmatprep.mubr.bf16.mxu0 %v10513_v24  ;;  %v5057_v4 = vmul.f32 %v10873_v21, %v4931_v59  ;;  %v5056_v8 = vmul.f32 %v10873_v21, %v4930_v1  ;;  %v10894_v50 = vadd.f32 %v10804_v31, %v4338_v60  ;;  %v4355_v1 = vpop.f32.mrf.mxu0  ;;  %v4960_v56 = vmax.f32 %v4279_v52, 0.0 }
 0x5ae   : > { %12343 = vst [vmem:[#allocation35_spill] sm:$0xff] %v10878_v48  ;;  %6868 = vmatmul.mubr.msk.bf16.gmra.mxu1 %vm3921_vm12, %v7114_v20  ;;  %v5072_v55 = vmul.f32 %v10878_v48, %v4946_v26  ;;  %v5071_v24 = vmul.f32 %v10878_v48, %v4945_v18  ;;  %v4285_v6 = vadd.f32 %v10743_v61, %v4222_v42  ;;  %v4932_v63 = vmax.f32 %v4395_v27, 0.0  ;;  %v4418_v42 = vpop.f32.mrf.mxu1 }
 0x5af   : > { %4916 = vmatprep.mubr.bf16.mxu1 %v12273_v51  ;;  %v4947_v2 = vmax.f32 %v4399_v9, 0.0  ;;  %v4975_v58 = vmax.f32 %v4283_v15, 0.0  ;;  %v4961_v60 = vmax.f32 %v4281_v7, 0.0  ;;  %v4357_v9 = vpop.f32.mrf.mxu0 }
 0x5b0   : > { %v10901_v10 = vpop.permute.xlu0 %5035  ;;  %v5147_v44 = vpack.c.bf16 %v5072_v55, %v5057_v4  ;;  %v5146_v16 = vpack.c.bf16 %v5071_v24, %v5056_v8  ;;  %v4976_v12 = vmax.f32 %v4285_v6, 0.0  ;;  %v5058_v51 = vmul.f32 %v10873_v21, %v4932_v63  ;;  %v4420_v47 = vpop.f32.mrf.mxu1 }
 0x5b1   : > { %v10903_v59 = vpop.permute.xlu1 %5040  ;;  %v5086_v31 = vmul.f32 %v10901_v10, %v4960_v56  ;;  %v5087_v4 = vmul.f32 %v10901_v10, %v4961_v60  ;;  %v5073_v15 = vmul.f32 %v10878_v48, %v4947_v2  ;;  %v7115_v2 = vld [vmem:[%s12178_s5 + $0x38] ss:$12 sps:$4 sm:$0xff]  }
 0x5b2   : > { %v5197_v52 = vshrl.u32 %v5147_v44, 16  ;;  %v5200_v26 = vshll.u32 %v5147_v44, 16  ;;  %v5189_v61 = vshrl.u32 %v5146_v16, 16  ;;  %v5192_v27 = vshll.u32 %v5146_v16, 16 }
 0x5b3   : > { %v5101_v18 = vmul.f32 %v10903_v59, %v4975_v58  ;;  %v5102_v8 = vmul.f32 %v10903_v59, %v4976_v12  ;;  %v4933_v16 = vmax.f32 %v10876_v19, 0.0 }
 0x5b4   : > { %4854 = vmatmul.mubr.bf16.gmra.mxu0 %v10541_v29  ;;  %v5348_v7 = vrot.slane %v5197_v52, 1  ;;  %v5349_v20 = vrot.slane %v5200_v26, 2  ;;  %v5345_v55 = vrot.slane %v5189_v61, 1  ;;  %v5346_v24 = vrot.slane %v5192_v27, 2  ;;  %v10924_v19 = vpop.permute.xlu0 %3868 }
 0x5b5   : > { %v10912_v56 = vpop.permute.xlu1 %3873  ;;  %v5191_v6 = vrot.slane %v5189_v61, 5  ;;  %v5194_v63 = vrot.slane %v5192_v27, 6  ;;  %v5161_v44 = vpack.c.bf16 %v5101_v18, %v5086_v31  ;;  %v10922_v31 = vpack.c.bf16 %v5073_v15, %v5058_v51 }
 0x5b6   : > { %v4358_v58 = vadd.f32 %v4357_v9, %v10912_v56  ;;  %v4356_v60 = vadd.f32 %v4355_v1, %v10912_v56  ;;  %6869 = vmatmul.mubr.msk.bf16.gmra.mxu1 %vm3921_vm12, %v7115_v2  ;;  %v5350_v29 = vor.u32 %v5349_v20, %v5348_v7  ;;  %v5347_v12 = vor.u32 %v5346_v24, %v5345_v55 }
 0x5b7   : > { %v5442_v61 = vshrl.u32 %v5161_v44, 16  ;;  %v5445_v27 = vshll.u32 %v5161_v44, 16  ;;  %v5199_v1 = vrot.slane %v5197_v52, 5  ;;  %v5162_v9 = vpack.c.bf16 %v5102_v8, %v5087_v4 }
 0x5b8   : > { %5359 = vrot.lane.b32.xlu1 %v5350_v29, %s7135_s28  ;;  %5357 = vrot.lane.b32.xlu0 %v5347_v12, %s7135_s28  ;;  %v4948_v18 = vmax.f32 %v10894_v50, 0.0  ;;  %v5059_v7 = vmul.f32 %v10873_v21, %v4933_v16  ;;  %v5195_v20 = vor.u32 %v5194_v63, %v5191_v6  ;;  %v5202_v2 = vrot.slane %v5200_v26, 6 }
 0x5b9   : > { %v5586_v55 = vrot.slane %v5442_v61, 1  ;;  %v5587_v24 = vrot.slane %v5445_v27, 2  ;;  %v10930_v44 = vadd.f32 %v4418_v42, %v4356_v60  ;;  %v10932_v51 = vadd.f32 %v4420_v47, %v4358_v58 }
 0x5ba   : > { %v5450_v15 = vshrl.u32 %v5162_v9, 16  ;;  %v5453_v38 = vshll.u32 %v5162_v9, 16  ;;  %v4226_v29 = vadd.f32 %v10759_v49, %v10924_v19  ;;  %v4230_v52 = vadd.f32 %v10772_v41, %v10912_v56 }
 0x5bb   : > { %v5588_v62 = vor.u32 %v5587_v24, %v5586_v55  ;;  %v5205_v50 = vshrl.u32 %v10922_v31, 16  ;;  %v5444_v26 = vrot.slane %v5442_v61, 5  ;;  %v5447_v42 = vrot.slane %v5445_v27, 6 }
 0x5bc   : > { %5220 = vrot.lane.b32.xlu0 %v5195_v20, %s7135_s28  ;;  %v5452_v4 = vrot.slane %v5450_v15, 5  ;;  %v5455_v8 = vrot.slane %v5453_v38, 6  ;;  %v5203_v47 = vor.u32 %v5202_v2, %v5199_v1  ;;  %v4289_v6 = vadd.f32 %v10752_v23, %v4226_v29  ;;  %v10953_v1 = vpop.permute.xlu0 %5045 }
 0x5bd   : > { %5598 = vrot.lane.b32.xlu1 %v5588_v62, %s7135_s28  ;;  %v4293_v63 = vadd.f32 %v10769_v37, %v4230_v52  ;;  %v5589_v16 = vrot.slane %v5450_v15, 1  ;;  %v5590_v58 = vrot.slane %v5453_v38, 2  ;;  %v5208_v41 = vshll.u32 %v10922_v31, 16  ;;  %v10951_v37 = vpop.permute.xlu1 %5050 }
 0x5be   : > { %v5456_v49 = vor.u32 %v5455_v8, %v5452_v4  ;;  %v4228_v60 = vadd.f32 %v10767_v46, %v10924_v19  ;;  %v4990_v12 = vmax.f32 %v4289_v6, 0.0  ;;  %v4232_v61 = vadd.f32 %v10782_v0, %v10912_v56 }
 0x5bf   : > { %v5005_v9 = vmax.f32 %v4293_v63, 0.0  ;;  %v5074_v62 = vmul.f32 %v10878_v48, %v4948_v18  ;;  %v5007_v27 = vmax.f32 %v10930_v44, 0.0  ;;  %v5008_v23 = vmax.f32 %v10932_v51, 0.0 }
 0x5c0   : > { %5222 = vrot.lane.b32.xlu0 %v5203_v47, %s7135_s28  ;;  %v5448_v38 = vor.u32 %v5447_v42, %v5444_v26  ;;  %v4291_v46 = vadd.f32 %v10763_v35, %v4228_v60  ;;  %v5116_v31 = vmul.f32 %v10953_v1, %v4990_v12  ;;  %v4295_v18 = vadd.f32 %v10778_v30, %v4232_v61 }
 0x5c1   : > { %5475 = vrot.lane.b32.xlu1 %v5456_v49, %s7135_s28  ;;  %v5131_v0 = vmul.f32 %v10951_v37, %v5005_v9  ;;  %v10961_v20 = vpack.c.bf16 %v5074_v62, %v5059_v7  ;;  %v5591_v55 = vor.u32 %v5590_v58, %v5589_v16  ;;  %v5207_v24 = vrot.slane %v5205_v50, 5 }
 0x5c2   : > { %v4991_v2 = vmax.f32 %v4291_v46, 0.0  ;;  %v4342_v51 = vadd.f32 %v10808_v54, %v10845_v39  ;;  %v5210_v29 = vrot.slane %v5208_v41, 6  ;;  %v5006_v35 = vmax.f32 %v4295_v18, 0.0 }
 0x5c3   : > { %v10965_v15 = vpack.c.bf16 %v5131_v0, %v5116_v31  ;;  %v5351_v52 = vrot.slane %v5205_v50, 1  ;;  %v5213_v8 = vshrl.u32 %v10961_v20, 16  ;;  %v4344_v7 = vadd.f32 %v10813_v28, %v10845_v39 }
 0x5c4   : > { %5473 = vrot.lane.b32.xlu0 %v5448_v38, %s7135_s28  ;;  %v5117_v4 = vmul.f32 %v10953_v1, %v4991_v2  ;;  %v4405_v30 = vadd.f32 %v10811_v43, %v4342_v51  ;;  %v5132_v42 = vmul.f32 %v10951_v37, %v5006_v35  ;;  %v5352_v47 = vrot.slane %v5208_v41, 2  ;;  %v4520_v2 = vpop.f32.mrf.mxu0 }
 0x5c5   : > { %v5683_v26 = vshrl.u32 %v10965_v15, 16  ;;  %v5686_v54 = vshll.u32 %v10965_v15, 16  ;;  %v5216_v50 = vshll.u32 %v10961_v20, 16  ;;  %v12344_v63 = vmax.f32 %v10870_v14, 0.0 }
 0x5c6   : > { %v4962_v6 = vmax.f32 %v4405_v30, 0.0  ;;  %v4407_v49 = vadd.f32 %v10818_v45, %v4344_v7  ;;  %v10985_v58 = vpack.c.bf16 %v5132_v42, %v5117_v4  ;;  %v4354_v41 = vadd.f32 %v10861_v36, %v10924_v19 }
 0x5c7   : > { %v5103_v16 = vmul.f32 %v10903_v59, %v12344_v63  ;;  %v5829_v43 = vrot.slane %v5683_v26, 1  ;;  %v5830_v28 = vrot.slane %v5686_v54, 2  ;;  %v5354_v14 = vrot.slane %v5213_v8, 1 }
 0x5c8   : > { %5600 = vrot.lane.b32.xlu0 %v5591_v55, %s7135_s28  ;;  %v5088_v60 = vmul.f32 %v10901_v10, %v4962_v6  ;;  %v4963_v12 = vmax.f32 %v4407_v49, 0.0  ;;  %v12345_v45 = vmax.f32 %v10885_v32, 0.0  ;;  %v5691_v62 = vshrl.u32 %v10985_v58, 16 }
 0x5c9   : > { %v5831_v61 = vor.u32 %v5830_v28, %v5829_v43  ;;  %v5694_v38 = vshll.u32 %v10985_v58, 16  ;;  %v4417_v46 = vadd.f32 %v10896_v40, %v4354_v41  ;;  %v5355_v36 = vrot.slane %v5216_v50, 2  ;;  %v4522_v43 = vpop.f32.mrf.mxu0 }
 0x5ca   : > { %v5104_v9 = vmul.f32 %v10903_v59, %v12345_v45  ;;  %v5163_v31 = vpack.c.bf16 %v5103_v16, %v5088_v60  ;;  %v5089_v0 = vmul.f32 %v10901_v10, %v4963_v12  ;;  %v4352_v18 = vadd.f32 %v10841_v34, %v10924_v19 }
 0x5cb   : > { %5841 = vrot.lane.b32.xlu1 %v5831_v61, %s7135_s28  ;;  %v5832_v32 = vrot.slane %v5691_v62, 1  ;;  %v5833_v55 = vrot.slane %v5694_v38, 2  ;;  %v4993_v51 = vmax.f32 %v4417_v46, 0.0  ;;  %v5134_v40 = vmul.f32 %v10951_v37, %v5008_v23 }
 0x5cc   : > { %v5458_v35 = vshrl.u32 %v5163_v31, 16  ;;  %v5461_v4 = vshll.u32 %v5163_v31, 16  ;;  %v5164_v30 = vpack.c.bf16 %v5104_v9, %v5089_v0  ;;  %v4415_v7 = vadd.f32 %v10863_v13, %v4352_v18 }
 0x5cd   : > { %v5211_v42 = vor.u32 %v5210_v29, %v5207_v24  ;;  %v5834_v6 = vor.u32 %v5833_v55, %v5832_v32  ;;  %v5119_v34 = vmul.f32 %v10953_v1, %v4993_v51  ;;  %v5353_v49 = vor.u32 %v5352_v47, %v5351_v52  ;;  %v4524_v52 = vpop.f32.mrf.mxu0 }
 0x5ce   : > { %v5466_v63 = vshrl.u32 %v5164_v30, 16  ;;  %v5469_v16 = vshll.u32 %v5164_v30, 16  ;;  %v4992_v23 = vmax.f32 %v4415_v7, 0.0  ;;  %v5356_v41 = vor.u32 %v5355_v36, %v5354_v14 }
 0x5cf   : > { %5224 = vrot.lane.b32.xlu1 %v5211_v42, %s7135_s28  ;;  %5843 = vrot.lane.b32.xlu0 %v5834_v6, %s7135_s28  ;;  %v11014_v28 = vpack.c.bf16 %v5134_v40, %v5119_v34  ;;  %v5460_v60 = vrot.slane %v5458_v35, 5  ;;  %v5463_v12 = vrot.slane %v5461_v4, 6  ;;  %v5133_v13 = vmul.f32 %v10951_v37, %v5007_v27  ;;  %v4526_v0 = vpop.f32.mrf.mxu0 }
 0x5d0   : > { %v5468_v24 = vrot.slane %v5466_v63, 5  ;;  %v5471_v29 = vrot.slane %v5469_v16, 6  ;;  %v5118_v61 = vmul.f32 %v10953_v1, %v4992_v23  ;;  %v5592_v14 = vrot.slane %v5458_v35, 1 }
 0x5d1   : > { %v5707_v45 = vshrl.u32 %v11014_v28, 16  ;;  %v5710_v9 = vshll.u32 %v11014_v28, 16  ;;  %v5464_v47 = vor.u32 %v5463_v12, %v5460_v60  ;;  %v5593_v46 = vrot.slane %v5461_v4, 2  ;;  %v4530_v4 = vpop.f32.mrf.mxu0 }
 0x5d2   : > { %v5472_v36 = vor.u32 %v5471_v29, %v5468_v24  ;;  %v11028_v31 = vpack.c.bf16 %v5133_v13, %v5118_v61  ;;  %v5595_v32 = vrot.slane %v5466_v63, 1  ;;  %v5596_v51 = vrot.slane %v5469_v16, 2 }
 0x5d3   : > { %5363 = vrot.lane.b32.xlu1 %v5356_v41, %s7135_s28  ;;  %5361 = vrot.lane.b32.xlu0 %v5353_v49, %s7135_s28  ;;  %v5838_v44 = vrot.slane %v5707_v45, 1  ;;  %v5839_v27 = vrot.slane %v5710_v9, 2  ;;  %v5594_v18 = vor.u32 %v5593_v46, %v5592_v14  ;;  %v4532_v6 = vpop.f32.mrf.mxu0 }
 0x5d4   : > { %v5699_v40 = vshrl.u32 %v11028_v31, 16  ;;  %v5702_v35 = vshll.u32 %v11028_v31, 16  ;;  %v5597_v30 = vor.u32 %v5596_v51, %v5595_v32 }
 0x5d5   : > { %v5840_v55 = vor.u32 %v5839_v27, %v5838_v44  ;;  %v4534_v60 = vpop.f32.mrf.mxu0 }
 0x5d6   : > { %v5835_v7 = vrot.slane %v5699_v40, 1  ;;  %v5836_v42 = vrot.slane %v5702_v35, 2 }
 0x5d7   : > { %5477 = vrot.lane.b32.xlu1 %v5464_v47, %s7135_s28  ;;  %5479 = vrot.lane.b32.xlu0 %v5472_v36, %s7135_s28  ;;  %v4536_v46 = vpop.f32.mrf.mxu0 }
 0x5d8   : > { %v5837_v23 = vor.u32 %v5836_v42, %v5835_v7 }
 0x5d9   : > { %v4540_v42 = vpop.f32.mrf.mxu0 }
 0x5db   : > { %5602 = vrot.lane.b32.xlu1 %v5594_v18, %s7135_s28  ;;  %5847 = vrot.lane.b32.xlu0 %v5840_v55, %s7135_s28 }
 0x5de   : > { %v4457_v34 = vpop.f32.mrf.mxu1 }
 0x5df   : > { %5604 = vrot.lane.b32.xlu1 %v5597_v30, %s7135_s28  ;;  %v4458_v63 = vadd.f32 %v4457_v34, %v10821_v33 }
 0x5e0   : > { %v4459_v16 = vpop.f32.mrf.mxu1 }
 0x5e1   : > { %v4521_v49 = vadd.f32 %v4520_v2, %v4458_v63  ;;  %v4460_v41 = vadd.f32 %v4459_v16, %v10821_v33 }
 0x5e2   : > { %v4461_v12 = vpop.f32.mrf.mxu1 }
 0x5e3   : > { %5845 = vrot.lane.b32.xlu1 %v5837_v23, %s7135_s28  ;;  %v4523_v13 = vadd.f32 %v4522_v43, %v4460_v41  ;;  %v4462_v24 = vadd.f32 %v4461_v12, %v10823_v3  ;;  %v4934_v29 = vmax.f32 %v4521_v49, 0.0 }
 0x5e4   : > { %v4463_v61 = vpop.f32.mrf.mxu1 }
 0x5e5   : > { %v4525_v47 = vadd.f32 %v4524_v52, %v4462_v24  ;;  %v4464_v14 = vadd.f32 %v4463_v61, %v10823_v3  ;;  %v4935_v44 = vmax.f32 %v4523_v13, 0.0  ;;  %v5060_v32 = vmul.f32 %v10873_v21, %v4934_v29  ;;  %v4542_v29 = vpop.f32.mrf.mxu0 }
 0x5e6   : > { %v4467_v36 = vpop.f32.mrf.mxu1 }
 0x5e7   : > { %v4949_v27 = vmax.f32 %v4525_v47, 0.0  ;;  %v4527_v2 = vadd.f32 %v4526_v0, %v4464_v14  ;;  %v4468_v18 = vadd.f32 %v4467_v36, %v10845_v39  ;;  %v5061_v34 = vmul.f32 %v10873_v21, %v4935_v44 }
 0x5e8   : > { %v4469_v55 = vpop.f32.mrf.mxu1 }
 0x5e9   : > { %v5075_v51 = vmul.f32 %v10878_v48, %v4949_v27  ;;  %v4950_v43 = vmax.f32 %v4527_v2, 0.0  ;;  %v4470_v30 = vadd.f32 %v4469_v55, %v10845_v39  ;;  %v4531_v7 = vadd.f32 %v4530_v4, %v4468_v18  ;;  %v4544_v55 = vpop.f32.mrf.mxu0 }
 0x5ea   : > { %v4471_v52 = vpop.f32.mrf.mxu1 }
 0x5eb   : > { %v5150_v63 = vpack.c.bf16 %v5075_v51, %v5060_v32  ;;  %v5076_v16 = vmul.f32 %v10878_v48, %v4950_v43  ;;  %v4472_v0 = vadd.f32 %v4471_v52, %v10851_v57  ;;  %v4533_v49 = vadd.f32 %v4532_v6, %v4470_v30 }
 0x5ec   : > { %v4473_v23 = vpop.f32.mrf.mxu1  ;;  %v4964_v12 = vmax.f32 %v4531_v7, 0.0 }
 0x5ed   : > { %v5151_v41 = vpack.c.bf16 %v5076_v16, %v5061_v34  ;;  %v4474_v13 = vadd.f32 %v4473_v23, %v10851_v57  ;;  %v4535_v24 = vadd.f32 %v4534_v60, %v4472_v0  ;;  %v4965_v61 = vmax.f32 %v4533_v49, 0.0 }
 0x5ee   : > { %v4477_v47 = vpop.f32.mrf.mxu1  ;;  %v5371_v4 = vrot.slane %v5150_v63, 7  ;;  %v5090_v6 = vmul.f32 %v10901_v10, %v4964_v12 }
 0x5ef   : > { %v4979_v14 = vmax.f32 %v4535_v24, 0.0  ;;  %v4478_v36 = vadd.f32 %v4477_v47, %v10924_v19  ;;  %v4537_v44 = vadd.f32 %v4536_v46, %v4474_v13  ;;  %v5372_v27 = vrot.slane %v5151_v41, 7  ;;  %v4546_v13 = vpop.f32.mrf.mxu0 }
 0x5f0   : > { %5375 = vrot.lane.b32.xlu0 %v5371_v4, %s7136_s25  ;;  %v4479_v2 = vpop.f32.mrf.mxu1  ;;  %v5091_v51 = vmul.f32 %v10901_v10, %v4965_v61  ;;  %v5239_v46 = vrot.slane %v5150_v63, 3  ;;  %v5240_v16 = vrot.slane %v5151_v41, 3  ;;  %v11068_v47 = vrot.slane %v5213_v8, 5 }
 0x5f1   : > { %v5105_v18 = vmul.f32 %v10903_v59, %v4979_v14  ;;  %v4980_v32 = vmax.f32 %v4537_v44, 0.0  ;;  %v4480_v60 = vadd.f32 %v4479_v2, %v10924_v19  ;;  %5377 = vrot.lane.b32.xlu1 %v5372_v27, %s7136_s25  ;;  %v4541_v43 = vadd.f32 %v4540_v42, %v4478_v36 }
 0x5f2   : > { %v4481_v30 = vpop.f32.mrf.mxu1  ;;  %12346 = vst [vmem:[#allocation36_spill] sm:$0xff] %v11068_v47  ;;  %v11074_v36 = vrot.slane %v5216_v50, 6  ;;  %v11080_v8 = vrot.slane %v5699_v40, 5  ;;  %v11095_v40 = vrot.slane %v5707_v45, 5 }
 0x5f3   : > { %v5165_v7 = vpack.c.bf16 %v5105_v18, %v5090_v6  ;;  %v5106_v52 = vmul.f32 %v10903_v59, %v4980_v32  ;;  %v4482_v34 = vadd.f32 %v4481_v30, %v10912_v56  ;;  %v4543_v0 = vadd.f32 %v4542_v29, %v4480_v60 }
 0x5f4   : > { %5243 = vrot.lane.b32.xlu0 %v5239_v46, %s7136_s25  ;;  %v4483_v49 = vpop.f32.mrf.mxu1  ;;  %v4994_v24 = vmax.f32 %v4541_v43, 0.0  ;;  %12347 = vst [vmem:[#allocation37_spill] sm:$0xff] %v11074_v36  ;;  %12348 = vst [vmem:[#allocation38_spill] sm:$0xff] %v11080_v8  ;;  %v11086_v60 = vrot.slane %v5702_v35, 6  ;;  %v11102_v35 = vrot.slane %v5710_v9, 6  ;;  %v11106_v43 = vrot.slane %v5683_v26, 5 }
 0x5f5   : > { %v5491_v23 = vrot.slane %v5165_v7, 3  ;;  %v5166_v12 = vpack.c.bf16 %v5106_v52, %v5091_v51  ;;  %5245 = vrot.lane.b32.xlu1 %v5240_v16, %s7136_s25  ;;  %v4484_v42 = vadd.f32 %v4483_v49, %v10912_v56  ;;  %v4545_v61 = vadd.f32 %v4544_v55, %v4482_v34  ;;  %12351 = vst [vmem:[#allocation41_spill] sm:$0xff] %v11095_v40 }
 0x5f6   : > { %v4995_v4 = vmax.f32 %v4543_v0, 0.0  ;;  %v5612_v14 = vrot.slane %v5165_v7, 7  ;;  %v5120_v44 = vmul.f32 %v10953_v1, %v4994_v24  ;;  %12349 = vst [vmem:[#allocation39_spill] sm:$0xff] %v11086_v60  ;;  %12352 = vst [vmem:[#allocation42_spill] sm:$0xff] %v11102_v35  ;;  %v11114_v52 = vrot.slane %v5686_v54, 6 }
 0x5f7   : > { %v5492_v63 = vrot.slane %v5166_v12, 3  ;;  %v5009_v41 = vmax.f32 %v4545_v61, 0.0  ;;  %v4547_v29 = vadd.f32 %v4546_v13, %v4484_v42  ;;  %v5613_v18 = vrot.slane %v5166_v12, 7  ;;  %12353 = vst [vmem:[#allocation43_spill] sm:$0xff] %v11106_v43 }
 0x5f8   : > { %5495 = vrot.lane.b32.xlu0 %v5491_v23, %s7136_s25  ;;  %v5121_v20 = vmul.f32 %v10953_v1, %v4995_v4  ;;  %12355 = vst [vmem:[#allocation45_spill] sm:$0xff] %v11114_v52  ;;  %v11120_v9 = vrot.slane %v5691_v62, 5  ;;  %v11124_v26 = vrot.slane %v5694_v38, 6  ;;  %v3986_v62 = vadd.f32 %v10398_v5, %v10924_v19 }
 0x5f9   : > { %5497 = vrot.lane.b32.xlu1 %v5492_v63, %s7136_s25  ;;  %v5135_v27 = vmul.f32 %v10951_v37, %v5009_v41  ;;  %v5010_v2 = vmax.f32 %v4547_v29, 0.0 }
 0x5fa   : > { %v4583_v6 = vpop.f32.mrf.mxu0  ;;  %12356 = vst [vmem:[#allocation46_spill] sm:$0xff] %v11120_v9  ;;  %12357 = vst [vmem:[#allocation47_spill] sm:$0xff] %v11124_v26 }
 0x5fb   : > { %v11089_v50 = vpack.c.bf16 %v5135_v27, %v5120_v44  ;;  %v5136_v55 = vmul.f32 %v10951_v37, %v5010_v2  ;;  %v4584_v45 = vadd.f32 %v4583_v6, %v10821_v33 }
 0x5fc   : > { %5616 = vrot.lane.b32.xlu0 %v5612_v14, %s7136_s25  ;;  %v4585_v51 = vpop.f32.mrf.mxu0 }
 0x5fd   : > { %12350 = vst [vmem:[#allocation40_spill] sm:$0xff] %v11089_v50  ;;  %5618 = vrot.lane.b32.xlu1 %v5613_v18, %s7136_s25  ;;  %v5855_v30 = vrot.slane %v11089_v50, 7  ;;  %v11109_v46 = vpack.c.bf16 %v5136_v55, %v5121_v20  ;;  %v4586_v0 = vadd.f32 %v4585_v51, %v10821_v33 }
 0x5fe   : > { %v4587_v7 = vpop.f32.mrf.mxu0 }
 0x5ff   : > { %12354 = vst [vmem:[#allocation44_spill] sm:$0xff] %v11109_v46  ;;  %v4646_v34 = vpop.f32.mrf.mxu1  ;;  %v5856_v16 = vrot.slane %v11109_v46, 7  ;;  %v4588_v12 = vadd.f32 %v4587_v7, %v10823_v3 }
 0x600   : > { %v4647_v49 = vadd.f32 %v4646_v34, %v4584_v45  ;;  %5859 = vrot.lane.b32.xlu0 %v5855_v30, %s7136_s25  ;;  %v4589_v15 = vpop.f32.mrf.mxu0 }
 0x601   : > { %v4648_v23 = vpop.f32.mrf.mxu1  ;;  %5861 = vrot.lane.b32.xlu1 %v5856_v16, %s7136_s25  ;;  %v4590_v42 = vadd.f32 %v4589_v15, %v10823_v3 }
 0x602   : > { %v4649_v58 = vadd.f32 %v4648_v23, %v4586_v0  ;;  %v4593_v38 = vpop.f32.mrf.mxu0  ;;  %v4936_v24 = vmax.f32 %v4647_v49, 0.0 }
 0x603   : > { %v4650_v13 = vpop.f32.mrf.mxu1  ;;  %v4594_v27 = vadd.f32 %v4593_v38, %v10845_v39 }
 0x604   : > { %v4651_v61 = vadd.f32 %v4650_v13, %v4588_v12  ;;  %v4595_v63 = vpop.f32.mrf.mxu0  ;;  %v4937_v41 = vmax.f32 %v4649_v58, 0.0  ;;  %v5062_v6 = vmul.f32 %v10873_v21, %v4936_v24 }
 0x605   : > { %v4652_v4 = vpop.f32.mrf.mxu1  ;;  %v4596_v20 = vadd.f32 %v4595_v63, %v10845_v39 }
 0x606   : > { %v4951_v29 = vmax.f32 %v4651_v61, 0.0  ;;  %v4653_v14 = vadd.f32 %v4652_v4, %v4590_v42  ;;  %v4597_v44 = vpop.f32.mrf.mxu0  ;;  %v5063_v7 = vmul.f32 %v10873_v21, %v4937_v41 }
 0x607   : > { %v4656_v2 = vpop.f32.mrf.mxu1  ;;  %v4598_v15 = vadd.f32 %v4597_v44, %v10851_v57 }
 0x608   : > { %v5077_v18 = vmul.f32 %v10878_v48, %v4951_v29  ;;  %v4952_v55 = vmax.f32 %v4653_v14, 0.0  ;;  %v4599_v51 = vpop.f32.mrf.mxu0  ;;  %v4657_v30 = vadd.f32 %v4656_v2, %v4594_v27 }
 0x609   : > { %v4658_v45 = vpop.f32.mrf.mxu1  ;;  %v4600_v38 = vadd.f32 %v4599_v51, %v10851_v57 }
 0x60a   : > { %v5152_v34 = vpack.c.bf16 %v5077_v18, %v5062_v6  ;;  %v5078_v16 = vmul.f32 %v10878_v48, %v4952_v55  ;;  %v4659_v0 = vadd.f32 %v4658_v45, %v4596_v20  ;;  %v4603_v49 = vpop.f32.mrf.mxu0  ;;  %v4966_v24 = vmax.f32 %v4657_v30, 0.0 }
 0x60b   : > { %v4660_v23 = vpop.f32.mrf.mxu1  ;;  %v4604_v41 = vadd.f32 %v4603_v49, %v10924_v19 }
 0x60c   : > { %v5373_v12 = vrot.slane %v5152_v34, 7  ;;  %v11143_v58 = vpack.c.bf16 %v5078_v16, %v5063_v7  ;;  %v4605_v13 = vpop.f32.mrf.mxu0  ;;  %v4661_v42 = vadd.f32 %v4660_v23, %v4598_v15  ;;  %v4967_v4 = vmax.f32 %v4659_v0, 0.0 }
 0x60d   : > { %v4662_v61 = vpop.f32.mrf.mxu1  ;;  %v5241_v2 = vrot.slane %v5152_v34, 3  ;;  %v5092_v20 = vmul.f32 %v10901_v10, %v4966_v24  ;;  %v4606_v51 = vadd.f32 %v4605_v13, %v10924_v19 }
 0x60e   : > { %v5374_v63 = vrot.slane %v11143_v58, 7  ;;  %v4663_v29 = vadd.f32 %v4662_v61, %v4600_v38  ;;  %5379 = vrot.lane.b32.xlu0 %v5373_v12, %s7136_s25  ;;  %v4607_v14 = vpop.f32.mrf.mxu0  ;;  %v4981_v44 = vmax.f32 %v4661_v42, 0.0  ;;  %v5093_v45 = vmul.f32 %v10901_v10, %v4967_v4 }
 0x60f   : > { %v4666_v27 = vpop.f32.mrf.mxu1  ;;  %v4608_v16 = vadd.f32 %v4607_v14, %v10912_v56 }
 0x610   : > { %v4982_v6 = vmax.f32 %v4663_v29, 0.0  ;;  %v4667_v18 = vadd.f32 %v4666_v27, %v4604_v41  ;;  %5381 = vrot.lane.b32.xlu1 %v5374_v63, %s7136_s25  ;;  %v5107_v55 = vmul.f32 %v10903_v59, %v4981_v44  ;;  %v4609_v0 = vpop.f32.mrf.mxu0 }
 0x611   : > { %v4668_v30 = vpop.f32.mrf.mxu1  ;;  %v4610_v42 = vadd.f32 %v4609_v0, %v10912_v56 }
 0x612   : > { %v5108_v7 = vmul.f32 %v10903_v59, %v4982_v6  ;;  %5247 = vrot.lane.b32.xlu0 %v5241_v2, %s7136_s25  ;;  %v5167_v34 = vpack.c.bf16 %v5107_v55, %v5092_v20  ;;  %v4669_v49 = vadd.f32 %v4668_v30, %v4606_v51  ;;  %v4996_v12 = vmax.f32 %v4667_v18, 0.0 }
 0x613   : > { %v4670_v15 = vpop.f32.mrf.mxu1 }
 0x614   : > { %v5168_v23 = vpack.c.bf16 %v5108_v7, %v5093_v45  ;;  %v4671_v38 = vadd.f32 %v4670_v15, %v4608_v16  ;;  %v5493_v24 = vrot.slane %v5167_v34, 3  ;;  %v4997_v4 = vmax.f32 %v4669_v49, 0.0 }
 0x615   : > { %v4672_v13 = vpop.f32.mrf.mxu1  ;;  %v5122_v29 = vmul.f32 %v10953_v1, %v4996_v12  ;;  %v5614_v44 = vrot.slane %v5167_v34, 7 }
 0x616   : > { %v5494_v61 = vrot.slane %v5168_v23, 3  ;;  %v5011_v63 = vmax.f32 %v4671_v38, 0.0  ;;  %v4673_v41 = vadd.f32 %v4672_v13, %v4610_v42  ;;  %5499 = vrot.lane.b32.xlu0 %v5493_v24, %s7136_s25  ;;  %v5123_v6 = vmul.f32 %v10953_v1, %v4997_v4 }
 0x617   : > { %v5615_v55 = vrot.slane %v5168_v23, 7 }
 0x618   : > { %v5137_v14 = vmul.f32 %v10951_v37, %v5011_v63  ;;  %5501 = vrot.lane.b32.xlu1 %v5494_v61, %s7136_s25  ;;  %v5012_v27 = vmax.f32 %v4673_v41, 0.0 }
 0x61a   : > { %v11162_v2 = vpack.c.bf16 %v5137_v14, %v5122_v29  ;;  %v5138_v18 = vmul.f32 %v10951_v37, %v5012_v27  ;;  %5620 = vrot.lane.b32.xlu0 %v5614_v44, %s7136_s25  ;;  %v4772_v49 = vpop.f32.mrf.mxu0 }
 0x61c   : > { %12358 = vst [vmem:[#allocation48_spill] sm:$0xff] %v11162_v2  ;;  %v5857_v20 = vrot.slane %v11162_v2, 7  ;;  %v11168_v51 = vpack.c.bf16 %v5138_v18, %v5123_v6  ;;  %v4774_v12 = vpop.f32.mrf.mxu0 }
 0x61e   : > { %12359 = vst [vmem:[#allocation49_spill] sm:$0xff] %v11168_v51  ;;  %5863 = vrot.lane.b32.xlu1 %v5857_v20, %s7136_s25  ;;  %5622 = vrot.lane.b32.xlu0 %v5615_v55, %s7136_s25  ;;  %v5858_v30 = vrot.slane %v11168_v51, 7  ;;  %v4776_v42 = vpop.f32.mrf.mxu0  ;;  %v4049_v51 = vadd.f32 %v10428_v17, %v3986_v62 }
 0x620   : > { %v4778_v63 = vpop.f32.mrf.mxu0  ;;  %v4987_v62 = vmax.f32 %v4049_v51, 0.0 }
 0x622   : > { %5865 = vrot.lane.b32.xlu0 %v5858_v30, %s7136_s25  ;;  %v4782_v4 = vpop.f32.mrf.mxu0 }
 0x624   : > { %v4784_v44 = vpop.f32.mrf.mxu0 }
 0x626   : > { %v4786_v20 = vpop.f32.mrf.mxu0 }
 0x628   : > { %v4788_v31 = vpop.f32.mrf.mxu0 }
 0x62a   : > { %v11174_v45 = vpop.permute.xlu0 %5357  ;;  %v11176_v7 = vpop.permute.xlu1 %5359 }
 0x62b   : > { %12360 = vst [vmem:[#allocation50_spill] sm:$0xff] %v11174_v45  ;;  %12361 = vst [vmem:[#allocation51_spill] sm:$0xff] %v11176_v7 }
 0x62e   : > { %v11178_v16 = vpop.permute.xlu0 %5220 }
 0x62f   : > { %12362 = vst [vmem:[#allocation52_spill] sm:$0xff] %v11178_v16  ;;  %v11182_v34 = vpop.permute.xlu1 %5598 }
 0x630   : > { %12364 = vst [vmem:[#allocation54_spill] sm:$0xff] %v11182_v34 }
 0x632   : > { %v11180_v0 = vpop.permute.xlu0 %5222 }
 0x633   : > { %12363 = vst [vmem:[#allocation53_spill] sm:$0xff] %v11180_v0  ;;  %v11186_v23 = vpop.permute.xlu1 %5475 }
 0x636   : > { %v11184_v15 = vpop.permute.xlu0 %5473 }
 0x637   : > { %12365 = vst [vmem:[#allocation55_spill] sm:$0xff] %v11184_v15 }
 0x63a   : > { %v11188_v38 = vpop.permute.xlu0 %5600 }
 0x63d   : > { %v11190_v24 = vpop.permute.xlu1 %5841 }
 0x641   : > { %v11192_v13 = vpop.permute.xlu1 %5224  ;;  %v11194_v61 = vpop.permute.xlu0 %5843 }
 0x642   : > { %12366 = vst [vmem:[#allocation56_spill] sm:$0xff] %v11192_v13 }
 0x645   : > { %v5364_v41 = vpop.permute.xlu1 %5363  ;;  %v11196_v29 = vpop.permute.xlu0 %5361 }
 0x646   : > { %12367 = vst [vmem:[#allocation57_spill] sm:$0xff] %v11196_v29  ;;  %v11200_v14 = vsel %vm5228_vm13, %v11196_v29, %v5364_v41  ;;  %v3990_v41 = vadd.f32 %v10414_v11, %v10912_v56  ;;  %v11223_v11 = vpop.f32.mrf.mxu0 }
 0x647   : > { %12368 = vst [vmem:[#allocation58_spill] sm:$0xff] %v11200_v14 }
 0x648   : > { %v11237_v34 = vpop.f32.mrf.mxu0 }
 0x649   : > { %v11202_v27 = vpop.permute.xlu1 %5477  ;;  %v5480_v6 = vpop.permute.xlu0 %5479 }
 0x64a   : > { %v11206_v18 = vsel %vm5228_vm13, %v11202_v27, %v5480_v6 }
 0x64d   : > { %v11208_v55 = vpop.permute.xlu1 %5602  ;;  %v5848_v29 = vpop.permute.xlu0 %5847 }
 0x64e   : > { %v4709_v30 = vpop.f32.mrf.mxu1 }
 0x64f   : > { %v4710_v54 = vadd.f32 %v4709_v30, %v10821_v33  ;;  %v4053_v30 = vadd.f32 %v10462_v25, %v3990_v41 }
 0x650   : > { %v4711_v28 = vpop.f32.mrf.mxu1 }
 0x651   : > { %v5605_v32 = vpop.permute.xlu1 %5604  ;;  %v4773_v46 = vadd.f32 %v4772_v49, %v4710_v54  ;;  %v4712_v16 = vadd.f32 %v4711_v28, %v10821_v33 }
 0x652   : > { %v11218_v6 = vsel %vm5228_vm13, %v11208_v55, %v5605_v32  ;;  %v4713_v50 = vpop.f32.mrf.mxu1 }
 0x653   : > { %v4714_v5 = vadd.f32 %v4713_v50, %v10823_v3  ;;  %v4775_v14 = vadd.f32 %v4774_v12, %v4712_v16  ;;  %v4938_v0 = vmax.f32 %v4773_v46, 0.0  ;;  %v5002_v16 = vmax.f32 %v4053_v30, 0.0 }
 0x654   : > { %v4715_v2 = vpop.f32.mrf.mxu1 }
 0x655   : > { %v5846_v54 = vpop.permute.xlu1 %5845  ;;  %v4777_v49 = vadd.f32 %v4776_v42, %v4714_v5  ;;  %v4716_v28 = vadd.f32 %v4715_v2, %v10823_v3  ;;  %v4939_v12 = vmax.f32 %v4775_v14, 0.0  ;;  %v5064_v42 = vmul.f32 %v10873_v21, %v4938_v0 }
 0x656   : > { %v11228_v32 = vsel %vm5228_vm13, %v11194_v61, %v5846_v54  ;;  %v11231_v17 = vsel %vm5228_vm13, %v5846_v54, %v5848_v29  ;;  %v4719_v50 = vpop.f32.mrf.mxu1  ;;  %v3978_v29 = vadd.f32 %v10372_v22, %v10845_v39 }
 0x657   : > { %12369 = vst [vmem:[#allocation59_spill] sm:$0xff] %v11231_v17  ;;  %v4953_v25 = vmax.f32 %v4777_v49, 0.0  ;;  %v4779_v41 = vadd.f32 %v4778_v63, %v4716_v28  ;;  %v4720_v13 = vadd.f32 %v4719_v50, %v10845_v39  ;;  %v3982_v63 = vadd.f32 %v10388_v53, %v10851_v57  ;;  %v12375_v17 = vld [vmem:[#allocation20_spill] sm:$0xff] }
 0x658   : > { %v4721_v46 = vpop.f32.mrf.mxu1  ;;  %v5113_v28 = vmul.f32 %v10953_v1, %v4987_v62  ;;  %v5128_v50 = vmul.f32 %v10951_v37, %v5002_v16 }
 0x659   : > { %v5079_v2 = vmul.f32 %v10878_v48, %v4953_v25  ;;  %v4722_v5 = vadd.f32 %v4721_v46, %v10845_v39  ;;  %v4954_v54 = vmax.f32 %v4779_v41, 0.0  ;;  %v4783_v51 = vadd.f32 %v4782_v4, %v4720_v13 }
 0x65a   : > { %v4723_v49 = vpop.f32.mrf.mxu1  ;;  %v5065_v25 = vmul.f32 %v10873_v21, %v4939_v12  ;;  %v12371_v12 = vld [vmem:[#allocation29_spill] sm:$0xff] }
 0x65b   : > { %v11243_v14 = vpack.c.bf16 %v5079_v2, %v5064_v42  ;;  %v4785_v30 = vadd.f32 %v4784_v44, %v4722_v5  ;;  %v4724_v0 = vadd.f32 %v4723_v49, %v10851_v57  ;;  %v5080_v46 = vmul.f32 %v10878_v48, %v4954_v54  ;;  %v11252_v42 = vpop.f32.mrf.mxu0  ;;  %v12370_v44 = vld [vmem:[#allocation19_spill] sm:$0xff] }
 0x65c   : > { %v4725_v22 = vpop.f32.mrf.mxu1  ;;  %v4968_v41 = vmax.f32 %v4783_v51, 0.0  ;;  %v11255_v2 = vadd.f32 %v12370_v44, %v3978_v29  ;;  %v11263_v54 = vadd.f32 %v12371_v12, %v3982_v63  ;;  %v4100_v63 = vadd.f32 %v12375_v17, %v10845_v39 }
 0x65d   : > { %v4787_v53 = vadd.f32 %v4786_v20, %v4724_v0  ;;  %v11257_v5 = vpack.c.bf16 %v5080_v46, %v5065_v25  ;;  %v4726_v62 = vadd.f32 %v4725_v22, %v10851_v57  ;;  %v4969_v49 = vmax.f32 %v4785_v30, 0.0  ;;  %v4798_v12 = vpop.f32.mrf.mxu0 }
 0x65e   : > { %v11260_v16 = vpop.f32.mrf.mxu1  ;;  %v12372_v4 = vshll.u32 %v11243_v14, 16  ;;  %v12373_v25 = vshrl.u32 %v11243_v14, 16  ;;  %v11271_v22 = vpack.c.bf16 %v5128_v50, %v5113_v28  ;;  %v5094_v30 = vmul.f32 %v10901_v10, %v4968_v41 }
 0x65f   : > { %v4983_v13 = vmax.f32 %v4787_v53, 0.0  ;;  %v4789_v29 = vadd.f32 %v4788_v31, %v4726_v62  ;;  %v4958_v50 = vmax.f32 %v11255_v2, 0.0 }
 0x660   : > { %v5386_v51 = vrot.slane %v12372_v4, 5  ;;  %v4731_v44 = vpop.f32.mrf.mxu1  ;;  %v5390_v46 = vrot.slane %v12373_v25, 4  ;;  %12374 = vst [vmem:[#allocation19_spill] sm:$0xff] %v11271_v22  ;;  %v12376_v4 = vld [vmem:[#allocation24_spill] sm:$0xff]  ;;  %v12378_v25 = vshll.u32 %v11257_v5, 16 }
 0x661   : > { %v5109_v53 = vmul.f32 %v10903_v59, %v4983_v13  ;;  %v4103_v20 = vadd.f32 %v12376_v4, %v10851_v57  ;;  %v4984_v15 = vmax.f32 %v4789_v29, 0.0  ;;  %v4732_v17 = vadd.f32 %v4731_v44, %v10924_v19  ;;  %v12381_v44 = vld [vmem:[#allocation8_spill] sm:$0xff] }
 0x662   : > { %v11279_v0 = vpop.permute.xlu0 %5375  ;;  %v4733_v31 = vpop.f32.mrf.mxu1  ;;  %v5391_v62 = vor.u32 %v5390_v46, %v5386_v51  ;;  %v5387_v28 = vrot.slane %v12378_v25, 5  ;;  %v5095_v13 = vmul.f32 %v10901_v10, %v4969_v49  ;;  %v12380_v25 = vshrl.u32 %v11257_v5, 16 }
 0x663   : > { %12377 = vst [vmem:[#allocation29_spill] sm:$0xff] %v11279_v0  ;;  %v11284_v45 = vpack.c.bf16 %v5109_v53, %v5094_v30  ;;  %v11287_v41 = vpop.permute.xlu1 %5377  ;;  %v5110_v4 = vmul.f32 %v10903_v59, %v4984_v15  ;;  %v11297_v53 = vadd.f32 %v12381_v44, %v4100_v63  ;;  %v4795_v63 = vadd.f32 %v11237_v34, %v4732_v17 }
 0x664   : > { %12379 = vst [vmem:[#allocation20_spill] sm:$0xff] %v11287_v41  ;;  %5406 = vrot.lane.b32.xlu1 %v5391_v62, %s7137_s26  ;;  %v4735_v29 = vpop.f32.mrf.mxu1  ;;  %v4835_v46 = vpop.f32.mrf.mxu0  ;;  %v6980_v0 = vpack.i.bf16 %v5387_v28, %v5386_v51  ;;  %v5392_v7 = vrot.slane %v12380_v25, 4  ;;  %v12382_v41 = vld [vmem:[#allocation6_spill] sm:$0xff]  ;;  %v12383_v62 = vld [vmem:[#allocation28_spill] sm:$0xff] }
 0x665   : > { %v11301_v15 = vadd.f32 %v12382_v41, %v4103_v20  ;;  %v3992_v9 = vadd.f32 %v12383_v62, %v10912_v56  ;;  %v11305_v26 = vpack.c.bf16 %v5110_v4, %v5095_v13  ;;  %v4736_v51 = vadd.f32 %v4735_v29, %v10912_v56 }
 0x666   : > { %6981 = vrot.lane.b32.xlu0 %v6980_v0, %s7137_s26  ;;  %v5244_v25 = vpop.permute.xlu0 %5243  ;;  %v4837_v2 = vpop.f32.mrf.mxu0  ;;  %v4836_v44 = vadd.f32 %v4835_v46, %v10821_v33  ;;  %v12385_v41 = vshll.u32 %v11284_v45, 16  ;;  %v4734_v13 = vadd.f32 %v4733_v31, %v10912_v56  ;;  %v5393_v29 = vor.u32 %v5392_v7, %v5387_v28 }
 0x667   : > { %v4898_v49 = vpop.f32.mrf.mxu1  ;;  %v11312_v20 = vpop.permute.xlu1 %5245  ;;  %v4799_v4 = vadd.f32 %v4798_v12, %v4736_v51  ;;  %v12387_v46 = vshrl.u32 %v11284_v45, 16  ;;  %v5511_v31 = vshll.u32 %v11305_v26, 16  ;;  %v4838_v7 = vadd.f32 %v4837_v2, %v10821_v33 }
 0x668   : > { %12384 = vst [vmem:[#allocation24_spill] sm:$0xff] %v11312_v20  ;;  %v11316_v62 = vrot.slane %v12385_v41, 1  ;;  %v4839_v0 = vpop.f32.mrf.mxu0  ;;  %v4899_v43 = vadd.f32 %v4898_v49, %v4836_v44  ;;  %v11321_v30 = vsel %vm5251_vm14, %v5244_v25, %v11312_v20  ;;  %v12388_v41 = vld [vmem:[#allocation27_spill] sm:$0xff]  ;;  %v4730_v51 = vadd.f32 %v11260_v16, %v10924_v19 }
 0x669   : > { %12386 = vst [vmem:[#allocation8_spill] sm:$0xff] %v11321_v30  ;;  %v4840_v34 = vadd.f32 %v4839_v0, %v10823_v3  ;;  %v4900_v17 = vpop.f32.mrf.mxu1  ;;  %v3988_v40 = vadd.f32 %v12388_v41, %v10924_v19  ;;  %v5014_v12 = vmax.f32 %v4799_v4, 0.0  ;;  %v4999_v25 = vmax.f32 %v4795_v63, 0.0 }
 0x66a   : > { %v5524_v52 = vor.u32 %v12387_v46, %v11316_v62  ;;  %5408 = vrot.lane.b32.xlu0 %v5393_v29, %s7137_s26  ;;  %v11332_v28 = vpop.permute.xlu0 %5495  ;;  %v4841_v49 = vpop.f32.mrf.mxu0  ;;  %v12390_v2 = vshll.u32 %v11257_v5, 16  ;;  %v12391_v29 = vld [vmem:[#allocation11_spill] sm:$0xff]  ;;  %v4797_v20 = vadd.f32 %v11252_v42, %v4734_v13  ;;  %v11350_v63 = vmul.f32 %v10901_v10, %v4958_v50 }
 0x66b   : > { %12389 = vst [vmem:[#allocation6_spill] sm:$0xff] %v11332_v28  ;;  %v4842_v44 = vadd.f32 %v4841_v49, %v10823_v3  ;;  %v4902_v0 = vpop.f32.mrf.mxu1  ;;  %v11338_v46 = vpop.permute.xlu1 %5497  ;;  %v4055_v41 = vadd.f32 %v12391_v29, %v3992_v9  ;;  %v4940_v49 = vmax.f32 %v4899_v43, 0.0  ;;  %v4959_v9 = vmax.f32 %v11297_v53, 0.0 }
 0x66c   : > { %5542 = vrot.lane.b32.xlu1 %v5524_v52, %s7137_s26  ;;  %v11342_v4 = vrot.slane %v12390_v2, 1  ;;  %v4903_v28 = vadd.f32 %v4902_v0, %v4840_v34  ;;  %v11347_v16 = vpop.f32.mrf.mxu0  ;;  %v5140_v52 = vmul.f32 %v10951_v37, %v5014_v12  ;;  %v12392_v2 = vshrl.u32 %v11257_v5, 16 }
 0x66d   : > { %v4904_v3 = vpop.f32.mrf.mxu1  ;;  %v4974_v29 = vmax.f32 %v11301_v15, 0.0  ;;  %v4901_v30 = vadd.f32 %v4900_v17, %v4838_v7  ;;  %v11362_v34 = vrot.slane %v5511_v31, 5  ;;  %v4793_v50 = vadd.f32 %v11223_v11, %v4730_v51  ;;  %v12394_v15 = vld [vmem:[#allocation10_spill] sm:$0xff] }
 0x66e   : > { %v5276_v33 = vor.u32 %v12392_v2, %v11342_v4  ;;  %v11358_v42 = vpop.permute.xlu0 %5616  ;;  %v11360_v13 = vpop.f32.mrf.mxu0  ;;  %v5125_v43 = vmul.f32 %v10953_v1, %v4999_v25  ;;  %v4955_v12 = vmax.f32 %v4903_v28, 0.0  ;;  %v4905_v0 = vadd.f32 %v4904_v3, %v4842_v44 }
 0x66f   : > { %12393 = vst [vmem:[#allocation28_spill] sm:$0xff] %v11358_v42  ;;  %v11367_v5 = vpop.f32.mrf.mxu1  ;;  %v11369_v53 = vpop.permute.xlu1 %5618  ;;  %v4051_v17 = vadd.f32 %v12394_v15, %v3988_v40  ;;  %v5003_v7 = vmax.f32 %v4055_v41, 0.0  ;;  %v5013_v2 = vmax.f32 %v4797_v20, 0.0  ;;  %v12395_v42 = vshrl.u32 %v11305_v26, 16 }
 0x670   : > { %5293 = vrot.lane.b32.xlu0 %v5276_v33, %s7137_s26  ;;  %v4849_v8 = vpop.f32.mrf.mxu0  ;;  %v11374_v60 = vpack.c.bf16 %v5140_v52, %v5125_v43  ;;  %v5066_v11 = vmul.f32 %v10873_v21, %v4940_v49  ;;  %v5081_v3 = vmul.f32 %v10878_v48, %v4955_v12  ;;  %v4956_v28 = vmax.f32 %v4905_v0, 0.0 }
 0x671   : > { %v5633_v35 = vrot.slane %v12395_v42, 4  ;;  %v11378_v33 = vpop.f32.mrf.mxu1  ;;  %v12396_v51 = vmax.f32 %v11263_v54, 0.0  ;;  %v5085_v40 = vmul.f32 %v10901_v10, %v4959_v9  ;;  %v4941_v20 = vmax.f32 %v4901_v30, 0.0 }
 0x672   : > { %v11385_v41 = vpop.f32.mrf.mxu0  ;;  %v5100_v52 = vmul.f32 %v10903_v59, %v4974_v29  ;;  %v4998_v42 = vmax.f32 %v4793_v50, 0.0  ;;  %v11388_v49 = vpack.c.bf16 %v5081_v3, %v5066_v11  ;;  %v11390_v43 = vrot.slane %v5511_v31, 1  ;;  %v5860_v11 = vpop.permute.xlu0 %5859 }
 0x673   : > { %v5099_v25 = vmul.f32 %v10903_v59, %v12396_v51  ;;  %v5634_v44 = vor.u32 %v5633_v35, %v11362_v34  ;;  %v4912_v12 = vpop.f32.mrf.mxu1  ;;  %v5849_v54 = vsel %vm5228_vm13, %v11190_v24, %v11194_v61  ;;  %v4988_v0 = vmax.f32 %v4051_v17, 0.0  ;;  %v11398_v35 = vpop.permute.xlu1 %5861  ;;  %v7099_v61 = vld [vmem:[%s12181_s8 + $0x38] ss:$68 sps:$4 sm:$0xff]  }
 0x674   : > { %v5129_v9 = vmul.f32 %v10951_v37, %v5003_v7  ;;  %v5082_v30 = vmul.f32 %v10878_v48, %v4956_v28  ;;  %v4855_v29 = vpop.f32.mrf.mxu0  ;;  %v5139_v50 = vmul.f32 %v10951_v37, %v5013_v2  ;;  %v6985_v15 = vpack.i.bf16 %v11390_v43, %v11316_v62 }
 0x675   : > { %5649 = vrot.lane.b32.xlu1 %v5634_v44, %s7137_s26  ;;  %v11404_v24 = vpop.f32.mrf.mxu1  ;;  %v5067_v7 = vmul.f32 %v10873_v21, %v4941_v20  ;;  %v5264_v2 = vshll.u32 %v11388_v49, 16  ;;  %v5867_v3 = vsel %vm5251_vm14, %v5860_v11, %v11398_v35  ;;  %v12399_v62 = vrot.slane %v11271_v22, 4 }
 0x676   : > { %v4857_v28 = vpop.f32.mrf.mxu0  ;;  %v5124_v44 = vmul.f32 %v10953_v1, %v4998_v42  ;;  %6986 = vrot.lane.b32.xlu0 %v6985_v15, %s7137_s26  ;;  %v4856_v31 = vadd.f32 %v4855_v29, %v10924_v19  ;;  %v12400_v17 = vshll.u32 %v11284_v45, 16  ;;  %v5114_v21 = vmul.f32 %v10953_v1, %v4988_v0 }
 0x677   : > { %v5907_v51 = vsel %vm11408_vm2, %v12399_v62, %v5849_v54  ;;  %v4918_v48 = vpop.f32.mrf.mxu1  ;;  %v11427_v47 = vpack.c.bf16 %v5082_v30, %v5067_v7  ;;  %v4850_v11 = vadd.f32 %v4849_v8, %v10851_v57  ;;  %v11434_v42 = vpack.c.bf16 %v5099_v25, %v11350_v63 }
 0x678   : > { %v5627_v20 = vrot.slane %v12400_v17, 5  ;;  %v11431_v22 = vsel %vm5317_vm1, %v5907_v51, %v5867_v3  ;;  %v4859_v54 = vpop.f32.mrf.mxu0  ;;  %v11436_v15 = vpack.c.bf16 %v5139_v50, %v5124_v44  ;;  %v12402_v17 = vshll.u32 %v11374_v60, 16 }
 0x679   : > { %12401 = vst [vmem:[#allocation27_spill] sm:$0xff] %v11431_v22  ;;  %v4920_v0 = vpop.f32.mrf.mxu1  ;;  %v11443_v30 = vpack.c.bf16 %v5100_v52, %v5085_v40  ;;  %v11445_v7 = vrot.slane %v5264_v2, 1  ;;  %v4846_v8 = vadd.f32 %v11347_v16, %v10845_v39  ;;  %v12403_v3 = vshrl.u32 %v11374_v60, 16 }
 0x67a   : > { %v6990_v29 = vpack.i.bf16 %v11362_v34, %v5627_v20  ;;  %v11441_v62 = vrot.slane %v12402_v17, 5  ;;  %v4858_v25 = vadd.f32 %v4857_v28, %v10924_v19  ;;  %v4919_v34 = vadd.f32 %v4918_v48, %v4856_v31  ;;  %v4861_v36 = vpop.f32.mrf.mxu0 }
 0x67b   : > { %v5876_v63 = vrot.slane %v12403_v3, 4  ;;  %v4860_v50 = vadd.f32 %v4859_v54, %v10912_v56  ;;  %v12404_v51 = vshrl.u32 %v11284_v45, 16  ;;  %v4922_v40 = vpop.f32.mrf.mxu1  ;;  %v11456_v52 = vpack.c.bf16 %v5129_v9, %v5114_v21 }
 0x67c   : > { %6991 = vrot.lane.b32.xlu0 %v6990_v29, %s7137_s26  ;;  %v5268_v17 = vshll.u32 %v11427_v47, 16  ;;  %v4913_v22 = vadd.f32 %v4912_v12, %v4850_v11  ;;  %v11463_v29 = vsel %vm5228_vm13, %v11186_v23, %v11202_v27  ;;  %v5748_v48 = vshll.u32 %v11436_v15, 16 }
 0x67d   : > { %v5631_v44 = vrot.slane %v12404_v51, 4  ;;  %v5877_v16 = vor.u32 %v5876_v63, %v11441_v62  ;;  %v4921_v31 = vadd.f32 %v4920_v0, %v4858_v25  ;;  %v5277_v45 = vshrl.u32 %v11388_v49, 16  ;;  %v4924_v11 = vpop.f32.mrf.mxu1 }
 0x67e   : > { %v4909_v21 = vadd.f32 %v11367_v5, %v4846_v8  ;;  %v5000_v9 = vmax.f32 %v4919_v34, 0.0  ;;  %v6995_v12 = vpack.i.bf16 %v11445_v7, %v11342_v4  ;;  %v5763_v54 = vshrl.u32 %v11436_v15, 16 }
 0x67f   : > { %v5632_v28 = vor.u32 %v5631_v44, %v5627_v20  ;;  %5892 = vrot.lane.b32.xlu1 %v5877_v16, %s7137_s26  ;;  %v4848_v27 = vadd.f32 %v11360_v13, %v10845_v39  ;;  %v4862_v20 = vadd.f32 %v4861_v36, %v10912_v56  ;;  %v4923_v0 = vadd.f32 %v4922_v40, %v4860_v50 }
 0x680   : > { %v5280_v3 = vshrl.u32 %v11427_v47, 16  ;;  %v5389_v5 = vrot.slane %v5268_v17, 5  ;;  %v4852_v8 = vadd.f32 %v11385_v41, %v10851_v57  ;;  %v4985_v4 = vmax.f32 %v4913_v22, 0.0  ;;  %v11481_v63 = vpop.permute.xlu0 %5379 }
 0x681   : > { %5647 = vrot.lane.b32.xlu0 %v5632_v28, %s7137_s26  ;;  %v5001_v25 = vmax.f32 %v4921_v31, 0.0  ;;  %v5015_v34 = vmax.f32 %v4923_v0, 0.0  ;;  %v4925_v51 = vadd.f32 %v4924_v11, %v4862_v20  ;;  %v12405_v13 = vshrl.u32 %v11305_v26, 16 }
 0x682   : > { %v5388_v36 = vrot.slane %v5264_v2, 5  ;;  %v5394_v50 = vrot.slane %v5277_v45, 4  ;;  %v4970_v40 = vmax.f32 %v4909_v21, 0.0  ;;  %v5126_v16 = vmul.f32 %v10953_v1, %v5000_v9 }
 0x683   : > { %v5527_v44 = vor.u32 %v12405_v13, %v11390_v43  ;;  %6996 = vrot.lane.b32.xlu1 %v6995_v12, %s7137_s26  ;;  %v5141_v22 = vmul.f32 %v10951_v37, %v5015_v34  ;;  %v5016_v41 = vmax.f32 %v4925_v51, 0.0  ;;  %v11494_v31 = vrot.slane %v5748_v48, 5 }
 0x684   : > { %v5874_v26 = vrot.slane %v5763_v54, 4  ;;  %v5396_v43 = vrot.slane %v5280_v3, 4  ;;  %v5111_v2 = vmul.f32 %v10903_v59, %v4985_v4  ;;  %v4915_v28 = vadd.f32 %v11404_v24, %v4852_v8  ;;  %v11502_v9 = vpop.permute.xlu0 %5247  ;;  %v11514_v24 = vpop.permute.xlu1 %5381 }
 0x685   : > { %5544 = vrot.lane.b32.xlu0 %v5527_v44, %s7137_s26  ;;  %v7000_v21 = vpack.i.bf16 %v5389_v5, %v5388_v36  ;;  %v5127_v12 = vmul.f32 %v10953_v1, %v5001_v25  ;;  %v11505_v11 = vpack.c.bf16 %v5141_v22, %v5126_v16  ;;  %v5142_v20 = vmul.f32 %v10951_v37, %v5016_v41 }
 0x686   : > { %v5875_v0 = vor.u32 %v5874_v26, %v11494_v31  ;;  %v5581_v34 = vrot.slane %v11434_v42, 4  ;;  %v5582_v51 = vrot.slane %v11443_v30, 4  ;;  %v5096_v13 = vmul.f32 %v10901_v10, %v4970_v40 }
 0x687   : > { %v4911_v4 = vadd.f32 %v11378_v33, %v4848_v27  ;;  %7001 = vrot.lane.b32.xlu1 %v7000_v21, %s7137_s26  ;;  %v5607_v8 = vsel %vm5228_vm13, %v11188_v38, %v11208_v55  ;;  %v5824_v25 = vrot.slane %v11456_v52, 4  ;;  %v5756_v44 = vshll.u32 %v11505_v11, 16 }
 0x688   : > { %v11521_v16 = vpack.c.bf16 %v5142_v20, %v5127_v12  ;;  %v5560_v33 = vsel %vm11408_vm2, %v11434_v42, %v11463_v29  ;;  %v5171_v27 = vpack.c.bf16 %v5111_v2, %v5096_v13  ;;  %v4986_v40 = vmax.f32 %v4915_v28, 0.0  ;;  %v5500_v21 = vpop.permute.xlu0 %5499 }
 0x689   : > { %5890 = vrot.lane.b32.xlu0 %v5875_v0, %s7137_s26  ;;  %v5395_v22 = vor.u32 %v5394_v50, %v5388_v36  ;;  %v11530_v41 = vrot.slane %v5756_v44, 1  ;;  %v5397_v26 = vor.u32 %v5396_v43, %v5389_v5  ;;  %v12406_v12 = vshll.u32 %v11243_v14, 16 }
 0x68a   : > { %v5760_v55 = vshll.u32 %v11521_v16, 16  ;;  %v5561_v42 = vsel %vm11408_vm2, %v11443_v30, %v11206_v18  ;;  %v5665_v29 = vsel %vm11408_vm2, %v5581_v34, %v5607_v8  ;;  %v4971_v36 = vmax.f32 %v4911_v4, 0.0  ;;  %v5502_v5 = vpop.permute.xlu1 %5501 }
 0x68b   : > { %v11535_v20 = vrot.slane %v12406_v12, 1  ;;  %5410 = vrot.lane.b32.xlu1 %v5395_v22, %s7137_s26  ;;  %v5504_v50 = vsel %vm5251_vm14, %v11338_v46, %v5500_v21  ;;  %v5769_v43 = vshrl.u32 %v11505_v11, 16  ;;  %v5505_v30 = vsel %vm5251_vm14, %v5500_v21, %v5502_v5 }
 0x68c   : > { %v11549_v2 = vrot.slane %v5760_v55, 1  ;;  %v11553_v18 = vsel %vm5317_vm1, %v5560_v33, %v5504_v50  ;;  %v5515_v28 = vshll.u32 %v5171_v27, 16  ;;  %v5112_v0 = vmul.f32 %v10903_v59, %v4986_v40  ;;  %v5621_v33 = vpop.permute.xlu0 %5620 }
 0x68d   : > { %5412 = vrot.lane.b32.xlu0 %v5397_v26, %s7137_s26  ;;  %v5279_v34 = vor.u32 %v5277_v45, %v11445_v7  ;;  %v11561_v13 = vsel %vm5317_vm1, %v5561_v42, %v5505_v30  ;;  %v5772_v4 = vshrl.u32 %v11521_v16, 16  ;;  %v12407_v8 = vshrl.u32 %v11243_v14, 16  ;;  %v12431_v16 = vld [vmem:[#allocation34_spill] sm:$0xff] }
 0x68e   : > { %v7030_v26 = vpack.i.bf16 %v11549_v2, %v11530_v41  ;;  %v11572_v40 = vor.u32 %v5769_v43, %v11530_v41  ;;  %v5097_v49 = vmul.f32 %v10901_v10, %v4971_v36  ;;  %v5625_v7 = vsel %vm5251_vm14, %v11369_v53, %v5621_v33  ;;  %v12467_v41 = vld [vmem:[#allocation31_spill] sm:$0xff] }
 0x68f   : > { %v5273_v22 = vor.u32 %v12407_v8, %v11535_v20  ;;  %5295 = vrot.lane.b32.xlu1 %v5279_v34, %s7137_s26  ;;  %v11580_v14 = vrot.slane %v5748_v48, 1  ;;  %v12408_v45 = vshll.u32 %v11374_v60, 16  ;;  %v5242_v12 = vrot.slane %v11143_v58, 3 }
 0x690   : > { %v5270_v42 = vrot.slane %v5268_v17, 1  ;;  %v11591_v36 = vsel %vm5317_vm1, %v5665_v29, %v5625_v7  ;;  %v11596_v50 = vor.u32 %v5772_v4, %v11549_v2  ;;  %v5172_v48 = vpack.c.bf16 %v5112_v0, %v5097_v49  ;;  %v11598_v5 = vpop.permute.xlu1 %5863  ;;  %v5623_v49 = vpop.permute.xlu0 %5622 }
 0x691   : > { %v11584_v21 = vrot.slane %v12408_v45, 1  ;;  %5291 = vrot.lane.b32.xlu0 %v5273_v22, %s7137_s26  ;;  %v11605_v58 = vor.u32 %v5763_v54, %v11580_v14  ;;  %v12409_v17 = vshrl.u32 %v11374_v60, 16  ;;  %v5908_v34 = vsel %vm11408_vm2, %v5824_v25, %v11228_v32  ;;  %v12410_v54 = vld [vmem:[#allocation37_spill] sm:$0xff]  ;;  %v12411_v60 = vld [vmem:[#allocation36_spill] sm:$0xff] }
 0x692   : > { %v5517_v0 = vrot.slane %v5515_v28, 1  ;;  %v5528_v8 = vshrl.u32 %v5171_v27, 16  ;;  %v5868_v22 = vsel %vm5251_vm14, %v11398_v35, %v11598_v5  ;;  %v5666_v15 = vsel %vm11408_vm2, %v5582_v51, %v11218_v6 }
 0x693   : > { %v7035_v30 = vpack.i.bf16 %v11584_v21, %v11580_v14  ;;  %v11610_v29 = vor.u32 %v12409_v17, %v11584_v21  ;;  %v12412_v7 = vor.u32 %v12410_v54, %v12411_v60  ;;  %v11626_v45 = vsel %vm5317_vm1, %v5908_v34, %v5868_v22  ;;  %v7077_v34 = vld [vmem:[%s12181_s8] ss:$68 sps:$4 sm:$0xff]   ;;  %v12417_v60 = vld [vmem:[#allocation41_spill] sm:$0xff] }
 0x694   : > { %v5626_v32 = vsel %vm5251_vm14, %v5621_v33, %v5623_v49  ;;  %v5629_v35 = vrot.slane %v5515_v28, 5  ;;  %v5519_v27 = vshll.u32 %v5172_v48, 16  ;;  %v5282_v6 = vor.u32 %v5280_v3, %v5270_v42  ;;  %v7079_v33 = vld [vmem:[%s12181_s8 + $0x4] ss:$68 sps:$4 sm:$0xff]  }
 0x695   : > { %5226 = vrot.lane.b32.xlu1 %v12412_v7, %s7135_s28  ;;  %5249 = vrot.lane.b32.xlu0 %v5242_v12, %s7136_s25  ;;  %v11631_v25 = vsel %vm5317_vm1, %v5666_v15, %v5626_v32  ;;  %v5635_v51 = vrot.slane %v5528_v8, 4  ;;  %v5530_v17 = vor.u32 %v5528_v8, %v5517_v0  ;;  %v12413_v8 = vld [vmem:[#allocation39_spill] sm:$0xff]  ;;  %v12414_v22 = vld [vmem:[#allocation38_spill] sm:$0xff]  ;;  %v5872_v54 = vrot.slane %v5756_v44, 5  ;;  %v12419_v32 = vld [vmem:[#allocation45_spill] sm:$0xff] }
 0x696   : > { %v5521_v12 = vrot.slane %v5519_v27, 1  ;;  %v7005_v28 = vpack.i.bf16 %v11494_v31, %v5629_v35  ;;  %6183 = vmatprep.subr.bf16.mxu1 %v7079_v33  ;;  %v12415_v49 = vor.u32 %v12413_v8, %v12414_v22  ;;  %v5630_v15 = vrot.slane %v5519_v27, 5  ;;  %v12416_v31 = vld [vmem:[#allocation42_spill] sm:$0xff]  ;;  %v12426_v8 = vld [vmem:[#allocation7_spill] sm:$0xff] }
 0x697   : > { %v5636_v47 = vor.u32 %v5635_v51, %v5629_v35  ;;  %6184 = vmatpush1.bf16.xpose.msra.mxu1 %v7077_v34  ;;  %v12418_v7 = vor.u32 %v12416_v31, %v12417_v60  ;;  %v12420_v35 = vld [vmem:[#allocation43_spill] sm:$0xff]  ;;  %v5878_v51 = vrot.slane %v5769_v43, 4  ;;  %v7020_v27 = vpack.i.bf16 %v5872_v54, %v11535_v20  ;;  %v12429_v60 = vld [vmem:[#allocation13_spill] sm:$0xff] }
 0x698   : > { %v7010_v3 = vpack.i.bf16 %v5521_v12, %v5517_v0  ;;  %v12421_v0 = vor.u32 %v12419_v32, %v12420_v35  ;;  %v5873_v11 = vrot.slane %v5760_v55, 5  ;;  %v5880_v43 = vrot.slane %v5772_v4, 4 }
 0x699   : > { %5297 = vrot.lane.b32.xlu1 %v5282_v6, %s7137_s26  ;;  %5546 = vrot.lane.b32.xlu0 %v5530_v17, %s7137_s26  ;;  %v7015_v6 = vpack.i.bf16 %v5630_v15, %v11441_v62  ;;  %v5531_v17 = vshrl.u32 %v5172_v48, 16  ;;  %v5879_v34 = vor.u32 %v5878_v51, %v5872_v54  ;;  %v12423_v62 = vld [vmem:[#allocation46_spill] sm:$0xff]  ;;  %v12428_v54 = vld [vmem:[#allocation21_spill] sm:$0xff]  ;;  %v11690_v51 = vpop.permute.xlu0 %5865  ;;  %v4111_v2 = vadd.f32 %v12467_v41, %v10912_v56  ;;  %v12469_v56 = vld [vmem:[#allocation15_spill] sm:$0xff] }
 0x69a   : > { %v7025_v48 = vpack.i.bf16 %v5270_v42, %v5873_v11  ;;  %v12432_v42 = vld [vmem:[#allocation35_spill] sm:$0xff] }
 0x69b   : > { %v5533_v44 = vor.u32 %v5531_v17, %v5521_v12  ;;  %v5637_v33 = vrot.slane %v5531_v17, 4  ;;  %v5881_v12 = vor.u32 %v5880_v43, %v5873_v11  ;;  %v12434_v17 = vld [vmem:[#allocation50_spill] sm:$0xff] }
 0x69d   : > { %7006 = vrot.lane.b32.xlu1 %v7005_v28, %s7137_s26  ;;  %5651 = vrot.lane.b32.xlu0 %v5636_v47, %s7137_s26  ;;  %v12422_v28 = vld [vmem:[#allocation47_spill] sm:$0xff]  ;;  %v5638_v20 = vor.u32 %v5637_v33, %v5630_v15  ;;  %v12430_v15 = vld [vmem:[#allocation5_spill] sm:$0xff]  ;;  %v12435_v33 = vld [vmem:[#allocation20_spill] sm:$0xff] }
 0x69e   : > { %v12424_v47 = vor.u32 %v12422_v28, %v12423_v62  ;;  %v12436_v28 = vld [vmem:[#allocation29_spill] sm:$0xff] }
 0x69f   : > { %v5383_v62 = vsel %vm5251_vm14, %v12436_v28, %v12435_v33  ;;  %v7082_v28 = vld [vmem:[%s12181_s8 + $0xc] ss:$68 sps:$4 sm:$0xff]  }
 0x6a0   : > { %6231 = vmatprep.subr.bf16.mxu0 %v7082_v28 }
 0x6a1   : > { %7011 = vrot.lane.b32.xlu1 %v7010_v3, %s7137_s26  ;;  %5718 = vrot.lane.b32.xlu0 %v12415_v49, %s7135_s28  ;;  %v12425_v3 = vld [vmem:[#allocation32_spill] sm:$0xff]  ;;  %v12427_v49 = vld [vmem:[#allocation33_spill] sm:$0xff] }
 0x6a2   : > { %v3966_v22 = vadd.f32 %v12426_v8, %v12425_v3  ;;  %v3970_v31 = vadd.f32 %v12428_v54, %v12427_v49 }
 0x6a4   : > { %v4029_v55 = vadd.f32 %v12429_v60, %v3966_v22  ;;  %v12440_v22 = vld [vmem:[#allocation25_spill] sm:$0xff] }
 0x6a5   : > { %5720 = vrot.lane.b32.xlu1 %v12418_v7, %s7135_s28  ;;  %5714 = vrot.lane.b32.xlu0 %v12421_v0, %s7135_s28  ;;  %v4033_v7 = vadd.f32 %v12430_v15, %v3970_v31  ;;  %v3980_v54 = vadd.f32 %v12440_v22, %v10851_v57 }
 0x6a6   : > { %v4927_v32 = vmax.f32 %v4029_v55, 0.0 }
 0x6a7   : > { %v4942_v35 = vmax.f32 %v4033_v7, 0.0 }
 0x6a8   : > { %v5053_v4 = vmul.f32 %v12431_v16, %v4927_v32 }
 0x6a9   : > { %7016 = vrot.lane.b32.xlu1 %v7015_v6, %s7137_s26  ;;  %7021 = vrot.lane.b32.xlu0 %v7020_v27, %s7137_s26  ;;  %v5068_v0 = vmul.f32 %v12432_v42, %v4942_v35  ;;  %v12433_v27 = vld [vmem:[#allocation51_spill] sm:$0xff]  ;;  %v12442_v35 = vld [vmem:[#allocation26_spill] sm:$0xff] }
 0x6ab   : > { %v11688_v6 = vpack.c.bf16 %v5068_v0, %v5053_v4  ;;  %v4043_v4 = vadd.f32 %v12442_v35, %v3980_v54  ;;  %v12448_v35 = vld [vmem:[#allocation2_spill] sm:$0xff] }
 0x6ad   : > { %5548 = vrot.lane.b32.xlu1 %v5533_v44, %s7137_s26  ;;  %5894 = vrot.lane.b32.xlu0 %v5879_v34, %s7137_s26  ;;  %v5365_v44 = vsel %vm5228_vm13, %v12434_v17, %v12433_v27  ;;  %v5339_v34 = vrot.slane %v11688_v6, 4  ;;  %v4972_v17 = vmax.f32 %v4043_v4, 0.0 }
 0x6b1   : > { %5716 = vrot.lane.b32.xlu1 %v12424_v47, %s7135_s28 }
 0x6b5   : > { %5653 = vrot.lane.b32.xlu1 %v5638_v20, %s7137_s26 }
 0x6b9   : > { %7026 = vrot.lane.b32.xlu1 %v7025_v48, %s7137_s26  ;;  %v5423_v48 = vsel %vm11408_vm2, %v5339_v34, %v5365_v44  ;;  %v7080_v34 = vld [vmem:[%s12181_s8 + $0x8] ss:$68 sps:$4 sm:$0xff]  }
 0x6ba   : > { %v5428_v31 = vsel %vm5317_vm1, %v5423_v48, %v5383_v62  ;;  %v12443_v48 = vld [vmem:[#allocation4_spill] sm:$0xff]  ;;  %6232 = vmatpush1.bf16.xpose.msra.mxu0 %v7080_v34 }
 0x6bd   : > { %5896 = vrot.lane.b32.xlu1 %v5881_v12, %s7137_s26  ;;  %v12439_v12 = vld [vmem:[#allocation16_spill] sm:$0xff] }
 0x6be   : > { %v3976_v8 = vadd.f32 %v12439_v12, %v10845_v39  ;;  %v12441_v39 = vld [vmem:[#allocation3_spill] sm:$0xff]  ;;  %v3968_v12 = vadd.f32 %v12443_v48, %v12425_v3 }
 0x6c0   : > { %v4039_v57 = vadd.f32 %v12441_v39, %v3976_v8  ;;  %v12444_v8 = vld [vmem:[#allocation18_spill] sm:$0xff] }
 0x6c1   : > { %v3972_v22 = vadd.f32 %v12444_v8, %v12427_v49 }
 0x6c2   : > { %v4957_v0 = vmax.f32 %v4039_v57, 0.0  ;;  %v7085_v57 = vld [vmem:[%s12181_s8 + $0x14] ss:$68 sps:$4 sm:$0xff]  }
 0x6c3   : > { %v4035_v4 = vadd.f32 %v12448_v35, %v3972_v22  ;;  %6279 = vmatprep.subr.bf16.mxu1 %v7085_v57  ;;  %v12453_v57 = vld [vmem:[#allocation14_spill] sm:$0xff] }
 0x6c4   : > { %v5083_v62 = vmul.f32 %v10901_v10, %v4957_v0  ;;  %v12447_v10 = vld [vmem:[#allocation6_spill] sm:$0xff] }
 0x6c5   : > { %v12449_v0 = vld [vmem:[#allocation30_spill] sm:$0xff] }
 0x6d6   : > { %v5407_v55 = vpop.permute.xlu1 %5406 }
 0x6d8   : > { %v11699_v47 = vpop.permute.xlu0 %6981 }
 0x6d9   : > { %v6984_v11 = vunpack.i.h.bf16 %v11699_v47  ;;  %v6983_v20 = vunpack.i.l.bf16 %v11699_v47 }
 0x6db   : > { %v5414_v60 = vsel %vm5299_vm5, %v6983_v20, %v6984_v11  ;;  %v5098_v20 = vmul.f32 %v10903_v59, %v4972_v17  ;;  %v5503_v59 = vsel %vm5251_vm14, %v12447_v10, %v11338_v46  ;;  %v4092_v17 = vadd.f32 %v12449_v0, %v12425_v3  ;;  %v12450_v46 = vld [vmem:[#allocation22_spill] sm:$0xff] }
 0x6dc   : > { %v11717_v15 = vpop.permute.xlu0 %5408  ;;  %v5438_v7 = vsel %vm11703_vm6, %v5428_v31, %v5414_v60  ;;  %v12445_v31 = vld [vmem:[#allocation55_spill] sm:$0xff] }
 0x6dd   : > { %v5417_v32 = vsel %vm5299_vm5, %v5407_v55, %v11717_v15  ;;  %5928 = vrot.lane.b32.xlu1 %v5438_v7, %s7138_s30  ;;  %v5481_v60 = vsel %vm5228_vm13, %v12445_v31, %v11186_v23  ;;  %v5158_v55 = vpack.c.bf16 %v5098_v20, %v5083_v62  ;;  %v12446_v7 = vld [vmem:[#allocation9_spill] sm:$0xff]  ;;  %v4095_v62 = vadd.f32 %v12450_v46, %v12427_v49  ;;  %v12451_v20 = vld [vmem:[#allocation54_spill] sm:$0xff] }
 0x6de   : > { %5934 = vrot.lane.b32.xlu0 %v5417_v32, %s7138_s30  ;;  %v5543_v54 = vpop.permute.xlu1 %5542  ;;  %v4031_v32 = vadd.f32 %v12446_v7, %v3968_v12  ;;  %v5606_v48 = vsel %vm5228_vm13, %v12451_v20, %v11188_v38  ;;  %v4943_v38 = vmax.f32 %v4035_v4, 0.0 }
 0x6df   : > { %v5559_v28 = vsel %vm11408_vm2, %v5158_v55, %v5481_v60  ;;  %v5580_v22 = vrot.slane %v5158_v55, 4  ;;  %v12452_v60 = vld [vmem:[#allocation28_spill] sm:$0xff] }
 0x6e0   : > { %v5564_v12 = vsel %vm5317_vm1, %v5559_v28, %v5503_v59  ;;  %v4928_v31 = vmax.f32 %v4031_v32, 0.0  ;;  %v5624_v7 = vsel %vm5251_vm14, %v12452_v60, %v11369_v53  ;;  %v4149_v59 = vadd.f32 %v12453_v57, %v4092_v17  ;;  %v12454_v32 = vld [vmem:[#allocation17_spill] sm:$0xff] }
 0x6e1   : > { %v5664_v55 = vsel %vm11408_vm2, %v5580_v22, %v5606_v48  ;;  %v4152_v53 = vadd.f32 %v12454_v32, %v4095_v62  ;;  %v5069_v28 = vmul.f32 %v12432_v42, %v4943_v38  ;;  %v12455_v62 = vld [vmem:[#allocation56_spill] sm:$0xff]  ;;  %v12456_v48 = vld [vmem:[#allocation53_spill] sm:$0xff] }
 0x6e2   : > { %v11727_v44 = vpop.permute.xlu0 %5293  ;;  %v5669_v4 = vsel %vm5317_vm1, %v5664_v55, %v5624_v7  ;;  %v5230_v22 = vsel %vm5228_vm13, %v12456_v48, %v12455_v62 }
 0x6e7   : > { %v11766_v8 = vpop.permute.xlu1 %5649 }
 0x6e8   : > { %v11748_v39 = vpop.permute.xlu0 %6986 }
 0x6e9   : > { %v6989_v23 = vunpack.i.h.bf16 %v11748_v39  ;;  %v6988_v34 = vunpack.i.l.bf16 %v11748_v39 }
 0x6eb   : > { %v5550_v3 = vsel %vm5299_vm5, %v6988_v34, %v6989_v23  ;;  %v5054_v34 = vmul.f32 %v12431_v16, %v4928_v31  ;;  %v4944_v31 = vmax.f32 %v4152_v53, 0.0 }
 0x6ec   : > { %v5574_v10 = vsel %vm11703_vm6, %v5564_v12, %v5550_v3  ;;  %v4929_v3 = vmax.f32 %v4149_v59, 0.0 }
 0x6ed   : > { %5952 = vrot.lane.b32.xlu0 %v5574_v10, %s7139_s13  ;;  %v5144_v60 = vpack.c.bf16 %v5069_v28, %v5054_v34  ;;  %v12457_v10 = vld [vmem:[#allocation24_spill] sm:$0xff]  ;;  %v12458_v34 = vld [vmem:[#allocation57_spill] sm:$0xff] }
 0x6ee   : > { %v11774_v49 = vpop.permute.xlu0 %6991  ;;  %v5055_v7 = vmul.f32 %v12431_v16, %v4929_v3  ;;  %v5253_v38 = vsel %vm5251_vm14, %v12457_v10, %v11502_v9 }
 0x6ef   : > { %v6994_v35 = vunpack.i.h.bf16 %v11774_v49  ;;  %v6993_v0 = vunpack.i.l.bf16 %v11774_v49  ;;  %v5315_v16 = vsel %vm11408_vm2, %v5144_v60, %v5230_v22 }
 0x6f1   : > { %v11788_v46 = vpop.permute.xlu1 %5892  ;;  %v5655_v17 = vsel %vm5299_vm5, %v6993_v0, %v6994_v35  ;;  %v5070_v0 = vmul.f32 %v12432_v42, %v4944_v31  ;;  %v5366_v42 = vsel %vm5228_vm13, %v12433_v27, %v12458_v34 }
 0x6f2   : > { %v5679_v12 = vsel %vm11703_vm6, %v5669_v4, %v5655_v17  ;;  %v5324_v17 = vsel %vm5317_vm1, %v5315_v16, %v5253_v38 }
 0x6f3   : > { %v5648_v20 = vpop.permute.xlu0 %5647  ;;  %5976 = vrot.lane.b32.xlu0 %v5679_v12, %s7140_s24  ;;  %v5145_v27 = vpack.c.bf16 %v5070_v0, %v5055_v7  ;;  %v5385_v7 = vsel %vm5251_vm14, %v11481_v63, %v11514_v24 }
 0x6f4   : > { %v5658_v59 = vsel %vm5299_vm5, %v5648_v20, %v11766_v8  ;;  %v5340_v20 = vrot.slane %v5144_v60, 4 }
 0x6f5   : > { %v11803_v57 = vpop.permute.xlu1 %6996 }
 0x6f6   : > { %v6999_v55 = vunpack.i.h.bf16 %v11803_v57  ;;  %v6998_v32 = vunpack.i.l.bf16 %v11803_v57  ;;  %v5424_v10 = vsel %vm11408_vm2, %v5340_v20, %v5366_v42 }
 0x6f7   : > { %v11810_v4 = vpop.permute.xlu0 %5544  ;;  %5982 = vrot.lane.b32.xlu0 %v5658_v59, %s7140_s24 }
 0x6f8   : > { %v5553_v53 = vsel %vm5299_vm5, %v5543_v54, %v11810_v4  ;;  %v5301_v28 = vsel %vm5299_vm5, %v6998_v32, %v6999_v55  ;;  %v5384_v54 = vsel %vm5251_vm14, %v12435_v33, %v11481_v63 }
 0x6f9   : > { %5958 = vrot.lane.b32.xlu1 %v5553_v53, %s7139_s13  ;;  %v7002_v12 = vpop.permute.xlu1 %7001  ;;  %v5334_v3 = vsel %vm11703_vm6, %v5324_v17, %v5301_v28  ;;  %v5432_v59 = vsel %vm5317_vm1, %v5424_v10, %v5384_v54  ;;  %v5341_v53 = vrot.slane %v5145_v27, 4  ;;  %v12460_v28 = vld [vmem:[#allocation58_spill] sm:$0xff] }
 0x6fa   : > { %v7003_v22 = vunpack.i.l.bf16 %v7002_v12  ;;  %6201 = vmatprep.mubr.bf16.mxu1 %v5334_v3  ;;  %v7004_v38 = vunpack.i.h.bf16 %v7002_v12 }
 0x6fb   : > { %v11832_v31 = vpop.permute.xlu0 %5890  ;;  %v5425_v17 = vsel %vm11408_vm2, %v5341_v53, %v12460_v28 }
 0x6fc   : > { %v5415_v60 = vsel %vm5299_vm5, %v6984_v11, %v7003_v22  ;;  %v5416_v47 = vsel %vm5299_vm5, %v7003_v22, %v7004_v38  ;;  %v12459_v11 = vld [vmem:[#allocation48_spill] sm:$0xff]  ;;  %v5436_v20 = vsel %vm5317_vm1, %v5425_v17, %v5385_v7 }
 0x6fd   : > { %v5411_v33 = vpop.permute.xlu1 %5410  ;;  %v5439_v16 = vsel %vm11703_vm6, %v5432_v59, %v5415_v60  ;;  %v5734_v42 = vrot.slane %v12459_v11, 3  ;;  %v5440_v63 = vsel %vm11703_vm6, %v5436_v20, %v5416_v47  ;;  %v7091_v59 = vld [vmem:[%s12181_s8 + $0x1c] ss:$68 sps:$4 sm:$0xff]  }
 0x6fe   : > { %v5418_v0 = vsel %vm5299_vm5, %v11717_v15, %v5411_v33  ;;  %5930 = vrot.lane.b32.xlu0 %v5439_v16, %s7138_s30  ;;  %v12461_v15 = vld [vmem:[#allocation49_spill] sm:$0xff]  ;;  %6327 = vmatprep.subr.bf16.mxu0 %v7091_v59 }
 0x6ff   : > { %v5413_v34 = vpop.permute.xlu0 %5412  ;;  %5936 = vrot.lane.b32.xlu1 %v5418_v0, %s7138_s30  ;;  %v5735_v12 = vrot.slane %v12461_v15, 3 }
 0x700   : > { %v5419_v3 = vsel %vm5299_vm5, %v5411_v33, %v5413_v34  ;;  %v12462_v33 = vld [vmem:[#allocation40_spill] sm:$0xff] }
 0x701   : > { %v11855_v54 = vpop.permute.xlu1 %5295  ;;  %v5732_v53 = vrot.slane %v12462_v33, 3 }
 0x702   : > { %5740 = vrot.lane.b32.xlu0 %v5734_v42, %s7136_s25 }
 0x703   : > { %v11860_v24 = vpop.permute.xlu0 %5291  ;;  %5932 = vrot.lane.b32.xlu1 %v5440_v63, %s7138_s30 }
 0x706   : > { %5938 = vrot.lane.b32.xlu0 %v5419_v3, %s7138_s30 }
 0x707   : > { %v5227_v22 = vpop.permute.xlu1 %5226  ;;  %v5250_v38 = vpop.permute.xlu0 %5249  ;;  %5742 = vrot.lane.b32.xlu1 %v5735_v12, %s7136_s25 }
 0x708   : > { %v5231_v10 = vsel %vm5228_vm13, %v12455_v62, %v5227_v22  ;;  %v5254_v16 = vsel %vm5251_vm14, %v11502_v9, %v5250_v38 }
 0x709   : > { %v5316_v60 = vsel %vm11408_vm2, %v5145_v27, %v5231_v10 }
 0x70a   : > { %v11878_v7 = vsel %vm5317_vm1, %v5316_v60, %v5254_v16  ;;  %5736 = vrot.lane.b32.xlu0 %v5732_v53, %s7136_s25  ;;  %v12464_v16 = vld [vmem:[#allocation44_spill] sm:$0xff] }
 0x70b   : > { %v5298_v62 = vpop.permute.xlu1 %5297  ;;  %v5547_v34 = vpop.permute.xlu0 %5546  ;;  %v5733_v33 = vrot.slane %v12464_v16, 3  ;;  %v12465_v53 = vld [vmem:[#allocation8_spill] sm:$0xff] }
 0x70c   : > { %v11882_v0 = vsel %vm5299_vm5, %v11855_v54, %v5298_v62 }
 0x70f   : > { %v11885_v27 = vpop.permute.xlu1 %7006  ;;  %v11888_v11 = vpop.permute.xlu0 %5651 }
 0x710   : > { %v7008_v47 = vunpack.i.l.bf16 %v11885_v27  ;;  %v5659_v49 = vsel %vm5299_vm5, %v11766_v8, %v11888_v11  ;;  %v5554_v8 = vsel %vm5299_vm5, %v11810_v4, %v5547_v34  ;;  %v7009_v4 = vunpack.i.h.bf16 %v11885_v27 }
 0x712   : > { %v5656_v9 = vsel %vm5299_vm5, %v6994_v35, %v7008_v47 }
 0x713   : > { %v7012_v42 = vpop.permute.xlu1 %7011  ;;  %v5680_v28 = vsel %vm11703_vm6, %v11591_v36, %v5656_v9  ;;  %v5719_v63 = vpop.permute.xlu0 %5718 }
 0x714   : > { %v7014_v17 = vunpack.i.h.bf16 %v7012_v42  ;;  %v7013_v20 = vunpack.i.l.bf16 %v7012_v42  ;;  %5978 = vrot.lane.b32.xlu1 %v5680_v28, %s7140_s24  ;;  %v7088_v28 = vld [vmem:[%s12181_s8 + $0x24] ss:$68 sps:$4 sm:$0xff]  }
 0x716   : > { %v5551_v15 = vsel %vm5299_vm5, %v6989_v23, %v7013_v20  ;;  %v5552_v39 = vsel %vm5299_vm5, %v7013_v20, %v7014_v17  ;;  %v12463_v23 = vld [vmem:[#allocation52_spill] sm:$0xff]  ;;  %v12466_v17 = vld [vmem:[#allocation23_spill] sm:$0xff] }
 0x717   : > { %v5721_v12 = vpop.permute.xlu1 %5720  ;;  %v5575_v35 = vsel %vm11703_vm6, %v11553_v18, %v5551_v15  ;;  %v5715_v3 = vpop.permute.xlu0 %5714  ;;  %v5229_v22 = vsel %vm5228_vm13, %v12463_v23, %v12456_v48  ;;  %v5576_v18 = vsel %vm11703_vm6, %v11561_v13, %v5552_v39  ;;  %v7083_v13 = vld [vmem:[%s12181_s8 + $0x10] ss:$68 sps:$4 sm:$0xff]   ;;  %v4108_v20 = vadd.f32 %v12466_v17, %v10924_v19 }
 0x718   : > { %v11907_v36 = vsel %vm5228_vm13, %v5719_v63, %v5721_v12  ;;  %5954 = vrot.lane.b32.xlu0 %v5575_v35, %s7139_s13  ;;  %5984 = vrot.lane.b32.xlu1 %v5659_v49, %s7140_s24  ;;  %v5314_v48 = vsel %vm11408_vm2, %v11688_v6, %v5229_v22  ;;  %v12468_v49 = vld [vmem:[#allocation27_spill] sm:$0xff] }
 0x719   : > { %v5320_v62 = vsel %vm5317_vm1, %v5314_v48, %v12465_v53  ;;  %v4165_v19 = vadd.f32 %v12469_v56, %v4108_v20  ;;  %v7086_v20 = vld [vmem:[%s12181_s8 + $0x20] ss:$68 sps:$4 sm:$0xff]  }
 0x71b   : > { %v7017_v10 = vpop.permute.xlu1 %7016  ;;  %v11922_v59 = vpop.permute.xlu0 %7021 }
 0x71c   : > { %v7018_v38 = vunpack.i.l.bf16 %v7017_v10  ;;  %5960 = vrot.lane.b32.xlu0 %v5554_v8, %s7139_s13  ;;  %5956 = vrot.lane.b32.xlu1 %v5576_v18, %s7139_s13  ;;  %v7023_v60 = vunpack.i.l.bf16 %v11922_v59  ;;  %v7019_v35 = vunpack.i.h.bf16 %v7017_v10  ;;  %v5303_v8 = vsel %vm5299_vm5, %v11860_v24, %v11727_v44 }
 0x71e   : > { %v5300_v9 = vsel %vm5299_vm5, %v7023_v60, %v6998_v32  ;;  %v5898_v27 = vsel %vm5299_vm5, %v7009_v4, %v7018_v38  ;;  %v5304_v32 = vsel %vm5299_vm5, %v11727_v44, %v11855_v54  ;;  %v7024_v44 = vunpack.i.h.bf16 %v11922_v59  ;;  %v12471_v59 = vld [vmem:[#allocation59_spill] sm:$0xff] }
 0x71f   : > { %v5549_v42 = vpop.permute.xlu1 %5548  ;;  %v5333_v6 = vsel %vm11703_vm6, %v5320_v62, %v5300_v9  ;;  %v5922_v12 = vsel %vm11703_vm6, %v12468_v49, %v5898_v27  ;;  %v7089_v9 = vld [vmem:[%s12181_s8 + $0x18] ss:$68 sps:$4 sm:$0xff]  }
 0x720   : > { %7031 = vrot.lane.b32.xlu0 %v7030_v26, %s7137_s26  ;;  %5738 = vrot.lane.b32.xlu1 %v5733_v33, %s7136_s25  ;;  %v5555_v26 = vsel %vm5299_vm5, %v5547_v34, %v5549_v42  ;;  %v12470_v34 = vld [vmem:[#allocation12_spill] sm:$0xff] }
 0x721   : > { %6202 = vmatmul.mubr.bf16.vlgmr.msra.gmra.mxu1 %v5333_v6  ;;  %v4168_v23 = vadd.f32 %v12470_v34, %v4111_v2 }
 0x722   : > { %6209 = vmatprep.mubr.bf16.mxu1 %v5304_v32  ;;  %6280 = vmatpush1.bf16.xpose.msra.mxu1 %v7083_v13 }
 0x723   : > { %v5717_v15 = vpop.permute.xlu1 %5716  ;;  %6375 = vmatprep.subr.bf16.mxu1 %v7088_v28  ;;  %v5004_v10 = vmax.f32 %v4168_v23, 0.0 }
 0x724   : > { %v11961_v39 = vsel %vm5228_vm13, %v5715_v3, %v5717_v15  ;;  %v11964_v54 = vsel %vm5228_vm13, %v5717_v15, %v5719_v63  ;;  %6000 = vrot.lane.b32.xlu0 %v5922_v12, %s7138_s30  ;;  %5962 = vrot.lane.b32.xlu1 %v5555_v26, %s7139_s13  ;;  %v5657_v63 = vsel %vm5299_vm5, %v7008_v47, %v7019_v35  ;;  %v4989_v3 = vmax.f32 %v4165_v19, 0.0  ;;  %v7094_v26 = vld [vmem:[%s12181_s8 + $0x34] ss:$68 sps:$4 sm:$0xff]  }
 0x725   : > { %v5681_v60 = vsel %vm11703_vm6, %v11631_v25, %v5657_v63  ;;  %v5130_v14 = vmul.f32 %v10951_v37, %v5004_v10  ;;  %v7095_v10 = vld [vmem:[%s12181_s8 + $0x28] ss:$68 sps:$4 sm:$0xff]   ;;  %vm6713_vm13 = vcmask 39943  }
 0x726   : > { %v5115_v21 = vmul.f32 %v10953_v1, %v4989_v3 }
 0x727   : > { %v5654_v22 = vpop.permute.xlu1 %5653 }
 0x728   : > { %5787 = vrot.lane.b32.xlu0 %v11572_v40, %s7137_s26  ;;  %7036 = vrot.lane.b32.xlu1 %v7035_v30, %s7137_s26  ;;  %v5901_v30 = vsel %vm5299_vm5, %v11832_v31, %v11788_v46  ;;  %v12002_v57 = vpack.c.bf16 %v5130_v14, %v5115_v21  ;;  %v5895_v31 = vpop.permute.xlu0 %5894  ;;  %v5660_v47 = vsel %vm5299_vm5, %v11888_v11, %v5654_v22 }
 0x729   : > { %6210 = vmatmul.mubr.bf16.gmra.mxu1 %v5303_v8 }
 0x72b   : > { %v7027_v18 = vpop.permute.xlu1 %7026 }
 0x72c   : > { %v7029_v24 = vunpack.i.h.bf16 %v7027_v18  ;;  %5783 = vrot.lane.b32.xlu0 %v11605_v58, %s7137_s26  ;;  %5980 = vrot.lane.b32.xlu1 %v5681_v60, %s7140_s24  ;;  %v5899_v58 = vsel %vm5299_vm5, %v7018_v38, %v7024_v44  ;;  %v7028_v1 = vunpack.i.l.bf16 %v7027_v18 }
 0x72d   : > { %v5923_v37 = vsel %vm11703_vm6, %v11626_v45, %v5899_v58 }
 0x72e   : > { %v5302_v40 = vsel %vm5299_vm5, %v6999_v55, %v7029_v24  ;;  %v5900_v45 = vsel %vm5299_vm5, %v7024_v44, %v7028_v1  ;;  %v7098_v44 = vld [vmem:[%s12181_s8 + $0x40] ss:$68 sps:$4 sm:$0xff]   ;;  %v5804_v1 = vsel %vm11408_vm2, %v12002_v57, %v11907_v36 }
 0x72f   : > { %v5335_v25 = vsel %vm11703_vm6, %v11878_v7, %v5302_v40  ;;  %v5897_v55 = vpop.permute.xlu1 %5896  ;;  %v5825_v7 = vrot.slane %v12002_v57, 4  ;;  %v7101_v24 = vld [vmem:[%s12181_s8 + $0x3c] ss:$68 sps:$4 sm:$0xff]  }
 0x730   : > { %6006 = vrot.lane.b32.xlu0 %v5901_v30, %s7138_s30  ;;  %5789 = vrot.lane.b32.xlu1 %v11596_v50, %s7137_s26  ;;  %v5869_v50 = vsel %vm5251_vm14, %v11598_v5, %v11690_v51  ;;  %v5903_v38 = vsel %vm5299_vm5, %v5895_v31, %v5897_v55  ;;  %v5902_v51 = vsel %vm5299_vm5, %v11788_v46, %v5895_v31  ;;  %v7097_v46 = vld [vmem:[%s12181_s8 + $0x2c] ss:$68 sps:$4 sm:$0xff]  }
 0x734   : > { %6002 = vrot.lane.b32.xlu0 %v5923_v37, %s7138_s30  ;;  %5785 = vrot.lane.b32.xlu1 %v11610_v29, %s7137_s26  ;;  %v5909_v29 = vsel %vm11408_vm2, %v5825_v7, %v12471_v59 }
 0x735   : > { %v5920_v16 = vsel %vm5317_vm1, %v5909_v29, %v5869_v50 }
 0x736   : > { %v5924_v5 = vsel %vm11703_vm6, %v5920_v16, %v5900_v45 }
 0x738   : > { %6010 = vrot.lane.b32.xlu0 %v5903_v38, %s7138_s30  ;;  %5986 = vrot.lane.b32.xlu1 %v5660_v47, %s7140_s24 }
 0x73c   : > { %6004 = vrot.lane.b32.xlu1 %v5924_v5, %s7138_s30 }
 0x740   : > { %6008 = vrot.lane.b32.xlu1 %v5902_v51, %s7138_s30 }
 0x74f   : > { %v5929_v4 = vpop.permute.xlu1 %5928 }
 0x750   : > { %v5935_v11 = vpop.permute.xlu0 %5934  ;;  %v6023_v6 = vsel %vm5940_vm7, %v5335_v25, %v5929_v4 }
 0x751   : > { %v6027_v12 = vsel %vm5940_vm7, %v11882_v0, %v5935_v11  ;;  %v7092_v0 = vld [vmem:[%s12181_s8 + $0x30] ss:$68 sps:$4 sm:$0xff]  }
 0x75f   : > { %v5953_v33 = vpop.permute.xlu0 %5952 }
 0x765   : > { %v5977_v48 = vpop.permute.xlu0 %5976 }
 0x769   : > { %v12030_v13 = vpop.permute.xlu0 %5982 }
 0x76b   : > { %v12032_v53 = vpop.permute.xlu1 %5958 }
 0x770   : > { %v5931_v62 = vpop.permute.xlu0 %5930 }
 0x771   : > { %v5937_v42 = vpop.permute.xlu1 %5936  ;;  %v5941_v28 = vsel %vm5940_vm7, %v5929_v4, %v5931_v62  ;;  %v5803_v4 = vsel %vm11408_vm2, %v11456_v52, %v11964_v54 }
 0x772   : > { %6249 = vmatprep.mubr.bf16.mxu0 %v5941_v28  ;;  %v5943_v27 = vsel %vm5940_vm7, %v5935_v11, %v5937_v42 }
 0x773   : > { %6250 = vmatmul.mubr.bf16.vlgmr.msra.gmra.mxu0 %v6023_v6  ;;  %v6167_v6 = vsel %vm5964_vm8, %v7098_v44, 0 }
 0x774   : > { %v12043_v32 = vpop.permute.xlu0 %5740  ;;  %6257 = vmatprep.mubr.bf16.mxu0 %v5943_v27  ;;  %6328 = vmatpush1.bf16.xpose.msra.mxu0 %v7089_v9 }
 0x775   : > { %v5933_v17 = vpop.permute.xlu1 %5932  ;;  %6423 = vmatprep.subr.bf16.mxu0 %v7097_v46 }
 0x776   : > { %v5942_v41 = vsel %vm5940_vm7, %v5931_v62, %v5933_v17  ;;  %v6032_v2 = vsel %vm5964_vm8, %v5933_v17, %v5953_v33 }
 0x777   : > { %6297 = vmatprep.mubr.bf16.mxu1 %v6032_v2 }
 0x778   : > { %v5939_v15 = vpop.permute.xlu0 %5938  ;;  %6298 = vmatmul.mubr.bf16.vlgmr.msra.gmra.mxu1 %v5942_v41 }
 0x779   : > { %v6036_v49 = vsel %vm5964_vm8, %v5939_v15, %v12032_v53  ;;  %6376 = vmatpush1.bf16.xpose.msra.mxu1 %v7086_v20  ;;  %v5944_v35 = vsel %vm5940_vm7, %v5937_v42, %v5939_v15  ;;  %v5743_v56 = vpop.permute.xlu1 %5742 }
 0x77a   : > { %6305 = vmatprep.mubr.bf16.mxu1 %v6036_v49  ;;  %6471 = vmatprep.subr.bf16.mxu1 %v7094_v26  ;;  %v5746_v21 = vsel %vm5251_vm14, %v12043_v32, %v5743_v56 }
 0x77b   : > { %6258 = vmatmul.mubr.bf16.gmra.mxu0 %v6027_v12  ;;  %v5815_v55 = vsel %vm5317_vm1, %v5804_v1, %v5746_v21 }
 0x77c   : > { %v5737_v19 = vpop.permute.xlu0 %5736 }
 0x780   : > { %6306 = vmatmul.mubr.bf16.gmra.mxu1 %v5944_v35 }
 0x786   : > { %v5979_v34 = vpop.permute.xlu1 %5978 }
 0x787   : > { %v5989_v23 = vsel %vm3921_vm12, %v5977_v48, %v5979_v34 }
 0x788   : > { %6393 = vmatprep.mubr.bf16.mxu1 %v5989_v23 }
 0x78a   : > { %v5955_v22 = vpop.permute.xlu0 %5954  ;;  %v12059_v8 = vpop.permute.xlu1 %5984 }
 0x78b   : > { %v5965_v40 = vsel %vm5964_vm8, %v5953_v33, %v5955_v22  ;;  %v5991_v14 = vsel %vm3921_vm12, %v12030_v13, %v12059_v8  ;;  %v12472_v33 = vld [vmem:[#allocation19_spill] sm:$0xff] }
 0x78e   : > { %v5961_v63 = vpop.permute.xlu0 %5960  ;;  %v5957_v3 = vpop.permute.xlu1 %5956 }
 0x78f   : > { %v6040_v18 = vsel %vm3921_vm12, %v5957_v3, %v5977_v48  ;;  %v5966_v60 = vsel %vm5964_vm8, %v5955_v22, %v5957_v3  ;;  %v5967_v29 = vsel %vm5964_vm8, %v12032_v53, %v5961_v63  ;;  %v5802_v48 = vsel %vm11408_vm2, %v12472_v33, %v11961_v39 }
 0x790   : > { %6345 = vmatprep.mubr.bf16.mxu0 %v5966_v60  ;;  %6394 = vmatmul.mubr.bf16.vlgmr.msra.gmra.mxu1 %v6040_v18 }
 0x791   : > { %6346 = vmatmul.mubr.bf16.vlgmr.msra.gmra.mxu0 %v5965_v40  ;;  %6401 = vmatprep.mubr.bf16.mxu1 %v5991_v14  ;;  %v6604_v40 = vld [vmem:[%s12183_s10] sm:$0xff] }
 0x792   : > { %v7032_v30 = vpop.permute.xlu0 %7031  ;;  %v5739_v25 = vpop.permute.xlu1 %5738  ;;  %6472 = vmatpush1.bf16.xpose.msra.mxu1 %v7092_v0  ;;  %6424 = vmatpush1.bf16.xpose.msra.mxu0 %v7095_v10 }
 0x793   : > { %v7034_v58 = vunpack.i.h.bf16 %v7032_v30  ;;  %v7033_v37 = vunpack.i.l.bf16 %v7032_v30  ;;  %6951 = vmatprep.subr.msk.bf16.mxu1 %vm5964_vm8, %v7098_v44  ;;  %6519 = vmatprep.subr.bf16.mxu0 %v7101_v24  ;;  %v5744_v36 = vsel %vm5251_vm14, %v5737_v19, %v5739_v25  ;;  %v5745_v57 = vsel %vm5251_vm14, %v5739_v25, %v12043_v32  ;;  %v6605_v24 = vld [vmem:[%s12183_s10 + $0x8] sm:$0xff] }
 0x794   : > { %v5807_v9 = vsel %vm5317_vm1, %v5802_v48, %v5744_v36  ;;  %v12473_v32 = vmov 0.0   ;;  %vm6715_vm14 = vcmask 35840  }
 0x795   : > { %v5793_v31 = vsel %vm5299_vm5, %v7033_v37, %v7034_v58 }
 0x796   : > { %v6001_v7 = vpop.permute.xlu0 %6000  ;;  %v5963_v50 = vpop.permute.xlu1 %5962  ;;  %v5819_v47 = vsel %vm11703_vm6, %v5815_v55, %v5793_v31 }
 0x797   : > { %v6044_v38 = vsel %vm3921_vm12, %v5963_v50, %v12030_v13  ;;  %v5968_v45 = vsel %vm5964_vm8, %v5961_v63, %v5963_v50  ;;  %v6048_v59 = vsel %vm5940_vm7, %v5819_v47, %v6001_v7  ;;  %v5811_v13 = vsel %vm5317_vm1, %v5803_v4, %v5745_v57 }
 0x798   : > { %6353 = vmatprep.mubr.bf16.mxu0 %v5968_v45  ;;  %6402 = vmatmul.mubr.bf16.gmra.mxu1 %v6044_v38 }
 0x799   : > { %6354 = vmatmul.mubr.bf16.gmra.mxu0 %v5967_v29  ;;  %6489 = vmatprep.mubr.bf16.mxu1 %v6048_v59 }
 0x79a   : > { %v5788_v16 = vpop.permute.xlu0 %5787  ;;  %v7037_v5 = vpop.permute.xlu1 %7036 }
 0x79b   : > { %v7039_v51 = vunpack.i.h.bf16 %v7037_v5  ;;  %v7038_v11 = vunpack.i.l.bf16 %v7037_v5 }
 0x79d   : > { %v5792_v53 = vsel %vm5299_vm5, %v7039_v51, %v7033_v37  ;;  %v5791_v62 = vsel %vm5299_vm5, %v7038_v11, %v7039_v51 }
 0x79e   : > { %v5784_v42 = vpop.permute.xlu0 %5783  ;;  %v5981_v28 = vpop.permute.xlu1 %5980  ;;  %v5817_v46 = vsel %vm11703_vm6, %v5807_v9, %v5791_v62  ;;  %v5818_v39 = vsel %vm11703_vm6, %v5811_v13, %v5792_v53 }
 0x79f   : > { %v5990_v52 = vsel %vm3921_vm12, %v5979_v34, %v5981_v28  ;;  %6441 = vmatprep.mubr.bf16.mxu0 %v5817_v46 }
 0x7a0   : > { %6490 = vmatmul.mubr.bf16.vlgmr.msra.gmra.mxu1 %v5818_v39  ;;  %v6072_v39 = vld [vmem:[%s12182_s9] sm:$0xff] }
 0x7a1   : > { %6442 = vmatmul.mubr.bf16.vlgmr.msra.gmra.mxu0 %v5990_v52  ;;  %6929 = vmatpush3.bf16.xpose.msra.mxu1 %v6167_v6 }
 0x7a2   : > { %v6007_v54 = vpop.permute.xlu0 %6006  ;;  %v5790_v27 = vpop.permute.xlu1 %5789  ;;  %6520 = vmatpush1.bf16.xpose.msra.mxu0 %v7099_v61  ;;  %6947 = vmatprep.subr.mxu1 %v12473_v32 }
 0x7a3   : > { %v5796_v43 = vsel %vm5299_vm5, %v5788_v16, %v5790_v27  ;;  %6934 = vmatprep.subr.mxu0 %v12473_v32 }
 0x7a4   : > { %v6052_v17 = vsel %vm5940_vm7, %v5796_v43, %v6007_v54  ;;  %v6073_v43 = vld [vmem:[%s12182_s9 + $0x8] sm:$0xff] }
 0x7a5   : > { %6497 = vmatprep.mubr.bf16.mxu1 %v6052_v17 }
 0x7a6   : > { %v5786_v20 = vpop.permute.xlu1 %5785  ;;  %v6003_v26 = vpop.permute.xlu0 %6002 }
 0x7a7   : > { %v5795_v41 = vsel %vm5299_vm5, %v5786_v20, %v5788_v16  ;;  %v5794_v2 = vsel %vm5299_vm5, %v5784_v42, %v5786_v20  ;;  %v6012_v34 = vsel %vm5940_vm7, %v6001_v7, %v6003_v26 }
 0x7a8   : > { %6449 = vmatprep.mubr.bf16.mxu0 %v5794_v2  ;;  %6498 = vmatmul.mubr.bf16.gmra.mxu1 %v5795_v41 }
 0x7aa   : > { %v5987_v15 = vpop.permute.xlu1 %5986  ;;  %v6011_v35 = vpop.permute.xlu0 %6010 }
 0x7ab   : > { %v5992_v49 = vsel %vm3921_vm12, %v12059_v8, %v5987_v15  ;;  %vm6710_vm12 = vcmask 38914  }
 0x7ac   : > { %6450 = vmatmul.mubr.bf16.gmra.mxu0 %v5992_v49 }
 0x7ae   : > { %v6005_v12 = vpop.permute.xlu1 %6004 }
 0x7af   : > { %6930 = vmatprep.mubr.msk.bf16.mxu1 %vm5964_vm8, %v6005_v12  ;;  %v6013_v56 = vsel %vm5940_vm7, %v6003_v26, %v6005_v12  ;;  %v6074_v12 = vld [vmem:[%s12182_s9 + $0x10] sm:$0xf] }
 0x7b0   : > { %6537 = vmatprep.mubr.bf16.mxu0 %v6013_v56  ;;  %6931 = vmatmul.mubr.msk.bf16.vlgmr.msra.gmra.mxu1 %vm5964_vm8, %v6011_v35 }
 0x7b1   : > { %6941 = vmatprep.mubr.msk.f32.mxu1 %vm7134_vm10, %v12473_v32  ;;  %6949 = vmatpush3.msra.mxu1 %v6605_v24 }
 0x7b2   : > { %v6009_v19 = vpop.permute.xlu1 %6008  ;;  %6948 = vmatprep.subr.mxu1 %v12473_v32 }
 0x7b3   : > { %v6015_v23 = vsel %vm5940_vm7, %v6009_v19, %v6011_v35  ;;  %v6014_v22 = vsel %vm5940_vm7, %v6007_v54, %v6009_v19  ;;  %6950 = vmatpush3.msra.mxu1 %v6604_v40 }
 0x7b4   : > { %6538 = vmatmul.mubr.bf16.vlgmr.msra.gmra.mxu0 %v6012_v34 }
 0x7b5   : > { %6545 = vmatprep.mubr.bf16.mxu0 %v6015_v23  ;;  %6935 = vmatpush3.msra.mxu0 %v6605_v24 }
 0x7b6   : > { %6936 = vmatprep.subr.mxu0 %v12473_v32 }
 0x7b7   : > { %6937 = vmatpush3.msra.mxu0 %v6604_v40 }
 0x7bc   : > { %6546 = vmatmul.mubr.bf16.gmra.mxu0 %v6014_v22 }
 0x7bd   : > { %6938 = vmatprep.mubr.msk.f32.mxu0 %vm7134_vm10, %v12473_v32 }
 0x7e1   : > { %v6203_v8 = vpop.f32.mrf.mxu1 }
 0x7e2   : > { %v6204_v54 = vadd.f32 %v6203_v8, %v6072_v39 }
 0x7e3   : > { %v6205_v63 = vpop.f32.mrf.mxu1 }
 0x7e5   : > { %v6206_v3 = vpop.f32.mrf.mxu1 }
 0x7e6   : > { %v6207_v26 = vadd.f32 %v6206_v3, %v6073_v43 }
 0x7e7   : > { %v6208_v0 = vpop.f32.mrf.mxu1 }
 0x7e9   : > { %v12138_v10 = vpop.f32.mrf.mxu1 }
 0x7ea   : > { %v6212_v23 = vadd.f32 %v12138_v10, %v6074_v12 }
 0x7eb   : > { %v6213_v18 = vpop.f32.mrf.mxu1 }
 0x7ed   : > { %v6214_v60 = vpop.f32.mrf.mxu1 }
 0x7ef   : > { %v6215_v44 = vpop.f32.mrf.mxu1 }
 0x833   : > { %v6251_v14 = vpop.f32.mrf.mxu0 }
 0x834   : > { %v6252_v20 = vadd.f32 %v6251_v14, %v6204_v54 }
 0x835   : > { %v6253_v21 = vpop.f32.mrf.mxu0 }
 0x837   : > { %v6254_v30 = vpop.f32.mrf.mxu0 }
 0x838   : > { %v6299_v25 = vpop.f32.mrf.mxu1  ;;  %v6255_v56 = vadd.f32 %v6254_v30, %v6207_v26 }
 0x839   : > { %v6256_v58 = vpop.f32.mrf.mxu0  ;;  %v6300_v15 = vadd.f32 %v6299_v25, %v6252_v20 }
 0x83a   : > { %v6301_v37 = vpop.f32.mrf.mxu1 }
 0x83b   : > { %v6259_v1 = vpop.f32.mrf.mxu0 }
 0x83c   : > { %v6302_v55 = vpop.f32.mrf.mxu1  ;;  %v6260_v0 = vadd.f32 %v6259_v1, %v6212_v23 }
 0x83d   : > { %v6261_v31 = vpop.f32.mrf.mxu0  ;;  %v6303_v22 = vadd.f32 %v6302_v55, %v6255_v56 }
 0x83e   : > { %v6304_v7 = vpop.f32.mrf.mxu1 }
 0x83f   : > { %v6262_v50 = vpop.f32.mrf.mxu0 }
 0x840   : > { %v6307_v47 = vpop.f32.mrf.mxu1 }
 0x841   : > { %v6263_v38 = vpop.f32.mrf.mxu0  ;;  %v6308_v24 = vadd.f32 %v6307_v47, %v6260_v0 }
 0x842   : > { %v6309_v45 = vpop.f32.mrf.mxu1 }
 0x844   : > { %v6310_v59 = vpop.f32.mrf.mxu1 }
 0x846   : > { %v6311_v29 = vpop.f32.mrf.mxu1 }
 0x850   : > { %v6395_v36 = vpop.f32.mrf.mxu1 }
 0x851   : > { %v6347_v57 = vpop.f32.mrf.mxu0 }
 0x852   : > { %v6397_v16 = vpop.f32.mrf.mxu1  ;;  %v6348_v19 = vadd.f32 %v6347_v57, %v6300_v15 }
 0x853   : > { %v6349_v5 = vpop.f32.mrf.mxu0 }
 0x854   : > { %v6398_v51 = vpop.f32.mrf.mxu1  ;;  %v6396_v60 = vadd.f32 %v6395_v36, %v6348_v19 }
 0x855   : > { %v6350_v11 = vpop.f32.mrf.mxu0 }
 0x856   : > { %v6400_v33 = vpop.f32.mrf.mxu1  ;;  %v6351_v18 = vadd.f32 %v6350_v11, %v6303_v22 }
 0x857   : > { %v6352_v48 = vpop.f32.mrf.mxu0 }
 0x858   : > { %v6403_v4 = vpop.f32.mrf.mxu1  ;;  %v6399_v58 = vadd.f32 %v6398_v51, %v6351_v18 }
 0x859   : > { %v6355_v13 = vpop.f32.mrf.mxu0 }
 0x85a   : > { %v6405_v53 = vpop.f32.mrf.mxu1  ;;  %v6356_v25 = vadd.f32 %v6355_v13, %v6308_v24 }
 0x85b   : > { %v6357_v62 = vpop.f32.mrf.mxu0 }
 0x85c   : > { %v6406_v9 = vpop.f32.mrf.mxu1  ;;  %v6404_v55 = vadd.f32 %v6403_v4, %v6356_v25 }
 0x85d   : > { %v6358_v42 = vpop.f32.mrf.mxu0 }
 0x85e   : > { %v6407_v28 = vpop.f32.mrf.mxu1 }
 0x85f   : > { %v6359_v46 = vpop.f32.mrf.mxu0  ;;  %v6889_v28 = vld [vmem:[%s12184_s11] ss:$0 sm:$0xff] }
 0x860   : > { %v6491_v6 = vpop.f32.mrf.mxu1 }
 0x861   : > { %v6443_v61 = vpop.f32.mrf.mxu0 }
 0x862   : > { %v6493_v52 = vpop.f32.mrf.mxu1  ;;  %v6444_v40 = vadd.f32 %v6443_v61, %v6396_v60 }
 0x863   : > { %v6445_v27 = vpop.f32.mrf.mxu0 }
 0x864   : > { %v6494_v17 = vpop.f32.mrf.mxu1  ;;  %v6492_v7 = vadd.f32 %v6491_v6, %v6444_v40 }
 0x865   : > { %v6446_v41 = vpop.f32.mrf.mxu0 }
 0x866   : > { %v6496_v2 = vpop.f32.mrf.mxu1  ;;  %v6447_v31 = vadd.f32 %v6446_v41, %v6399_v58 }
 0x867   : > { %v6448_v49 = vpop.f32.mrf.mxu0 }
 0x868   : > { %v6499_v35 = vpop.f32.mrf.mxu1  ;;  %v6495_v29 = vadd.f32 %v6494_v17, %v6447_v31 }
 0x86a   : > { %v6501_v34 = vpop.f32.mrf.mxu1 }
 0x86c   : > { %v6451_v8 = vpop.f32.mrf.mxu0  ;;  %v6502_v63 = vpop.f32.mrf.mxu1 }
 0x86d   : > { %v6452_v1 = vadd.f32 %v6451_v8, %v6404_v55 }
 0x86e   : > { %v6453_v44 = vpop.f32.mrf.mxu0  ;;  %v6503_v3 = vpop.f32.mrf.mxu1 }
 0x86f   : > { %v6500_v51 = vadd.f32 %v6499_v35, %v6452_v1 }
 0x870   : > { %v6454_v14 = vpop.f32.mrf.mxu0  ;;  %v6932_v21 = vpop.f32.mrf.mxu1 }
 0x872   : > { %v6455_v37 = vpop.f32.mrf.mxu0  ;;  %v6587_v30 = vpop.f32.mrf.mxu1 }
 0x874   : > { %v6539_v50 = vpop.f32.mrf.mxu0  ;;  %v6933_v10 = vpop.f32.mrf.mxu1 }
 0x875   : > { %v6540_v38 = vadd.f32 %v6539_v50, %v6492_v7 }
 0x876   : > { %v6541_v45 = vpop.f32.mrf.mxu0  ;;  %v6590_v16 = vpop.f32.mrf.mxu1 }
 0x877   : > { %v6588_v59 = vadd.f32 %v6587_v30, %v6540_v38 }
 0x878   : > { %v6542_v36 = vpop.f32.mrf.mxu0 }
 0x879   : > { %v6601_v57 = vmax.f32 %v6588_v59, 0.0  ;;  %v6543_v47 = vadd.f32 %v6542_v36, %v6495_v29 }
 0x87a   : > { %v6544_v5 = vpop.f32.mrf.mxu0 }
 0x87b   : > { %v6591_v11 = vadd.f32 %v6590_v16, %v6543_v47  ;;  %6939 = vmatmul.mubr.msk.f32.vlgmr.msra.gmra.mxu0 %vm2261_vm11, %v6601_v57 }
 0x87c   : > { %v6547_v33 = vpop.f32.mrf.mxu0 }
 0x87d   : > { %v6602_v48 = vmax.f32 %v6591_v11, 0.0  ;;  %v6548_v13 = vadd.f32 %v6547_v33, %v6500_v51 }
 0x87e   : > { %v6549_v53 = vpop.f32.mrf.mxu0 }
 0x87f   : > { %v6596_v4 = vadd.f32 %v6932_v21, %v6548_v13  ;;  %6942 = vmatmul.mubr.msk.f32.vlgmr.msra.gmra.mxu1 %vm2261_vm11, %v6602_v48 }
 0x880   : > { %v6550_v62 = vpop.f32.mrf.mxu0  ;;  %6944 = vmatprep.mubr.msk.f32.mxu1 %vm7134_vm10, %v12473_v32  ;;  %vm6705_vm10 = vcmask 39941  }
 0x881   : > { %v6603_v9 = vmax.f32 %v6596_v4, 0.0 }
 0x882   : > { %v6551_v42 = vpop.f32.mrf.mxu0 }
 0x883   : > { %6945 = vmatmul.mubr.msk.f32.gmra.mxu1 %vm2261_vm11, %v6603_v9  ;;  %vm6707_vm11 = vcmask 33792  }
 0x93b   : > { %v6688_v46 = vpop.f32.mrf.mxu0 }
 0x93c   : > { %v6689_v39 = vadd.f32 %v6889_v28, %v6688_v46 }
 0x93d   : > { %v6940_v32 = vpop.f32.mrf.mxu0 }
 0x93e   : > { %6703 = vst.msk [vmem:[%s413_s16] sm:$0x1f] %vm6702_vm9, %v6689_v39 }
 0x93f   : > { %6893 = vst.msk [vmem:[%s413_s16 + $0x3] sm:$0xe0] %vm6705_vm10, %v6689_v39  ;;  %v6693_v6 = vpop.f32.mrf.mxu1 }
 0x940   : > { %v6694_v61 = vadd.f32 %v6889_v28, %v6693_v6 }
 0x941   : > { %v6943_v52 = vpop.f32.mrf.mxu1 }
 0x942   : > { %6894 = vst.msk [vmem:[%s413_s16 + $0xb] sm:$0x3] %vm6707_vm11, %v6694_v61 }
 0x943   : > { %6895 = vst.msk [vmem:[%s413_s16 + $0xe] sm:$0x7c] %vm6710_vm12, %v6694_v61  ;;  %v6698_v54 = vpop.f32.mrf.mxu1 }
 0x944   : > { %6896 = vst.msk [vmem:[%s413_s16 + $0x11] sm:$0x80] %vm6713_vm13, %v6694_v61  ;;  %v6699_v27 = vadd.f32 %v6889_v28, %v6698_v54 }
 0x945   : > { %v6946_v43 = vpop.f32.mrf.mxu1 }
 0x946   : > { %6897 = vst.msk [vmem:[%s413_s16 + $0x19] sm:$0xf] %vm6715_vm14, %v6699_v27 }
 0x947 PF: > { %s22_s21 = sadd.s32 1, %s7122_s21  }
 0x948   : > { %p19_p5 = scmp.ge.s32.totalorder %s22_s21, 4  }
 0x94a   :  { %21 = sbr.rel (!%p19_p5) target bundleno = 1 (0x1), region = 101 }

</bundles_post_ra>
